<compile_context>
chip_gen: v7x
topology: tpu7x:2x2x1
jax: 0.10.0
libtpu: 0.0.40
codegen_flags: <defaults>
</compile_context>

<pallas_src>
import jax
import jax.numpy as jnp
from jax.experimental import pallas as pl
from jax.experimental.pallas import tpu as pltpu

# ----------------------------- tiny BERT config -----------------------------
VOCAB = 100
HIDDEN = 32
LAYERS = 2
HEADS = 4
HEAD_DIM = HIDDEN // HEADS
INTER = 64
MAX_POS = 32
TYPE_VOCAB = 2
SEQ = 8
BATCH = 2
LN_EPS = 1e-12

HPAD = 128                      # hidden padded to one full vreg lane width
IPAD = 128                      # intermediate padded likewise
NB = 3 * BATCH                  # sequences per tower (tower 0 is padded up to this)
NBP = 8                         # pooled rows padded to 8 sublanes
ROWS = NB * SEQ                 # token rows per tower


# ------------------------------ in-kernel math ------------------------------
def _gelu(x):
    # TODO(synk): reference BERT gelu is erf-based; tanh approximation used for robust Mosaic lowering.
    c = jnp.float32(0.7978845608028654)  # sqrt(2/pi)
    return 0.5 * x * (1.0 + jnp.tanh(c * (x + 0.044715 * x * x * x)))


def _layernorm_padded(x, g, b):
    """LayerNorm over the first HIDDEN lanes of a 128-lane-padded activation.

    Pad lanes of x are zero, so sums over all lanes equal sums over valid lanes;
    gamma/beta are zero in pad lanes, so the output pad lanes stay zero.
    """
    inv_n = jnp.float32(1.0 / HIDDEN)
    mu = jnp.sum(x, axis=-1, keepdims=True) * inv_n
    ex2 = jnp.sum(x * x, axis=-1, keepdims=True) * inv_n
    var = ex2 - mu * mu
    return (x - mu) * jax.lax.rsqrt(var + LN_EPS) * g + b


# ------------------------------ fused dual-tower kernel ------------------------------
def _tower_kernel(emb_ref, mask_ref,
                  eg_ref, ebeta_ref,
                  qkv_w_ref, qkv_b_ref,
                  ao_w_ref, ao_b_ref, ao_g_ref, ao_beta_ref,
                  i_w_ref, i_b_ref,
                  o_w_ref, o_b_ref, o_g_ref, o_beta_ref,
                  pw_ref, pb_ref,
                  pooled_ref,
                  ctx_ref):
    """One grid step = one full BERT tower (embedding LN + all layers + pooler)."""
    scale = jnp.float32(1.0 / (HEAD_DIM ** 0.5))

    # Keep the pad lanes of the ctx scratch at zero for the whole kernel so the
    # attention-output matmul never sees uninitialized VMEM (its weight pad rows
    # are zero, but 0 * NaN would still be NaN).
    ctx_ref[...] = jnp.zeros_like(ctx_ref)

    h = _layernorm_padded(emb_ref[...], eg_ref[...], ebeta_ref[...])   # (ROWS, HPAD)
    mask_add = mask_ref[...]                                           # (NB, SEQ) additive

    for lyr in range(LAYERS):
        # Fused QKV: one [ROWS,128] @ [128,384] matmul; Q/K/V each own a full
        # 128-lane tile so the slices below are tile-aligned views.
        qkv = jnp.dot(h, qkv_w_ref[lyr], preferred_element_type=jnp.float32) + qkv_b_ref[lyr]
        q = qkv[:, 0 * HPAD:1 * HPAD]
        k = qkv[:, 1 * HPAD:2 * HPAD]
        v = qkv[:, 2 * HPAD:3 * HPAD]

        # Attention: per-sequence / per-head, results written straight into the
        # VMEM ctx scratch at static offsets (no list building / concatenates).
        for b in range(NB):
            rows = slice(b * SEQ, (b + 1) * SEQ)
            mrow = mask_add[b:b + 1, :]                 # (1, SEQ), broadcast over query rows
            qb, kb, vb = q[rows], k[rows], v[rows]
            for hd in range(HEADS):
                cols = slice(hd * HEAD_DIM, (hd + 1) * HEAD_DIM)
                qh, kh, vh = qb[:, cols], kb[:, cols], vb[:, cols]
                # q @ k^T via dot_general contracting on the feature axis — no transpose.
                s = jax.lax.dot_general(qh, kh, (((1,), (1,)), ((), ())),
                                        preferred_element_type=jnp.float32)
                s = s * scale + mrow
                s = s - jnp.max(s, axis=-1, keepdims=True)
                e = jnp.exp(s)
                p = e / jnp.sum(e, axis=-1, keepdims=True)
                ctx_ref[rows, cols] = jnp.dot(p, vh, preferred_element_type=jnp.float32)

        # Attention output projection + residual + LN.
        attn = jnp.dot(ctx_ref[...], ao_w_ref[lyr],
                       preferred_element_type=jnp.float32) + ao_b_ref[lyr]
        h = _layernorm_padded(attn + h, ao_g_ref[lyr], ao_beta_ref[lyr])

        # Feed-forward + residual + LN (intermediate is lane-padded; gelu(0)=0).
        inter = _gelu(jnp.dot(h, i_w_ref[lyr],
                              preferred_element_type=jnp.float32) + i_b_ref[lyr])
        ffn = jnp.dot(inter, o_w_ref[lyr],
                      preferred_element_type=jnp.float32) + o_b_ref[lyr]
        h = _layernorm_padded(ffn + h, o_g_ref[lyr], o_beta_ref[lyr])

    # Pooler on the first token of each sequence.  Gather the rows with a tiny
    # selection matmul (MXU row-gather) instead of sublane concatenates.
    r_idx = jax.lax.broadcasted_iota(jnp.int32, (NBP, ROWS), 1)
    b_idx = jax.lax.broadcasted_iota(jnp.int32, (NBP, ROWS), 0)
    sel = (r_idx == b_idx * SEQ).astype(jnp.float32)        # rows >= NB select nothing
    first = jnp.dot(sel, h, preferred_element_type=jnp.float32)          # (NBP, HPAD)
    pooled = jnp.tanh(jnp.dot(first, pw_ref[...],
                              preferred_element_type=jnp.float32) + pb_ref[...])
    pooled_ref[...] = pooled.astype(pooled_ref.dtype)


_TOWER_KEYS = ("emb_ln_g", "emb_ln_b", "qkv_w", "qkv_b", "ao_w", "ao_b",
               "ao_ln_g", "ao_ln_b", "i_w", "i_b", "o_w", "o_b",
               "o_ln_g", "o_ln_b", "pool_w", "pool_b")


def _stack_towers(p1, p2):
    """Stack the two towers' kernel weights along a new leading tower axis."""
    return [jnp.stack([p1[k], p2[k]], axis=0) for k in _TOWER_KEYS]


def _tower_spec(arr):
    nd = arr.ndim
    return pl.BlockSpec((None,) + tuple(arr.shape[1:]),
                        lambda t, _nd=nd: (t,) + (0,) * (_nd - 1))


def bert_towers(emb2, mask2, weights):
    """emb2: (2, ROWS, HPAD) f32, mask2: (2, NB, SEQ) additive mask -> pooled (2, NBP, HPAD)."""
    in_specs = [_tower_spec(emb2), _tower_spec(mask2)] + [_tower_spec(w) for w in weights]
    return pl.pallas_call(
        _tower_kernel,
        out_shape=jax.ShapeDtypeStruct((2, NBP, HPAD), jnp.float32),
        grid=(2,),
        in_specs=in_specs,
        out_specs=pl.BlockSpec((None, NBP, HPAD), lambda t: (t, 0, 0)),
        scratch_shapes=[pltpu.VMEM((ROWS, HPAD), jnp.float32)],
        compiler_params=pltpu.CompilerParams(
            # Tower axis is independent -> shards across v7x's two TensorCores.
            dimension_semantics=("parallel",)),
        cost_estimate=pl.CostEstimate(flops=50_000_000, transcendentals=50_000,
                                      bytes_accessed=4_000_000),
    )(emb2, mask2, *weights)


# ------------------------------ JAX glue ------------------------------
def _embed(params, ids, tok):
    """Embedding gathers (data-dependent) stay in JAX; tables are lane-padded already."""
    nb, s = ids.shape
    pos = jnp.arange(s, dtype=jnp.int32)[None, :]
    emb = (params["word_emb"][ids]
           + params["pos_emb"][pos]
           + params["type_emb"][tok])                    # (nb, s, HPAD)
    return emb.reshape(nb * s, HPAD).astype(jnp.float32)


def simmatch_v3_forward(bert1, bert2, sr_w, sr_b, a, b, c, ab, ac, labels):
    B = labels.shape[0]

    # Tower 0 (modelv1.bert): ab ++ ac ++ one dummy batch so both towers share a shape.
    pad_ids = jnp.zeros((B, SEQ), jnp.int32)
    pad_msk = jnp.ones((B, SEQ), jnp.int32)
    ids1 = jnp.concatenate([ab[0], ac[0], pad_ids], axis=0)
    tok1 = jnp.concatenate([ab[1], ac[1], pad_ids], axis=0)
    msk1 = jnp.concatenate([ab[2], ac[2], pad_msk], axis=0)
    # Tower 1 (modelv2.bert): a ++ b ++ c.
    ids2 = jnp.concatenate([a[0], b[0], c[0]], axis=0)
    tok2 = jnp.concatenate([a[1], b[1], c[1]], axis=0)
    msk2 = jnp.concatenate([a[2], b[2], c[2]], axis=0)

    emb_stack = jnp.stack([_embed(bert1, ids1, tok1),
                           _embed(bert2, ids2, tok2)], axis=0)            # (2, ROWS, HPAD)
    mask_stack = jnp.stack([(1.0 - msk1.astype(jnp.float32)) * -10000.0,
                            (1.0 - msk2.astype(jnp.float32)) * -10000.0], axis=0)  # (2, NB, SEQ)

    pooled = bert_towers(emb_stack, mask_stack, _stack_towers(bert1, bert2))

    p1 = pooled[0, :2 * B, :HIDDEN]
    p2 = pooled[1, :3 * B, :HIDDEN]
    ab_p, ac_p = p1[:B], p1[B:2 * B]
    a_p, b_p, c_p = p2[:B], p2[B:2 * B], p2[2 * B:3 * B]

    # ---- V1 + V2 + V3 head in plain JAX (tiny; a kernel here is pure launch overhead) ----
    out1 = (ab_p - ac_p) @ sr_w + sr_b                    # dropout is identity in eval
    eps = jnp.float32(1e-6)                               # PairwiseDistance(p=2, eps=1e-6)
    sim_ab = jnp.sqrt(jnp.sum((a_p - b_p + eps) ** 2, axis=1, keepdims=True))
    sim_ac = jnp.sqrt(jnp.sum((a_p - c_p + eps) ** 2, axis=1, keepdims=True))
    out2 = jnp.concatenate([sim_ac, sim_ab], axis=-1)     # matches torch.cat([sim_ac, sim_ab])
    output = out1 + out2
    prob = jax.nn.softmax(output, axis=1)
    logp = jax.nn.log_softmax(output, axis=1)
    loss = -jnp.mean(jnp.take_along_axis(logp, labels[:, None].astype(jnp.int32), axis=1))
    return output, prob, loss


# ------------------------------ parameter init (pre-padded layout) ------------------------------
def init_bert_params(key):
    keys = iter(jax.random.split(key, 16))

    def nrm(shape):
        return jax.random.normal(next(keys), shape, jnp.float32) * 0.02

    H, Hp, I, Ip, L = HIDDEN, HPAD, INTER, IPAD, LAYERS

    def padded(rv, cv, rp, cp, lead=()):
        w = nrm(lead + (rv, cv))
        z = jnp.zeros(lead + (rp, cp), jnp.float32)
        return z.at[..., :rv, :cv].set(w)

    def ln_gamma(lead=()):
        z = jnp.zeros(lead + (1, Hp), jnp.float32)
        return z.at[..., :, :H].set(1.0)

    qw = padded(H, H, Hp, Hp, (L,))
    kw = padded(H, H, Hp, Hp, (L,))
    vw = padded(H, H, Hp, Hp, (L,))
    return dict(
        word_emb=padded(VOCAB, H, VOCAB, Hp),
        pos_emb=padded(MAX_POS, H, MAX_POS, Hp),
        type_emb=padded(TYPE_VOCAB, H, TYPE_VOCAB, Hp),
        emb_ln_g=ln_gamma(), emb_ln_b=jnp.zeros((1, Hp), jnp.float32),
        # Q/K/V packed, each on its own 128-lane tile -> tile-aligned slices in-kernel.
        qkv_w=jnp.concatenate([qw, kw, vw], axis=-1),            # (L, Hp, 3*Hp)
        qkv_b=jnp.zeros((L, 1, 3 * Hp), jnp.float32),
        ao_w=padded(H, H, Hp, Hp, (L,)), ao_b=jnp.zeros((L, 1, Hp), jnp.float32),
        ao_ln_g=ln_gamma((L,)), ao_ln_b=jnp.zeros((L, 1, Hp), jnp.float32),
        i_w=padded(H, I, Hp, Ip, (L,)), i_b=jnp.zeros((L, 1, Ip), jnp.float32),
        o_w=padded(I, H, Ip, Hp, (L,)), o_b=jnp.zeros((L, 1, Hp), jnp.float32),
        o_ln_g=ln_gamma((L,)), o_ln_b=jnp.zeros((L, 1, Hp), jnp.float32),
        pool_w=padded(H, H, Hp, Hp), pool_b=jnp.zeros((1, Hp), jnp.float32),
    )


# ------------------------------ driver ------------------------------
if __name__ == "__main__":
    key = jax.random.PRNGKey(0)
    k1, k2, k3, kin = jax.random.split(key, 4)

    bert1 = init_bert_params(k1)        # modelv1.bert
    bert2 = init_bert_params(k2)        # modelv2.bert
    # seq_relationship weight stored as W^T (in, out); transpose if loading a real checkpoint.
    sr_w = jax.random.normal(k3, (HIDDEN, 2), jnp.float32) * 0.02
    sr_b = jnp.zeros((2,), jnp.float32)
    # NOTE: modelv3.weighting (nn.Linear(4, 2)) is unused in forward -> intentionally not created.

    ik = jax.random.split(kin, 8)

    def make_inputs(k):
        ids = jax.random.randint(k, (BATCH, SEQ), 0, VOCAB, dtype=jnp.int32)
        tok = jnp.zeros((BATCH, SEQ), jnp.int32)
        msk = jnp.ones((BATCH, SEQ), jnp.int32)
        return ids, tok, msk

    a = make_inputs(ik[0])
    b = make_inputs(ik[1])
    c = make_inputs(ik[2])
    ab = make_inputs(ik[3])
    ac = make_inputs(ik[4])
    labels = jax.random.randint(ik[5], (BATCH,), 0, 2, dtype=jnp.int32)

    fwd = jax.jit(simmatch_v3_forward)
    output, prob, loss = fwd(bert1, bert2, sr_w, sr_b, a, b, c, ab, ac, labels)
    jax.block_until_ready((output, prob, loss))
    print("KERNEL_OK")
</pallas_src>

<mosaic_0001>
module attributes {stable_mosaic.version = 11 : i64} {
  func.func @_tower_kernel(%arg0: i32, %arg1: memref<1x48x128xf32, #tpu.memory_space<vmem>>, %arg2: memref<1x6x8xf32, #tpu.memory_space<vmem>>, %arg3: memref<1x1x128xf32, #tpu.memory_space<vmem>>, %arg4: memref<1x1x128xf32, #tpu.memory_space<vmem>>, %arg5: memref<1x2x128x384xf32, #tpu.memory_space<vmem>>, %arg6: memref<1x2x1x384xf32, #tpu.memory_space<vmem>>, %arg7: memref<1x2x128x128xf32, #tpu.memory_space<vmem>>, %arg8: memref<1x2x1x128xf32, #tpu.memory_space<vmem>>, %arg9: memref<1x2x1x128xf32, #tpu.memory_space<vmem>>, %arg10: memref<1x2x1x128xf32, #tpu.memory_space<vmem>>, %arg11: memref<1x2x128x128xf32, #tpu.memory_space<vmem>>, %arg12: memref<1x2x1x128xf32, #tpu.memory_space<vmem>>, %arg13: memref<1x2x128x128xf32, #tpu.memory_space<vmem>>, %arg14: memref<1x2x1x128xf32, #tpu.memory_space<vmem>>, %arg15: memref<1x2x1x128xf32, #tpu.memory_space<vmem>>, %arg16: memref<1x2x1x128xf32, #tpu.memory_space<vmem>>, %arg17: memref<1x128x128xf32, #tpu.memory_space<vmem>>, %arg18: memref<1x1x128xf32, #tpu.memory_space<vmem>>, %arg19: memref<1x8x128xf32, #tpu.memory_space<vmem>>, %arg20: memref<48x128xf32, #tpu.memory_space<vmem>>) attributes {dimension_semantics = [#tpu.dimension_semantics<parallel>], iteration_bounds = array<i64: 2>, scalar_prefetch = 0 : i64, scratch_operands = 1 : i64, tpu.core_type = #tpu.core_type<tc>, window_params = [{transform_indices = @transform_0, window_bounds = array<i64: 1, 48, 128>}, {transform_indices = @transform_1, window_bounds = array<i64: 1, 6, 8>}, {transform_indices = @transform_2, window_bounds = array<i64: 1, 1, 128>}, {transform_indices = @transform_3, window_bounds = array<i64: 1, 1, 128>}, {transform_indices = @transform_4, window_bounds = array<i64: 1, 2, 128, 384>}, {transform_indices = @transform_5, window_bounds = array<i64: 1, 2, 1, 384>}, {transform_indices = @transform_6, window_bounds = array<i64: 1, 2, 128, 128>}, {transform_indices = @transform_7, window_bounds = array<i64: 1, 2, 1, 128>}, {transform_indices = @transform_8, window_bounds = array<i64: 1, 2, 1, 128>}, {transform_indices = @transform_9, window_bounds = array<i64: 1, 2, 1, 128>}, {transform_indices = @transform_10, window_bounds = array<i64: 1, 2, 128, 128>}, {transform_indices = @transform_11, window_bounds = array<i64: 1, 2, 1, 128>}, {transform_indices = @transform_12, window_bounds = array<i64: 1, 2, 128, 128>}, {transform_indices = @transform_13, window_bounds = array<i64: 1, 2, 1, 128>}, {transform_indices = @transform_14, window_bounds = array<i64: 1, 2, 1, 128>}, {transform_indices = @transform_15, window_bounds = array<i64: 1, 2, 1, 128>}, {transform_indices = @transform_16, window_bounds = array<i64: 1, 128, 128>}, {transform_indices = @transform_17, window_bounds = array<i64: 1, 1, 128>}, {transform_indices = @transform_18, window_bounds = array<i64: 1, 8, 128>}]} {
    %cst = arith.constant 0.000000e+00 : f32
    %0 = vector.broadcast %cst : f32 to vector<48x128xf32>
    %c0 = arith.constant 0 : index
    %c0_0 = arith.constant 0 : index
    %1 = vector.load %arg20[%c0, %c0_0] : memref<48x128xf32, #tpu.memory_space<vmem>>, vector<48x128xf32>
    tpu.vector_store %arg20[%c0, %c0_0], %0 {strides = array<i32>} : memref<48x128xf32, #tpu.memory_space<vmem>>, vector<48x128xf32>,
    %c0_1 = arith.constant 0 : index
    %c0_2 = arith.constant 0 : index
    %c0_3 = arith.constant 0 : index
    %2 = vector.load %arg1[%c0_1, %c0_2, %c0_3] : memref<1x48x128xf32, #tpu.memory_space<vmem>>, vector<1x48x128xf32>
    %3 = vector.shape_cast %2 : vector<1x48x128xf32> to vector<48x128xf32>
    %c0_4 = arith.constant 0 : index
    %c0_5 = arith.constant 0 : index
    %c0_6 = arith.constant 0 : index
    %4 = vector.load %arg3[%c0_4, %c0_5, %c0_6] : memref<1x1x128xf32, #tpu.memory_space<vmem>>, vector<1x1x128xf32>
    %5 = vector.shape_cast %4 : vector<1x1x128xf32> to vector<1x128xf32>
    %c0_7 = arith.constant 0 : index
    %c0_8 = arith.constant 0 : index
    %c0_9 = arith.constant 0 : index
    %6 = vector.load %arg4[%c0_7, %c0_8, %c0_9] : memref<1x1x128xf32, #tpu.memory_space<vmem>>, vector<1x1x128xf32>
    %7 = vector.shape_cast %6 : vector<1x1x128xf32> to vector<1x128xf32>
    %cst_10 = arith.constant dense<0.000000e+00> : vector<48xf32>
    %8 = vector.multi_reduction <add>, %3, %cst_10 [1] : vector<48x128xf32> to vector<48xf32>
    %9 = vector.shape_cast %8 : vector<48xf32> to vector<48x1xf32>
    %cst_11 = arith.constant 3.125000e-02 : f32
    %10 = vector.broadcast %cst_11 : f32 to vector<48x1xf32>
    %11 = arith.mulf %9, %10 : vector<48x1xf32>
    %12 = arith.mulf %3, %3 : vector<48x128xf32>
    %cst_12 = arith.constant dense<0.000000e+00> : vector<48xf32>
    %13 = vector.multi_reduction <add>, %12, %cst_12 [1] : vector<48x128xf32> to vector<48xf32>
    %14 = vector.shape_cast %13 : vector<48xf32> to vector<48x1xf32>
    %cst_13 = arith.constant 3.125000e-02 : f32
    %15 = vector.broadcast %cst_13 : f32 to vector<48x1xf32>
    %16 = arith.mulf %14, %15 : vector<48x1xf32>
    %17 = arith.mulf %11, %11 : vector<48x1xf32>
    %18 = arith.subf %16, %17 : vector<48x1xf32>
    %19 = vector.broadcast %11 : vector<48x1xf32> to vector<48x128xf32>
    %20 = arith.subf %3, %19 : vector<48x128xf32>
    %cst_14 = arith.constant 9.99999996E-13 : f32
    %21 = vector.broadcast %cst_14 : f32 to vector<48x1xf32>
    %22 = arith.addf %18, %21 : vector<48x1xf32>
    %23 = math.rsqrt %22 : vector<48x1xf32>
    %24 = vector.broadcast %23 : vector<48x1xf32> to vector<48x128xf32>
    %25 = arith.mulf %20, %24 : vector<48x128xf32>
    %26 = vector.broadcast %5 : vector<1x128xf32> to vector<48x128xf32>
    %27 = arith.mulf %25, %26 : vector<48x128xf32>
    %28 = vector.broadcast %7 : vector<1x128xf32> to vector<48x128xf32>
    %29 = arith.addf %27, %28 : vector<48x128xf32>
    %c0_15 = arith.constant 0 : index
    %c0_16 = arith.constant 0 : index
    %c0_17 = arith.constant 0 : index
    %30 = vector.load %arg2[%c0_15, %c0_16, %c0_17] : memref<1x6x8xf32, #tpu.memory_space<vmem>>, vector<1x6x8xf32>
    %31 = vector.shape_cast %30 : vector<1x6x8xf32> to vector<6x8xf32>
    %c0_18 = arith.constant 0 : index
    %c0_19 = arith.constant 0 : index
    %c0_20 = arith.constant 0 : index
    %c0_21 = arith.constant 0 : index
    %32 = vector.load %arg5[%c0_18, %c0_19, %c0_20, %c0_21] : memref<1x2x128x384xf32, #tpu.memory_space<vmem>>, vector<1x1x128x384xf32>
    %33 = vector.shape_cast %32 : vector<1x1x128x384xf32> to vector<128x384xf32>
    %cst_22 = arith.constant dense<0.000000e+00> : vector<48x384xf32>
    %34 = tpu.matmul %29, %33, %cst_22 {dimension_numbers = #tpu.dot_dimension_numbers<[1], [0], [0], [1], [0, 0, 1, 1], [], []>} : vector<48x128xf32>, vector<128x384xf32>, vector<48x384xf32> -> vector<48x384xf32>
    %c0_23 = arith.constant 0 : index
    %c0_24 = arith.constant 0 : index
    %c0_25 = arith.constant 0 : index
    %c0_26 = arith.constant 0 : index
    %35 = vector.load %arg6[%c0_23, %c0_24, %c0_25, %c0_26] : memref<1x2x1x384xf32, #tpu.memory_space<vmem>>, vector<1x1x1x384xf32>
    %36 = vector.shape_cast %35 : vector<1x1x1x384xf32> to vector<1x384xf32>
    %37 = vector.broadcast %36 : vector<1x384xf32> to vector<48x384xf32>
    %38 = arith.addf %34, %37 : vector<48x384xf32>
    %39 = vector.extract_strided_slice %38 {offsets = [0, 0], sizes = [48, 128], strides = [1, 1]} : vector<48x384xf32> to vector<48x128xf32>
    %40 = vector.extract_strided_slice %38 {offsets = [0, 128], sizes = [48, 128], strides = [1, 1]} : vector<48x384xf32> to vector<48x128xf32>
    %41 = vector.extract_strided_slice %38 {offsets = [0, 256], sizes = [48, 128], strides = [1, 1]} : vector<48x384xf32> to vector<48x128xf32>
    %42 = vector.extract_strided_slice %31 {offsets = [0, 0], sizes = [1, 8], strides = [1, 1]} : vector<6x8xf32> to vector<1x8xf32>
    %43 = vector.extract_strided_slice %39 {offsets = [0, 0], sizes = [8, 128], strides = [1, 1]} : vector<48x128xf32> to vector<8x128xf32>
    %44 = vector.extract_strided_slice %40 {offsets = [0, 0], sizes = [8, 128], strides = [1, 1]} : vector<48x128xf32> to vector<8x128xf32>
    %45 = vector.extract_strided_slice %41 {offsets = [0, 0], sizes = [8, 128], strides = [1, 1]} : vector<48x128xf32> to vector<8x128xf32>
    %46 = vector.extract_strided_slice %43 {offsets = [0, 0], sizes = [8, 8], strides = [1, 1]} : vector<8x128xf32> to vector<8x8xf32>
    %47 = vector.extract_strided_slice %44 {offsets = [0, 0], sizes = [8, 8], strides = [1, 1]} : vector<8x128xf32> to vector<8x8xf32>
    %48 = vector.extract_strided_slice %45 {offsets = [0, 0], sizes = [8, 8], strides = [1, 1]} : vector<8x128xf32> to vector<8x8xf32>
    %cst_27 = arith.constant dense<0.000000e+00> : vector<8x8xf32>
    %49 = tpu.matmul %46, %47, %cst_27 {dimension_numbers = #tpu.dot_dimension_numbers<[1], [1], [0], [0], [0, 0, 1, 0], [], []>} : vector<8x8xf32>, vector<8x8xf32>, vector<8x8xf32> -> vector<8x8xf32>
    %cst_28 = arith.constant 0.353553385 : f32
    %50 = vector.broadcast %cst_28 : f32 to vector<8x8xf32>
    %51 = arith.mulf %49, %50 : vector<8x8xf32>
    %52 = vector.broadcast %42 : vector<1x8xf32> to vector<8x8xf32>
    %53 = arith.addf %51, %52 : vector<8x8xf32>
    %cst_29 = arith.constant dense<0xFF800000> : vector<8xf32>
    %54 = vector.multi_reduction <maximumf>, %53, %cst_29 [1] : vector<8x8xf32> to vector<8xf32>
    %55 = vector.shape_cast %54 : vector<8xf32> to vector<8x1xf32>
    %56 = vector.broadcast %55 : vector<8x1xf32> to vector<8x8xf32>
    %57 = arith.subf %53, %56 : vector<8x8xf32>
    %58 = math.exp %57 : vector<8x8xf32>
    %cst_30 = arith.constant dense<0.000000e+00> : vector<8xf32>
    %59 = vector.multi_reduction <add>, %58, %cst_30 [1] : vector<8x8xf32> to vector<8xf32>
    %60 = vector.shape_cast %59 : vector<8xf32> to vector<8x1xf32>
    %61 = vector.broadcast %60 : vector<8x1xf32> to vector<8x8xf32>
    %62 = arith.divf %58, %61 : vector<8x8xf32>
    %cst_31 = arith.constant dense<0.000000e+00> : vector<8x8xf32>
    %63 = tpu.matmul %62, %48, %cst_31 {dimension_numbers = #tpu.dot_dimension_numbers<[1], [0], [0], [1], [0, 0, 1, 1], [], []>} : vector<8x8xf32>, vector<8x8xf32>, vector<8x8xf32> -> vector<8x8xf32>
    %c0_32 = arith.constant 0 : index
    %c0_33 = arith.constant 0 : index
    %64 = vector.load %arg20[%c0_32, %c0_33] : memref<48x128xf32, #tpu.memory_space<vmem>>, vector<8x8xf32>
    tpu.vector_store %arg20[%c0_32, %c0_33], %63 {strides = array<i32>} : memref<48x128xf32, #tpu.memory_space<vmem>>, vector<8x8xf32>,
    %65 = vector.extract_strided_slice %43 {offsets = [0, 8], sizes = [8, 8], strides = [1, 1]} : vector<8x128xf32> to vector<8x8xf32>
    %66 = vector.extract_strided_slice %44 {offsets = [0, 8], sizes = [8, 8], strides = [1, 1]} : vector<8x128xf32> to vector<8x8xf32>
    %67 = vector.extract_strided_slice %45 {offsets = [0, 8], sizes = [8, 8], strides = [1, 1]} : vector<8x128xf32> to vector<8x8xf32>
    %cst_34 = arith.constant dense<0.000000e+00> : vector<8x8xf32>
    %68 = tpu.matmul %65, %66, %cst_34 {dimension_numbers = #tpu.dot_dimension_numbers<[1], [1], [0], [0], [0, 0, 1, 0], [], []>} : vector<8x8xf32>, vector<8x8xf32>, vector<8x8xf32> -> vector<8x8xf32>
    %cst_35 = arith.constant 0.353553385 : f32
    %69 = vector.broadcast %cst_35 : f32 to vector<8x8xf32>
    %70 = arith.mulf %68, %69 : vector<8x8xf32>
    %71 = vector.broadcast %42 : vector<1x8xf32> to vector<8x8xf32>
    %72 = arith.addf %70, %71 : vector<8x8xf32>
    %cst_36 = arith.constant dense<0xFF800000> : vector<8xf32>
    %73 = vector.multi_reduction <maximumf>, %72, %cst_36 [1] : vector<8x8xf32> to vector<8xf32>
    %74 = vector.shape_cast %73 : vector<8xf32> to vector<8x1xf32>
    %75 = vector.broadcast %74 : vector<8x1xf32> to vector<8x8xf32>
    %76 = arith.subf %72, %75 : vector<8x8xf32>
    %77 = math.exp %76 : vector<8x8xf32>
    %cst_37 = arith.constant dense<0.000000e+00> : vector<8xf32>
    %78 = vector.multi_reduction <add>, %77, %cst_37 [1] : vector<8x8xf32> to vector<8xf32>
    %79 = vector.shape_cast %78 : vector<8xf32> to vector<8x1xf32>
    %80 = vector.broadcast %79 : vector<8x1xf32> to vector<8x8xf32>
    %81 = arith.divf %77, %80 : vector<8x8xf32>
    %cst_38 = arith.constant dense<0.000000e+00> : vector<8x8xf32>
    %82 = tpu.matmul %81, %67, %cst_38 {dimension_numbers = #tpu.dot_dimension_numbers<[1], [0], [0], [1], [0, 0, 1, 1], [], []>} : vector<8x8xf32>, vector<8x8xf32>, vector<8x8xf32> -> vector<8x8xf32>
    %c0_39 = arith.constant 0 : index
    %c8 = arith.constant 8 : index
    %83 = vector.load %arg20[%c0_39, %c8] : memref<48x128xf32, #tpu.memory_space<vmem>>, vector<8x8xf32>
    tpu.vector_store %arg20[%c0_39, %c8], %82 {strides = array<i32>} : memref<48x128xf32, #tpu.memory_space<vmem>>, vector<8x8xf32>,
    %84 = vector.extract_strided_slice %43 {offsets = [0, 16], sizes = [8, 8], strides = [1, 1]} : vector<8x128xf32> to vector<8x8xf32>
    %85 = vector.extract_strided_slice %44 {offsets = [0, 16], sizes = [8, 8], strides = [1, 1]} : vector<8x128xf32> to vector<8x8xf32>
    %86 = vector.extract_strided_slice %45 {offsets = [0, 16], sizes = [8, 8], strides = [1, 1]} : vector<8x128xf32> to vector<8x8xf32>
    %cst_40 = arith.constant dense<0.000000e+00> : vector<8x8xf32>
    %87 = tpu.matmul %84, %85, %cst_40 {dimension_numbers = #tpu.dot_dimension_numbers<[1], [1], [0], [0], [0, 0, 1, 0], [], []>} : vector<8x8xf32>, vector<8x8xf32>, vector<8x8xf32> -> vector<8x8xf32>
    %cst_41 = arith.constant 0.353553385 : f32
    %88 = vector.broadcast %cst_41 : f32 to vector<8x8xf32>
    %89 = arith.mulf %87, %88 : vector<8x8xf32>
    %90 = vector.broadcast %42 : vector<1x8xf32> to vector<8x8xf32>
    %91 = arith.addf %89, %90 : vector<8x8xf32>
    %cst_42 = arith.constant dense<0xFF800000> : vector<8xf32>
    %92 = vector.multi_reduction <maximumf>, %91, %cst_42 [1] : vector<8x8xf32> to vector<8xf32>
    %93 = vector.shape_cast %92 : vector<8xf32> to vector<8x1xf32>
    %94 = vector.broadcast %93 : vector<8x1xf32> to vector<8x8xf32>
    %95 = arith.subf %91, %94 : vector<8x8xf32>
    %96 = math.exp %95 : vector<8x8xf32>
    %cst_43 = arith.constant dense<0.000000e+00> : vector<8xf32>
    %97 = vector.multi_reduction <add>, %96, %cst_43 [1] : vector<8x8xf32> to vector<8xf32>
    %98 = vector.shape_cast %97 : vector<8xf32> to vector<8x1xf32>
    %99 = vector.broadcast %98 : vector<8x1xf32> to vector<8x8xf32>
    %100 = arith.divf %96, %99 : vector<8x8xf32>
    %cst_44 = arith.constant dense<0.000000e+00> : vector<8x8xf32>
    %101 = tpu.matmul %100, %86, %cst_44 {dimension_numbers = #tpu.dot_dimension_numbers<[1], [0], [0], [1], [0, 0, 1, 1], [], []>} : vector<8x8xf32>, vector<8x8xf32>, vector<8x8xf32> -> vector<8x8xf32>
    %c0_45 = arith.constant 0 : index
    %c16 = arith.constant 16 : index
    %102 = vector.load %arg20[%c0_45, %c16] : memref<48x128xf32, #tpu.memory_space<vmem>>, vector<8x8xf32>
    tpu.vector_store %arg20[%c0_45, %c16], %101 {strides = array<i32>} : memref<48x128xf32, #tpu.memory_space<vmem>>, vector<8x8xf32>,
    %103 = vector.extract_strided_slice %43 {offsets = [0, 24], sizes = [8, 8], strides = [1, 1]} : vector<8x128xf32> to vector<8x8xf32>
    %104 = vector.extract_strided_slice %44 {offsets = [0, 24], sizes = [8, 8], strides = [1, 1]} : vector<8x128xf32> to vector<8x8xf32>
    %105 = vector.extract_strided_slice %45 {offsets = [0, 24], sizes = [8, 8], strides = [1, 1]} : vector<8x128xf32> to vector<8x8xf32>
    %cst_46 = arith.constant dense<0.000000e+00> : vector<8x8xf32>
    %106 = tpu.matmul %103, %104, %cst_46 {dimension_numbers = #tpu.dot_dimension_numbers<[1], [1], [0], [0], [0, 0, 1, 0], [], []>} : vector<8x8xf32>, vector<8x8xf32>, vector<8x8xf32> -> vector<8x8xf32>
    %cst_47 = arith.constant 0.353553385 : f32
    %107 = vector.broadcast %cst_47 : f32 to vector<8x8xf32>
    %108 = arith.mulf %106, %107 : vector<8x8xf32>
    %109 = vector.broadcast %42 : vector<1x8xf32> to vector<8x8xf32>
    %110 = arith.addf %108, %109 : vector<8x8xf32>
    %cst_48 = arith.constant dense<0xFF800000> : vector<8xf32>
    %111 = vector.multi_reduction <maximumf>, %110, %cst_48 [1] : vector<8x8xf32> to vector<8xf32>
    %112 = vector.shape_cast %111 : vector<8xf32> to vector<8x1xf32>
    %113 = vector.broadcast %112 : vector<8x1xf32> to vector<8x8xf32>
    %114 = arith.subf %110, %113 : vector<8x8xf32>
    %115 = math.exp %114 : vector<8x8xf32>
    %cst_49 = arith.constant dense<0.000000e+00> : vector<8xf32>
    %116 = vector.multi_reduction <add>, %115, %cst_49 [1] : vector<8x8xf32> to vector<8xf32>
    %117 = vector.shape_cast %116 : vector<8xf32> to vector<8x1xf32>
    %118 = vector.broadcast %117 : vector<8x1xf32> to vector<8x8xf32>
    %119 = arith.divf %115, %118 : vector<8x8xf32>
    %cst_50 = arith.constant dense<0.000000e+00> : vector<8x8xf32>
    %120 = tpu.matmul %119, %105, %cst_50 {dimension_numbers = #tpu.dot_dimension_numbers<[1], [0], [0], [1], [0, 0, 1, 1], [], []>} : vector<8x8xf32>, vector<8x8xf32>, vector<8x8xf32> -> vector<8x8xf32>
    %c0_51 = arith.constant 0 : index
    %c24 = arith.constant 24 : index
    %121 = vector.load %arg20[%c0_51, %c24] : memref<48x128xf32, #tpu.memory_space<vmem>>, vector<8x8xf32>
    tpu.vector_store %arg20[%c0_51, %c24], %120 {strides = array<i32>} : memref<48x128xf32, #tpu.memory_space<vmem>>, vector<8x8xf32>,
    %122 = vector.extract_strided_slice %31 {offsets = [1, 0], sizes = [1, 8], strides = [1, 1]} : vector<6x8xf32> to vector<1x8xf32>
    %123 = vector.extract_strided_slice %39 {offsets = [8, 0], sizes = [8, 128], strides = [1, 1]} : vector<48x128xf32> to vector<8x128xf32>
    %124 = vector.extract_strided_slice %40 {offsets = [8, 0], sizes = [8, 128], strides = [1, 1]} : vector<48x128xf32> to vector<8x128xf32>
    %125 = vector.extract_strided_slice %41 {offsets = [8, 0], sizes = [8, 128], strides = [1, 1]} : vector<48x128xf32> to vector<8x128xf32>
    %126 = vector.extract_strided_slice %123 {offsets = [0, 0], sizes = [8, 8], strides = [1, 1]} : vector<8x128xf32> to vector<8x8xf32>
    %127 = vector.extract_strided_slice %124 {offsets = [0, 0], sizes = [8, 8], strides = [1, 1]} : vector<8x128xf32> to vector<8x8xf32>
    %128 = vector.extract_strided_slice %125 {offsets = [0, 0], sizes = [8, 8], strides = [1, 1]} : vector<8x128xf32> to vector<8x8xf32>
    %cst_52 = arith.constant dense<0.000000e+00> : vector<8x8xf32>
    %129 = tpu.matmul %126, %127, %cst_52 {dimension_numbers = #tpu.dot_dimension_numbers<[1], [1], [0], [0], [0, 0, 1, 0], [], []>} : vector<8x8xf32>, vector<8x8xf32>, vector<8x8xf32> -> vector<8x8xf32>
    %cst_53 = arith.constant 0.353553385 : f32
    %130 = vector.broadcast %cst_53 : f32 to vector<8x8xf32>
    %131 = arith.mulf %129, %130 : vector<8x8xf32>
    %132 = vector.broadcast %122 : vector<1x8xf32> to vector<8x8xf32>
    %133 = arith.addf %131, %132 : vector<8x8xf32>
    %cst_54 = arith.constant dense<0xFF800000> : vector<8xf32>
    %134 = vector.multi_reduction <maximumf>, %133, %cst_54 [1] : vector<8x8xf32> to vector<8xf32>
    %135 = vector.shape_cast %134 : vector<8xf32> to vector<8x1xf32>
    %136 = vector.broadcast %135 : vector<8x1xf32> to vector<8x8xf32>
    %137 = arith.subf %133, %136 : vector<8x8xf32>
    %138 = math.exp %137 : vector<8x8xf32>
    %cst_55 = arith.constant dense<0.000000e+00> : vector<8xf32>
    %139 = vector.multi_reduction <add>, %138, %cst_55 [1] : vector<8x8xf32> to vector<8xf32>
    %140 = vector.shape_cast %139 : vector<8xf32> to vector<8x1xf32>
    %141 = vector.broadcast %140 : vector<8x1xf32> to vector<8x8xf32>
    %142 = arith.divf %138, %141 : vector<8x8xf32>
    %cst_56 = arith.constant dense<0.000000e+00> : vector<8x8xf32>
    %143 = tpu.matmul %142, %128, %cst_56 {dimension_numbers = #tpu.dot_dimension_numbers<[1], [0], [0], [1], [0, 0, 1, 1], [], []>} : vector<8x8xf32>, vector<8x8xf32>, vector<8x8xf32> -> vector<8x8xf32>
    %c8_57 = arith.constant 8 : index
    %c0_58 = arith.constant 0 : index
    %144 = vector.load %arg20[%c8_57, %c0_58] : memref<48x128xf32, #tpu.memory_space<vmem>>, vector<8x8xf32>
    tpu.vector_store %arg20[%c8_57, %c0_58], %143 {strides = array<i32>} : memref<48x128xf32, #tpu.memory_space<vmem>>, vector<8x8xf32>,
    %145 = vector.extract_strided_slice %123 {offsets = [0, 8], sizes = [8, 8], strides = [1, 1]} : vector<8x128xf32> to vector<8x8xf32>
    %146 = vector.extract_strided_slice %124 {offsets = [0, 8], sizes = [8, 8], strides = [1, 1]} : vector<8x128xf32> to vector<8x8xf32>
    %147 = vector.extract_strided_slice %125 {offsets = [0, 8], sizes = [8, 8], strides = [1, 1]} : vector<8x128xf32> to vector<8x8xf32>
    %cst_59 = arith.constant dense<0.000000e+00> : vector<8x8xf32>
    %148 = tpu.matmul %145, %146, %cst_59 {dimension_numbers = #tpu.dot_dimension_numbers<[1], [1], [0], [0], [0, 0, 1, 0], [], []>} : vector<8x8xf32>, vector<8x8xf32>, vector<8x8xf32> -> vector<8x8xf32>
    %cst_60 = arith.constant 0.353553385 : f32
    %149 = vector.broadcast %cst_60 : f32 to vector<8x8xf32>
    %150 = arith.mulf %148, %149 : vector<8x8xf32>
    %151 = vector.broadcast %122 : vector<1x8xf32> to vector<8x8xf32>
    %152 = arith.addf %150, %151 : vector<8x8xf32>
    %cst_61 = arith.constant dense<0xFF800000> : vector<8xf32>
    %153 = vector.multi_reduction <maximumf>, %152, %cst_61 [1] : vector<8x8xf32> to vector<8xf32>
    %154 = vector.shape_cast %153 : vector<8xf32> to vector<8x1xf32>
    %155 = vector.broadcast %154 : vector<8x1xf32> to vector<8x8xf32>
    %156 = arith.subf %152, %155 : vector<8x8xf32>
    %157 = math.exp %156 : vector<8x8xf32>
    %cst_62 = arith.constant dense<0.000000e+00> : vector<8xf32>
    %158 = vector.multi_reduction <add>, %157, %cst_62 [1] : vector<8x8xf32> to vector<8xf32>
    %159 = vector.shape_cast %158 : vector<8xf32> to vector<8x1xf32>
    %160 = vector.broadcast %159 : vector<8x1xf32> to vector<8x8xf32>
    %161 = arith.divf %157, %160 : vector<8x8xf32>
    %cst_63 = arith.constant dense<0.000000e+00> : vector<8x8xf32>
    %162 = tpu.matmul %161, %147, %cst_63 {dimension_numbers = #tpu.dot_dimension_numbers<[1], [0], [0], [1], [0, 0, 1, 1], [], []>} : vector<8x8xf32>, vector<8x8xf32>, vector<8x8xf32> -> vector<8x8xf32>
    %c8_64 = arith.constant 8 : index
    %c8_65 = arith.constant 8 : index
    %163 = vector.load %arg20[%c8_64, %c8_65] : memref<48x128xf32, #tpu.memory_space<vmem>>, vector<8x8xf32>
    tpu.vector_store %arg20[%c8_64, %c8_65], %162 {strides = array<i32>} : memref<48x128xf32, #tpu.memory_space<vmem>>, vector<8x8xf32>,
    %164 = vector.extract_strided_slice %123 {offsets = [0, 16], sizes = [8, 8], strides = [1, 1]} : vector<8x128xf32> to vector<8x8xf32>
    %165 = vector.extract_strided_slice %124 {offsets = [0, 16], sizes = [8, 8], strides = [1, 1]} : vector<8x128xf32> to vector<8x8xf32>
    %166 = vector.extract_strided_slice %125 {offsets = [0, 16], sizes = [8, 8], strides = [1, 1]} : vector<8x128xf32> to vector<8x8xf32>
    %cst_66 = arith.constant dense<0.000000e+00> : vector<8x8xf32>
    %167 = tpu.matmul %164, %165, %cst_66 {dimension_numbers = #tpu.dot_dimension_numbers<[1], [1], [0], [0], [0, 0, 1, 0], [], []>} : vector<8x8xf32>, vector<8x8xf32>, vector<8x8xf32> -> vector<8x8xf32>
    %cst_67 = arith.constant 0.353553385 : f32
    %168 = vector.broadcast %cst_67 : f32 to vector<8x8xf32>
    %169 = arith.mulf %167, %168 : vector<8x8xf32>
    %170 = vector.broadcast %122 : vector<1x8xf32> to vector<8x8xf32>
    %171 = arith.addf %169, %170 : vector<8x8xf32>
    %cst_68 = arith.constant dense<0xFF800000> : vector<8xf32>
    %172 = vector.multi_reduction <maximumf>, %171, %cst_68 [1] : vector<8x8xf32> to vector<8xf32>
    %173 = vector.shape_cast %172 : vector<8xf32> to vector<8x1xf32>
    %174 = vector.broadcast %173 : vector<8x1xf32> to vector<8x8xf32>
    %175 = arith.subf %171, %174 : vector<8x8xf32>
    %176 = math.exp %175 : vector<8x8xf32>
    %cst_69 = arith.constant dense<0.000000e+00> : vector<8xf32>
    %177 = vector.multi_reduction <add>, %176, %cst_69 [1] : vector<8x8xf32> to vector<8xf32>
    %178 = vector.shape_cast %177 : vector<8xf32> to vector<8x1xf32>
    %179 = vector.broadcast %178 : vector<8x1xf32> to vector<8x8xf32>
    %180 = arith.divf %176, %179 : vector<8x8xf32>
    %cst_70 = arith.constant dense<0.000000e+00> : vector<8x8xf32>
    %181 = tpu.matmul %180, %166, %cst_70 {dimension_numbers = #tpu.dot_dimension_numbers<[1], [0], [0], [1], [0, 0, 1, 1], [], []>} : vector<8x8xf32>, vector<8x8xf32>, vector<8x8xf32> -> vector<8x8xf32>
    %c8_71 = arith.constant 8 : index
    %c16_72 = arith.constant 16 : index
    %182 = vector.load %arg20[%c8_71, %c16_72] : memref<48x128xf32, #tpu.memory_space<vmem>>, vector<8x8xf32>
    tpu.vector_store %arg20[%c8_71, %c16_72], %181 {strides = array<i32>} : memref<48x128xf32, #tpu.memory_space<vmem>>, vector<8x8xf32>,
    %183 = vector.extract_strided_slice %123 {offsets = [0, 24], sizes = [8, 8], strides = [1, 1]} : vector<8x128xf32> to vector<8x8xf32>
    %184 = vector.extract_strided_slice %124 {offsets = [0, 24], sizes = [8, 8], strides = [1, 1]} : vector<8x128xf32> to vector<8x8xf32>
    %185 = vector.extract_strided_slice %125 {offsets = [0, 24], sizes = [8, 8], strides = [1, 1]} : vector<8x128xf32> to vector<8x8xf32>
    %cst_73 = arith.constant dense<0.000000e+00> : vector<8x8xf32>
    %186 = tpu.matmul %183, %184, %cst_73 {dimension_numbers = #tpu.dot_dimension_numbers<[1], [1], [0], [0], [0, 0, 1, 0], [], []>} : vector<8x8xf32>, vector<8x8xf32>, vector<8x8xf32> -> vector<8x8xf32>
    %cst_74 = arith.constant 0.353553385 : f32
    %187 = vector.broadcast %cst_74 : f32 to vector<8x8xf32>
    %188 = arith.mulf %186, %187 : vector<8x8xf32>
    %189 = vector.broadcast %122 : vector<1x8xf32> to vector<8x8xf32>
    %190 = arith.addf %188, %189 : vector<8x8xf32>
    %cst_75 = arith.constant dense<0xFF800000> : vector<8xf32>
    %191 = vector.multi_reduction <maximumf>, %190, %cst_75 [1] : vector<8x8xf32> to vector<8xf32>
    %192 = vector.shape_cast %191 : vector<8xf32> to vector<8x1xf32>
    %193 = vector.broadcast %192 : vector<8x1xf32> to vector<8x8xf32>
    %194 = arith.subf %190, %193 : vector<8x8xf32>
    %195 = math.exp %194 : vector<8x8xf32>
    %cst_76 = arith.constant dense<0.000000e+00> : vector<8xf32>
    %196 = vector.multi_reduction <add>, %195, %cst_76 [1] : vector<8x8xf32> to vector<8xf32>
    %197 = vector.shape_cast %196 : vector<8xf32> to vector<8x1xf32>
    %198 = vector.broadcast %197 : vector<8x1xf32> to vector<8x8xf32>
    %199 = arith.divf %195, %198 : vector<8x8xf32>
    %cst_77 = arith.constant dense<0.000000e+00> : vector<8x8xf32>
    %200 = tpu.matmul %199, %185, %cst_77 {dimension_numbers = #tpu.dot_dimension_numbers<[1], [0], [0], [1], [0, 0, 1, 1], [], []>} : vector<8x8xf32>, vector<8x8xf32>, vector<8x8xf32> -> vector<8x8xf32>
    %c8_78 = arith.constant 8 : index
    %c24_79 = arith.constant 24 : index
    %201 = vector.load %arg20[%c8_78, %c24_79] : memref<48x128xf32, #tpu.memory_space<vmem>>, vector<8x8xf32>
    tpu.vector_store %arg20[%c8_78, %c24_79], %200 {strides = array<i32>} : memref<48x128xf32, #tpu.memory_space<vmem>>, vector<8x8xf32>,
    %202 = vector.extract_strided_slice %31 {offsets = [2, 0], sizes = [1, 8], strides = [1, 1]} : vector<6x8xf32> to vector<1x8xf32>
    %203 = vector.extract_strided_slice %39 {offsets = [16, 0], sizes = [8, 128], strides = [1, 1]} : vector<48x128xf32> to vector<8x128xf32>
    %204 = vector.extract_strided_slice %40 {offsets = [16, 0], sizes = [8, 128], strides = [1, 1]} : vector<48x128xf32> to vector<8x128xf32>
    %205 = vector.extract_strided_slice %41 {offsets = [16, 0], sizes = [8, 128], strides = [1, 1]} : vector<48x128xf32> to vector<8x128xf32>
    %206 = vector.extract_strided_slice %203 {offsets = [0, 0], sizes = [8, 8], strides = [1, 1]} : vector<8x128xf32> to vector<8x8xf32>
    %207 = vector.extract_strided_slice %204 {offsets = [0, 0], sizes = [8, 8], strides = [1, 1]} : vector<8x128xf32> to vector<8x8xf32>
    %208 = vector.extract_strided_slice %205 {offsets = [0, 0], sizes = [8, 8], strides = [1, 1]} : vector<8x128xf32> to vector<8x8xf32>
    %cst_80 = arith.constant dense<0.000000e+00> : vector<8x8xf32>
    %209 = tpu.matmul %206, %207, %cst_80 {dimension_numbers = #tpu.dot_dimension_numbers<[1], [1], [0], [0], [0, 0, 1, 0], [], []>} : vector<8x8xf32>, vector<8x8xf32>, vector<8x8xf32> -> vector<8x8xf32>
    %cst_81 = arith.constant 0.353553385 : f32
    %210 = vector.broadcast %cst_81 : f32 to vector<8x8xf32>
    %211 = arith.mulf %209, %210 : vector<8x8xf32>
    %212 = vector.broadcast %202 : vector<1x8xf32> to vector<8x8xf32>
    %213 = arith.addf %211, %212 : vector<8x8xf32>
    %cst_82 = arith.constant dense<0xFF800000> : vector<8xf32>
    %214 = vector.multi_reduction <maximumf>, %213, %cst_82 [1] : vector<8x8xf32> to vector<8xf32>
    %215 = vector.shape_cast %214 : vector<8xf32> to vector<8x1xf32>
    %216 = vector.broadcast %215 : vector<8x1xf32> to vector<8x8xf32>
    %217 = arith.subf %213, %216 : vector<8x8xf32>
    %218 = math.exp %217 : vector<8x8xf32>
    %cst_83 = arith.constant dense<0.000000e+00> : vector<8xf32>
    %219 = vector.multi_reduction <add>, %218, %cst_83 [1] : vector<8x8xf32> to vector<8xf32>
    %220 = vector.shape_cast %219 : vector<8xf32> to vector<8x1xf32>
    %221 = vector.broadcast %220 : vector<8x1xf32> to vector<8x8xf32>
    %222 = arith.divf %218, %221 : vector<8x8xf32>
    %cst_84 = arith.constant dense<0.000000e+00> : vector<8x8xf32>
    %223 = tpu.matmul %222, %208, %cst_84 {dimension_numbers = #tpu.dot_dimension_numbers<[1], [0], [0], [1], [0, 0, 1, 1], [], []>} : vector<8x8xf32>, vector<8x8xf32>, vector<8x8xf32> -> vector<8x8xf32>
    %c16_85 = arith.constant 16 : index
    %c0_86 = arith.constant 0 : index
    %224 = vector.load %arg20[%c16_85, %c0_86] : memref<48x128xf32, #tpu.memory_space<vmem>>, vector<8x8xf32>
    tpu.vector_store %arg20[%c16_85, %c0_86], %223 {strides = array<i32>} : memref<48x128xf32, #tpu.memory_space<vmem>>, vector<8x8xf32>,
    %225 = vector.extract_strided_slice %203 {offsets = [0, 8], sizes = [8, 8], strides = [1, 1]} : vector<8x128xf32> to vector<8x8xf32>
    %226 = vector.extract_strided_slice %204 {offsets = [0, 8], sizes = [8, 8], strides = [1, 1]} : vector<8x128xf32> to vector<8x8xf32>
    %227 = vector.extract_strided_slice %205 {offsets = [0, 8], sizes = [8, 8], strides = [1, 1]} : vector<8x128xf32> to vector<8x8xf32>
    %cst_87 = arith.constant dense<0.000000e+00> : vector<8x8xf32>
    %228 = tpu.matmul %225, %226, %cst_87 {dimension_numbers = #tpu.dot_dimension_numbers<[1], [1], [0], [0], [0, 0, 1, 0], [], []>} : vector<8x8xf32>, vector<8x8xf32>, vector<8x8xf32> -> vector<8x8xf32>
    %cst_88 = arith.constant 0.353553385 : f32
    %229 = vector.broadcast %cst_88 : f32 to vector<8x8xf32>
    %230 = arith.mulf %228, %229 : vector<8x8xf32>
    %231 = vector.broadcast %202 : vector<1x8xf32> to vector<8x8xf32>
    %232 = arith.addf %230, %231 : vector<8x8xf32>
    %cst_89 = arith.constant dense<0xFF800000> : vector<8xf32>
    %233 = vector.multi_reduction <maximumf>, %232, %cst_89 [1] : vector<8x8xf32> to vector<8xf32>
    %234 = vector.shape_cast %233 : vector<8xf32> to vector<8x1xf32>
    %235 = vector.broadcast %234 : vector<8x1xf32> to vector<8x8xf32>
    %236 = arith.subf %232, %235 : vector<8x8xf32>
    %237 = math.exp %236 : vector<8x8xf32>
    %cst_90 = arith.constant dense<0.000000e+00> : vector<8xf32>
    %238 = vector.multi_reduction <add>, %237, %cst_90 [1] : vector<8x8xf32> to vector<8xf32>
    %239 = vector.shape_cast %238 : vector<8xf32> to vector<8x1xf32>
    %240 = vector.broadcast %239 : vector<8x1xf32> to vector<8x8xf32>
    %241 = arith.divf %237, %240 : vector<8x8xf32>
    %cst_91 = arith.constant dense<0.000000e+00> : vector<8x8xf32>
    %242 = tpu.matmul %241, %227, %cst_91 {dimension_numbers = #tpu.dot_dimension_numbers<[1], [0], [0], [1], [0, 0, 1, 1], [], []>} : vector<8x8xf32>, vector<8x8xf32>, vector<8x8xf32> -> vector<8x8xf32>
    %c16_92 = arith.constant 16 : index
    %c8_93 = arith.constant 8 : index
    %243 = vector.load %arg20[%c16_92, %c8_93] : memref<48x128xf32, #tpu.memory_space<vmem>>, vector<8x8xf32>
    tpu.vector_store %arg20[%c16_92, %c8_93], %242 {strides = array<i32>} : memref<48x128xf32, #tpu.memory_space<vmem>>, vector<8x8xf32>,
    %244 = vector.extract_strided_slice %203 {offsets = [0, 16], sizes = [8, 8], strides = [1, 1]} : vector<8x128xf32> to vector<8x8xf32>
    %245 = vector.extract_strided_slice %204 {offsets = [0, 16], sizes = [8, 8], strides = [1, 1]} : vector<8x128xf32> to vector<8x8xf32>
    %246 = vector.extract_strided_slice %205 {offsets = [0, 16], sizes = [8, 8], strides = [1, 1]} : vector<8x128xf32> to vector<8x8xf32>
    %cst_94 = arith.constant dense<0.000000e+00> : vector<8x8xf32>
    %247 = tpu.matmul %244, %245, %cst_94 {dimension_numbers = #tpu.dot_dimension_numbers<[1], [1], [0], [0], [0, 0, 1, 0], [], []>} : vector<8x8xf32>, vector<8x8xf32>, vector<8x8xf32> -> vector<8x8xf32>
    %cst_95 = arith.constant 0.353553385 : f32
    %248 = vector.broadcast %cst_95 : f32 to vector<8x8xf32>
    %249 = arith.mulf %247, %248 : vector<8x8xf32>
    %250 = vector.broadcast %202 : vector<1x8xf32> to vector<8x8xf32>
    %251 = arith.addf %249, %250 : vector<8x8xf32>
    %cst_96 = arith.constant dense<0xFF800000> : vector<8xf32>
    %252 = vector.multi_reduction <maximumf>, %251, %cst_96 [1] : vector<8x8xf32> to vector<8xf32>
    %253 = vector.shape_cast %252 : vector<8xf32> to vector<8x1xf32>
    %254 = vector.broadcast %253 : vector<8x1xf32> to vector<8x8xf32>
    %255 = arith.subf %251, %254 : vector<8x8xf32>
    %256 = math.exp %255 : vector<8x8xf32>
    %cst_97 = arith.constant dense<0.000000e+00> : vector<8xf32>
    %257 = vector.multi_reduction <add>, %256, %cst_97 [1] : vector<8x8xf32> to vector<8xf32>
    %258 = vector.shape_cast %257 : vector<8xf32> to vector<8x1xf32>
    %259 = vector.broadcast %258 : vector<8x1xf32> to vector<8x8xf32>
    %260 = arith.divf %256, %259 : vector<8x8xf32>
    %cst_98 = arith.constant dense<0.000000e+00> : vector<8x8xf32>
    %261 = tpu.matmul %260, %246, %cst_98 {dimension_numbers = #tpu.dot_dimension_numbers<[1], [0], [0], [1], [0, 0, 1, 1], [], []>} : vector<8x8xf32>, vector<8x8xf32>, vector<8x8xf32> -> vector<8x8xf32>
    %c16_99 = arith.constant 16 : index
    %c16_100 = arith.constant 16 : index
    %262 = vector.load %arg20[%c16_99, %c16_100] : memref<48x128xf32, #tpu.memory_space<vmem>>, vector<8x8xf32>
    tpu.vector_store %arg20[%c16_99, %c16_100], %261 {strides = array<i32>} : memref<48x128xf32, #tpu.memory_space<vmem>>, vector<8x8xf32>,
    %263 = vector.extract_strided_slice %203 {offsets = [0, 24], sizes = [8, 8], strides = [1, 1]} : vector<8x128xf32> to vector<8x8xf32>
    %264 = vector.extract_strided_slice %204 {offsets = [0, 24], sizes = [8, 8], strides = [1, 1]} : vector<8x128xf32> to vector<8x8xf32>
    %265 = vector.extract_strided_slice %205 {offsets = [0, 24], sizes = [8, 8], strides = [1, 1]} : vector<8x128xf32> to vector<8x8xf32>
    %cst_101 = arith.constant dense<0.000000e+00> : vector<8x8xf32>
    %266 = tpu.matmul %263, %264, %cst_101 {dimension_numbers = #tpu.dot_dimension_numbers<[1], [1], [0], [0], [0, 0, 1, 0], [], []>} : vector<8x8xf32>, vector<8x8xf32>, vector<8x8xf32> -> vector<8x8xf32>
    %cst_102 = arith.constant 0.353553385 : f32
    %267 = vector.broadcast %cst_102 : f32 to vector<8x8xf32>
    %268 = arith.mulf %266, %267 : vector<8x8xf32>
    %269 = vector.broadcast %202 : vector<1x8xf32> to vector<8x8xf32>
    %270 = arith.addf %268, %269 : vector<8x8xf32>
    %cst_103 = arith.constant dense<0xFF800000> : vector<8xf32>
    %271 = vector.multi_reduction <maximumf>, %270, %cst_103 [1] : vector<8x8xf32> to vector<8xf32>
    %272 = vector.shape_cast %271 : vector<8xf32> to vector<8x1xf32>
    %273 = vector.broadcast %272 : vector<8x1xf32> to vector<8x8xf32>
    %274 = arith.subf %270, %273 : vector<8x8xf32>
    %275 = math.exp %274 : vector<8x8xf32>
    %cst_104 = arith.constant dense<0.000000e+00> : vector<8xf32>
    %276 = vector.multi_reduction <add>, %275, %cst_104 [1] : vector<8x8xf32> to vector<8xf32>
    %277 = vector.shape_cast %276 : vector<8xf32> to vector<8x1xf32>
    %278 = vector.broadcast %277 : vector<8x1xf32> to vector<8x8xf32>
    %279 = arith.divf %275, %278 : vector<8x8xf32>
    %cst_105 = arith.constant dense<0.000000e+00> : vector<8x8xf32>
    %280 = tpu.matmul %279, %265, %cst_105 {dimension_numbers = #tpu.dot_dimension_numbers<[1], [0], [0], [1], [0, 0, 1, 1], [], []>} : vector<8x8xf32>, vector<8x8xf32>, vector<8x8xf32> -> vector<8x8xf32>
    %c16_106 = arith.constant 16 : index
    %c24_107 = arith.constant 24 : index
    %281 = vector.load %arg20[%c16_106, %c24_107] : memref<48x128xf32, #tpu.memory_space<vmem>>, vector<8x8xf32>
    tpu.vector_store %arg20[%c16_106, %c24_107], %280 {strides = array<i32>} : memref<48x128xf32, #tpu.memory_space<vmem>>, vector<8x8xf32>,
    %282 = vector.extract_strided_slice %31 {offsets = [3, 0], sizes = [1, 8], strides = [1, 1]} : vector<6x8xf32> to vector<1x8xf32>
    %283 = vector.extract_strided_slice %39 {offsets = [24, 0], sizes = [8, 128], strides = [1, 1]} : vector<48x128xf32> to vector<8x128xf32>
    %284 = vector.extract_strided_slice %40 {offsets = [24, 0], sizes = [8, 128], strides = [1, 1]} : vector<48x128xf32> to vector<8x128xf32>
    %285 = vector.extract_strided_slice %41 {offsets = [24, 0], sizes = [8, 128], strides = [1, 1]} : vector<48x128xf32> to vector<8x128xf32>
    %286 = vector.extract_strided_slice %283 {offsets = [0, 0], sizes = [8, 8], strides = [1, 1]} : vector<8x128xf32> to vector<8x8xf32>
    %287 = vector.extract_strided_slice %284 {offsets = [0, 0], sizes = [8, 8], strides = [1, 1]} : vector<8x128xf32> to vector<8x8xf32>
    %288 = vector.extract_strided_slice %285 {offsets = [0, 0], sizes = [8, 8], strides = [1, 1]} : vector<8x128xf32> to vector<8x8xf32>
    %cst_108 = arith.constant dense<0.000000e+00> : vector<8x8xf32>
    %289 = tpu.matmul %286, %287, %cst_108 {dimension_numbers = #tpu.dot_dimension_numbers<[1], [1], [0], [0], [0, 0, 1, 0], [], []>} : vector<8x8xf32>, vector<8x8xf32>, vector<8x8xf32> -> vector<8x8xf32>
    %cst_109 = arith.constant 0.353553385 : f32
    %290 = vector.broadcast %cst_109 : f32 to vector<8x8xf32>
    %291 = arith.mulf %289, %290 : vector<8x8xf32>
    %292 = vector.broadcast %282 : vector<1x8xf32> to vector<8x8xf32>
    %293 = arith.addf %291, %292 : vector<8x8xf32>
    %cst_110 = arith.constant dense<0xFF800000> : vector<8xf32>
    %294 = vector.multi_reduction <maximumf>, %293, %cst_110 [1] : vector<8x8xf32> to vector<8xf32>
    %295 = vector.shape_cast %294 : vector<8xf32> to vector<8x1xf32>
    %296 = vector.broadcast %295 : vector<8x1xf32> to vector<8x8xf32>
    %297 = arith.subf %293, %296 : vector<8x8xf32>
    %298 = math.exp %297 : vector<8x8xf32>
    %cst_111 = arith.constant dense<0.000000e+00> : vector<8xf32>
    %299 = vector.multi_reduction <add>, %298, %cst_111 [1] : vector<8x8xf32> to vector<8xf32>
    %300 = vector.shape_cast %299 : vector<8xf32> to vector<8x1xf32>
    %301 = vector.broadcast %300 : vector<8x1xf32> to vector<8x8xf32>
    %302 = arith.divf %298, %301 : vector<8x8xf32>
    %cst_112 = arith.constant dense<0.000000e+00> : vector<8x8xf32>
    %303 = tpu.matmul %302, %288, %cst_112 {dimension_numbers = #tpu.dot_dimension_numbers<[1], [0], [0], [1], [0, 0, 1, 1], [], []>} : vector<8x8xf32>, vector<8x8xf32>, vector<8x8xf32> -> vector<8x8xf32>
    %c24_113 = arith.constant 24 : index
    %c0_114 = arith.constant 0 : index
    %304 = vector.load %arg20[%c24_113, %c0_114] : memref<48x128xf32, #tpu.memory_space<vmem>>, vector<8x8xf32>
    tpu.vector_store %arg20[%c24_113, %c0_114], %303 {strides = array<i32>} : memref<48x128xf32, #tpu.memory_space<vmem>>, vector<8x8xf32>,
    %305 = vector.extract_strided_slice %283 {offsets = [0, 8], sizes = [8, 8], strides = [1, 1]} : vector<8x128xf32> to vector<8x8xf32>
    %306 = vector.extract_strided_slice %284 {offsets = [0, 8], sizes = [8, 8], strides = [1, 1]} : vector<8x128xf32> to vector<8x8xf32>
    %307 = vector.extract_strided_slice %285 {offsets = [0, 8], sizes = [8, 8], strides = [1, 1]} : vector<8x128xf32> to vector<8x8xf32>
    %cst_115 = arith.constant dense<0.000000e+00> : vector<8x8xf32>
    %308 = tpu.matmul %305, %306, %cst_115 {dimension_numbers = #tpu.dot_dimension_numbers<[1], [1], [0], [0], [0, 0, 1, 0], [], []>} : vector<8x8xf32>, vector<8x8xf32>, vector<8x8xf32> -> vector<8x8xf32>
    %cst_116 = arith.constant 0.353553385 : f32
    %309 = vector.broadcast %cst_116 : f32 to vector<8x8xf32>
    %310 = arith.mulf %308, %309 : vector<8x8xf32>
    %311 = vector.broadcast %282 : vector<1x8xf32> to vector<8x8xf32>
    %312 = arith.addf %310, %311 : vector<8x8xf32>
    %cst_117 = arith.constant dense<0xFF800000> : vector<8xf32>
    %313 = vector.multi_reduction <maximumf>, %312, %cst_117 [1] : vector<8x8xf32> to vector<8xf32>
    %314 = vector.shape_cast %313 : vector<8xf32> to vector<8x1xf32>
    %315 = vector.broadcast %314 : vector<8x1xf32> to vector<8x8xf32>
    %316 = arith.subf %312, %315 : vector<8x8xf32>
    %317 = math.exp %316 : vector<8x8xf32>
    %cst_118 = arith.constant dense<0.000000e+00> : vector<8xf32>
    %318 = vector.multi_reduction <add>, %317, %cst_118 [1] : vector<8x8xf32> to vector<8xf32>
    %319 = vector.shape_cast %318 : vector<8xf32> to vector<8x1xf32>
    %320 = vector.broadcast %319 : vector<8x1xf32> to vector<8x8xf32>
    %321 = arith.divf %317, %320 : vector<8x8xf32>
    %cst_119 = arith.constant dense<0.000000e+00> : vector<8x8xf32>
    %322 = tpu.matmul %321, %307, %cst_119 {dimension_numbers = #tpu.dot_dimension_numbers<[1], [0], [0], [1], [0, 0, 1, 1], [], []>} : vector<8x8xf32>, vector<8x8xf32>, vector<8x8xf32> -> vector<8x8xf32>
    %c24_120 = arith.constant 24 : index
    %c8_121 = arith.constant 8 : index
    %323 = vector.load %arg20[%c24_120, %c8_121] : memref<48x128xf32, #tpu.memory_space<vmem>>, vector<8x8xf32>
    tpu.vector_store %arg20[%c24_120, %c8_121], %322 {strides = array<i32>} : memref<48x128xf32, #tpu.memory_space<vmem>>, vector<8x8xf32>,
    %324 = vector.extract_strided_slice %283 {offsets = [0, 16], sizes = [8, 8], strides = [1, 1]} : vector<8x128xf32> to vector<8x8xf32>
    %325 = vector.extract_strided_slice %284 {offsets = [0, 16], sizes = [8, 8], strides = [1, 1]} : vector<8x128xf32> to vector<8x8xf32>
    %326 = vector.extract_strided_slice %285 {offsets = [0, 16], sizes = [8, 8], strides = [1, 1]} : vector<8x128xf32> to vector<8x8xf32>
    %cst_122 = arith.constant dense<0.000000e+00> : vector<8x8xf32>
    %327 = tpu.matmul %324, %325, %cst_122 {dimension_numbers = #tpu.dot_dimension_numbers<[1], [1], [0], [0], [0, 0, 1, 0], [], []>} : vector<8x8xf32>, vector<8x8xf32>, vector<8x8xf32> -> vector<8x8xf32>
    %cst_123 = arith.constant 0.353553385 : f32
    %328 = vector.broadcast %cst_123 : f32 to vector<8x8xf32>
    %329 = arith.mulf %327, %328 : vector<8x8xf32>
    %330 = vector.broadcast %282 : vector<1x8xf32> to vector<8x8xf32>
    %331 = arith.addf %329, %330 : vector<8x8xf32>
    %cst_124 = arith.constant dense<0xFF800000> : vector<8xf32>
    %332 = vector.multi_reduction <maximumf>, %331, %cst_124 [1] : vector<8x8xf32> to vector<8xf32>
    %333 = vector.shape_cast %332 : vector<8xf32> to vector<8x1xf32>
    %334 = vector.broadcast %333 : vector<8x1xf32> to vector<8x8xf32>
    %335 = arith.subf %331, %334 : vector<8x8xf32>
    %336 = math.exp %335 : vector<8x8xf32>
    %cst_125 = arith.constant dense<0.000000e+00> : vector<8xf32>
    %337 = vector.multi_reduction <add>, %336, %cst_125 [1] : vector<8x8xf32> to vector<8xf32>
    %338 = vector.shape_cast %337 : vector<8xf32> to vector<8x1xf32>
    %339 = vector.broadcast %338 : vector<8x1xf32> to vector<8x8xf32>
    %340 = arith.divf %336, %339 : vector<8x8xf32>
    %cst_126 = arith.constant dense<0.000000e+00> : vector<8x8xf32>
    %341 = tpu.matmul %340, %326, %cst_126 {dimension_numbers = #tpu.dot_dimension_numbers<[1], [0], [0], [1], [0, 0, 1, 1], [], []>} : vector<8x8xf32>, vector<8x8xf32>, vector<8x8xf32> -> vector<8x8xf32>
    %c24_127 = arith.constant 24 : index
    %c16_128 = arith.constant 16 : index
    %342 = vector.load %arg20[%c24_127, %c16_128] : memref<48x128xf32, #tpu.memory_space<vmem>>, vector<8x8xf32>
    tpu.vector_store %arg20[%c24_127, %c16_128], %341 {strides = array<i32>} : memref<48x128xf32, #tpu.memory_space<vmem>>, vector<8x8xf32>,
    %343 = vector.extract_strided_slice %283 {offsets = [0, 24], sizes = [8, 8], strides = [1, 1]} : vector<8x128xf32> to vector<8x8xf32>
    %344 = vector.extract_strided_slice %284 {offsets = [0, 24], sizes = [8, 8], strides = [1, 1]} : vector<8x128xf32> to vector<8x8xf32>
    %345 = vector.extract_strided_slice %285 {offsets = [0, 24], sizes = [8, 8], strides = [1, 1]} : vector<8x128xf32> to vector<8x8xf32>
    %cst_129 = arith.constant dense<0.000000e+00> : vector<8x8xf32>
    %346 = tpu.matmul %343, %344, %cst_129 {dimension_numbers = #tpu.dot_dimension_numbers<[1], [1], [0], [0], [0, 0, 1, 0], [], []>} : vector<8x8xf32>, vector<8x8xf32>, vector<8x8xf32> -> vector<8x8xf32>
    %cst_130 = arith.constant 0.353553385 : f32
    %347 = vector.broadcast %cst_130 : f32 to vector<8x8xf32>
    %348 = arith.mulf %346, %347 : vector<8x8xf32>
    %349 = vector.broadcast %282 : vector<1x8xf32> to vector<8x8xf32>
    %350 = arith.addf %348, %349 : vector<8x8xf32>
    %cst_131 = arith.constant dense<0xFF800000> : vector<8xf32>
    %351 = vector.multi_reduction <maximumf>, %350, %cst_131 [1] : vector<8x8xf32> to vector<8xf32>
    %352 = vector.shape_cast %351 : vector<8xf32> to vector<8x1xf32>
    %353 = vector.broadcast %352 : vector<8x1xf32> to vector<8x8xf32>
    %354 = arith.subf %350, %353 : vector<8x8xf32>
    %355 = math.exp %354 : vector<8x8xf32>
    %cst_132 = arith.constant dense<0.000000e+00> : vector<8xf32>
    %356 = vector.multi_reduction <add>, %355, %cst_132 [1] : vector<8x8xf32> to vector<8xf32>
    %357 = vector.shape_cast %356 : vector<8xf32> to vector<8x1xf32>
    %358 = vector.broadcast %357 : vector<8x1xf32> to vector<8x8xf32>
    %359 = arith.divf %355, %358 : vector<8x8xf32>
    %cst_133 = arith.constant dense<0.000000e+00> : vector<8x8xf32>
    %360 = tpu.matmul %359, %345, %cst_133 {dimension_numbers = #tpu.dot_dimension_numbers<[1], [0], [0], [1], [0, 0, 1, 1], [], []>} : vector<8x8xf32>, vector<8x8xf32>, vector<8x8xf32> -> vector<8x8xf32>
    %c24_134 = arith.constant 24 : index
    %c24_135 = arith.constant 24 : index
    %361 = vector.load %arg20[%c24_134, %c24_135] : memref<48x128xf32, #tpu.memory_space<vmem>>, vector<8x8xf32>
    tpu.vector_store %arg20[%c24_134, %c24_135], %360 {strides = array<i32>} : memref<48x128xf32, #tpu.memory_space<vmem>>, vector<8x8xf32>,
    %362 = vector.extract_strided_slice %31 {offsets = [4, 0], sizes = [1, 8], strides = [1, 1]} : vector<6x8xf32> to vector<1x8xf32>
    %363 = vector.extract_strided_slice %39 {offsets = [32, 0], sizes = [8, 128], strides = [1, 1]} : vector<48x128xf32> to vector<8x128xf32>
    %364 = vector.extract_strided_slice %40 {offsets = [32, 0], sizes = [8, 128], strides = [1, 1]} : vector<48x128xf32> to vector<8x128xf32>
    %365 = vector.extract_strided_slice %41 {offsets = [32, 0], sizes = [8, 128], strides = [1, 1]} : vector<48x128xf32> to vector<8x128xf32>
    %366 = vector.extract_strided_slice %363 {offsets = [0, 0], sizes = [8, 8], strides = [1, 1]} : vector<8x128xf32> to vector<8x8xf32>
    %367 = vector.extract_strided_slice %364 {offsets = [0, 0], sizes = [8, 8], strides = [1, 1]} : vector<8x128xf32> to vector<8x8xf32>
    %368 = vector.extract_strided_slice %365 {offsets = [0, 0], sizes = [8, 8], strides = [1, 1]} : vector<8x128xf32> to vector<8x8xf32>
    %cst_136 = arith.constant dense<0.000000e+00> : vector<8x8xf32>
    %369 = tpu.matmul %366, %367, %cst_136 {dimension_numbers = #tpu.dot_dimension_numbers<[1], [1], [0], [0], [0, 0, 1, 0], [], []>} : vector<8x8xf32>, vector<8x8xf32>, vector<8x8xf32> -> vector<8x8xf32>
    %cst_137 = arith.constant 0.353553385 : f32
    %370 = vector.broadcast %cst_137 : f32 to vector<8x8xf32>
    %371 = arith.mulf %369, %370 : vector<8x8xf32>
    %372 = vector.broadcast %362 : vector<1x8xf32> to vector<8x8xf32>
    %373 = arith.addf %371, %372 : vector<8x8xf32>
    %cst_138 = arith.constant dense<0xFF800000> : vector<8xf32>
    %374 = vector.multi_reduction <maximumf>, %373, %cst_138 [1] : vector<8x8xf32> to vector<8xf32>
    %375 = vector.shape_cast %374 : vector<8xf32> to vector<8x1xf32>
    %376 = vector.broadcast %375 : vector<8x1xf32> to vector<8x8xf32>
    %377 = arith.subf %373, %376 : vector<8x8xf32>
    %378 = math.exp %377 : vector<8x8xf32>
    %cst_139 = arith.constant dense<0.000000e+00> : vector<8xf32>
    %379 = vector.multi_reduction <add>, %378, %cst_139 [1] : vector<8x8xf32> to vector<8xf32>
    %380 = vector.shape_cast %379 : vector<8xf32> to vector<8x1xf32>
    %381 = vector.broadcast %380 : vector<8x1xf32> to vector<8x8xf32>
    %382 = arith.divf %378, %381 : vector<8x8xf32>
    %cst_140 = arith.constant dense<0.000000e+00> : vector<8x8xf32>
    %383 = tpu.matmul %382, %368, %cst_140 {dimension_numbers = #tpu.dot_dimension_numbers<[1], [0], [0], [1], [0, 0, 1, 1], [], []>} : vector<8x8xf32>, vector<8x8xf32>, vector<8x8xf32> -> vector<8x8xf32>
    %c32 = arith.constant 32 : index
    %c0_141 = arith.constant 0 : index
    %384 = vector.load %arg20[%c32, %c0_141] : memref<48x128xf32, #tpu.memory_space<vmem>>, vector<8x8xf32>
    tpu.vector_store %arg20[%c32, %c0_141], %383 {strides = array<i32>} : memref<48x128xf32, #tpu.memory_space<vmem>>, vector<8x8xf32>,
    %385 = vector.extract_strided_slice %363 {offsets = [0, 8], sizes = [8, 8], strides = [1, 1]} : vector<8x128xf32> to vector<8x8xf32>
    %386 = vector.extract_strided_slice %364 {offsets = [0, 8], sizes = [8, 8], strides = [1, 1]} : vector<8x128xf32> to vector<8x8xf32>
    %387 = vector.extract_strided_slice %365 {offsets = [0, 8], sizes = [8, 8], strides = [1, 1]} : vector<8x128xf32> to vector<8x8xf32>
    %cst_142 = arith.constant dense<0.000000e+00> : vector<8x8xf32>
    %388 = tpu.matmul %385, %386, %cst_142 {dimension_numbers = #tpu.dot_dimension_numbers<[1], [1], [0], [0], [0, 0, 1, 0], [], []>} : vector<8x8xf32>, vector<8x8xf32>, vector<8x8xf32> -> vector<8x8xf32>
    %cst_143 = arith.constant 0.353553385 : f32
    %389 = vector.broadcast %cst_143 : f32 to vector<8x8xf32>
    %390 = arith.mulf %388, %389 : vector<8x8xf32>
    %391 = vector.broadcast %362 : vector<1x8xf32> to vector<8x8xf32>
    %392 = arith.addf %390, %391 : vector<8x8xf32>
    %cst_144 = arith.constant dense<0xFF800000> : vector<8xf32>
    %393 = vector.multi_reduction <maximumf>, %392, %cst_144 [1] : vector<8x8xf32> to vector<8xf32>
    %394 = vector.shape_cast %393 : vector<8xf32> to vector<8x1xf32>
    %395 = vector.broadcast %394 : vector<8x1xf32> to vector<8x8xf32>
    %396 = arith.subf %392, %395 : vector<8x8xf32>
    %397 = math.exp %396 : vector<8x8xf32>
    %cst_145 = arith.constant dense<0.000000e+00> : vector<8xf32>
    %398 = vector.multi_reduction <add>, %397, %cst_145 [1] : vector<8x8xf32> to vector<8xf32>
    %399 = vector.shape_cast %398 : vector<8xf32> to vector<8x1xf32>
    %400 = vector.broadcast %399 : vector<8x1xf32> to vector<8x8xf32>
    %401 = arith.divf %397, %400 : vector<8x8xf32>
    %cst_146 = arith.constant dense<0.000000e+00> : vector<8x8xf32>
    %402 = tpu.matmul %401, %387, %cst_146 {dimension_numbers = #tpu.dot_dimension_numbers<[1], [0], [0], [1], [0, 0, 1, 1], [], []>} : vector<8x8xf32>, vector<8x8xf32>, vector<8x8xf32> -> vector<8x8xf32>
    %c32_147 = arith.constant 32 : index
    %c8_148 = arith.constant 8 : index
    %403 = vector.load %arg20[%c32_147, %c8_148] : memref<48x128xf32, #tpu.memory_space<vmem>>, vector<8x8xf32>
    tpu.vector_store %arg20[%c32_147, %c8_148], %402 {strides = array<i32>} : memref<48x128xf32, #tpu.memory_space<vmem>>, vector<8x8xf32>,
    %404 = vector.extract_strided_slice %363 {offsets = [0, 16], sizes = [8, 8], strides = [1, 1]} : vector<8x128xf32> to vector<8x8xf32>
    %405 = vector.extract_strided_slice %364 {offsets = [0, 16], sizes = [8, 8], strides = [1, 1]} : vector<8x128xf32> to vector<8x8xf32>
    %406 = vector.extract_strided_slice %365 {offsets = [0, 16], sizes = [8, 8], strides = [1, 1]} : vector<8x128xf32> to vector<8x8xf32>
    %cst_149 = arith.constant dense<0.000000e+00> : vector<8x8xf32>
    %407 = tpu.matmul %404, %405, %cst_149 {dimension_numbers = #tpu.dot_dimension_numbers<[1], [1], [0], [0], [0, 0, 1, 0], [], []>} : vector<8x8xf32>, vector<8x8xf32>, vector<8x8xf32> -> vector<8x8xf32>
    %cst_150 = arith.constant 0.353553385 : f32
    %408 = vector.broadcast %cst_150 : f32 to vector<8x8xf32>
    %409 = arith.mulf %407, %408 : vector<8x8xf32>
    %410 = vector.broadcast %362 : vector<1x8xf32> to vector<8x8xf32>
    %411 = arith.addf %409, %410 : vector<8x8xf32>
    %cst_151 = arith.constant dense<0xFF800000> : vector<8xf32>
    %412 = vector.multi_reduction <maximumf>, %411, %cst_151 [1] : vector<8x8xf32> to vector<8xf32>
    %413 = vector.shape_cast %412 : vector<8xf32> to vector<8x1xf32>
    %414 = vector.broadcast %413 : vector<8x1xf32> to vector<8x8xf32>
    %415 = arith.subf %411, %414 : vector<8x8xf32>
    %416 = math.exp %415 : vector<8x8xf32>
    %cst_152 = arith.constant dense<0.000000e+00> : vector<8xf32>
    %417 = vector.multi_reduction <add>, %416, %cst_152 [1] : vector<8x8xf32> to vector<8xf32>
    %418 = vector.shape_cast %417 : vector<8xf32> to vector<8x1xf32>
    %419 = vector.broadcast %418 : vector<8x1xf32> to vector<8x8xf32>
    %420 = arith.divf %416, %419 : vector<8x8xf32>
    %cst_153 = arith.constant dense<0.000000e+00> : vector<8x8xf32>
    %421 = tpu.matmul %420, %406, %cst_153 {dimension_numbers = #tpu.dot_dimension_numbers<[1], [0], [0], [1], [0, 0, 1, 1], [], []>} : vector<8x8xf32>, vector<8x8xf32>, vector<8x8xf32> -> vector<8x8xf32>
    %c32_154 = arith.constant 32 : index
    %c16_155 = arith.constant 16 : index
    %422 = vector.load %arg20[%c32_154, %c16_155] : memref<48x128xf32, #tpu.memory_space<vmem>>, vector<8x8xf32>
    tpu.vector_store %arg20[%c32_154, %c16_155], %421 {strides = array<i32>} : memref<48x128xf32, #tpu.memory_space<vmem>>, vector<8x8xf32>,
    %423 = vector.extract_strided_slice %363 {offsets = [0, 24], sizes = [8, 8], strides = [1, 1]} : vector<8x128xf32> to vector<8x8xf32>
    %424 = vector.extract_strided_slice %364 {offsets = [0, 24], sizes = [8, 8], strides = [1, 1]} : vector<8x128xf32> to vector<8x8xf32>
    %425 = vector.extract_strided_slice %365 {offsets = [0, 24], sizes = [8, 8], strides = [1, 1]} : vector<8x128xf32> to vector<8x8xf32>
    %cst_156 = arith.constant dense<0.000000e+00> : vector<8x8xf32>
    %426 = tpu.matmul %423, %424, %cst_156 {dimension_numbers = #tpu.dot_dimension_numbers<[1], [1], [0], [0], [0, 0, 1, 0], [], []>} : vector<8x8xf32>, vector<8x8xf32>, vector<8x8xf32> -> vector<8x8xf32>
    %cst_157 = arith.constant 0.353553385 : f32
    %427 = vector.broadcast %cst_157 : f32 to vector<8x8xf32>
    %428 = arith.mulf %426, %427 : vector<8x8xf32>
    %429 = vector.broadcast %362 : vector<1x8xf32> to vector<8x8xf32>
    %430 = arith.addf %428, %429 : vector<8x8xf32>
    %cst_158 = arith.constant dense<0xFF800000> : vector<8xf32>
    %431 = vector.multi_reduction <maximumf>, %430, %cst_158 [1] : vector<8x8xf32> to vector<8xf32>
    %432 = vector.shape_cast %431 : vector<8xf32> to vector<8x1xf32>
    %433 = vector.broadcast %432 : vector<8x1xf32> to vector<8x8xf32>
    %434 = arith.subf %430, %433 : vector<8x8xf32>
    %435 = math.exp %434 : vector<8x8xf32>
    %cst_159 = arith.constant dense<0.000000e+00> : vector<8xf32>
    %436 = vector.multi_reduction <add>, %435, %cst_159 [1] : vector<8x8xf32> to vector<8xf32>
    %437 = vector.shape_cast %436 : vector<8xf32> to vector<8x1xf32>
    %438 = vector.broadcast %437 : vector<8x1xf32> to vector<8x8xf32>
    %439 = arith.divf %435, %438 : vector<8x8xf32>
    %cst_160 = arith.constant dense<0.000000e+00> : vector<8x8xf32>
    %440 = tpu.matmul %439, %425, %cst_160 {dimension_numbers = #tpu.dot_dimension_numbers<[1], [0], [0], [1], [0, 0, 1, 1], [], []>} : vector<8x8xf32>, vector<8x8xf32>, vector<8x8xf32> -> vector<8x8xf32>
    %c32_161 = arith.constant 32 : index
    %c24_162 = arith.constant 24 : index
    %441 = vector.load %arg20[%c32_161, %c24_162] : memref<48x128xf32, #tpu.memory_space<vmem>>, vector<8x8xf32>
    tpu.vector_store %arg20[%c32_161, %c24_162], %440 {strides = array<i32>} : memref<48x128xf32, #tpu.memory_space<vmem>>, vector<8x8xf32>,
    %442 = vector.extract_strided_slice %31 {offsets = [5, 0], sizes = [1, 8], strides = [1, 1]} : vector<6x8xf32> to vector<1x8xf32>
    %443 = vector.extract_strided_slice %39 {offsets = [40, 0], sizes = [8, 128], strides = [1, 1]} : vector<48x128xf32> to vector<8x128xf32>
    %444 = vector.extract_strided_slice %40 {offsets = [40, 0], sizes = [8, 128], strides = [1, 1]} : vector<48x128xf32> to vector<8x128xf32>
    %445 = vector.extract_strided_slice %41 {offsets = [40, 0], sizes = [8, 128], strides = [1, 1]} : vector<48x128xf32> to vector<8x128xf32>
    %446 = vector.extract_strided_slice %443 {offsets = [0, 0], sizes = [8, 8], strides = [1, 1]} : vector<8x128xf32> to vector<8x8xf32>
    %447 = vector.extract_strided_slice %444 {offsets = [0, 0], sizes = [8, 8], strides = [1, 1]} : vector<8x128xf32> to vector<8x8xf32>
    %448 = vector.extract_strided_slice %445 {offsets = [0, 0], sizes = [8, 8], strides = [1, 1]} : vector<8x128xf32> to vector<8x8xf32>
    %cst_163 = arith.constant dense<0.000000e+00> : vector<8x8xf32>
    %449 = tpu.matmul %446, %447, %cst_163 {dimension_numbers = #tpu.dot_dimension_numbers<[1], [1], [0], [0], [0, 0, 1, 0], [], []>} : vector<8x8xf32>, vector<8x8xf32>, vector<8x8xf32> -> vector<8x8xf32>
    %cst_164 = arith.constant 0.353553385 : f32
    %450 = vector.broadcast %cst_164 : f32 to vector<8x8xf32>
    %451 = arith.mulf %449, %450 : vector<8x8xf32>
    %452 = vector.broadcast %442 : vector<1x8xf32> to vector<8x8xf32>
    %453 = arith.addf %451, %452 : vector<8x8xf32>
    %cst_165 = arith.constant dense<0xFF800000> : vector<8xf32>
    %454 = vector.multi_reduction <maximumf>, %453, %cst_165 [1] : vector<8x8xf32> to vector<8xf32>
    %455 = vector.shape_cast %454 : vector<8xf32> to vector<8x1xf32>
    %456 = vector.broadcast %455 : vector<8x1xf32> to vector<8x8xf32>
    %457 = arith.subf %453, %456 : vector<8x8xf32>
    %458 = math.exp %457 : vector<8x8xf32>
    %cst_166 = arith.constant dense<0.000000e+00> : vector<8xf32>
    %459 = vector.multi_reduction <add>, %458, %cst_166 [1] : vector<8x8xf32> to vector<8xf32>
    %460 = vector.shape_cast %459 : vector<8xf32> to vector<8x1xf32>
    %461 = vector.broadcast %460 : vector<8x1xf32> to vector<8x8xf32>
    %462 = arith.divf %458, %461 : vector<8x8xf32>
    %cst_167 = arith.constant dense<0.000000e+00> : vector<8x8xf32>
    %463 = tpu.matmul %462, %448, %cst_167 {dimension_numbers = #tpu.dot_dimension_numbers<[1], [0], [0], [1], [0, 0, 1, 1], [], []>} : vector<8x8xf32>, vector<8x8xf32>, vector<8x8xf32> -> vector<8x8xf32>
    %c40 = arith.constant 40 : index
    %c0_168 = arith.constant 0 : index
    %464 = vector.load %arg20[%c40, %c0_168] : memref<48x128xf32, #tpu.memory_space<vmem>>, vector<8x8xf32>
    tpu.vector_store %arg20[%c40, %c0_168], %463 {strides = array<i32>} : memref<48x128xf32, #tpu.memory_space<vmem>>, vector<8x8xf32>,
    %465 = vector.extract_strided_slice %443 {offsets = [0, 8], sizes = [8, 8], strides = [1, 1]} : vector<8x128xf32> to vector<8x8xf32>
    %466 = vector.extract_strided_slice %444 {offsets = [0, 8], sizes = [8, 8], strides = [1, 1]} : vector<8x128xf32> to vector<8x8xf32>
    %467 = vector.extract_strided_slice %445 {offsets = [0, 8], sizes = [8, 8], strides = [1, 1]} : vector<8x128xf32> to vector<8x8xf32>
    %cst_169 = arith.constant dense<0.000000e+00> : vector<8x8xf32>
    %468 = tpu.matmul %465, %466, %cst_169 {dimension_numbers = #tpu.dot_dimension_numbers<[1], [1], [0], [0], [0, 0, 1, 0], [], []>} : vector<8x8xf32>, vector<8x8xf32>, vector<8x8xf32> -> vector<8x8xf32>
    %cst_170 = arith.constant 0.353553385 : f32
    %469 = vector.broadcast %cst_170 : f32 to vector<8x8xf32>
    %470 = arith.mulf %468, %469 : vector<8x8xf32>
    %471 = vector.broadcast %442 : vector<1x8xf32> to vector<8x8xf32>
    %472 = arith.addf %470, %471 : vector<8x8xf32>
    %cst_171 = arith.constant dense<0xFF800000> : vector<8xf32>
    %473 = vector.multi_reduction <maximumf>, %472, %cst_171 [1] : vector<8x8xf32> to vector<8xf32>
    %474 = vector.shape_cast %473 : vector<8xf32> to vector<8x1xf32>
    %475 = vector.broadcast %474 : vector<8x1xf32> to vector<8x8xf32>
    %476 = arith.subf %472, %475 : vector<8x8xf32>
    %477 = math.exp %476 : vector<8x8xf32>
    %cst_172 = arith.constant dense<0.000000e+00> : vector<8xf32>
    %478 = vector.multi_reduction <add>, %477, %cst_172 [1] : vector<8x8xf32> to vector<8xf32>
    %479 = vector.shape_cast %478 : vector<8xf32> to vector<8x1xf32>
    %480 = vector.broadcast %479 : vector<8x1xf32> to vector<8x8xf32>
    %481 = arith.divf %477, %480 : vector<8x8xf32>
    %cst_173 = arith.constant dense<0.000000e+00> : vector<8x8xf32>
    %482 = tpu.matmul %481, %467, %cst_173 {dimension_numbers = #tpu.dot_dimension_numbers<[1], [0], [0], [1], [0, 0, 1, 1], [], []>} : vector<8x8xf32>, vector<8x8xf32>, vector<8x8xf32> -> vector<8x8xf32>
    %c40_174 = arith.constant 40 : index
    %c8_175 = arith.constant 8 : index
    %483 = vector.load %arg20[%c40_174, %c8_175] : memref<48x128xf32, #tpu.memory_space<vmem>>, vector<8x8xf32>
    tpu.vector_store %arg20[%c40_174, %c8_175], %482 {strides = array<i32>} : memref<48x128xf32, #tpu.memory_space<vmem>>, vector<8x8xf32>,
    %484 = vector.extract_strided_slice %443 {offsets = [0, 16], sizes = [8, 8], strides = [1, 1]} : vector<8x128xf32> to vector<8x8xf32>
    %485 = vector.extract_strided_slice %444 {offsets = [0, 16], sizes = [8, 8], strides = [1, 1]} : vector<8x128xf32> to vector<8x8xf32>
    %486 = vector.extract_strided_slice %445 {offsets = [0, 16], sizes = [8, 8], strides = [1, 1]} : vector<8x128xf32> to vector<8x8xf32>
    %cst_176 = arith.constant dense<0.000000e+00> : vector<8x8xf32>
    %487 = tpu.matmul %484, %485, %cst_176 {dimension_numbers = #tpu.dot_dimension_numbers<[1], [1], [0], [0], [0, 0, 1, 0], [], []>} : vector<8x8xf32>, vector<8x8xf32>, vector<8x8xf32> -> vector<8x8xf32>
    %cst_177 = arith.constant 0.353553385 : f32
    %488 = vector.broadcast %cst_177 : f32 to vector<8x8xf32>
    %489 = arith.mulf %487, %488 : vector<8x8xf32>
    %490 = vector.broadcast %442 : vector<1x8xf32> to vector<8x8xf32>
    %491 = arith.addf %489, %490 : vector<8x8xf32>
    %cst_178 = arith.constant dense<0xFF800000> : vector<8xf32>
    %492 = vector.multi_reduction <maximumf>, %491, %cst_178 [1] : vector<8x8xf32> to vector<8xf32>
    %493 = vector.shape_cast %492 : vector<8xf32> to vector<8x1xf32>
    %494 = vector.broadcast %493 : vector<8x1xf32> to vector<8x8xf32>
    %495 = arith.subf %491, %494 : vector<8x8xf32>
    %496 = math.exp %495 : vector<8x8xf32>
    %cst_179 = arith.constant dense<0.000000e+00> : vector<8xf32>
    %497 = vector.multi_reduction <add>, %496, %cst_179 [1] : vector<8x8xf32> to vector<8xf32>
    %498 = vector.shape_cast %497 : vector<8xf32> to vector<8x1xf32>
    %499 = vector.broadcast %498 : vector<8x1xf32> to vector<8x8xf32>
    %500 = arith.divf %496, %499 : vector<8x8xf32>
    %cst_180 = arith.constant dense<0.000000e+00> : vector<8x8xf32>
    %501 = tpu.matmul %500, %486, %cst_180 {dimension_numbers = #tpu.dot_dimension_numbers<[1], [0], [0], [1], [0, 0, 1, 1], [], []>} : vector<8x8xf32>, vector<8x8xf32>, vector<8x8xf32> -> vector<8x8xf32>
    %c40_181 = arith.constant 40 : index
    %c16_182 = arith.constant 16 : index
    %502 = vector.load %arg20[%c40_181, %c16_182] : memref<48x128xf32, #tpu.memory_space<vmem>>, vector<8x8xf32>
    tpu.vector_store %arg20[%c40_181, %c16_182], %501 {strides = array<i32>} : memref<48x128xf32, #tpu.memory_space<vmem>>, vector<8x8xf32>,
    %503 = vector.extract_strided_slice %443 {offsets = [0, 24], sizes = [8, 8], strides = [1, 1]} : vector<8x128xf32> to vector<8x8xf32>
    %504 = vector.extract_strided_slice %444 {offsets = [0, 24], sizes = [8, 8], strides = [1, 1]} : vector<8x128xf32> to vector<8x8xf32>
    %505 = vector.extract_strided_slice %445 {offsets = [0, 24], sizes = [8, 8], strides = [1, 1]} : vector<8x128xf32> to vector<8x8xf32>
    %cst_183 = arith.constant dense<0.000000e+00> : vector<8x8xf32>
    %506 = tpu.matmul %503, %504, %cst_183 {dimension_numbers = #tpu.dot_dimension_numbers<[1], [1], [0], [0], [0, 0, 1, 0], [], []>} : vector<8x8xf32>, vector<8x8xf32>, vector<8x8xf32> -> vector<8x8xf32>
    %cst_184 = arith.constant 0.353553385 : f32
    %507 = vector.broadcast %cst_184 : f32 to vector<8x8xf32>
    %508 = arith.mulf %506, %507 : vector<8x8xf32>
    %509 = vector.broadcast %442 : vector<1x8xf32> to vector<8x8xf32>
    %510 = arith.addf %508, %509 : vector<8x8xf32>
    %cst_185 = arith.constant dense<0xFF800000> : vector<8xf32>
    %511 = vector.multi_reduction <maximumf>, %510, %cst_185 [1] : vector<8x8xf32> to vector<8xf32>
    %512 = vector.shape_cast %511 : vector<8xf32> to vector<8x1xf32>
    %513 = vector.broadcast %512 : vector<8x1xf32> to vector<8x8xf32>
    %514 = arith.subf %510, %513 : vector<8x8xf32>
    %515 = math.exp %514 : vector<8x8xf32>
    %cst_186 = arith.constant dense<0.000000e+00> : vector<8xf32>
    %516 = vector.multi_reduction <add>, %515, %cst_186 [1] : vector<8x8xf32> to vector<8xf32>
    %517 = vector.shape_cast %516 : vector<8xf32> to vector<8x1xf32>
    %518 = vector.broadcast %517 : vector<8x1xf32> to vector<8x8xf32>
    %519 = arith.divf %515, %518 : vector<8x8xf32>
    %cst_187 = arith.constant dense<0.000000e+00> : vector<8x8xf32>
    %520 = tpu.matmul %519, %505, %cst_187 {dimension_numbers = #tpu.dot_dimension_numbers<[1], [0], [0], [1], [0, 0, 1, 1], [], []>} : vector<8x8xf32>, vector<8x8xf32>, vector<8x8xf32> -> vector<8x8xf32>
    %c40_188 = arith.constant 40 : index
    %c24_189 = arith.constant 24 : index
    %521 = vector.load %arg20[%c40_188, %c24_189] : memref<48x128xf32, #tpu.memory_space<vmem>>, vector<8x8xf32>
    tpu.vector_store %arg20[%c40_188, %c24_189], %520 {strides = array<i32>} : memref<48x128xf32, #tpu.memory_space<vmem>>, vector<8x8xf32>,
    %c0_190 = arith.constant 0 : index
    %c0_191 = arith.constant 0 : index
    %522 = vector.load %arg20[%c0_190, %c0_191] : memref<48x128xf32, #tpu.memory_space<vmem>>, vector<48x128xf32>
    %c0_192 = arith.constant 0 : index
    %c0_193 = arith.constant 0 : index
    %c0_194 = arith.constant 0 : index
    %c0_195 = arith.constant 0 : index
    %523 = vector.load %arg7[%c0_192, %c0_193, %c0_194, %c0_195] : memref<1x2x128x128xf32, #tpu.memory_space<vmem>>, vector<1x1x128x128xf32>
    %524 = vector.shape_cast %523 : vector<1x1x128x128xf32> to vector<128x128xf32>
    %cst_196 = arith.constant dense<0.000000e+00> : vector<48x128xf32>
    %525 = tpu.matmul %522, %524, %cst_196 {dimension_numbers = #tpu.dot_dimension_numbers<[1], [0], [0], [1], [0, 0, 1, 1], [], []>} : vector<48x128xf32>, vector<128x128xf32>, vector<48x128xf32> -> vector<48x128xf32>
    %c0_197 = arith.constant 0 : index
    %c0_198 = arith.constant 0 : index
    %c0_199 = arith.constant 0 : index
    %c0_200 = arith.constant 0 : index
    %526 = vector.load %arg8[%c0_197, %c0_198, %c0_199, %c0_200] : memref<1x2x1x128xf32, #tpu.memory_space<vmem>>, vector<1x1x1x128xf32>
    %527 = vector.shape_cast %526 : vector<1x1x1x128xf32> to vector<1x128xf32>
    %528 = vector.broadcast %527 : vector<1x128xf32> to vector<48x128xf32>
    %529 = arith.addf %525, %528 : vector<48x128xf32>
    %530 = arith.addf %529, %29 : vector<48x128xf32>
    %c0_201 = arith.constant 0 : index
    %c0_202 = arith.constant 0 : index
    %c0_203 = arith.constant 0 : index
    %c0_204 = arith.constant 0 : index
    %531 = vector.load %arg9[%c0_201, %c0_202, %c0_203, %c0_204] : memref<1x2x1x128xf32, #tpu.memory_space<vmem>>, vector<1x1x1x128xf32>
    %532 = vector.shape_cast %531 : vector<1x1x1x128xf32> to vector<1x128xf32>
    %c0_205 = arith.constant 0 : index
    %c0_206 = arith.constant 0 : index
    %c0_207 = arith.constant 0 : index
    %c0_208 = arith.constant 0 : index
    %533 = vector.load %arg10[%c0_205, %c0_206, %c0_207, %c0_208] : memref<1x2x1x128xf32, #tpu.memory_space<vmem>>, vector<1x1x1x128xf32>
    %534 = vector.shape_cast %533 : vector<1x1x1x128xf32> to vector<1x128xf32>
    %cst_209 = arith.constant dense<0.000000e+00> : vector<48xf32>
    %535 = vector.multi_reduction <add>, %530, %cst_209 [1] : vector<48x128xf32> to vector<48xf32>
    %536 = vector.shape_cast %535 : vector<48xf32> to vector<48x1xf32>
    %cst_210 = arith.constant 3.125000e-02 : f32
    %537 = vector.broadcast %cst_210 : f32 to vector<48x1xf32>
    %538 = arith.mulf %536, %537 : vector<48x1xf32>
    %539 = arith.mulf %530, %530 : vector<48x128xf32>
    %cst_211 = arith.constant dense<0.000000e+00> : vector<48xf32>
    %540 = vector.multi_reduction <add>, %539, %cst_211 [1] : vector<48x128xf32> to vector<48xf32>
    %541 = vector.shape_cast %540 : vector<48xf32> to vector<48x1xf32>
    %cst_212 = arith.constant 3.125000e-02 : f32
    %542 = vector.broadcast %cst_212 : f32 to vector<48x1xf32>
    %543 = arith.mulf %541, %542 : vector<48x1xf32>
    %544 = arith.mulf %538, %538 : vector<48x1xf32>
    %545 = arith.subf %543, %544 : vector<48x1xf32>
    %546 = vector.broadcast %538 : vector<48x1xf32> to vector<48x128xf32>
    %547 = arith.subf %530, %546 : vector<48x128xf32>
    %cst_213 = arith.constant 9.99999996E-13 : f32
    %548 = vector.broadcast %cst_213 : f32 to vector<48x1xf32>
    %549 = arith.addf %545, %548 : vector<48x1xf32>
    %550 = math.rsqrt %549 : vector<48x1xf32>
    %551 = vector.broadcast %550 : vector<48x1xf32> to vector<48x128xf32>
    %552 = arith.mulf %547, %551 : vector<48x128xf32>
    %553 = vector.broadcast %532 : vector<1x128xf32> to vector<48x128xf32>
    %554 = arith.mulf %552, %553 : vector<48x128xf32>
    %555 = vector.broadcast %534 : vector<1x128xf32> to vector<48x128xf32>
    %556 = arith.addf %554, %555 : vector<48x128xf32>
    %c0_214 = arith.constant 0 : index
    %c0_215 = arith.constant 0 : index
    %c0_216 = arith.constant 0 : index
    %c0_217 = arith.constant 0 : index
    %557 = vector.load %arg11[%c0_214, %c0_215, %c0_216, %c0_217] : memref<1x2x128x128xf32, #tpu.memory_space<vmem>>, vector<1x1x128x128xf32>
    %558 = vector.shape_cast %557 : vector<1x1x128x128xf32> to vector<128x128xf32>
    %cst_218 = arith.constant dense<0.000000e+00> : vector<48x128xf32>
    %559 = tpu.matmul %556, %558, %cst_218 {dimension_numbers = #tpu.dot_dimension_numbers<[1], [0], [0], [1], [0, 0, 1, 1], [], []>} : vector<48x128xf32>, vector<128x128xf32>, vector<48x128xf32> -> vector<48x128xf32>
    %c0_219 = arith.constant 0 : index
    %c0_220 = arith.constant 0 : index
    %c0_221 = arith.constant 0 : index
    %c0_222 = arith.constant 0 : index
    %560 = vector.load %arg12[%c0_219, %c0_220, %c0_221, %c0_222] : memref<1x2x1x128xf32, #tpu.memory_space<vmem>>, vector<1x1x1x128xf32>
    %561 = vector.shape_cast %560 : vector<1x1x1x128xf32> to vector<1x128xf32>
    %562 = vector.broadcast %561 : vector<1x128xf32> to vector<48x128xf32>
    %563 = arith.addf %559, %562 : vector<48x128xf32>
    %cst_223 = arith.constant 5.000000e-01 : f32
    %564 = vector.broadcast %cst_223 : f32 to vector<48x128xf32>
    %565 = arith.mulf %564, %563 : vector<48x128xf32>
    %cst_224 = arith.constant 4.471500e-02 : f32
    %566 = vector.broadcast %cst_224 : f32 to vector<48x128xf32>
    %567 = arith.mulf %566, %563 : vector<48x128xf32>
    %568 = arith.mulf %567, %563 : vector<48x128xf32>
    %569 = arith.mulf %568, %563 : vector<48x128xf32>
    %570 = arith.addf %563, %569 : vector<48x128xf32>
    %cst_225 = arith.constant 0.797884583 : f32
    %571 = vector.broadcast %cst_225 : f32 to vector<48x128xf32>
    %572 = arith.mulf %571, %570 : vector<48x128xf32>
    %573 = math.tanh %572 : vector<48x128xf32>
    %cst_226 = arith.constant 1.000000e+00 : f32
    %574 = vector.broadcast %cst_226 : f32 to vector<48x128xf32>
    %575 = arith.addf %574, %573 : vector<48x128xf32>
    %576 = arith.mulf %565, %575 : vector<48x128xf32>
    %c0_227 = arith.constant 0 : index
    %c0_228 = arith.constant 0 : index
    %c0_229 = arith.constant 0 : index
    %c0_230 = arith.constant 0 : index
    %577 = vector.load %arg13[%c0_227, %c0_228, %c0_229, %c0_230] : memref<1x2x128x128xf32, #tpu.memory_space<vmem>>, vector<1x1x128x128xf32>
    %578 = vector.shape_cast %577 : vector<1x1x128x128xf32> to vector<128x128xf32>
    %cst_231 = arith.constant dense<0.000000e+00> : vector<48x128xf32>
    %579 = tpu.matmul %576, %578, %cst_231 {dimension_numbers = #tpu.dot_dimension_numbers<[1], [0], [0], [1], [0, 0, 1, 1], [], []>} : vector<48x128xf32>, vector<128x128xf32>, vector<48x128xf32> -> vector<48x128xf32>
    %c0_232 = arith.constant 0 : index
    %c0_233 = arith.constant 0 : index
    %c0_234 = arith.constant 0 : index
    %c0_235 = arith.constant 0 : index
    %580 = vector.load %arg14[%c0_232, %c0_233, %c0_234, %c0_235] : memref<1x2x1x128xf32, #tpu.memory_space<vmem>>, vector<1x1x1x128xf32>
    %581 = vector.shape_cast %580 : vector<1x1x1x128xf32> to vector<1x128xf32>
    %582 = vector.broadcast %581 : vector<1x128xf32> to vector<48x128xf32>
    %583 = arith.addf %579, %582 : vector<48x128xf32>
    %584 = arith.addf %583, %556 : vector<48x128xf32>
    %c0_236 = arith.constant 0 : index
    %c0_237 = arith.constant 0 : index
    %c0_238 = arith.constant 0 : index
    %c0_239 = arith.constant 0 : index
    %585 = vector.load %arg15[%c0_236, %c0_237, %c0_238, %c0_239] : memref<1x2x1x128xf32, #tpu.memory_space<vmem>>, vector<1x1x1x128xf32>
    %586 = vector.shape_cast %585 : vector<1x1x1x128xf32> to vector<1x128xf32>
    %c0_240 = arith.constant 0 : index
    %c0_241 = arith.constant 0 : index
    %c0_242 = arith.constant 0 : index
    %c0_243 = arith.constant 0 : index
    %587 = vector.load %arg16[%c0_240, %c0_241, %c0_242, %c0_243] : memref<1x2x1x128xf32, #tpu.memory_space<vmem>>, vector<1x1x1x128xf32>
    %588 = vector.shape_cast %587 : vector<1x1x1x128xf32> to vector<1x128xf32>
    %cst_244 = arith.constant dense<0.000000e+00> : vector<48xf32>
    %589 = vector.multi_reduction <add>, %584, %cst_244 [1] : vector<48x128xf32> to vector<48xf32>
    %590 = vector.shape_cast %589 : vector<48xf32> to vector<48x1xf32>
    %cst_245 = arith.constant 3.125000e-02 : f32
    %591 = vector.broadcast %cst_245 : f32 to vector<48x1xf32>
    %592 = arith.mulf %590, %591 : vector<48x1xf32>
    %593 = arith.mulf %584, %584 : vector<48x128xf32>
    %cst_246 = arith.constant dense<0.000000e+00> : vector<48xf32>
    %594 = vector.multi_reduction <add>, %593, %cst_246 [1] : vector<48x128xf32> to vector<48xf32>
    %595 = vector.shape_cast %594 : vector<48xf32> to vector<48x1xf32>
    %cst_247 = arith.constant 3.125000e-02 : f32
    %596 = vector.broadcast %cst_247 : f32 to vector<48x1xf32>
    %597 = arith.mulf %595, %596 : vector<48x1xf32>
    %598 = arith.mulf %592, %592 : vector<48x1xf32>
    %599 = arith.subf %597, %598 : vector<48x1xf32>
    %600 = vector.broadcast %592 : vector<48x1xf32> to vector<48x128xf32>
    %601 = arith.subf %584, %600 : vector<48x128xf32>
    %cst_248 = arith.constant 9.99999996E-13 : f32
    %602 = vector.broadcast %cst_248 : f32 to vector<48x1xf32>
    %603 = arith.addf %599, %602 : vector<48x1xf32>
    %604 = math.rsqrt %603 : vector<48x1xf32>
    %605 = vector.broadcast %604 : vector<48x1xf32> to vector<48x128xf32>
    %606 = arith.mulf %601, %605 : vector<48x128xf32>
    %607 = vector.broadcast %586 : vector<1x128xf32> to vector<48x128xf32>
    %608 = arith.mulf %606, %607 : vector<48x128xf32>
    %609 = vector.broadcast %588 : vector<1x128xf32> to vector<48x128xf32>
    %610 = arith.addf %608, %609 : vector<48x128xf32>
    %c0_249 = arith.constant 0 : index
    %c1 = arith.constant 1 : index
    %c0_250 = arith.constant 0 : index
    %c0_251 = arith.constant 0 : index
    %611 = vector.load %arg5[%c0_249, %c1, %c0_250, %c0_251] : memref<1x2x128x384xf32, #tpu.memory_space<vmem>>, vector<1x1x128x384xf32>
    %612 = vector.shape_cast %611 : vector<1x1x128x384xf32> to vector<128x384xf32>
    %cst_252 = arith.constant dense<0.000000e+00> : vector<48x384xf32>
    %613 = tpu.matmul %610, %612, %cst_252 {dimension_numbers = #tpu.dot_dimension_numbers<[1], [0], [0], [1], [0, 0, 1, 1], [], []>} : vector<48x128xf32>, vector<128x384xf32>, vector<48x384xf32> -> vector<48x384xf32>
    %c0_253 = arith.constant 0 : index
    %c1_254 = arith.constant 1 : index
    %c0_255 = arith.constant 0 : index
    %c0_256 = arith.constant 0 : index
    %614 = vector.load %arg6[%c0_253, %c1_254, %c0_255, %c0_256] : memref<1x2x1x384xf32, #tpu.memory_space<vmem>>, vector<1x1x1x384xf32>
    %615 = vector.shape_cast %614 : vector<1x1x1x384xf32> to vector<1x384xf32>
    %616 = vector.broadcast %615 : vector<1x384xf32> to vector<48x384xf32>
    %617 = arith.addf %613, %616 : vector<48x384xf32>
    %618 = vector.extract_strided_slice %617 {offsets = [0, 0], sizes = [48, 128], strides = [1, 1]} : vector<48x384xf32> to vector<48x128xf32>
    %619 = vector.extract_strided_slice %617 {offsets = [0, 128], sizes = [48, 128], strides = [1, 1]} : vector<48x384xf32> to vector<48x128xf32>
    %620 = vector.extract_strided_slice %617 {offsets = [0, 256], sizes = [48, 128], strides = [1, 1]} : vector<48x384xf32> to vector<48x128xf32>
    %621 = vector.extract_strided_slice %31 {offsets = [0, 0], sizes = [1, 8], strides = [1, 1]} : vector<6x8xf32> to vector<1x8xf32>
    %622 = vector.extract_strided_slice %618 {offsets = [0, 0], sizes = [8, 128], strides = [1, 1]} : vector<48x128xf32> to vector<8x128xf32>
    %623 = vector.extract_strided_slice %619 {offsets = [0, 0], sizes = [8, 128], strides = [1, 1]} : vector<48x128xf32> to vector<8x128xf32>
    %624 = vector.extract_strided_slice %620 {offsets = [0, 0], sizes = [8, 128], strides = [1, 1]} : vector<48x128xf32> to vector<8x128xf32>
    %625 = vector.extract_strided_slice %622 {offsets = [0, 0], sizes = [8, 8], strides = [1, 1]} : vector<8x128xf32> to vector<8x8xf32>
    %626 = vector.extract_strided_slice %623 {offsets = [0, 0], sizes = [8, 8], strides = [1, 1]} : vector<8x128xf32> to vector<8x8xf32>
    %627 = vector.extract_strided_slice %624 {offsets = [0, 0], sizes = [8, 8], strides = [1, 1]} : vector<8x128xf32> to vector<8x8xf32>
    %cst_257 = arith.constant dense<0.000000e+00> : vector<8x8xf32>
    %628 = tpu.matmul %625, %626, %cst_257 {dimension_numbers = #tpu.dot_dimension_numbers<[1], [1], [0], [0], [0, 0, 1, 0], [], []>} : vector<8x8xf32>, vector<8x8xf32>, vector<8x8xf32> -> vector<8x8xf32>
    %cst_258 = arith.constant 0.353553385 : f32
    %629 = vector.broadcast %cst_258 : f32 to vector<8x8xf32>
    %630 = arith.mulf %628, %629 : vector<8x8xf32>
    %631 = vector.broadcast %621 : vector<1x8xf32> to vector<8x8xf32>
    %632 = arith.addf %630, %631 : vector<8x8xf32>
    %cst_259 = arith.constant dense<0xFF800000> : vector<8xf32>
    %633 = vector.multi_reduction <maximumf>, %632, %cst_259 [1] : vector<8x8xf32> to vector<8xf32>
    %634 = vector.shape_cast %633 : vector<8xf32> to vector<8x1xf32>
    %635 = vector.broadcast %634 : vector<8x1xf32> to vector<8x8xf32>
    %636 = arith.subf %632, %635 : vector<8x8xf32>
    %637 = math.exp %636 : vector<8x8xf32>
    %cst_260 = arith.constant dense<0.000000e+00> : vector<8xf32>
    %638 = vector.multi_reduction <add>, %637, %cst_260 [1] : vector<8x8xf32> to vector<8xf32>
    %639 = vector.shape_cast %638 : vector<8xf32> to vector<8x1xf32>
    %640 = vector.broadcast %639 : vector<8x1xf32> to vector<8x8xf32>
    %641 = arith.divf %637, %640 : vector<8x8xf32>
    %cst_261 = arith.constant dense<0.000000e+00> : vector<8x8xf32>
    %642 = tpu.matmul %641, %627, %cst_261 {dimension_numbers = #tpu.dot_dimension_numbers<[1], [0], [0], [1], [0, 0, 1, 1], [], []>} : vector<8x8xf32>, vector<8x8xf32>, vector<8x8xf32> -> vector<8x8xf32>
    %c0_262 = arith.constant 0 : index
    %c0_263 = arith.constant 0 : index
    %643 = vector.load %arg20[%c0_262, %c0_263] : memref<48x128xf32, #tpu.memory_space<vmem>>, vector<8x8xf32>
    tpu.vector_store %arg20[%c0_262, %c0_263], %642 {strides = array<i32>} : memref<48x128xf32, #tpu.memory_space<vmem>>, vector<8x8xf32>,
    %644 = vector.extract_strided_slice %622 {offsets = [0, 8], sizes = [8, 8], strides = [1, 1]} : vector<8x128xf32> to vector<8x8xf32>
    %645 = vector.extract_strided_slice %623 {offsets = [0, 8], sizes = [8, 8], strides = [1, 1]} : vector<8x128xf32> to vector<8x8xf32>
    %646 = vector.extract_strided_slice %624 {offsets = [0, 8], sizes = [8, 8], strides = [1, 1]} : vector<8x128xf32> to vector<8x8xf32>
    %cst_264 = arith.constant dense<0.000000e+00> : vector<8x8xf32>
    %647 = tpu.matmul %644, %645, %cst_264 {dimension_numbers = #tpu.dot_dimension_numbers<[1], [1], [0], [0], [0, 0, 1, 0], [], []>} : vector<8x8xf32>, vector<8x8xf32>, vector<8x8xf32> -> vector<8x8xf32>
    %cst_265 = arith.constant 0.353553385 : f32
    %648 = vector.broadcast %cst_265 : f32 to vector<8x8xf32>
    %649 = arith.mulf %647, %648 : vector<8x8xf32>
    %650 = vector.broadcast %621 : vector<1x8xf32> to vector<8x8xf32>
    %651 = arith.addf %649, %650 : vector<8x8xf32>
    %cst_266 = arith.constant dense<0xFF800000> : vector<8xf32>
    %652 = vector.multi_reduction <maximumf>, %651, %cst_266 [1] : vector<8x8xf32> to vector<8xf32>
    %653 = vector.shape_cast %652 : vector<8xf32> to vector<8x1xf32>
    %654 = vector.broadcast %653 : vector<8x1xf32> to vector<8x8xf32>
    %655 = arith.subf %651, %654 : vector<8x8xf32>
    %656 = math.exp %655 : vector<8x8xf32>
    %cst_267 = arith.constant dense<0.000000e+00> : vector<8xf32>
    %657 = vector.multi_reduction <add>, %656, %cst_267 [1] : vector<8x8xf32> to vector<8xf32>
    %658 = vector.shape_cast %657 : vector<8xf32> to vector<8x1xf32>
    %659 = vector.broadcast %658 : vector<8x1xf32> to vector<8x8xf32>
    %660 = arith.divf %656, %659 : vector<8x8xf32>
    %cst_268 = arith.constant dense<0.000000e+00> : vector<8x8xf32>
    %661 = tpu.matmul %660, %646, %cst_268 {dimension_numbers = #tpu.dot_dimension_numbers<[1], [0], [0], [1], [0, 0, 1, 1], [], []>} : vector<8x8xf32>, vector<8x8xf32>, vector<8x8xf32> -> vector<8x8xf32>
    %c0_269 = arith.constant 0 : index
    %c8_270 = arith.constant 8 : index
    %662 = vector.load %arg20[%c0_269, %c8_270] : memref<48x128xf32, #tpu.memory_space<vmem>>, vector<8x8xf32>
    tpu.vector_store %arg20[%c0_269, %c8_270], %661 {strides = array<i32>} : memref<48x128xf32, #tpu.memory_space<vmem>>, vector<8x8xf32>,
    %663 = vector.extract_strided_slice %622 {offsets = [0, 16], sizes = [8, 8], strides = [1, 1]} : vector<8x128xf32> to vector<8x8xf32>
    %664 = vector.extract_strided_slice %623 {offsets = [0, 16], sizes = [8, 8], strides = [1, 1]} : vector<8x128xf32> to vector<8x8xf32>
    %665 = vector.extract_strided_slice %624 {offsets = [0, 16], sizes = [8, 8], strides = [1, 1]} : vector<8x128xf32> to vector<8x8xf32>
    %cst_271 = arith.constant dense<0.000000e+00> : vector<8x8xf32>
    %666 = tpu.matmul %663, %664, %cst_271 {dimension_numbers = #tpu.dot_dimension_numbers<[1], [1], [0], [0], [0, 0, 1, 0], [], []>} : vector<8x8xf32>, vector<8x8xf32>, vector<8x8xf32> -> vector<8x8xf32>
    %cst_272 = arith.constant 0.353553385 : f32
    %667 = vector.broadcast %cst_272 : f32 to vector<8x8xf32>
    %668 = arith.mulf %666, %667 : vector<8x8xf32>
    %669 = vector.broadcast %621 : vector<1x8xf32> to vector<8x8xf32>
    %670 = arith.addf %668, %669 : vector<8x8xf32>
    %cst_273 = arith.constant dense<0xFF800000> : vector<8xf32>
    %671 = vector.multi_reduction <maximumf>, %670, %cst_273 [1] : vector<8x8xf32> to vector<8xf32>
    %672 = vector.shape_cast %671 : vector<8xf32> to vector<8x1xf32>
    %673 = vector.broadcast %672 : vector<8x1xf32> to vector<8x8xf32>
    %674 = arith.subf %670, %673 : vector<8x8xf32>
    %675 = math.exp %674 : vector<8x8xf32>
    %cst_274 = arith.constant dense<0.000000e+00> : vector<8xf32>
    %676 = vector.multi_reduction <add>, %675, %cst_274 [1] : vector<8x8xf32> to vector<8xf32>
    %677 = vector.shape_cast %676 : vector<8xf32> to vector<8x1xf32>
    %678 = vector.broadcast %677 : vector<8x1xf32> to vector<8x8xf32>
    %679 = arith.divf %675, %678 : vector<8x8xf32>
    %cst_275 = arith.constant dense<0.000000e+00> : vector<8x8xf32>
    %680 = tpu.matmul %679, %665, %cst_275 {dimension_numbers = #tpu.dot_dimension_numbers<[1], [0], [0], [1], [0, 0, 1, 1], [], []>} : vector<8x8xf32>, vector<8x8xf32>, vector<8x8xf32> -> vector<8x8xf32>
    %c0_276 = arith.constant 0 : index
    %c16_277 = arith.constant 16 : index
    %681 = vector.load %arg20[%c0_276, %c16_277] : memref<48x128xf32, #tpu.memory_space<vmem>>, vector<8x8xf32>
    tpu.vector_store %arg20[%c0_276, %c16_277], %680 {strides = array<i32>} : memref<48x128xf32, #tpu.memory_space<vmem>>, vector<8x8xf32>,
    %682 = vector.extract_strided_slice %622 {offsets = [0, 24], sizes = [8, 8], strides = [1, 1]} : vector<8x128xf32> to vector<8x8xf32>
    %683 = vector.extract_strided_slice %623 {offsets = [0, 24], sizes = [8, 8], strides = [1, 1]} : vector<8x128xf32> to vector<8x8xf32>
    %684 = vector.extract_strided_slice %624 {offsets = [0, 24], sizes = [8, 8], strides = [1, 1]} : vector<8x128xf32> to vector<8x8xf32>
    %cst_278 = arith.constant dense<0.000000e+00> : vector<8x8xf32>
    %685 = tpu.matmul %682, %683, %cst_278 {dimension_numbers = #tpu.dot_dimension_numbers<[1], [1], [0], [0], [0, 0, 1, 0], [], []>} : vector<8x8xf32>, vector<8x8xf32>, vector<8x8xf32> -> vector<8x8xf32>
    %cst_279 = arith.constant 0.353553385 : f32
    %686 = vector.broadcast %cst_279 : f32 to vector<8x8xf32>
    %687 = arith.mulf %685, %686 : vector<8x8xf32>
    %688 = vector.broadcast %621 : vector<1x8xf32> to vector<8x8xf32>
    %689 = arith.addf %687, %688 : vector<8x8xf32>
    %cst_280 = arith.constant dense<0xFF800000> : vector<8xf32>
    %690 = vector.multi_reduction <maximumf>, %689, %cst_280 [1] : vector<8x8xf32> to vector<8xf32>
    %691 = vector.shape_cast %690 : vector<8xf32> to vector<8x1xf32>
    %692 = vector.broadcast %691 : vector<8x1xf32> to vector<8x8xf32>
    %693 = arith.subf %689, %692 : vector<8x8xf32>
    %694 = math.exp %693 : vector<8x8xf32>
    %cst_281 = arith.constant dense<0.000000e+00> : vector<8xf32>
    %695 = vector.multi_reduction <add>, %694, %cst_281 [1] : vector<8x8xf32> to vector<8xf32>
    %696 = vector.shape_cast %695 : vector<8xf32> to vector<8x1xf32>
    %697 = vector.broadcast %696 : vector<8x1xf32> to vector<8x8xf32>
    %698 = arith.divf %694, %697 : vector<8x8xf32>
    %cst_282 = arith.constant dense<0.000000e+00> : vector<8x8xf32>
    %699 = tpu.matmul %698, %684, %cst_282 {dimension_numbers = #tpu.dot_dimension_numbers<[1], [0], [0], [1], [0, 0, 1, 1], [], []>} : vector<8x8xf32>, vector<8x8xf32>, vector<8x8xf32> -> vector<8x8xf32>
    %c0_283 = arith.constant 0 : index
    %c24_284 = arith.constant 24 : index
    %700 = vector.load %arg20[%c0_283, %c24_284] : memref<48x128xf32, #tpu.memory_space<vmem>>, vector<8x8xf32>
    tpu.vector_store %arg20[%c0_283, %c24_284], %699 {strides = array<i32>} : memref<48x128xf32, #tpu.memory_space<vmem>>, vector<8x8xf32>,
    %701 = vector.extract_strided_slice %31 {offsets = [1, 0], sizes = [1, 8], strides = [1, 1]} : vector<6x8xf32> to vector<1x8xf32>
    %702 = vector.extract_strided_slice %618 {offsets = [8, 0], sizes = [8, 128], strides = [1, 1]} : vector<48x128xf32> to vector<8x128xf32>
    %703 = vector.extract_strided_slice %619 {offsets = [8, 0], sizes = [8, 128], strides = [1, 1]} : vector<48x128xf32> to vector<8x128xf32>
    %704 = vector.extract_strided_slice %620 {offsets = [8, 0], sizes = [8, 128], strides = [1, 1]} : vector<48x128xf32> to vector<8x128xf32>
    %705 = vector.extract_strided_slice %702 {offsets = [0, 0], sizes = [8, 8], strides = [1, 1]} : vector<8x128xf32> to vector<8x8xf32>
    %706 = vector.extract_strided_slice %703 {offsets = [0, 0], sizes = [8, 8], strides = [1, 1]} : vector<8x128xf32> to vector<8x8xf32>
    %707 = vector.extract_strided_slice %704 {offsets = [0, 0], sizes = [8, 8], strides = [1, 1]} : vector<8x128xf32> to vector<8x8xf32>
    %cst_285 = arith.constant dense<0.000000e+00> : vector<8x8xf32>
    %708 = tpu.matmul %705, %706, %cst_285 {dimension_numbers = #tpu.dot_dimension_numbers<[1], [1], [0], [0], [0, 0, 1, 0], [], []>} : vector<8x8xf32>, vector<8x8xf32>, vector<8x8xf32> -> vector<8x8xf32>
    %cst_286 = arith.constant 0.353553385 : f32
    %709 = vector.broadcast %cst_286 : f32 to vector<8x8xf32>
    %710 = arith.mulf %708, %709 : vector<8x8xf32>
    %711 = vector.broadcast %701 : vector<1x8xf32> to vector<8x8xf32>
    %712 = arith.addf %710, %711 : vector<8x8xf32>
    %cst_287 = arith.constant dense<0xFF800000> : vector<8xf32>
    %713 = vector.multi_reduction <maximumf>, %712, %cst_287 [1] : vector<8x8xf32> to vector<8xf32>
    %714 = vector.shape_cast %713 : vector<8xf32> to vector<8x1xf32>
    %715 = vector.broadcast %714 : vector<8x1xf32> to vector<8x8xf32>
    %716 = arith.subf %712, %715 : vector<8x8xf32>
    %717 = math.exp %716 : vector<8x8xf32>
    %cst_288 = arith.constant dense<0.000000e+00> : vector<8xf32>
    %718 = vector.multi_reduction <add>, %717, %cst_288 [1] : vector<8x8xf32> to vector<8xf32>
    %719 = vector.shape_cast %718 : vector<8xf32> to vector<8x1xf32>
    %720 = vector.broadcast %719 : vector<8x1xf32> to vector<8x8xf32>
    %721 = arith.divf %717, %720 : vector<8x8xf32>
    %cst_289 = arith.constant dense<0.000000e+00> : vector<8x8xf32>
    %722 = tpu.matmul %721, %707, %cst_289 {dimension_numbers = #tpu.dot_dimension_numbers<[1], [0], [0], [1], [0, 0, 1, 1], [], []>} : vector<8x8xf32>, vector<8x8xf32>, vector<8x8xf32> -> vector<8x8xf32>
    %c8_290 = arith.constant 8 : index
    %c0_291 = arith.constant 0 : index
    %723 = vector.load %arg20[%c8_290, %c0_291] : memref<48x128xf32, #tpu.memory_space<vmem>>, vector<8x8xf32>
    tpu.vector_store %arg20[%c8_290, %c0_291], %722 {strides = array<i32>} : memref<48x128xf32, #tpu.memory_space<vmem>>, vector<8x8xf32>,
    %724 = vector.extract_strided_slice %702 {offsets = [0, 8], sizes = [8, 8], strides = [1, 1]} : vector<8x128xf32> to vector<8x8xf32>
    %725 = vector.extract_strided_slice %703 {offsets = [0, 8], sizes = [8, 8], strides = [1, 1]} : vector<8x128xf32> to vector<8x8xf32>
    %726 = vector.extract_strided_slice %704 {offsets = [0, 8], sizes = [8, 8], strides = [1, 1]} : vector<8x128xf32> to vector<8x8xf32>
    %cst_292 = arith.constant dense<0.000000e+00> : vector<8x8xf32>
    %727 = tpu.matmul %724, %725, %cst_292 {dimension_numbers = #tpu.dot_dimension_numbers<[1], [1], [0], [0], [0, 0, 1, 0], [], []>} : vector<8x8xf32>, vector<8x8xf32>, vector<8x8xf32> -> vector<8x8xf32>
    %cst_293 = arith.constant 0.353553385 : f32
    %728 = vector.broadcast %cst_293 : f32 to vector<8x8xf32>
    %729 = arith.mulf %727, %728 : vector<8x8xf32>
    %730 = vector.broadcast %701 : vector<1x8xf32> to vector<8x8xf32>
    %731 = arith.addf %729, %730 : vector<8x8xf32>
    %cst_294 = arith.constant dense<0xFF800000> : vector<8xf32>
    %732 = vector.multi_reduction <maximumf>, %731, %cst_294 [1] : vector<8x8xf32> to vector<8xf32>
    %733 = vector.shape_cast %732 : vector<8xf32> to vector<8x1xf32>
    %734 = vector.broadcast %733 : vector<8x1xf32> to vector<8x8xf32>
    %735 = arith.subf %731, %734 : vector<8x8xf32>
    %736 = math.exp %735 : vector<8x8xf32>
    %cst_295 = arith.constant dense<0.000000e+00> : vector<8xf32>
    %737 = vector.multi_reduction <add>, %736, %cst_295 [1] : vector<8x8xf32> to vector<8xf32>
    %738 = vector.shape_cast %737 : vector<8xf32> to vector<8x1xf32>
    %739 = vector.broadcast %738 : vector<8x1xf32> to vector<8x8xf32>
    %740 = arith.divf %736, %739 : vector<8x8xf32>
    %cst_296 = arith.constant dense<0.000000e+00> : vector<8x8xf32>
    %741 = tpu.matmul %740, %726, %cst_296 {dimension_numbers = #tpu.dot_dimension_numbers<[1], [0], [0], [1], [0, 0, 1, 1], [], []>} : vector<8x8xf32>, vector<8x8xf32>, vector<8x8xf32> -> vector<8x8xf32>
    %c8_297 = arith.constant 8 : index
    %c8_298 = arith.constant 8 : index
    %742 = vector.load %arg20[%c8_297, %c8_298] : memref<48x128xf32, #tpu.memory_space<vmem>>, vector<8x8xf32>
    tpu.vector_store %arg20[%c8_297, %c8_298], %741 {strides = array<i32>} : memref<48x128xf32, #tpu.memory_space<vmem>>, vector<8x8xf32>,
    %743 = vector.extract_strided_slice %702 {offsets = [0, 16], sizes = [8, 8], strides = [1, 1]} : vector<8x128xf32> to vector<8x8xf32>
    %744 = vector.extract_strided_slice %703 {offsets = [0, 16], sizes = [8, 8], strides = [1, 1]} : vector<8x128xf32> to vector<8x8xf32>
    %745 = vector.extract_strided_slice %704 {offsets = [0, 16], sizes = [8, 8], strides = [1, 1]} : vector<8x128xf32> to vector<8x8xf32>
    %cst_299 = arith.constant dense<0.000000e+00> : vector<8x8xf32>
    %746 = tpu.matmul %743, %744, %cst_299 {dimension_numbers = #tpu.dot_dimension_numbers<[1], [1], [0], [0], [0, 0, 1, 0], [], []>} : vector<8x8xf32>, vector<8x8xf32>, vector<8x8xf32> -> vector<8x8xf32>
    %cst_300 = arith.constant 0.353553385 : f32
    %747 = vector.broadcast %cst_300 : f32 to vector<8x8xf32>
    %748 = arith.mulf %746, %747 : vector<8x8xf32>
    %749 = vector.broadcast %701 : vector<1x8xf32> to vector<8x8xf32>
    %750 = arith.addf %748, %749 : vector<8x8xf32>
    %cst_301 = arith.constant dense<0xFF800000> : vector<8xf32>
    %751 = vector.multi_reduction <maximumf>, %750, %cst_301 [1] : vector<8x8xf32> to vector<8xf32>
    %752 = vector.shape_cast %751 : vector<8xf32> to vector<8x1xf32>
    %753 = vector.broadcast %752 : vector<8x1xf32> to vector<8x8xf32>
    %754 = arith.subf %750, %753 : vector<8x8xf32>
    %755 = math.exp %754 : vector<8x8xf32>
    %cst_302 = arith.constant dense<0.000000e+00> : vector<8xf32>
    %756 = vector.multi_reduction <add>, %755, %cst_302 [1] : vector<8x8xf32> to vector<8xf32>
    %757 = vector.shape_cast %756 : vector<8xf32> to vector<8x1xf32>
    %758 = vector.broadcast %757 : vector<8x1xf32> to vector<8x8xf32>
    %759 = arith.divf %755, %758 : vector<8x8xf32>
    %cst_303 = arith.constant dense<0.000000e+00> : vector<8x8xf32>
    %760 = tpu.matmul %759, %745, %cst_303 {dimension_numbers = #tpu.dot_dimension_numbers<[1], [0], [0], [1], [0, 0, 1, 1], [], []>} : vector<8x8xf32>, vector<8x8xf32>, vector<8x8xf32> -> vector<8x8xf32>
    %c8_304 = arith.constant 8 : index
    %c16_305 = arith.constant 16 : index
    %761 = vector.load %arg20[%c8_304, %c16_305] : memref<48x128xf32, #tpu.memory_space<vmem>>, vector<8x8xf32>
    tpu.vector_store %arg20[%c8_304, %c16_305], %760 {strides = array<i32>} : memref<48x128xf32, #tpu.memory_space<vmem>>, vector<8x8xf32>,
    %762 = vector.extract_strided_slice %702 {offsets = [0, 24], sizes = [8, 8], strides = [1, 1]} : vector<8x128xf32> to vector<8x8xf32>
    %763 = vector.extract_strided_slice %703 {offsets = [0, 24], sizes = [8, 8], strides = [1, 1]} : vector<8x128xf32> to vector<8x8xf32>
    %764 = vector.extract_strided_slice %704 {offsets = [0, 24], sizes = [8, 8], strides = [1, 1]} : vector<8x128xf32> to vector<8x8xf32>
    %cst_306 = arith.constant dense<0.000000e+00> : vector<8x8xf32>
    %765 = tpu.matmul %762, %763, %cst_306 {dimension_numbers = #tpu.dot_dimension_numbers<[1], [1], [0], [0], [0, 0, 1, 0], [], []>} : vector<8x8xf32>, vector<8x8xf32>, vector<8x8xf32> -> vector<8x8xf32>
    %cst_307 = arith.constant 0.353553385 : f32
    %766 = vector.broadcast %cst_307 : f32 to vector<8x8xf32>
    %767 = arith.mulf %765, %766 : vector<8x8xf32>
    %768 = vector.broadcast %701 : vector<1x8xf32> to vector<8x8xf32>
    %769 = arith.addf %767, %768 : vector<8x8xf32>
    %cst_308 = arith.constant dense<0xFF800000> : vector<8xf32>
    %770 = vector.multi_reduction <maximumf>, %769, %cst_308 [1] : vector<8x8xf32> to vector<8xf32>
    %771 = vector.shape_cast %770 : vector<8xf32> to vector<8x1xf32>
    %772 = vector.broadcast %771 : vector<8x1xf32> to vector<8x8xf32>
    %773 = arith.subf %769, %772 : vector<8x8xf32>
    %774 = math.exp %773 : vector<8x8xf32>
    %cst_309 = arith.constant dense<0.000000e+00> : vector<8xf32>
    %775 = vector.multi_reduction <add>, %774, %cst_309 [1] : vector<8x8xf32> to vector<8xf32>
    %776 = vector.shape_cast %775 : vector<8xf32> to vector<8x1xf32>
    %777 = vector.broadcast %776 : vector<8x1xf32> to vector<8x8xf32>
    %778 = arith.divf %774, %777 : vector<8x8xf32>
    %cst_310 = arith.constant dense<0.000000e+00> : vector<8x8xf32>
    %779 = tpu.matmul %778, %764, %cst_310 {dimension_numbers = #tpu.dot_dimension_numbers<[1], [0], [0], [1], [0, 0, 1, 1], [], []>} : vector<8x8xf32>, vector<8x8xf32>, vector<8x8xf32> -> vector<8x8xf32>
    %c8_311 = arith.constant 8 : index
    %c24_312 = arith.constant 24 : index
    %780 = vector.load %arg20[%c8_311, %c24_312] : memref<48x128xf32, #tpu.memory_space<vmem>>, vector<8x8xf32>
    tpu.vector_store %arg20[%c8_311, %c24_312], %779 {strides = array<i32>} : memref<48x128xf32, #tpu.memory_space<vmem>>, vector<8x8xf32>,
    %781 = vector.extract_strided_slice %31 {offsets = [2, 0], sizes = [1, 8], strides = [1, 1]} : vector<6x8xf32> to vector<1x8xf32>
    %782 = vector.extract_strided_slice %618 {offsets = [16, 0], sizes = [8, 128], strides = [1, 1]} : vector<48x128xf32> to vector<8x128xf32>
    %783 = vector.extract_strided_slice %619 {offsets = [16, 0], sizes = [8, 128], strides = [1, 1]} : vector<48x128xf32> to vector<8x128xf32>
    %784 = vector.extract_strided_slice %620 {offsets = [16, 0], sizes = [8, 128], strides = [1, 1]} : vector<48x128xf32> to vector<8x128xf32>
    %785 = vector.extract_strided_slice %782 {offsets = [0, 0], sizes = [8, 8], strides = [1, 1]} : vector<8x128xf32> to vector<8x8xf32>
    %786 = vector.extract_strided_slice %783 {offsets = [0, 0], sizes = [8, 8], strides = [1, 1]} : vector<8x128xf32> to vector<8x8xf32>
    %787 = vector.extract_strided_slice %784 {offsets = [0, 0], sizes = [8, 8], strides = [1, 1]} : vector<8x128xf32> to vector<8x8xf32>
    %cst_313 = arith.constant dense<0.000000e+00> : vector<8x8xf32>
    %788 = tpu.matmul %785, %786, %cst_313 {dimension_numbers = #tpu.dot_dimension_numbers<[1], [1], [0], [0], [0, 0, 1, 0], [], []>} : vector<8x8xf32>, vector<8x8xf32>, vector<8x8xf32> -> vector<8x8xf32>
    %cst_314 = arith.constant 0.353553385 : f32
    %789 = vector.broadcast %cst_314 : f32 to vector<8x8xf32>
    %790 = arith.mulf %788, %789 : vector<8x8xf32>
    %791 = vector.broadcast %781 : vector<1x8xf32> to vector<8x8xf32>
    %792 = arith.addf %790, %791 : vector<8x8xf32>
    %cst_315 = arith.constant dense<0xFF800000> : vector<8xf32>
    %793 = vector.multi_reduction <maximumf>, %792, %cst_315 [1] : vector<8x8xf32> to vector<8xf32>
    %794 = vector.shape_cast %793 : vector<8xf32> to vector<8x1xf32>
    %795 = vector.broadcast %794 : vector<8x1xf32> to vector<8x8xf32>
    %796 = arith.subf %792, %795 : vector<8x8xf32>
    %797 = math.exp %796 : vector<8x8xf32>
    %cst_316 = arith.constant dense<0.000000e+00> : vector<8xf32>
    %798 = vector.multi_reduction <add>, %797, %cst_316 [1] : vector<8x8xf32> to vector<8xf32>
    %799 = vector.shape_cast %798 : vector<8xf32> to vector<8x1xf32>
    %800 = vector.broadcast %799 : vector<8x1xf32> to vector<8x8xf32>
    %801 = arith.divf %797, %800 : vector<8x8xf32>
    %cst_317 = arith.constant dense<0.000000e+00> : vector<8x8xf32>
    %802 = tpu.matmul %801, %787, %cst_317 {dimension_numbers = #tpu.dot_dimension_numbers<[1], [0], [0], [1], [0, 0, 1, 1], [], []>} : vector<8x8xf32>, vector<8x8xf32>, vector<8x8xf32> -> vector<8x8xf32>
    %c16_318 = arith.constant 16 : index
    %c0_319 = arith.constant 0 : index
    %803 = vector.load %arg20[%c16_318, %c0_319] : memref<48x128xf32, #tpu.memory_space<vmem>>, vector<8x8xf32>
    tpu.vector_store %arg20[%c16_318, %c0_319], %802 {strides = array<i32>} : memref<48x128xf32, #tpu.memory_space<vmem>>, vector<8x8xf32>,
    %804 = vector.extract_strided_slice %782 {offsets = [0, 8], sizes = [8, 8], strides = [1, 1]} : vector<8x128xf32> to vector<8x8xf32>
    %805 = vector.extract_strided_slice %783 {offsets = [0, 8], sizes = [8, 8], strides = [1, 1]} : vector<8x128xf32> to vector<8x8xf32>
    %806 = vector.extract_strided_slice %784 {offsets = [0, 8], sizes = [8, 8], strides = [1, 1]} : vector<8x128xf32> to vector<8x8xf32>
    %cst_320 = arith.constant dense<0.000000e+00> : vector<8x8xf32>
    %807 = tpu.matmul %804, %805, %cst_320 {dimension_numbers = #tpu.dot_dimension_numbers<[1], [1], [0], [0], [0, 0, 1, 0], [], []>} : vector<8x8xf32>, vector<8x8xf32>, vector<8x8xf32> -> vector<8x8xf32>
    %cst_321 = arith.constant 0.353553385 : f32
    %808 = vector.broadcast %cst_321 : f32 to vector<8x8xf32>
    %809 = arith.mulf %807, %808 : vector<8x8xf32>
    %810 = vector.broadcast %781 : vector<1x8xf32> to vector<8x8xf32>
    %811 = arith.addf %809, %810 : vector<8x8xf32>
    %cst_322 = arith.constant dense<0xFF800000> : vector<8xf32>
    %812 = vector.multi_reduction <maximumf>, %811, %cst_322 [1] : vector<8x8xf32> to vector<8xf32>
    %813 = vector.shape_cast %812 : vector<8xf32> to vector<8x1xf32>
    %814 = vector.broadcast %813 : vector<8x1xf32> to vector<8x8xf32>
    %815 = arith.subf %811, %814 : vector<8x8xf32>
    %816 = math.exp %815 : vector<8x8xf32>
    %cst_323 = arith.constant dense<0.000000e+00> : vector<8xf32>
    %817 = vector.multi_reduction <add>, %816, %cst_323 [1] : vector<8x8xf32> to vector<8xf32>
    %818 = vector.shape_cast %817 : vector<8xf32> to vector<8x1xf32>
    %819 = vector.broadcast %818 : vector<8x1xf32> to vector<8x8xf32>
    %820 = arith.divf %816, %819 : vector<8x8xf32>
    %cst_324 = arith.constant dense<0.000000e+00> : vector<8x8xf32>
    %821 = tpu.matmul %820, %806, %cst_324 {dimension_numbers = #tpu.dot_dimension_numbers<[1], [0], [0], [1], [0, 0, 1, 1], [], []>} : vector<8x8xf32>, vector<8x8xf32>, vector<8x8xf32> -> vector<8x8xf32>
    %c16_325 = arith.constant 16 : index
    %c8_326 = arith.constant 8 : index
    %822 = vector.load %arg20[%c16_325, %c8_326] : memref<48x128xf32, #tpu.memory_space<vmem>>, vector<8x8xf32>
    tpu.vector_store %arg20[%c16_325, %c8_326], %821 {strides = array<i32>} : memref<48x128xf32, #tpu.memory_space<vmem>>, vector<8x8xf32>,
    %823 = vector.extract_strided_slice %782 {offsets = [0, 16], sizes = [8, 8], strides = [1, 1]} : vector<8x128xf32> to vector<8x8xf32>
    %824 = vector.extract_strided_slice %783 {offsets = [0, 16], sizes = [8, 8], strides = [1, 1]} : vector<8x128xf32> to vector<8x8xf32>
    %825 = vector.extract_strided_slice %784 {offsets = [0, 16], sizes = [8, 8], strides = [1, 1]} : vector<8x128xf32> to vector<8x8xf32>
    %cst_327 = arith.constant dense<0.000000e+00> : vector<8x8xf32>
    %826 = tpu.matmul %823, %824, %cst_327 {dimension_numbers = #tpu.dot_dimension_numbers<[1], [1], [0], [0], [0, 0, 1, 0], [], []>} : vector<8x8xf32>, vector<8x8xf32>, vector<8x8xf32> -> vector<8x8xf32>
    %cst_328 = arith.constant 0.353553385 : f32
    %827 = vector.broadcast %cst_328 : f32 to vector<8x8xf32>
    %828 = arith.mulf %826, %827 : vector<8x8xf32>
    %829 = vector.broadcast %781 : vector<1x8xf32> to vector<8x8xf32>
    %830 = arith.addf %828, %829 : vector<8x8xf32>
    %cst_329 = arith.constant dense<0xFF800000> : vector<8xf32>
    %831 = vector.multi_reduction <maximumf>, %830, %cst_329 [1] : vector<8x8xf32> to vector<8xf32>
    %832 = vector.shape_cast %831 : vector<8xf32> to vector<8x1xf32>
    %833 = vector.broadcast %832 : vector<8x1xf32> to vector<8x8xf32>
    %834 = arith.subf %830, %833 : vector<8x8xf32>
    %835 = math.exp %834 : vector<8x8xf32>
    %cst_330 = arith.constant dense<0.000000e+00> : vector<8xf32>
    %836 = vector.multi_reduction <add>, %835, %cst_330 [1] : vector<8x8xf32> to vector<8xf32>
    %837 = vector.shape_cast %836 : vector<8xf32> to vector<8x1xf32>
    %838 = vector.broadcast %837 : vector<8x1xf32> to vector<8x8xf32>
    %839 = arith.divf %835, %838 : vector<8x8xf32>
    %cst_331 = arith.constant dense<0.000000e+00> : vector<8x8xf32>
    %840 = tpu.matmul %839, %825, %cst_331 {dimension_numbers = #tpu.dot_dimension_numbers<[1], [0], [0], [1], [0, 0, 1, 1], [], []>} : vector<8x8xf32>, vector<8x8xf32>, vector<8x8xf32> -> vector<8x8xf32>
    %c16_332 = arith.constant 16 : index
    %c16_333 = arith.constant 16 : index
    %841 = vector.load %arg20[%c16_332, %c16_333] : memref<48x128xf32, #tpu.memory_space<vmem>>, vector<8x8xf32>
    tpu.vector_store %arg20[%c16_332, %c16_333], %840 {strides = array<i32>} : memref<48x128xf32, #tpu.memory_space<vmem>>, vector<8x8xf32>,
    %842 = vector.extract_strided_slice %782 {offsets = [0, 24], sizes = [8, 8], strides = [1, 1]} : vector<8x128xf32> to vector<8x8xf32>
    %843 = vector.extract_strided_slice %783 {offsets = [0, 24], sizes = [8, 8], strides = [1, 1]} : vector<8x128xf32> to vector<8x8xf32>
    %844 = vector.extract_strided_slice %784 {offsets = [0, 24], sizes = [8, 8], strides = [1, 1]} : vector<8x128xf32> to vector<8x8xf32>
    %cst_334 = arith.constant dense<0.000000e+00> : vector<8x8xf32>
    %845 = tpu.matmul %842, %843, %cst_334 {dimension_numbers = #tpu.dot_dimension_numbers<[1], [1], [0], [0], [0, 0, 1, 0], [], []>} : vector<8x8xf32>, vector<8x8xf32>, vector<8x8xf32> -> vector<8x8xf32>
    %cst_335 = arith.constant 0.353553385 : f32
    %846 = vector.broadcast %cst_335 : f32 to vector<8x8xf32>
    %847 = arith.mulf %845, %846 : vector<8x8xf32>
    %848 = vector.broadcast %781 : vector<1x8xf32> to vector<8x8xf32>
    %849 = arith.addf %847, %848 : vector<8x8xf32>
    %cst_336 = arith.constant dense<0xFF800000> : vector<8xf32>
    %850 = vector.multi_reduction <maximumf>, %849, %cst_336 [1] : vector<8x8xf32> to vector<8xf32>
    %851 = vector.shape_cast %850 : vector<8xf32> to vector<8x1xf32>
    %852 = vector.broadcast %851 : vector<8x1xf32> to vector<8x8xf32>
    %853 = arith.subf %849, %852 : vector<8x8xf32>
    %854 = math.exp %853 : vector<8x8xf32>
    %cst_337 = arith.constant dense<0.000000e+00> : vector<8xf32>
    %855 = vector.multi_reduction <add>, %854, %cst_337 [1] : vector<8x8xf32> to vector<8xf32>
    %856 = vector.shape_cast %855 : vector<8xf32> to vector<8x1xf32>
    %857 = vector.broadcast %856 : vector<8x1xf32> to vector<8x8xf32>
    %858 = arith.divf %854, %857 : vector<8x8xf32>
    %cst_338 = arith.constant dense<0.000000e+00> : vector<8x8xf32>
    %859 = tpu.matmul %858, %844, %cst_338 {dimension_numbers = #tpu.dot_dimension_numbers<[1], [0], [0], [1], [0, 0, 1, 1], [], []>} : vector<8x8xf32>, vector<8x8xf32>, vector<8x8xf32> -> vector<8x8xf32>
    %c16_339 = arith.constant 16 : index
    %c24_340 = arith.constant 24 : index
    %860 = vector.load %arg20[%c16_339, %c24_340] : memref<48x128xf32, #tpu.memory_space<vmem>>, vector<8x8xf32>
    tpu.vector_store %arg20[%c16_339, %c24_340], %859 {strides = array<i32>} : memref<48x128xf32, #tpu.memory_space<vmem>>, vector<8x8xf32>,
    %861 = vector.extract_strided_slice %31 {offsets = [3, 0], sizes = [1, 8], strides = [1, 1]} : vector<6x8xf32> to vector<1x8xf32>
    %862 = vector.extract_strided_slice %618 {offsets = [24, 0], sizes = [8, 128], strides = [1, 1]} : vector<48x128xf32> to vector<8x128xf32>
    %863 = vector.extract_strided_slice %619 {offsets = [24, 0], sizes = [8, 128], strides = [1, 1]} : vector<48x128xf32> to vector<8x128xf32>
    %864 = vector.extract_strided_slice %620 {offsets = [24, 0], sizes = [8, 128], strides = [1, 1]} : vector<48x128xf32> to vector<8x128xf32>
    %865 = vector.extract_strided_slice %862 {offsets = [0, 0], sizes = [8, 8], strides = [1, 1]} : vector<8x128xf32> to vector<8x8xf32>
    %866 = vector.extract_strided_slice %863 {offsets = [0, 0], sizes = [8, 8], strides = [1, 1]} : vector<8x128xf32> to vector<8x8xf32>
    %867 = vector.extract_strided_slice %864 {offsets = [0, 0], sizes = [8, 8], strides = [1, 1]} : vector<8x128xf32> to vector<8x8xf32>
    %cst_341 = arith.constant dense<0.000000e+00> : vector<8x8xf32>
    %868 = tpu.matmul %865, %866, %cst_341 {dimension_numbers = #tpu.dot_dimension_numbers<[1], [1], [0], [0], [0, 0, 1, 0], [], []>} : vector<8x8xf32>, vector<8x8xf32>, vector<8x8xf32> -> vector<8x8xf32>
    %cst_342 = arith.constant 0.353553385 : f32
    %869 = vector.broadcast %cst_342 : f32 to vector<8x8xf32>
    %870 = arith.mulf %868, %869 : vector<8x8xf32>
    %871 = vector.broadcast %861 : vector<1x8xf32> to vector<8x8xf32>
    %872 = arith.addf %870, %871 : vector<8x8xf32>
    %cst_343 = arith.constant dense<0xFF800000> : vector<8xf32>
    %873 = vector.multi_reduction <maximumf>, %872, %cst_343 [1] : vector<8x8xf32> to vector<8xf32>
    %874 = vector.shape_cast %873 : vector<8xf32> to vector<8x1xf32>
    %875 = vector.broadcast %874 : vector<8x1xf32> to vector<8x8xf32>
    %876 = arith.subf %872, %875 : vector<8x8xf32>
    %877 = math.exp %876 : vector<8x8xf32>
    %cst_344 = arith.constant dense<0.000000e+00> : vector<8xf32>
    %878 = vector.multi_reduction <add>, %877, %cst_344 [1] : vector<8x8xf32> to vector<8xf32>
    %879 = vector.shape_cast %878 : vector<8xf32> to vector<8x1xf32>
    %880 = vector.broadcast %879 : vector<8x1xf32> to vector<8x8xf32>
    %881 = arith.divf %877, %880 : vector<8x8xf32>
    %cst_345 = arith.constant dense<0.000000e+00> : vector<8x8xf32>
    %882 = tpu.matmul %881, %867, %cst_345 {dimension_numbers = #tpu.dot_dimension_numbers<[1], [0], [0], [1], [0, 0, 1, 1], [], []>} : vector<8x8xf32>, vector<8x8xf32>, vector<8x8xf32> -> vector<8x8xf32>
    %c24_346 = arith.constant 24 : index
    %c0_347 = arith.constant 0 : index
    %883 = vector.load %arg20[%c24_346, %c0_347] : memref<48x128xf32, #tpu.memory_space<vmem>>, vector<8x8xf32>
    tpu.vector_store %arg20[%c24_346, %c0_347], %882 {strides = array<i32>} : memref<48x128xf32, #tpu.memory_space<vmem>>, vector<8x8xf32>,
    %884 = vector.extract_strided_slice %862 {offsets = [0, 8], sizes = [8, 8], strides = [1, 1]} : vector<8x128xf32> to vector<8x8xf32>
    %885 = vector.extract_strided_slice %863 {offsets = [0, 8], sizes = [8, 8], strides = [1, 1]} : vector<8x128xf32> to vector<8x8xf32>
    %886 = vector.extract_strided_slice %864 {offsets = [0, 8], sizes = [8, 8], strides = [1, 1]} : vector<8x128xf32> to vector<8x8xf32>
    %cst_348 = arith.constant dense<0.000000e+00> : vector<8x8xf32>
    %887 = tpu.matmul %884, %885, %cst_348 {dimension_numbers = #tpu.dot_dimension_numbers<[1], [1], [0], [0], [0, 0, 1, 0], [], []>} : vector<8x8xf32>, vector<8x8xf32>, vector<8x8xf32> -> vector<8x8xf32>
    %cst_349 = arith.constant 0.353553385 : f32
    %888 = vector.broadcast %cst_349 : f32 to vector<8x8xf32>
    %889 = arith.mulf %887, %888 : vector<8x8xf32>
    %890 = vector.broadcast %861 : vector<1x8xf32> to vector<8x8xf32>
    %891 = arith.addf %889, %890 : vector<8x8xf32>
    %cst_350 = arith.constant dense<0xFF800000> : vector<8xf32>
    %892 = vector.multi_reduction <maximumf>, %891, %cst_350 [1] : vector<8x8xf32> to vector<8xf32>
    %893 = vector.shape_cast %892 : vector<8xf32> to vector<8x1xf32>
    %894 = vector.broadcast %893 : vector<8x1xf32> to vector<8x8xf32>
    %895 = arith.subf %891, %894 : vector<8x8xf32>
    %896 = math.exp %895 : vector<8x8xf32>
    %cst_351 = arith.constant dense<0.000000e+00> : vector<8xf32>
    %897 = vector.multi_reduction <add>, %896, %cst_351 [1] : vector<8x8xf32> to vector<8xf32>
    %898 = vector.shape_cast %897 : vector<8xf32> to vector<8x1xf32>
    %899 = vector.broadcast %898 : vector<8x1xf32> to vector<8x8xf32>
    %900 = arith.divf %896, %899 : vector<8x8xf32>
    %cst_352 = arith.constant dense<0.000000e+00> : vector<8x8xf32>
    %901 = tpu.matmul %900, %886, %cst_352 {dimension_numbers = #tpu.dot_dimension_numbers<[1], [0], [0], [1], [0, 0, 1, 1], [], []>} : vector<8x8xf32>, vector<8x8xf32>, vector<8x8xf32> -> vector<8x8xf32>
    %c24_353 = arith.constant 24 : index
    %c8_354 = arith.constant 8 : index
    %902 = vector.load %arg20[%c24_353, %c8_354] : memref<48x128xf32, #tpu.memory_space<vmem>>, vector<8x8xf32>
    tpu.vector_store %arg20[%c24_353, %c8_354], %901 {strides = array<i32>} : memref<48x128xf32, #tpu.memory_space<vmem>>, vector<8x8xf32>,
    %903 = vector.extract_strided_slice %862 {offsets = [0, 16], sizes = [8, 8], strides = [1, 1]} : vector<8x128xf32> to vector<8x8xf32>
    %904 = vector.extract_strided_slice %863 {offsets = [0, 16], sizes = [8, 8], strides = [1, 1]} : vector<8x128xf32> to vector<8x8xf32>
    %905 = vector.extract_strided_slice %864 {offsets = [0, 16], sizes = [8, 8], strides = [1, 1]} : vector<8x128xf32> to vector<8x8xf32>
    %cst_355 = arith.constant dense<0.000000e+00> : vector<8x8xf32>
    %906 = tpu.matmul %903, %904, %cst_355 {dimension_numbers = #tpu.dot_dimension_numbers<[1], [1], [0], [0], [0, 0, 1, 0], [], []>} : vector<8x8xf32>, vector<8x8xf32>, vector<8x8xf32> -> vector<8x8xf32>
    %cst_356 = arith.constant 0.353553385 : f32
    %907 = vector.broadcast %cst_356 : f32 to vector<8x8xf32>
    %908 = arith.mulf %906, %907 : vector<8x8xf32>
    %909 = vector.broadcast %861 : vector<1x8xf32> to vector<8x8xf32>
    %910 = arith.addf %908, %909 : vector<8x8xf32>
    %cst_357 = arith.constant dense<0xFF800000> : vector<8xf32>
    %911 = vector.multi_reduction <maximumf>, %910, %cst_357 [1] : vector<8x8xf32> to vector<8xf32>
    %912 = vector.shape_cast %911 : vector<8xf32> to vector<8x1xf32>
    %913 = vector.broadcast %912 : vector<8x1xf32> to vector<8x8xf32>
    %914 = arith.subf %910, %913 : vector<8x8xf32>
    %915 = math.exp %914 : vector<8x8xf32>
    %cst_358 = arith.constant dense<0.000000e+00> : vector<8xf32>
    %916 = vector.multi_reduction <add>, %915, %cst_358 [1] : vector<8x8xf32> to vector<8xf32>
    %917 = vector.shape_cast %916 : vector<8xf32> to vector<8x1xf32>
    %918 = vector.broadcast %917 : vector<8x1xf32> to vector<8x8xf32>
    %919 = arith.divf %915, %918 : vector<8x8xf32>
    %cst_359 = arith.constant dense<0.000000e+00> : vector<8x8xf32>
    %920 = tpu.matmul %919, %905, %cst_359 {dimension_numbers = #tpu.dot_dimension_numbers<[1], [0], [0], [1], [0, 0, 1, 1], [], []>} : vector<8x8xf32>, vector<8x8xf32>, vector<8x8xf32> -> vector<8x8xf32>
    %c24_360 = arith.constant 24 : index
    %c16_361 = arith.constant 16 : index
    %921 = vector.load %arg20[%c24_360, %c16_361] : memref<48x128xf32, #tpu.memory_space<vmem>>, vector<8x8xf32>
    tpu.vector_store %arg20[%c24_360, %c16_361], %920 {strides = array<i32>} : memref<48x128xf32, #tpu.memory_space<vmem>>, vector<8x8xf32>,
    %922 = vector.extract_strided_slice %862 {offsets = [0, 24], sizes = [8, 8], strides = [1, 1]} : vector<8x128xf32> to vector<8x8xf32>
    %923 = vector.extract_strided_slice %863 {offsets = [0, 24], sizes = [8, 8], strides = [1, 1]} : vector<8x128xf32> to vector<8x8xf32>
    %924 = vector.extract_strided_slice %864 {offsets = [0, 24], sizes = [8, 8], strides = [1, 1]} : vector<8x128xf32> to vector<8x8xf32>
    %cst_362 = arith.constant dense<0.000000e+00> : vector<8x8xf32>
    %925 = tpu.matmul %922, %923, %cst_362 {dimension_numbers = #tpu.dot_dimension_numbers<[1], [1], [0], [0], [0, 0, 1, 0], [], []>} : vector<8x8xf32>, vector<8x8xf32>, vector<8x8xf32> -> vector<8x8xf32>
    %cst_363 = arith.constant 0.353553385 : f32
    %926 = vector.broadcast %cst_363 : f32 to vector<8x8xf32>
    %927 = arith.mulf %925, %926 : vector<8x8xf32>
    %928 = vector.broadcast %861 : vector<1x8xf32> to vector<8x8xf32>
    %929 = arith.addf %927, %928 : vector<8x8xf32>
    %cst_364 = arith.constant dense<0xFF800000> : vector<8xf32>
    %930 = vector.multi_reduction <maximumf>, %929, %cst_364 [1] : vector<8x8xf32> to vector<8xf32>
    %931 = vector.shape_cast %930 : vector<8xf32> to vector<8x1xf32>
    %932 = vector.broadcast %931 : vector<8x1xf32> to vector<8x8xf32>
    %933 = arith.subf %929, %932 : vector<8x8xf32>
    %934 = math.exp %933 : vector<8x8xf32>
    %cst_365 = arith.constant dense<0.000000e+00> : vector<8xf32>
    %935 = vector.multi_reduction <add>, %934, %cst_365 [1] : vector<8x8xf32> to vector<8xf32>
    %936 = vector.shape_cast %935 : vector<8xf32> to vector<8x1xf32>
    %937 = vector.broadcast %936 : vector<8x1xf32> to vector<8x8xf32>
    %938 = arith.divf %934, %937 : vector<8x8xf32>
    %cst_366 = arith.constant dense<0.000000e+00> : vector<8x8xf32>
    %939 = tpu.matmul %938, %924, %cst_366 {dimension_numbers = #tpu.dot_dimension_numbers<[1], [0], [0], [1], [0, 0, 1, 1], [], []>} : vector<8x8xf32>, vector<8x8xf32>, vector<8x8xf32> -> vector<8x8xf32>
    %c24_367 = arith.constant 24 : index
    %c24_368 = arith.constant 24 : index
    %940 = vector.load %arg20[%c24_367, %c24_368] : memref<48x128xf32, #tpu.memory_space<vmem>>, vector<8x8xf32>
    tpu.vector_store %arg20[%c24_367, %c24_368], %939 {strides = array<i32>} : memref<48x128xf32, #tpu.memory_space<vmem>>, vector<8x8xf32>,
    %941 = vector.extract_strided_slice %31 {offsets = [4, 0], sizes = [1, 8], strides = [1, 1]} : vector<6x8xf32> to vector<1x8xf32>
    %942 = vector.extract_strided_slice %618 {offsets = [32, 0], sizes = [8, 128], strides = [1, 1]} : vector<48x128xf32> to vector<8x128xf32>
    %943 = vector.extract_strided_slice %619 {offsets = [32, 0], sizes = [8, 128], strides = [1, 1]} : vector<48x128xf32> to vector<8x128xf32>
    %944 = vector.extract_strided_slice %620 {offsets = [32, 0], sizes = [8, 128], strides = [1, 1]} : vector<48x128xf32> to vector<8x128xf32>
    %945 = vector.extract_strided_slice %942 {offsets = [0, 0], sizes = [8, 8], strides = [1, 1]} : vector<8x128xf32> to vector<8x8xf32>
    %946 = vector.extract_strided_slice %943 {offsets = [0, 0], sizes = [8, 8], strides = [1, 1]} : vector<8x128xf32> to vector<8x8xf32>
    %947 = vector.extract_strided_slice %944 {offsets = [0, 0], sizes = [8, 8], strides = [1, 1]} : vector<8x128xf32> to vector<8x8xf32>
    %cst_369 = arith.constant dense<0.000000e+00> : vector<8x8xf32>
    %948 = tpu.matmul %945, %946, %cst_369 {dimension_numbers = #tpu.dot_dimension_numbers<[1], [1], [0], [0], [0, 0, 1, 0], [], []>} : vector<8x8xf32>, vector<8x8xf32>, vector<8x8xf32> -> vector<8x8xf32>
    %cst_370 = arith.constant 0.353553385 : f32
    %949 = vector.broadcast %cst_370 : f32 to vector<8x8xf32>
    %950 = arith.mulf %948, %949 : vector<8x8xf32>
    %951 = vector.broadcast %941 : vector<1x8xf32> to vector<8x8xf32>
    %952 = arith.addf %950, %951 : vector<8x8xf32>
    %cst_371 = arith.constant dense<0xFF800000> : vector<8xf32>
    %953 = vector.multi_reduction <maximumf>, %952, %cst_371 [1] : vector<8x8xf32> to vector<8xf32>
    %954 = vector.shape_cast %953 : vector<8xf32> to vector<8x1xf32>
    %955 = vector.broadcast %954 : vector<8x1xf32> to vector<8x8xf32>
    %956 = arith.subf %952, %955 : vector<8x8xf32>
    %957 = math.exp %956 : vector<8x8xf32>
    %cst_372 = arith.constant dense<0.000000e+00> : vector<8xf32>
    %958 = vector.multi_reduction <add>, %957, %cst_372 [1] : vector<8x8xf32> to vector<8xf32>
    %959 = vector.shape_cast %958 : vector<8xf32> to vector<8x1xf32>
    %960 = vector.broadcast %959 : vector<8x1xf32> to vector<8x8xf32>
    %961 = arith.divf %957, %960 : vector<8x8xf32>
    %cst_373 = arith.constant dense<0.000000e+00> : vector<8x8xf32>
    %962 = tpu.matmul %961, %947, %cst_373 {dimension_numbers = #tpu.dot_dimension_numbers<[1], [0], [0], [1], [0, 0, 1, 1], [], []>} : vector<8x8xf32>, vector<8x8xf32>, vector<8x8xf32> -> vector<8x8xf32>
    %c32_374 = arith.constant 32 : index
    %c0_375 = arith.constant 0 : index
    %963 = vector.load %arg20[%c32_374, %c0_375] : memref<48x128xf32, #tpu.memory_space<vmem>>, vector<8x8xf32>
    tpu.vector_store %arg20[%c32_374, %c0_375], %962 {strides = array<i32>} : memref<48x128xf32, #tpu.memory_space<vmem>>, vector<8x8xf32>,
    %964 = vector.extract_strided_slice %942 {offsets = [0, 8], sizes = [8, 8], strides = [1, 1]} : vector<8x128xf32> to vector<8x8xf32>
    %965 = vector.extract_strided_slice %943 {offsets = [0, 8], sizes = [8, 8], strides = [1, 1]} : vector<8x128xf32> to vector<8x8xf32>
    %966 = vector.extract_strided_slice %944 {offsets = [0, 8], sizes = [8, 8], strides = [1, 1]} : vector<8x128xf32> to vector<8x8xf32>
    %cst_376 = arith.constant dense<0.000000e+00> : vector<8x8xf32>
    %967 = tpu.matmul %964, %965, %cst_376 {dimension_numbers = #tpu.dot_dimension_numbers<[1], [1], [0], [0], [0, 0, 1, 0], [], []>} : vector<8x8xf32>, vector<8x8xf32>, vector<8x8xf32> -> vector<8x8xf32>
    %cst_377 = arith.constant 0.353553385 : f32
    %968 = vector.broadcast %cst_377 : f32 to vector<8x8xf32>
    %969 = arith.mulf %967, %968 : vector<8x8xf32>
    %970 = vector.broadcast %941 : vector<1x8xf32> to vector<8x8xf32>
    %971 = arith.addf %969, %970 : vector<8x8xf32>
    %cst_378 = arith.constant dense<0xFF800000> : vector<8xf32>
    %972 = vector.multi_reduction <maximumf>, %971, %cst_378 [1] : vector<8x8xf32> to vector<8xf32>
    %973 = vector.shape_cast %972 : vector<8xf32> to vector<8x1xf32>
    %974 = vector.broadcast %973 : vector<8x1xf32> to vector<8x8xf32>
    %975 = arith.subf %971, %974 : vector<8x8xf32>
    %976 = math.exp %975 : vector<8x8xf32>
    %cst_379 = arith.constant dense<0.000000e+00> : vector<8xf32>
    %977 = vector.multi_reduction <add>, %976, %cst_379 [1] : vector<8x8xf32> to vector<8xf32>
    %978 = vector.shape_cast %977 : vector<8xf32> to vector<8x1xf32>
    %979 = vector.broadcast %978 : vector<8x1xf32> to vector<8x8xf32>
    %980 = arith.divf %976, %979 : vector<8x8xf32>
    %cst_380 = arith.constant dense<0.000000e+00> : vector<8x8xf32>
    %981 = tpu.matmul %980, %966, %cst_380 {dimension_numbers = #tpu.dot_dimension_numbers<[1], [0], [0], [1], [0, 0, 1, 1], [], []>} : vector<8x8xf32>, vector<8x8xf32>, vector<8x8xf32> -> vector<8x8xf32>
    %c32_381 = arith.constant 32 : index
    %c8_382 = arith.constant 8 : index
    %982 = vector.load %arg20[%c32_381, %c8_382] : memref<48x128xf32, #tpu.memory_space<vmem>>, vector<8x8xf32>
    tpu.vector_store %arg20[%c32_381, %c8_382], %981 {strides = array<i32>} : memref<48x128xf32, #tpu.memory_space<vmem>>, vector<8x8xf32>,
    %983 = vector.extract_strided_slice %942 {offsets = [0, 16], sizes = [8, 8], strides = [1, 1]} : vector<8x128xf32> to vector<8x8xf32>
    %984 = vector.extract_strided_slice %943 {offsets = [0, 16], sizes = [8, 8], strides = [1, 1]} : vector<8x128xf32> to vector<8x8xf32>
    %985 = vector.extract_strided_slice %944 {offsets = [0, 16], sizes = [8, 8], strides = [1, 1]} : vector<8x128xf32> to vector<8x8xf32>
    %cst_383 = arith.constant dense<0.000000e+00> : vector<8x8xf32>
    %986 = tpu.matmul %983, %984, %cst_383 {dimension_numbers = #tpu.dot_dimension_numbers<[1], [1], [0], [0], [0, 0, 1, 0], [], []>} : vector<8x8xf32>, vector<8x8xf32>, vector<8x8xf32> -> vector<8x8xf32>
    %cst_384 = arith.constant 0.353553385 : f32
    %987 = vector.broadcast %cst_384 : f32 to vector<8x8xf32>
    %988 = arith.mulf %986, %987 : vector<8x8xf32>
    %989 = vector.broadcast %941 : vector<1x8xf32> to vector<8x8xf32>
    %990 = arith.addf %988, %989 : vector<8x8xf32>
    %cst_385 = arith.constant dense<0xFF800000> : vector<8xf32>
    %991 = vector.multi_reduction <maximumf>, %990, %cst_385 [1] : vector<8x8xf32> to vector<8xf32>
    %992 = vector.shape_cast %991 : vector<8xf32> to vector<8x1xf32>
    %993 = vector.broadcast %992 : vector<8x1xf32> to vector<8x8xf32>
    %994 = arith.subf %990, %993 : vector<8x8xf32>
    %995 = math.exp %994 : vector<8x8xf32>
    %cst_386 = arith.constant dense<0.000000e+00> : vector<8xf32>
    %996 = vector.multi_reduction <add>, %995, %cst_386 [1] : vector<8x8xf32> to vector<8xf32>
    %997 = vector.shape_cast %996 : vector<8xf32> to vector<8x1xf32>
    %998 = vector.broadcast %997 : vector<8x1xf32> to vector<8x8xf32>
    %999 = arith.divf %995, %998 : vector<8x8xf32>
    %cst_387 = arith.constant dense<0.000000e+00> : vector<8x8xf32>
    %1000 = tpu.matmul %999, %985, %cst_387 {dimension_numbers = #tpu.dot_dimension_numbers<[1], [0], [0], [1], [0, 0, 1, 1], [], []>} : vector<8x8xf32>, vector<8x8xf32>, vector<8x8xf32> -> vector<8x8xf32>
    %c32_388 = arith.constant 32 : index
    %c16_389 = arith.constant 16 : index
    %1001 = vector.load %arg20[%c32_388, %c16_389] : memref<48x128xf32, #tpu.memory_space<vmem>>, vector<8x8xf32>
    tpu.vector_store %arg20[%c32_388, %c16_389], %1000 {strides = array<i32>} : memref<48x128xf32, #tpu.memory_space<vmem>>, vector<8x8xf32>,
    %1002 = vector.extract_strided_slice %942 {offsets = [0, 24], sizes = [8, 8], strides = [1, 1]} : vector<8x128xf32> to vector<8x8xf32>
    %1003 = vector.extract_strided_slice %943 {offsets = [0, 24], sizes = [8, 8], strides = [1, 1]} : vector<8x128xf32> to vector<8x8xf32>
    %1004 = vector.extract_strided_slice %944 {offsets = [0, 24], sizes = [8, 8], strides = [1, 1]} : vector<8x128xf32> to vector<8x8xf32>
    %cst_390 = arith.constant dense<0.000000e+00> : vector<8x8xf32>
    %1005 = tpu.matmul %1002, %1003, %cst_390 {dimension_numbers = #tpu.dot_dimension_numbers<[1], [1], [0], [0], [0, 0, 1, 0], [], []>} : vector<8x8xf32>, vector<8x8xf32>, vector<8x8xf32> -> vector<8x8xf32>
    %cst_391 = arith.constant 0.353553385 : f32
    %1006 = vector.broadcast %cst_391 : f32 to vector<8x8xf32>
    %1007 = arith.mulf %1005, %1006 : vector<8x8xf32>
    %1008 = vector.broadcast %941 : vector<1x8xf32> to vector<8x8xf32>
    %1009 = arith.addf %1007, %1008 : vector<8x8xf32>
    %cst_392 = arith.constant dense<0xFF800000> : vector<8xf32>
    %1010 = vector.multi_reduction <maximumf>, %1009, %cst_392 [1] : vector<8x8xf32> to vector<8xf32>
    %1011 = vector.shape_cast %1010 : vector<8xf32> to vector<8x1xf32>
    %1012 = vector.broadcast %1011 : vector<8x1xf32> to vector<8x8xf32>
    %1013 = arith.subf %1009, %1012 : vector<8x8xf32>
    %1014 = math.exp %1013 : vector<8x8xf32>
    %cst_393 = arith.constant dense<0.000000e+00> : vector<8xf32>
    %1015 = vector.multi_reduction <add>, %1014, %cst_393 [1] : vector<8x8xf32> to vector<8xf32>
    %1016 = vector.shape_cast %1015 : vector<8xf32> to vector<8x1xf32>
    %1017 = vector.broadcast %1016 : vector<8x1xf32> to vector<8x8xf32>
    %1018 = arith.divf %1014, %1017 : vector<8x8xf32>
    %cst_394 = arith.constant dense<0.000000e+00> : vector<8x8xf32>
    %1019 = tpu.matmul %1018, %1004, %cst_394 {dimension_numbers = #tpu.dot_dimension_numbers<[1], [0], [0], [1], [0, 0, 1, 1], [], []>} : vector<8x8xf32>, vector<8x8xf32>, vector<8x8xf32> -> vector<8x8xf32>
    %c32_395 = arith.constant 32 : index
    %c24_396 = arith.constant 24 : index
    %1020 = vector.load %arg20[%c32_395, %c24_396] : memref<48x128xf32, #tpu.memory_space<vmem>>, vector<8x8xf32>
    tpu.vector_store %arg20[%c32_395, %c24_396], %1019 {strides = array<i32>} : memref<48x128xf32, #tpu.memory_space<vmem>>, vector<8x8xf32>,
    %1021 = vector.extract_strided_slice %31 {offsets = [5, 0], sizes = [1, 8], strides = [1, 1]} : vector<6x8xf32> to vector<1x8xf32>
    %1022 = vector.extract_strided_slice %618 {offsets = [40, 0], sizes = [8, 128], strides = [1, 1]} : vector<48x128xf32> to vector<8x128xf32>
    %1023 = vector.extract_strided_slice %619 {offsets = [40, 0], sizes = [8, 128], strides = [1, 1]} : vector<48x128xf32> to vector<8x128xf32>
    %1024 = vector.extract_strided_slice %620 {offsets = [40, 0], sizes = [8, 128], strides = [1, 1]} : vector<48x128xf32> to vector<8x128xf32>
    %1025 = vector.extract_strided_slice %1022 {offsets = [0, 0], sizes = [8, 8], strides = [1, 1]} : vector<8x128xf32> to vector<8x8xf32>
    %1026 = vector.extract_strided_slice %1023 {offsets = [0, 0], sizes = [8, 8], strides = [1, 1]} : vector<8x128xf32> to vector<8x8xf32>
    %1027 = vector.extract_strided_slice %1024 {offsets = [0, 0], sizes = [8, 8], strides = [1, 1]} : vector<8x128xf32> to vector<8x8xf32>
    %cst_397 = arith.constant dense<0.000000e+00> : vector<8x8xf32>
    %1028 = tpu.matmul %1025, %1026, %cst_397 {dimension_numbers = #tpu.dot_dimension_numbers<[1], [1], [0], [0], [0, 0, 1, 0], [], []>} : vector<8x8xf32>, vector<8x8xf32>, vector<8x8xf32> -> vector<8x8xf32>
    %cst_398 = arith.constant 0.353553385 : f32
    %1029 = vector.broadcast %cst_398 : f32 to vector<8x8xf32>
    %1030 = arith.mulf %1028, %1029 : vector<8x8xf32>
    %1031 = vector.broadcast %1021 : vector<1x8xf32> to vector<8x8xf32>
    %1032 = arith.addf %1030, %1031 : vector<8x8xf32>
    %cst_399 = arith.constant dense<0xFF800000> : vector<8xf32>
    %1033 = vector.multi_reduction <maximumf>, %1032, %cst_399 [1] : vector<8x8xf32> to vector<8xf32>
    %1034 = vector.shape_cast %1033 : vector<8xf32> to vector<8x1xf32>
    %1035 = vector.broadcast %1034 : vector<8x1xf32> to vector<8x8xf32>
    %1036 = arith.subf %1032, %1035 : vector<8x8xf32>
    %1037 = math.exp %1036 : vector<8x8xf32>
    %cst_400 = arith.constant dense<0.000000e+00> : vector<8xf32>
    %1038 = vector.multi_reduction <add>, %1037, %cst_400 [1] : vector<8x8xf32> to vector<8xf32>
    %1039 = vector.shape_cast %1038 : vector<8xf32> to vector<8x1xf32>
    %1040 = vector.broadcast %1039 : vector<8x1xf32> to vector<8x8xf32>
    %1041 = arith.divf %1037, %1040 : vector<8x8xf32>
    %cst_401 = arith.constant dense<0.000000e+00> : vector<8x8xf32>
    %1042 = tpu.matmul %1041, %1027, %cst_401 {dimension_numbers = #tpu.dot_dimension_numbers<[1], [0], [0], [1], [0, 0, 1, 1], [], []>} : vector<8x8xf32>, vector<8x8xf32>, vector<8x8xf32> -> vector<8x8xf32>
    %c40_402 = arith.constant 40 : index
    %c0_403 = arith.constant 0 : index
    %1043 = vector.load %arg20[%c40_402, %c0_403] : memref<48x128xf32, #tpu.memory_space<vmem>>, vector<8x8xf32>
    tpu.vector_store %arg20[%c40_402, %c0_403], %1042 {strides = array<i32>} : memref<48x128xf32, #tpu.memory_space<vmem>>, vector<8x8xf32>,
    %1044 = vector.extract_strided_slice %1022 {offsets = [0, 8], sizes = [8, 8], strides = [1, 1]} : vector<8x128xf32> to vector<8x8xf32>
    %1045 = vector.extract_strided_slice %1023 {offsets = [0, 8], sizes = [8, 8], strides = [1, 1]} : vector<8x128xf32> to vector<8x8xf32>
    %1046 = vector.extract_strided_slice %1024 {offsets = [0, 8], sizes = [8, 8], strides = [1, 1]} : vector<8x128xf32> to vector<8x8xf32>
    %cst_404 = arith.constant dense<0.000000e+00> : vector<8x8xf32>
    %1047 = tpu.matmul %1044, %1045, %cst_404 {dimension_numbers = #tpu.dot_dimension_numbers<[1], [1], [0], [0], [0, 0, 1, 0], [], []>} : vector<8x8xf32>, vector<8x8xf32>, vector<8x8xf32> -> vector<8x8xf32>
    %cst_405 = arith.constant 0.353553385 : f32
    %1048 = vector.broadcast %cst_405 : f32 to vector<8x8xf32>
    %1049 = arith.mulf %1047, %1048 : vector<8x8xf32>
    %1050 = vector.broadcast %1021 : vector<1x8xf32> to vector<8x8xf32>
    %1051 = arith.addf %1049, %1050 : vector<8x8xf32>
    %cst_406 = arith.constant dense<0xFF800000> : vector<8xf32>
    %1052 = vector.multi_reduction <maximumf>, %1051, %cst_406 [1] : vector<8x8xf32> to vector<8xf32>
    %1053 = vector.shape_cast %1052 : vector<8xf32> to vector<8x1xf32>
    %1054 = vector.broadcast %1053 : vector<8x1xf32> to vector<8x8xf32>
    %1055 = arith.subf %1051, %1054 : vector<8x8xf32>
    %1056 = math.exp %1055 : vector<8x8xf32>
    %cst_407 = arith.constant dense<0.000000e+00> : vector<8xf32>
    %1057 = vector.multi_reduction <add>, %1056, %cst_407 [1] : vector<8x8xf32> to vector<8xf32>
    %1058 = vector.shape_cast %1057 : vector<8xf32> to vector<8x1xf32>
    %1059 = vector.broadcast %1058 : vector<8x1xf32> to vector<8x8xf32>
    %1060 = arith.divf %1056, %1059 : vector<8x8xf32>
    %cst_408 = arith.constant dense<0.000000e+00> : vector<8x8xf32>
    %1061 = tpu.matmul %1060, %1046, %cst_408 {dimension_numbers = #tpu.dot_dimension_numbers<[1], [0], [0], [1], [0, 0, 1, 1], [], []>} : vector<8x8xf32>, vector<8x8xf32>, vector<8x8xf32> -> vector<8x8xf32>
    %c40_409 = arith.constant 40 : index
    %c8_410 = arith.constant 8 : index
    %1062 = vector.load %arg20[%c40_409, %c8_410] : memref<48x128xf32, #tpu.memory_space<vmem>>, vector<8x8xf32>
    tpu.vector_store %arg20[%c40_409, %c8_410], %1061 {strides = array<i32>} : memref<48x128xf32, #tpu.memory_space<vmem>>, vector<8x8xf32>,
    %1063 = vector.extract_strided_slice %1022 {offsets = [0, 16], sizes = [8, 8], strides = [1, 1]} : vector<8x128xf32> to vector<8x8xf32>
    %1064 = vector.extract_strided_slice %1023 {offsets = [0, 16], sizes = [8, 8], strides = [1, 1]} : vector<8x128xf32> to vector<8x8xf32>
    %1065 = vector.extract_strided_slice %1024 {offsets = [0, 16], sizes = [8, 8], strides = [1, 1]} : vector<8x128xf32> to vector<8x8xf32>
    %cst_411 = arith.constant dense<0.000000e+00> : vector<8x8xf32>
    %1066 = tpu.matmul %1063, %1064, %cst_411 {dimension_numbers = #tpu.dot_dimension_numbers<[1], [1], [0], [0], [0, 0, 1, 0], [], []>} : vector<8x8xf32>, vector<8x8xf32>, vector<8x8xf32> -> vector<8x8xf32>
    %cst_412 = arith.constant 0.353553385 : f32
    %1067 = vector.broadcast %cst_412 : f32 to vector<8x8xf32>
    %1068 = arith.mulf %1066, %1067 : vector<8x8xf32>
    %1069 = vector.broadcast %1021 : vector<1x8xf32> to vector<8x8xf32>
    %1070 = arith.addf %1068, %1069 : vector<8x8xf32>
    %cst_413 = arith.constant dense<0xFF800000> : vector<8xf32>
    %1071 = vector.multi_reduction <maximumf>, %1070, %cst_413 [1] : vector<8x8xf32> to vector<8xf32>
    %1072 = vector.shape_cast %1071 : vector<8xf32> to vector<8x1xf32>
    %1073 = vector.broadcast %1072 : vector<8x1xf32> to vector<8x8xf32>
    %1074 = arith.subf %1070, %1073 : vector<8x8xf32>
    %1075 = math.exp %1074 : vector<8x8xf32>
    %cst_414 = arith.constant dense<0.000000e+00> : vector<8xf32>
    %1076 = vector.multi_reduction <add>, %1075, %cst_414 [1] : vector<8x8xf32> to vector<8xf32>
    %1077 = vector.shape_cast %1076 : vector<8xf32> to vector<8x1xf32>
    %1078 = vector.broadcast %1077 : vector<8x1xf32> to vector<8x8xf32>
    %1079 = arith.divf %1075, %1078 : vector<8x8xf32>
    %cst_415 = arith.constant dense<0.000000e+00> : vector<8x8xf32>
    %1080 = tpu.matmul %1079, %1065, %cst_415 {dimension_numbers = #tpu.dot_dimension_numbers<[1], [0], [0], [1], [0, 0, 1, 1], [], []>} : vector<8x8xf32>, vector<8x8xf32>, vector<8x8xf32> -> vector<8x8xf32>
    %c40_416 = arith.constant 40 : index
    %c16_417 = arith.constant 16 : index
    %1081 = vector.load %arg20[%c40_416, %c16_417] : memref<48x128xf32, #tpu.memory_space<vmem>>, vector<8x8xf32>
    tpu.vector_store %arg20[%c40_416, %c16_417], %1080 {strides = array<i32>} : memref<48x128xf32, #tpu.memory_space<vmem>>, vector<8x8xf32>,
    %1082 = vector.extract_strided_slice %1022 {offsets = [0, 24], sizes = [8, 8], strides = [1, 1]} : vector<8x128xf32> to vector<8x8xf32>
    %1083 = vector.extract_strided_slice %1023 {offsets = [0, 24], sizes = [8, 8], strides = [1, 1]} : vector<8x128xf32> to vector<8x8xf32>
    %1084 = vector.extract_strided_slice %1024 {offsets = [0, 24], sizes = [8, 8], strides = [1, 1]} : vector<8x128xf32> to vector<8x8xf32>
    %cst_418 = arith.constant dense<0.000000e+00> : vector<8x8xf32>
    %1085 = tpu.matmul %1082, %1083, %cst_418 {dimension_numbers = #tpu.dot_dimension_numbers<[1], [1], [0], [0], [0, 0, 1, 0], [], []>} : vector<8x8xf32>, vector<8x8xf32>, vector<8x8xf32> -> vector<8x8xf32>
    %cst_419 = arith.constant 0.353553385 : f32
    %1086 = vector.broadcast %cst_419 : f32 to vector<8x8xf32>
    %1087 = arith.mulf %1085, %1086 : vector<8x8xf32>
    %1088 = vector.broadcast %1021 : vector<1x8xf32> to vector<8x8xf32>
    %1089 = arith.addf %1087, %1088 : vector<8x8xf32>
    %cst_420 = arith.constant dense<0xFF800000> : vector<8xf32>
    %1090 = vector.multi_reduction <maximumf>, %1089, %cst_420 [1] : vector<8x8xf32> to vector<8xf32>
    %1091 = vector.shape_cast %1090 : vector<8xf32> to vector<8x1xf32>
    %1092 = vector.broadcast %1091 : vector<8x1xf32> to vector<8x8xf32>
    %1093 = arith.subf %1089, %1092 : vector<8x8xf32>
    %1094 = math.exp %1093 : vector<8x8xf32>
    %cst_421 = arith.constant dense<0.000000e+00> : vector<8xf32>
    %1095 = vector.multi_reduction <add>, %1094, %cst_421 [1] : vector<8x8xf32> to vector<8xf32>
    %1096 = vector.shape_cast %1095 : vector<8xf32> to vector<8x1xf32>
    %1097 = vector.broadcast %1096 : vector<8x1xf32> to vector<8x8xf32>
    %1098 = arith.divf %1094, %1097 : vector<8x8xf32>
    %cst_422 = arith.constant dense<0.000000e+00> : vector<8x8xf32>
    %1099 = tpu.matmul %1098, %1084, %cst_422 {dimension_numbers = #tpu.dot_dimension_numbers<[1], [0], [0], [1], [0, 0, 1, 1], [], []>} : vector<8x8xf32>, vector<8x8xf32>, vector<8x8xf32> -> vector<8x8xf32>
    %c40_423 = arith.constant 40 : index
    %c24_424 = arith.constant 24 : index
    %1100 = vector.load %arg20[%c40_423, %c24_424] : memref<48x128xf32, #tpu.memory_space<vmem>>, vector<8x8xf32>
    tpu.vector_store %arg20[%c40_423, %c24_424], %1099 {strides = array<i32>} : memref<48x128xf32, #tpu.memory_space<vmem>>, vector<8x8xf32>,
    %c0_425 = arith.constant 0 : index
    %c0_426 = arith.constant 0 : index
    %1101 = vector.load %arg20[%c0_425, %c0_426] : memref<48x128xf32, #tpu.memory_space<vmem>>, vector<48x128xf32>
    %c0_427 = arith.constant 0 : index
    %c1_428 = arith.constant 1 : index
    %c0_429 = arith.constant 0 : index
    %c0_430 = arith.constant 0 : index
    %1102 = vector.load %arg7[%c0_427, %c1_428, %c0_429, %c0_430] : memref<1x2x128x128xf32, #tpu.memory_space<vmem>>, vector<1x1x128x128xf32>
    %1103 = vector.shape_cast %1102 : vector<1x1x128x128xf32> to vector<128x128xf32>
    %cst_431 = arith.constant dense<0.000000e+00> : vector<48x128xf32>
    %1104 = tpu.matmul %1101, %1103, %cst_431 {dimension_numbers = #tpu.dot_dimension_numbers<[1], [0], [0], [1], [0, 0, 1, 1], [], []>} : vector<48x128xf32>, vector<128x128xf32>, vector<48x128xf32> -> vector<48x128xf32>
    %c0_432 = arith.constant 0 : index
    %c1_433 = arith.constant 1 : index
    %c0_434 = arith.constant 0 : index
    %c0_435 = arith.constant 0 : index
    %1105 = vector.load %arg8[%c0_432, %c1_433, %c0_434, %c0_435] : memref<1x2x1x128xf32, #tpu.memory_space<vmem>>, vector<1x1x1x128xf32>
    %1106 = vector.shape_cast %1105 : vector<1x1x1x128xf32> to vector<1x128xf32>
    %1107 = vector.broadcast %1106 : vector<1x128xf32> to vector<48x128xf32>
    %1108 = arith.addf %1104, %1107 : vector<48x128xf32>
    %1109 = arith.addf %1108, %610 : vector<48x128xf32>
    %c0_436 = arith.constant 0 : index
    %c1_437 = arith.constant 1 : index
    %c0_438 = arith.constant 0 : index
    %c0_439 = arith.constant 0 : index
    %1110 = vector.load %arg9[%c0_436, %c1_437, %c0_438, %c0_439] : memref<1x2x1x128xf32, #tpu.memory_space<vmem>>, vector<1x1x1x128xf32>
    %1111 = vector.shape_cast %1110 : vector<1x1x1x128xf32> to vector<1x128xf32>
    %c0_440 = arith.constant 0 : index
    %c1_441 = arith.constant 1 : index
    %c0_442 = arith.constant 0 : index
    %c0_443 = arith.constant 0 : index
    %1112 = vector.load %arg10[%c0_440, %c1_441, %c0_442, %c0_443] : memref<1x2x1x128xf32, #tpu.memory_space<vmem>>, vector<1x1x1x128xf32>
    %1113 = vector.shape_cast %1112 : vector<1x1x1x128xf32> to vector<1x128xf32>
    %cst_444 = arith.constant dense<0.000000e+00> : vector<48xf32>
    %1114 = vector.multi_reduction <add>, %1109, %cst_444 [1] : vector<48x128xf32> to vector<48xf32>
    %1115 = vector.shape_cast %1114 : vector<48xf32> to vector<48x1xf32>
    %cst_445 = arith.constant 3.125000e-02 : f32
    %1116 = vector.broadcast %cst_445 : f32 to vector<48x1xf32>
    %1117 = arith.mulf %1115, %1116 : vector<48x1xf32>
    %1118 = arith.mulf %1109, %1109 : vector<48x128xf32>
    %cst_446 = arith.constant dense<0.000000e+00> : vector<48xf32>
    %1119 = vector.multi_reduction <add>, %1118, %cst_446 [1] : vector<48x128xf32> to vector<48xf32>
    %1120 = vector.shape_cast %1119 : vector<48xf32> to vector<48x1xf32>
    %cst_447 = arith.constant 3.125000e-02 : f32
    %1121 = vector.broadcast %cst_447 : f32 to vector<48x1xf32>
    %1122 = arith.mulf %1120, %1121 : vector<48x1xf32>
    %1123 = arith.mulf %1117, %1117 : vector<48x1xf32>
    %1124 = arith.subf %1122, %1123 : vector<48x1xf32>
    %1125 = vector.broadcast %1117 : vector<48x1xf32> to vector<48x128xf32>
    %1126 = arith.subf %1109, %1125 : vector<48x128xf32>
    %cst_448 = arith.constant 9.99999996E-13 : f32
    %1127 = vector.broadcast %cst_448 : f32 to vector<48x1xf32>
    %1128 = arith.addf %1124, %1127 : vector<48x1xf32>
    %1129 = math.rsqrt %1128 : vector<48x1xf32>
    %1130 = vector.broadcast %1129 : vector<48x1xf32> to vector<48x128xf32>
    %1131 = arith.mulf %1126, %1130 : vector<48x128xf32>
    %1132 = vector.broadcast %1111 : vector<1x128xf32> to vector<48x128xf32>
    %1133 = arith.mulf %1131, %1132 : vector<48x128xf32>
    %1134 = vector.broadcast %1113 : vector<1x128xf32> to vector<48x128xf32>
    %1135 = arith.addf %1133, %1134 : vector<48x128xf32>
    %c0_449 = arith.constant 0 : index
    %c1_450 = arith.constant 1 : index
    %c0_451 = arith.constant 0 : index
    %c0_452 = arith.constant 0 : index
    %1136 = vector.load %arg11[%c0_449, %c1_450, %c0_451, %c0_452] : memref<1x2x128x128xf32, #tpu.memory_space<vmem>>, vector<1x1x128x128xf32>
    %1137 = vector.shape_cast %1136 : vector<1x1x128x128xf32> to vector<128x128xf32>
    %cst_453 = arith.constant dense<0.000000e+00> : vector<48x128xf32>
    %1138 = tpu.matmul %1135, %1137, %cst_453 {dimension_numbers = #tpu.dot_dimension_numbers<[1], [0], [0], [1], [0, 0, 1, 1], [], []>} : vector<48x128xf32>, vector<128x128xf32>, vector<48x128xf32> -> vector<48x128xf32>
    %c0_454 = arith.constant 0 : index
    %c1_455 = arith.constant 1 : index
    %c0_456 = arith.constant 0 : index
    %c0_457 = arith.constant 0 : index
    %1139 = vector.load %arg12[%c0_454, %c1_455, %c0_456, %c0_457] : memref<1x2x1x128xf32, #tpu.memory_space<vmem>>, vector<1x1x1x128xf32>
    %1140 = vector.shape_cast %1139 : vector<1x1x1x128xf32> to vector<1x128xf32>
    %1141 = vector.broadcast %1140 : vector<1x128xf32> to vector<48x128xf32>
    %1142 = arith.addf %1138, %1141 : vector<48x128xf32>
    %cst_458 = arith.constant 5.000000e-01 : f32
    %1143 = vector.broadcast %cst_458 : f32 to vector<48x128xf32>
    %1144 = arith.mulf %1143, %1142 : vector<48x128xf32>
    %cst_459 = arith.constant 4.471500e-02 : f32
    %1145 = vector.broadcast %cst_459 : f32 to vector<48x128xf32>
    %1146 = arith.mulf %1145, %1142 : vector<48x128xf32>
    %1147 = arith.mulf %1146, %1142 : vector<48x128xf32>
    %1148 = arith.mulf %1147, %1142 : vector<48x128xf32>
    %1149 = arith.addf %1142, %1148 : vector<48x128xf32>
    %cst_460 = arith.constant 0.797884583 : f32
    %1150 = vector.broadcast %cst_460 : f32 to vector<48x128xf32>
    %1151 = arith.mulf %1150, %1149 : vector<48x128xf32>
    %1152 = math.tanh %1151 : vector<48x128xf32>
    %cst_461 = arith.constant 1.000000e+00 : f32
    %1153 = vector.broadcast %cst_461 : f32 to vector<48x128xf32>
    %1154 = arith.addf %1153, %1152 : vector<48x128xf32>
    %1155 = arith.mulf %1144, %1154 : vector<48x128xf32>
    %c0_462 = arith.constant 0 : index
    %c1_463 = arith.constant 1 : index
    %c0_464 = arith.constant 0 : index
    %c0_465 = arith.constant 0 : index
    %1156 = vector.load %arg13[%c0_462, %c1_463, %c0_464, %c0_465] : memref<1x2x128x128xf32, #tpu.memory_space<vmem>>, vector<1x1x128x128xf32>
    %1157 = vector.shape_cast %1156 : vector<1x1x128x128xf32> to vector<128x128xf32>
    %cst_466 = arith.constant dense<0.000000e+00> : vector<48x128xf32>
    %1158 = tpu.matmul %1155, %1157, %cst_466 {dimension_numbers = #tpu.dot_dimension_numbers<[1], [0], [0], [1], [0, 0, 1, 1], [], []>} : vector<48x128xf32>, vector<128x128xf32>, vector<48x128xf32> -> vector<48x128xf32>
    %c0_467 = arith.constant 0 : index
    %c1_468 = arith.constant 1 : index
    %c0_469 = arith.constant 0 : index
    %c0_470 = arith.constant 0 : index
    %1159 = vector.load %arg14[%c0_467, %c1_468, %c0_469, %c0_470] : memref<1x2x1x128xf32, #tpu.memory_space<vmem>>, vector<1x1x1x128xf32>
    %1160 = vector.shape_cast %1159 : vector<1x1x1x128xf32> to vector<1x128xf32>
    %1161 = vector.broadcast %1160 : vector<1x128xf32> to vector<48x128xf32>
    %1162 = arith.addf %1158, %1161 : vector<48x128xf32>
    %1163 = arith.addf %1162, %1135 : vector<48x128xf32>
    %c0_471 = arith.constant 0 : index
    %c1_472 = arith.constant 1 : index
    %c0_473 = arith.constant 0 : index
    %c0_474 = arith.constant 0 : index
    %1164 = vector.load %arg15[%c0_471, %c1_472, %c0_473, %c0_474] : memref<1x2x1x128xf32, #tpu.memory_space<vmem>>, vector<1x1x1x128xf32>
    %1165 = vector.shape_cast %1164 : vector<1x1x1x128xf32> to vector<1x128xf32>
    %c0_475 = arith.constant 0 : index
    %c1_476 = arith.constant 1 : index
    %c0_477 = arith.constant 0 : index
    %c0_478 = arith.constant 0 : index
    %1166 = vector.load %arg16[%c0_475, %c1_476, %c0_477, %c0_478] : memref<1x2x1x128xf32, #tpu.memory_space<vmem>>, vector<1x1x1x128xf32>
    %1167 = vector.shape_cast %1166 : vector<1x1x1x128xf32> to vector<1x128xf32>
    %cst_479 = arith.constant dense<0.000000e+00> : vector<48xf32>
    %1168 = vector.multi_reduction <add>, %1163, %cst_479 [1] : vector<48x128xf32> to vector<48xf32>
    %1169 = vector.shape_cast %1168 : vector<48xf32> to vector<48x1xf32>
    %cst_480 = arith.constant 3.125000e-02 : f32
    %1170 = vector.broadcast %cst_480 : f32 to vector<48x1xf32>
    %1171 = arith.mulf %1169, %1170 : vector<48x1xf32>
    %1172 = arith.mulf %1163, %1163 : vector<48x128xf32>
    %cst_481 = arith.constant dense<0.000000e+00> : vector<48xf32>
    %1173 = vector.multi_reduction <add>, %1172, %cst_481 [1] : vector<48x128xf32> to vector<48xf32>
    %1174 = vector.shape_cast %1173 : vector<48xf32> to vector<48x1xf32>
    %cst_482 = arith.constant 3.125000e-02 : f32
    %1175 = vector.broadcast %cst_482 : f32 to vector<48x1xf32>
    %1176 = arith.mulf %1174, %1175 : vector<48x1xf32>
    %1177 = arith.mulf %1171, %1171 : vector<48x1xf32>
    %1178 = arith.subf %1176, %1177 : vector<48x1xf32>
    %1179 = vector.broadcast %1171 : vector<48x1xf32> to vector<48x128xf32>
    %1180 = arith.subf %1163, %1179 : vector<48x128xf32>
    %cst_483 = arith.constant 9.99999996E-13 : f32
    %1181 = vector.broadcast %cst_483 : f32 to vector<48x1xf32>
    %1182 = arith.addf %1178, %1181 : vector<48x1xf32>
    %1183 = math.rsqrt %1182 : vector<48x1xf32>
    %1184 = vector.broadcast %1183 : vector<48x1xf32> to vector<48x128xf32>
    %1185 = arith.mulf %1180, %1184 : vector<48x128xf32>
    %1186 = vector.broadcast %1165 : vector<1x128xf32> to vector<48x128xf32>
    %1187 = arith.mulf %1185, %1186 : vector<48x128xf32>
    %1188 = vector.broadcast %1167 : vector<1x128xf32> to vector<48x128xf32>
    %1189 = arith.addf %1187, %1188 : vector<48x128xf32>
    %1190 = tpu.iota {dimensions = array<i32: 1>} : vector<8x48xi32>
    %1191 = tpu.iota {dimensions = array<i32: 0>} : vector<8x48xi32>
    %c8_i32 = arith.constant 8 : i32
    %1192 = vector.broadcast %c8_i32 : i32 to vector<8x48xi32>
    %1193 = arith.muli %1191, %1192 : vector<8x48xi32>
    %1194 = arith.cmpi eq, %1190, %1193 : vector<8x48xi32>
    %1195 = arith.extui %1194 : vector<8x48xi1> to vector<8x48xi32>
    %1196 = arith.sitofp %1195 : vector<8x48xi32> to vector<8x48xf32>
    %cst_484 = arith.constant dense<0.000000e+00> : vector<8x128xf32>
    %1197 = tpu.matmul %1196, %1189, %cst_484 {dimension_numbers = #tpu.dot_dimension_numbers<[1], [0], [0], [1], [0, 0, 1, 1], [], []>} : vector<8x48xf32>, vector<48x128xf32>, vector<8x128xf32> -> vector<8x128xf32>
    %c0_485 = arith.constant 0 : index
    %c0_486 = arith.constant 0 : index
    %c0_487 = arith.constant 0 : index
    %1198 = vector.load %arg17[%c0_485, %c0_486, %c0_487] : memref<1x128x128xf32, #tpu.memory_space<vmem>>, vector<1x128x128xf32>
    %1199 = vector.shape_cast %1198 : vector<1x128x128xf32> to vector<128x128xf32>
    %cst_488 = arith.constant dense<0.000000e+00> : vector<8x128xf32>
    %1200 = tpu.matmul %1197, %1199, %cst_488 {dimension_numbers = #tpu.dot_dimension_numbers<[1], [0], [0], [1], [0, 0, 1, 1], [], []>} : vector<8x128xf32>, vector<128x128xf32>, vector<8x128xf32> -> vector<8x128xf32>
    %c0_489 = arith.constant 0 : index
    %c0_490 = arith.constant 0 : index
    %c0_491 = arith.constant 0 : index
    %1201 = vector.load %arg18[%c0_489, %c0_490, %c0_491] : memref<1x1x128xf32, #tpu.memory_space<vmem>>, vector<1x1x128xf32>
    %1202 = vector.shape_cast %1201 : vector<1x1x128xf32> to vector<1x128xf32>
    %1203 = vector.broadcast %1202 : vector<1x128xf32> to vector<8x128xf32>
    %1204 = arith.addf %1200, %1203 : vector<8x128xf32>
    %1205 = math.tanh %1204 : vector<8x128xf32>
    %c0_492 = arith.constant 0 : index
    %c0_493 = arith.constant 0 : index
    %c0_494 = arith.constant 0 : index
    %1206 = vector.load %arg19[%c0_492, %c0_493, %c0_494] : memref<1x8x128xf32, #tpu.memory_space<vmem>>, vector<1x8x128xf32>
    %1207 = vector.shape_cast %1206 : vector<1x8x128xf32> to vector<8x128xf32>
    %1208 = vector.shape_cast %1205 : vector<8x128xf32> to vector<1x8x128xf32>
    tpu.vector_store %arg19[%c0_492, %c0_493, %c0_494], %1208 {strides = array<i32>} : memref<1x8x128xf32, #tpu.memory_space<vmem>>, vector<1x8x128xf32>,
    return
  }
  func.func @transform_0(%arg0: i32) -> (i32, i32, i32) {
    %c0_i32 = arith.constant 0 : i32
    %c0_i32_0 = arith.constant 0 : i32
    %c0_i32_1 = arith.constant 0 : i32
    return %arg0, %c0_i32, %c0_i32_0 : i32, i32, i32
  }
  func.func @transform_1(%arg0: i32) -> (i32, i32, i32) {
    %c0_i32 = arith.constant 0 : i32
    %c0_i32_0 = arith.constant 0 : i32
    %c0_i32_1 = arith.constant 0 : i32
    return %arg0, %c0_i32, %c0_i32_0 : i32, i32, i32
  }
  func.func @transform_2(%arg0: i32) -> (i32, i32, i32) {
    %c0_i32 = arith.constant 0 : i32
    %c0_i32_0 = arith.constant 0 : i32
    %c0_i32_1 = arith.constant 0 : i32
    return %arg0, %c0_i32, %c0_i32_0 : i32, i32, i32
  }
  func.func @transform_3(%arg0: i32) -> (i32, i32, i32) {
    %c0_i32 = arith.constant 0 : i32
    %c0_i32_0 = arith.constant 0 : i32
    %c0_i32_1 = arith.constant 0 : i32
    return %arg0, %c0_i32, %c0_i32_0 : i32, i32, i32
  }
  func.func @transform_4(%arg0: i32) -> (i32, i32, i32, i32) {
    %c0_i32 = arith.constant 0 : i32
    %c0_i32_0 = arith.constant 0 : i32
    %c0_i32_1 = arith.constant 0 : i32
    %c0_i32_2 = arith.constant 0 : i32
    return %arg0, %c0_i32, %c0_i32_0, %c0_i32_1 : i32, i32, i32, i32
  }
  func.func @transform_5(%arg0: i32) -> (i32, i32, i32, i32) {
    %c0_i32 = arith.constant 0 : i32
    %c0_i32_0 = arith.constant 0 : i32
    %c0_i32_1 = arith.constant 0 : i32
    %c0_i32_2 = arith.constant 0 : i32
    return %arg0, %c0_i32, %c0_i32_0, %c0_i32_1 : i32, i32, i32, i32
  }
  func.func @transform_6(%arg0: i32) -> (i32, i32, i32, i32) {
    %c0_i32 = arith.constant 0 : i32
    %c0_i32_0 = arith.constant 0 : i32
    %c0_i32_1 = arith.constant 0 : i32
    %c0_i32_2 = arith.constant 0 : i32
    return %arg0, %c0_i32, %c0_i32_0, %c0_i32_1 : i32, i32, i32, i32
  }
  func.func @transform_7(%arg0: i32) -> (i32, i32, i32, i32) {
    %c0_i32 = arith.constant 0 : i32
    %c0_i32_0 = arith.constant 0 : i32
    %c0_i32_1 = arith.constant 0 : i32
    %c0_i32_2 = arith.constant 0 : i32
    return %arg0, %c0_i32, %c0_i32_0, %c0_i32_1 : i32, i32, i32, i32
  }
  func.func @transform_8(%arg0: i32) -> (i32, i32, i32, i32) {
    %c0_i32 = arith.constant 0 : i32
    %c0_i32_0 = arith.constant 0 : i32
    %c0_i32_1 = arith.constant 0 : i32
    %c0_i32_2 = arith.constant 0 : i32
    return %arg0, %c0_i32, %c0_i32_0, %c0_i32_1 : i32, i32, i32, i32
  }
  func.func @transform_9(%arg0: i32) -> (i32, i32, i32, i32) {
    %c0_i32 = arith.constant 0 : i32
    %c0_i32_0 = arith.constant 0 : i32
    %c0_i32_1 = arith.constant 0 : i32
    %c0_i32_2 = arith.constant 0 : i32
    return %arg0, %c0_i32, %c0_i32_0, %c0_i32_1 : i32, i32, i32, i32
  }
  func.func @transform_10(%arg0: i32) -> (i32, i32, i32, i32) {
    %c0_i32 = arith.constant 0 : i32
    %c0_i32_0 = arith.constant 0 : i32
    %c0_i32_1 = arith.constant 0 : i32
    %c0_i32_2 = arith.constant 0 : i32
    return %arg0, %c0_i32, %c0_i32_0, %c0_i32_1 : i32, i32, i32, i32
  }
  func.func @transform_11(%arg0: i32) -> (i32, i32, i32, i32) {
    %c0_i32 = arith.constant 0 : i32
    %c0_i32_0 = arith.constant 0 : i32
    %c0_i32_1 = arith.constant 0 : i32
    %c0_i32_2 = arith.constant 0 : i32
    return %arg0, %c0_i32, %c0_i32_0, %c0_i32_1 : i32, i32, i32, i32
  }
  func.func @transform_12(%arg0: i32) -> (i32, i32, i32, i32) {
    %c0_i32 = arith.constant 0 : i32
    %c0_i32_0 = arith.constant 0 : i32
    %c0_i32_1 = arith.constant 0 : i32
    %c0_i32_2 = arith.constant 0 : i32
    return %arg0, %c0_i32, %c0_i32_0, %c0_i32_1 : i32, i32, i32, i32
  }
  func.func @transform_13(%arg0: i32) -> (i32, i32, i32, i32) {
    %c0_i32 = arith.constant 0 : i32
    %c0_i32_0 = arith.constant 0 : i32
    %c0_i32_1 = arith.constant 0 : i32
    %c0_i32_2 = arith.constant 0 : i32
    return %arg0, %c0_i32, %c0_i32_0, %c0_i32_1 : i32, i32, i32, i32
  }
  func.func @transform_14(%arg0: i32) -> (i32, i32, i32, i32) {
    %c0_i32 = arith.constant 0 : i32
    %c0_i32_0 = arith.constant 0 : i32
    %c0_i32_1 = arith.constant 0 : i32
    %c0_i32_2 = arith.constant 0 : i32
    return %arg0, %c0_i32, %c0_i32_0, %c0_i32_1 : i32, i32, i32, i32
  }
  func.func @transform_15(%arg0: i32) -> (i32, i32, i32, i32) {
    %c0_i32 = arith.constant 0 : i32
    %c0_i32_0 = arith.constant 0 : i32
    %c0_i32_1 = arith.constant 0 : i32
    %c0_i32_2 = arith.constant 0 : i32
    return %arg0, %c0_i32, %c0_i32_0, %c0_i32_1 : i32, i32, i32, i32
  }
  func.func @transform_16(%arg0: i32) -> (i32, i32, i32) {
    %c0_i32 = arith.constant 0 : i32
    %c0_i32_0 = arith.constant 0 : i32
    %c0_i32_1 = arith.constant 0 : i32
    return %arg0, %c0_i32, %c0_i32_0 : i32, i32, i32
  }
  func.func @transform_17(%arg0: i32) -> (i32, i32, i32) {
    %c0_i32 = arith.constant 0 : i32
    %c0_i32_0 = arith.constant 0 : i32
    %c0_i32_1 = arith.constant 0 : i32
    return %arg0, %c0_i32, %c0_i32_0 : i32, i32, i32
  }
  func.func @transform_18(%arg0: i32) -> (i32, i32, i32) {
    %c0_i32 = arith.constant 0 : i32
    %c0_i32_0 = arith.constant 0 : i32
    %c0_i32_1 = arith.constant 0 : i32
    return %arg0, %c0_i32, %c0_i32_0 : i32, i32, i32
  }
}

</mosaic_0001>

<bundles_post_ra>
// kernel: simmatch_v3_forward.1
= control target key start
LH: loop header
LB: loop body
LE: loop exit
PB: predicated region body
PF: predicated region fallthrough
CT: control target
= control target key end

     0   :  { %s13712_s27 = smov 0   ;;  %s16015_s0 = inlined_call_operand.vmem [shape: f32[2,48,128], index: 0, kind: input, shape index: {}]   ;;  %s16016_s1 = inlined_call_operand.vmem [shape: f32[2,6,8], index: 1, kind: input, shape index: {}]   ;;  %s16017_s2 = inlined_call_operand.vmem [shape: f32[2,1,128], index: 2, kind: input, shape index: {}]   ;;  %s16018_s3 = inlined_call_operand.vmem [shape: f32[2,1,128], index: 3, kind: input, shape index: {}]   ;;  %s16019_s4 = inlined_call_operand.vmem [shape: f32[2,2,128,384], index: 4, kind: input, shape index: {}]   ;;  %s16020_s5 = inlined_call_operand.vmem [shape: f32[2,2,1,384], index: 5, kind: input, shape index: {}]   ;;  %s16021_s6 = inlined_call_operand.vmem [shape: f32[2,2,128,128], index: 6, kind: input, shape index: {}]   ;;  %s16022_s7 = inlined_call_operand.vmem [shape: f32[2,2,1,128], index: 7, kind: input, shape index: {}]   ;;  %s16023_s8 = inlined_call_operand.vmem [shape: f32[2,2,1,128], index: 8, kind: input, shape index: {}]   ;;  %s16024_s9 = inlined_call_operand.vmem [shape: f32[2,2,1,128], index: 9, kind: input, shape index: {}]   ;;  %s16025_s10 = inlined_call_operand.vmem [shape: f32[2,2,128,128], index: 10, kind: input, shape index: {}]   ;;  %s16026_s11 = inlined_call_operand.vmem [shape: f32[2,2,1,128], index: 11, kind: input, shape index: {}]   ;;  %s16027_s12 = inlined_call_operand.vmem [shape: f32[2,2,128,128], index: 12, kind: input, shape index: {}]   ;;  %s16028_s13 = inlined_call_operand.vmem [shape: f32[2,2,1,128], index: 13, kind: input, shape index: {}]   ;;  %s16029_s14 = inlined_call_operand.vmem [shape: f32[2,2,1,128], index: 14, kind: input, shape index: {}]   ;;  %s16030_s15 = inlined_call_operand.vmem [shape: f32[2,2,1,128], index: 15, kind: input, shape index: {}]   ;;  %s16031_s16 = inlined_call_operand.vmem [shape: f32[2,128,128], index: 16, kind: input, shape index: {}]   ;;  %s16032_s17 = inlined_call_operand.vmem [shape: f32[2,1,128], index: 17, kind: input, shape index: {}]   ;;  %s16033_s18 = inlined_call_operand.vmem [shape: f32[2,8,128], index: 18, kind: output, shape index: {}]  }
   0x1   :  { %16047 = sst [smem:[#allocation3_spill]] %s16015_s0 }
   0x2   :  { %16048 = sst [smem:[#allocation4_spill]] %s16016_s1 }
   0x3   :  { %16049 = sst [smem:[#allocation5_spill]] %s16017_s2 }
   0x4   :  { %16050 = sst [smem:[#allocation6_spill]] %s16018_s3 }
   0x5   :  { %16051 = sst [smem:[#allocation7_spill]] %s16019_s4 }
   0x6   :  { %16052 = sst [smem:[#allocation8_spill]] %s16020_s5 }
   0x7 LB: > { %s11401_s28 = sadd.s32 4294967295, %s13606_s27   ;;  %p11405_p0 = scmp.ge.s32.totalorder %s13606_s27, 1  ;;  %s13606_s27 = sphi %s13712_s27, %s28_s27  }
   0x8   : > { %p667_p1 = scmp.lt.s32.totalorder %s13606_s27, 3 }
   0xa   : > { %p668_p2 = pnand %p11405_p0, %p667_p1 }
   0xb   : > { %p790_p3 = scmp.lt.s32.totalorder (!%p668_p2), %s11401_s28, 1  ;;  %s16053_s1 = sld [smem:[#allocation3_spill]] (!%p668_p2)  ;;  %v13608_v39 = vmov (!%p668_p2), 0.0   ;;  %vm13609_vm0 = vmmov (!%p668_p2), 0   ;;  %vm1247_vm1 = vcmask (!%p668_p2), 64512   ;;  %vm1587_vm2 = vcmask (!%p668_p2), 130112  }
   0xc   : > { %671 = sbr.rel (%p668_p2) target bundleno = 6760 (0x1a68), region = 92  ;;  %s16054_s4 = sld [smem:[#allocation7_spill]] (!%p668_p2)  ;;  %1115 = vmatprep.mubr.f32.mxu0 (!%p668_p2), %v13608_v39  ;;  %869 = vst [vmem:[#allocation2] sm:$0xff] (!%p668_p2), %v13608_v39  ;;  %870 = vst [vmem:[#allocation2 + $0x8] sm:$0xff] (!%p668_p2), %v13608_v39  ;;  %vm1760_vm3 = vcmask (!%p668_p2), 195712   ;;  %vm1933_vm4 = vcmask (!%p668_p2), 261312  }
   0xd   : > { %871 = vst [vmem:[#allocation2 + $0x10] sm:$0xff] (!%p668_p2), %v13608_v39  ;;  %872 = vst [vmem:[#allocation2 + $0x18] sm:$0xff] (!%p668_p2), %v13608_v39  ;;  %s16055_s25 = sld [smem:[#allocation5_spill]] (!%p668_p2)  ;;  %s16056_s3 = sld [smem:[#allocation6_spill]] (!%p668_p2)  ;;  %vm10984_vm6 = vcmask (!%p668_p2), 392192  }
   0xe   : > { %873 = vst [vmem:[#allocation2 + $0x20] sm:$0xff] (!%p668_p2), %v13608_v39  ;;  %874 = vst [vmem:[#allocation2 + $0x28] sm:$0xff] (!%p668_p2), %v13608_v39  ;;  %s16057_s5 = sld [smem:[#allocation8_spill]] (!%p668_p2)  ;;  %s16045_s22 = smov (!%p668_p2), 120  }
   0xf   : > { %s16043_s23 = smov (!%p668_p2), 112  }
  0x13   : > { %s16067_s28 = smov (!%p790_p3, %s11401_s28), 1 }
  0x14   : > { %s13301_s29 = smul.u32 48, %s16067_s28  ;;  %s801_s26 = scalar_lea.vmem %s16055_s25, %s16067_s28 }
  0x15   : > { %s13302_s30 = smul.u32 768, %s16067_s28  ;;  %s804_s0 = scalar_lea.vmem %s16056_s3, %s16067_s28 }
  0x16   : > { %s13727_s20 = scalar_lea.vmem %s16053_s1, %s13301_s29  ;;  %s13303_s19 = smul.u32 6, %s16067_s28 }
  0x17   : > { %s13732_s2 = scalar_lea.vmem %s16054_s4, %s13302_s30  ;;  %v13735_v0 = vld [vmem:[%s13727_s20] sm:$0xff]  ;;  %v13781_v51 = vld [vmem:[%s13727_s20 + $0x8] sm:$0xff]  ;;  %v13784_v52 = vld [vmem:[%s13727_s20 + $0x10] sm:$0xff]  ;;  %s16034_s24 = sshll.u32 %s16067_s28, 3 }
  0x18   : > { %883 = vadd.xlane.f32.xlu0 %v13735_v0  ;;  %v901_v1 = vmul.f32 %v13735_v0, %v13735_v0  ;;  %v987_v2 = vld [vmem:[%s13732_s2 + $0x8] sm:$0xff]  ;;  %v990_v3 = vld [vmem:[%s13732_s2 + $0x20] sm:$0xff]  ;;  %v989_v6 = vld [vmem:[%s13732_s2 + $0x18] sm:$0xff]  ;;  %885 = vadd.xlane.f32.xlu1 %v13781_v51  ;;  %v903_v53 = vmul.f32 %v13784_v52, %v13784_v52  ;;  %v902_v55 = vmul.f32 %v13781_v51, %v13781_v51  ;;  %s13897_s21 = scalar_lea.vmem %s16057_s5, %s13303_s19  ;;  %s16058_s29 = sld [smem:[#allocation4_spill]] }
  0x19   : > { %v986_v4 = vld [vmem:[%s13732_s2] sm:$0xff]  ;;  %v12948_v5 = vpack.c.bf16 %v990_v3, %v987_v2  ;;  %v993_v7 = vld [vmem:[%s13732_s2 + $0x38] sm:$0xff]  ;;  %v996_v8 = vld [vmem:[%s13732_s2 + $0x50] sm:$0xff]  ;;  %s16039_s19 = smov 8   ;;  %s16037_s1 = smov 16  }
  0x1a   : > { %v12950_v9 = vpack.c.bf16 %v989_v6, %v986_v4  ;;  %v12952_v10 = vpack.c.bf16 %v996_v8, %v993_v7  ;;  %v992_v11 = vld [vmem:[%s13732_s2 + $0x30] sm:$0xff]  ;;  %v995_v12 = vld [vmem:[%s13732_s2 + $0x48] sm:$0xff]  ;;  %v1002_v15 = vld [vmem:[%s13732_s2 + $0x80] sm:$0xff]  ;;  %s14555_s25 = sshll.u32 %s16067_s28, 8  ;;  %s16059_s3 = smov 120  }
  0x1b   : > { %12949 = vmatprep.subr.bf16.mxu0 %v12948_v5  ;;  %v12954_v13 = vpack.c.bf16 %v995_v12, %v992_v11  ;;  %v999_v14 = vld [vmem:[%s13732_s2 + $0x68] sm:$0xff]  ;;  %v998_v17 = vld [vmem:[%s13732_s2 + $0x60] sm:$0xff]  ;;  %v1001_v18 = vld [vmem:[%s13732_s2 + $0x78] sm:$0xff]  ;;  %s16060_s4 = smov 112  }
  0x1c   : > { %907 = vadd.xlane.f32.xlu0 %v901_v1  ;;  %12951 = vmatpush1.bf16.msra.mxu0 %v12950_v9  ;;  %v12956_v16 = vpack.c.bf16 %v1002_v15, %v999_v14  ;;  %v12958_v19 = vpack.c.bf16 %v1001_v18, %v998_v17  ;;  %v1005_v20 = vld [vmem:[%s13732_s2 + $0x98] sm:$0xff]  ;;  %v1008_v21 = vld [vmem:[%s13732_s2 + $0xb0] sm:$0xff]  ;;  %v1007_v24 = vld [vmem:[%s13732_s2 + $0xa8] sm:$0xff] }
  0x1d   : > { %12953 = vmatprep.subr.bf16.mxu0 %v12952_v10  ;;  %v12960_v22 = vpack.c.bf16 %v1008_v21, %v1005_v20  ;;  %v1004_v23 = vld [vmem:[%s13732_s2 + $0x90] sm:$0xff]  ;;  %v1011_v26 = vld [vmem:[%s13732_s2 + $0xc8] sm:$0xff]  ;;  %v1014_v27 = vld [vmem:[%s13732_s2 + $0xe0] sm:$0xff] }
  0x1e   : > { %v12962_v25 = vpack.c.bf16 %v1007_v24, %v1004_v23  ;;  %v12964_v28 = vpack.c.bf16 %v1014_v27, %v1011_v26  ;;  %v1010_v29 = vld [vmem:[%s13732_s2 + $0xc0] sm:$0xff]  ;;  %v1013_v30 = vld [vmem:[%s13732_s2 + $0xd8] sm:$0xff]  ;;  %v1020_v33 = vld [vmem:[%s13732_s2 + $0x110] sm:$0xff]  ;;  %s798_s30 = scalar_lea.vmem %s16058_s29, %s16034_s24  ;;  %s14788_s24 = scalar_lea.vmem %s16027_s12, %s14555_s25 }
  0x1f   : > { %v12966_v31 = vpack.c.bf16 %v1013_v30, %v1010_v29  ;;  %v1017_v32 = vld [vmem:[%s13732_s2 + $0xf8] sm:$0xff]  ;;  %v1016_v34 = vld [vmem:[%s13732_s2 + $0xf0] sm:$0xff]  ;;  %v1019_v36 = vld [vmem:[%s13732_s2 + $0x108] sm:$0xff] }
  0x20   : > { %12955 = vmatpush1.bf16.msra.mxu0 %v12954_v13  ;;  %v12968_v35 = vpack.c.bf16 %v1020_v33, %v1017_v32  ;;  %v1023_v37 = vld [vmem:[%s13732_s2 + $0x128] sm:$0xff]  ;;  %v1026_v38 = vld [vmem:[%s13732_s2 + $0x140] sm:$0xff]  ;;  %v12970_v40 = vpack.c.bf16 %v1019_v36, %v1016_v34  ;;  %v1025_v43 = vld [vmem:[%s13732_s2 + $0x138] sm:$0xff]  ;;  %887 = vadd.xlane.f32.xlu0 %v13784_v52 }
  0x21   : > { %12957 = vmatprep.subr.bf16.mxu0 %v12956_v16  ;;  %v12972_v41 = vpack.c.bf16 %v1026_v38, %v1023_v37  ;;  %v1022_v42 = vld [vmem:[%s13732_s2 + $0x120] sm:$0xff]  ;;  %v1029_v44 = vld [vmem:[%s13732_s2 + $0x158] sm:$0xff]  ;;  %v1032_v45 = vld [vmem:[%s13732_s2 + $0x170] sm:$0xff] }
  0x22   : > { %v12974_v46 = vpack.c.bf16 %v1025_v43, %v1022_v42  ;;  %v12976_v47 = vpack.c.bf16 %v1032_v45, %v1029_v44  ;;  %v1028_v48 = vld [vmem:[%s13732_s2 + $0x150] sm:$0xff]  ;;  %v1031_v49 = vld [vmem:[%s13732_s2 + $0x168] sm:$0xff]  ;;  %v13791_v54 = vld [vmem:[%s13727_s20 + $0x18] sm:$0xff] }
  0x23   : > { %v12978_v50 = vpack.c.bf16 %v1031_v49, %v1028_v48  ;;  %889 = vadd.xlane.f32.xlu1 %v13791_v54  ;;  %v13797_v56 = vld [vmem:[%s13727_s20 + $0x20] sm:$0xff]  ;;  %v904_v57 = vmul.f32 %v13791_v54, %v13791_v54  ;;  %v13805_v59 = vld [vmem:[%s13727_s20 + $0x28] sm:$0xff]  ;;  %v988_v61 = vld [vmem:[%s13732_s2 + $0x10] sm:$0xff]  ;;  %s16035_s20 = smov 24  }
  0x24   : > { %12959 = vmatpush1.bf16.msra.mxu0 %v12958_v19  ;;  %911 = vadd.xlane.f32.xlu0 %v903_v53  ;;  %v905_v58 = vmul.f32 %v13797_v56, %v13797_v56  ;;  %v906_v60 = vmul.f32 %v13805_v59, %v13805_v59  ;;  %v991_v62 = vld [vmem:[%s13732_s2 + $0x28] sm:$0xff]  ;;  %v994_v1 = vld [vmem:[%s13732_s2 + $0x40] sm:$0xff]  ;;  %v997_v2 = vld [vmem:[%s13732_s2 + $0x58] sm:$0xff] }
  0x25   : > { %12961 = vmatprep.subr.bf16.mxu0 %v12960_v22  ;;  %v12980_v63 = vpack.c.bf16 %v991_v62, %v988_v61  ;;  %v12984_v3 = vpack.c.bf16 %v997_v2, %v994_v1  ;;  %v1000_v4 = vld [vmem:[%s13732_s2 + $0x70] sm:$0xff]  ;;  %v1003_v5 = vld [vmem:[%s13732_s2 + $0x88] sm:$0xff]  ;;  %v1006_v6 = vld [vmem:[%s13732_s2 + $0xa0] sm:$0xff] }
  0x26   : > { %v12988_v7 = vpack.c.bf16 %v1003_v5, %v1000_v4  ;;  %v1009_v8 = vld [vmem:[%s13732_s2 + $0xb8] sm:$0xff]  ;;  %v1012_v10 = vld [vmem:[%s13732_s2 + $0xd0] sm:$0xff]  ;;  %v1015_v11 = vld [vmem:[%s13732_s2 + $0xe8] sm:$0xff] }
  0x27   : > { %909 = vadd.xlane.f32.xlu1 %v902_v55  ;;  %12981 = vmatprep.subr.bf16.mxu1 %v12980_v63  ;;  %v12992_v9 = vpack.c.bf16 %v1009_v8, %v1006_v6  ;;  %v12996_v12 = vpack.c.bf16 %v1015_v11, %v1012_v10  ;;  %v1018_v13 = vld [vmem:[%s13732_s2 + $0x100] sm:$0xff]  ;;  %v1021_v14 = vld [vmem:[%s13732_s2 + $0x118] sm:$0xff]  ;;  %v1024_v16 = vld [vmem:[%s13732_s2 + $0x130] sm:$0xff] }
  0x28   : > { %12963 = vmatpush1.bf16.msra.mxu0 %v12962_v25  ;;  %891 = vadd.xlane.f32.xlu0 %v13797_v56  ;;  %v13000_v15 = vpack.c.bf16 %v1021_v14, %v1018_v13  ;;  %v1027_v17 = vld [vmem:[%s13732_s2 + $0x148] sm:$0xff]  ;;  %v1030_v19 = vld [vmem:[%s13732_s2 + $0x160] sm:$0xff]  ;;  %v1033_v20 = vld [vmem:[%s13732_s2 + $0x178] sm:$0xff] }
  0x29   : > { %12965 = vmatprep.subr.bf16.mxu0 %v12964_v28  ;;  %12983 = vmatpush3.bf16.msra.mxu1 %v12980_v63  ;;  %v13004_v18 = vpack.c.bf16 %v1027_v17, %v1024_v16  ;;  %v13008_v21 = vpack.c.bf16 %v1033_v20, %v1030_v19  ;;  %v13838_v33 = vld [vmem:[%s804_s0] ss:$0 sm:$0xff]  ;;  %s16041_s0 = smov 104  }
  0x2a   : > { %12985 = vmatprep.subr.bf16.mxu1 %v12984_v3 }
  0x2b   : > { %913 = vadd.xlane.f32.xlu1 %v904_v57 }
  0x2c   : > { %12967 = vmatpush1.bf16.msra.mxu0 %v12966_v31  ;;  %915 = vadd.xlane.f32.xlu0 %v905_v58  ;;  %v13836_v31 = vld [vmem:[%s801_s26] ss:$0 sm:$0xff]  ;;  %s14686_s26 = sshll.u32 %s16067_s28, 1 }
  0x2d   : > { %12969 = vmatprep.subr.bf16.mxu0 %v12968_v35  ;;  %12987 = vmatpush3.bf16.msra.mxu1 %v12984_v3  ;;  %s14872_s29 = scalar_lea.vmem %s16028_s13, %s14686_s26  ;;  %s14951_s5 = scalar_lea.vmem %s16030_s15, %s14686_s26 }
  0x2e   : > { %12989 = vmatprep.subr.bf16.mxu1 %v12988_v7 }
  0x2f   : > { %893 = vadd.xlane.f32.xlu1 %v13805_v59 }
  0x30   : > { %12971 = vmatpush1.bf16.msra.mxu0 %v12970_v40 }
  0x31   : > { %12973 = vmatprep.subr.bf16.mxu0 %v12972_v41  ;;  %12991 = vmatpush3.bf16.msra.mxu1 %v12988_v7 }
  0x32   : > { %12993 = vmatprep.subr.bf16.mxu1 %v12992_v9 }
  0x33   : > { %917 = vadd.xlane.f32.xlu1 %v906_v60 }
  0x34   : > { %12975 = vmatpush1.bf16.msra.mxu0 %v12974_v46 }
  0x35   : > { %12977 = vmatprep.subr.bf16.mxu0 %v12976_v47  ;;  %12995 = vmatpush3.bf16.msra.mxu1 %v12992_v9 }
  0x36   : > { %12997 = vmatprep.subr.bf16.mxu1 %v12996_v12 }
  0x38   : > { %12979 = vmatpush1.bf16.msra.mxu0 %v12978_v50 }
  0x39   : > { %12146 = vmatprep.subr.mxu0 %v13608_v39  ;;  %12999 = vmatpush3.bf16.msra.mxu1 %v12996_v12 }
  0x3a   : > { %13001 = vmatprep.subr.bf16.mxu1 %v13000_v15 }
  0x3d   : > { %13003 = vmatpush3.bf16.msra.mxu1 %v13000_v15 }
  0x3e   : > { %13005 = vmatprep.subr.bf16.mxu1 %v13004_v18 }
  0x41   : > { %13007 = vmatpush3.bf16.msra.mxu1 %v13004_v18 }
  0x42   : > { %13009 = vmatprep.subr.bf16.mxu1 %v13008_v21 }
  0x45   : > { %13011 = vmatpush3.bf16.msra.mxu1 %v13008_v21 }
  0x46   : > { %12131 = vmatprep.subr.mxu1 %v13608_v39 }
  0xa5   : > { %v884_v22 = vpop.xlane.xlu0 %883 }
  0xa6   : > { %v895_v23 = vmul.f32 0.03125, %v884_v22 }
  0xa8   : > { %v925_v25 = vmul.f32 %v895_v23, %v895_v23  ;;  %v937_v29 = vsub.f32 %v13735_v0, %v895_v23  ;;  %v886_v0 = vpop.xlane.xlu1 %885 }
  0xa9   : > { %v908_v24 = vpop.xlane.xlu0 %907  ;;  %v896_v38 = vmul.f32 0.03125, %v886_v0 }
  0xaa   : > { %v919_v26 = vmul.f32 0.03125, %v908_v24 }
  0xab   : > { %v926_v44 = vmul.f32 %v896_v38, %v896_v38  ;;  %v938_v13 = vsub.f32 %v13781_v51, %v896_v38 }
  0xac   : > { %v931_v27 = vsub.f32 %v919_v26, %v925_v25 }
  0xad   : > { %v888_v36 = vpop.xlane.xlu0 %887 }
  0xae   : > { %v943_v28 = vadd.f32 1e-12, %v931_v27  ;;  %v897_v37 = vmul.f32 0.03125, %v888_v36  ;;  %v1034_v36 = vld [vmem:[%s13897_s21] sm:$0x7] }
  0xb0   : > { %13321 = vrsqrt.f32 %v943_v28  ;;  %v927_v40 = vmul.f32 %v897_v37, %v897_v37  ;;  %v890_v41 = vpop.xlane.xlu1 %889  ;;  %v939_v8 = vsub.f32 %v13784_v52, %v897_v37 }
  0xb1   : > { %v912_v42 = vpop.xlane.xlu0 %911  ;;  %v898_v45 = vmul.f32 0.03125, %v890_v41 }
  0xb2   : > { %v921_v43 = vmul.f32 0.03125, %v912_v42 }
  0xb3   : > { %v928_v55 = vmul.f32 %v898_v45, %v898_v45  ;;  %v940_v18 = vsub.f32 %v13791_v54, %v898_v45 }
  0xb4   : > { %v933_v46 = vsub.f32 %v921_v43, %v927_v40  ;;  %v910_v47 = vpop.xlane.xlu1 %909 }
  0xb5   : > { %v892_v48 = vpop.xlane.xlu0 %891  ;;  %v920_v49 = vmul.f32 0.03125, %v910_v47 }
  0xb6   : > { %v945_v50 = vadd.f32 1e-12, %v933_v46  ;;  %v899_v53 = vmul.f32 0.03125, %v892_v48 }
  0xb7   : > { %v932_v57 = vsub.f32 %v920_v49, %v926_v44 }
  0xb8   : > { %13323 = vrsqrt.f32 %v945_v50  ;;  %v929_v58 = vmul.f32 %v899_v53, %v899_v53  ;;  %v914_v60 = vpop.xlane.xlu1 %913  ;;  %v941_v20 = vsub.f32 %v13797_v56, %v899_v53 }
  0xb9   : > { %v916_v61 = vpop.xlane.xlu0 %915  ;;  %v944_v62 = vadd.f32 1e-12, %v932_v57  ;;  %v922_v63 = vmul.f32 0.03125, %v914_v60 }
  0xba   : > { %v13322_v30 = vpop.eup %13321  ;;  %v923_v1 = vmul.f32 0.03125, %v916_v61 }
  0xbb   : > { %v955_v32 = vmul.f32 %v13322_v30, %v937_v29  ;;  %13325 = vrsqrt.f32 %v944_v62  ;;  %v934_v2 = vsub.f32 %v922_v63, %v928_v55 }
  0xbc   : > { %v935_v3 = vsub.f32 %v923_v1, %v929_v58  ;;  %v894_v4 = vpop.xlane.xlu1 %893 }
  0xbd   : > { %v967_v34 = vmul.f32 %v13836_v31, %v955_v32  ;;  %v946_v5 = vadd.f32 1e-12, %v934_v2  ;;  %v900_v6 = vmul.f32 0.03125, %v894_v4 }
  0xbe   : > { %v947_v7 = vadd.f32 1e-12, %v935_v3 }
  0xbf   : > { %v13842_v35 = vadd.f32 %v13838_v33, %v967_v34  ;;  %13327 = vrsqrt.f32 %v946_v5  ;;  %v930_v9 = vmul.f32 %v900_v6, %v900_v6  ;;  %v942_v27 = vsub.f32 %v13805_v59, %v900_v6 }
  0xc0   : > { %13329 = vrsqrt.f32 %v947_v7  ;;  %v918_v10 = vpop.xlane.xlu1 %917 }
  0xc1   : > { %1116 = vmatmul.mubr.f32.vlgmr.msra.gmra.mrb[0].mxu0 %v13842_v35  ;;  %12122 = vmatprep.mubr.f32.mxu1 %v13842_v35  ;;  %v924_v12 = vmul.f32 0.03125, %v918_v10 }
  0xc2   : > { %1121 = vmatprep.mubr.f32.mxu0 %v13608_v39  ;;  %v13324_v11 = vpop.eup %13323 }
  0xc3   : > { %v936_v14 = vsub.f32 %v924_v12, %v930_v9  ;;  %v957_v15 = vmul.f32 %v13324_v11, %v939_v8 }
  0xc5   : > { %v13326_v16 = vpop.eup %13325  ;;  %v948_v17 = vadd.f32 1e-12, %v936_v14  ;;  %v969_v52 = vmul.f32 %v13836_v31, %v957_v15 }
  0xc6   : > { %v956_v19 = vmul.f32 %v13326_v16, %v938_v13 }
  0xc7   : > { %13331 = vrsqrt.f32 %v948_v17  ;;  %v13857_v25 = vadd.f32 %v13838_v33, %v969_v52  ;;  %v13963_v52 = vld [vmem:[%s798_s30] sm:$0x3f]  ;;  %s14564_s30 = scalar_lea.vmem %s16021_s6, %s14555_s25 }
  0xc8   : > { %v968_v21 = vmul.f32 %v13836_v31, %v956_v19 }
  0xc9   : > { %v13328_v22 = vpop.eup %13327 }
  0xca   : > { %v13330_v23 = vpop.eup %13329  ;;  %v13854_v24 = vadd.f32 %v13838_v33, %v968_v21  ;;  %v958_v51 = vmul.f32 %v13328_v22, %v940_v18 }
  0xcb   : > { %v959_v26 = vmul.f32 %v13330_v23, %v941_v20 }
  0xcc   : > { %1122 = vmatmul.mubr.f32.gmra.mrb[2].mxu0 %v13854_v24  ;;  %12123 = vmatmul.mubr.f32.vlgmr.msra.gmra.mrb[0].mxu1 %v13854_v24  ;;  %v970_v54 = vmul.f32 %v13836_v31, %v958_v51 }
  0xcd   : > { %1127 = vmatprep.mubr.f32.mxu0 %v13608_v39  ;;  %12125 = vmatprep.mubr.f32.mxu1 %v13857_v25  ;;  %v971_v56 = vmul.f32 %v13836_v31, %v959_v26 }
  0xce   : > { %v13867_v28 = vadd.f32 %v13838_v33, %v970_v54 }
  0xcf   : > { %v13870_v29 = vadd.f32 %v13838_v33, %v971_v56 }
  0xd0   : > { %1128 = vmatmul.mubr.f32.gmra.mrb[4].mxu0 %v13857_v25  ;;  %12126 = vmatmul.mubr.f32.gmra.mrb[2].mxu1 %v13867_v28 }
  0xd1   : > { %v13332_v30 = vpop.eup %13331  ;;  %1133 = vmatprep.mubr.f32.mxu0 %v13608_v39  ;;  %12128 = vmatprep.mubr.f32.mxu1 %v13870_v29 }
  0xd2   : > { %v960_v32 = vmul.f32 %v13332_v30, %v942_v27 }
  0xd4   : > { %1134 = vmatmul.mubr.f32.gmra.mrb[6].mxu0 %v13867_v28  ;;  %v972_v59 = vmul.f32 %v13836_v31, %v960_v32  ;;  %v1036_v31 = vlaneseq }
  0xd5   : > { %1139 = vmatprep.mubr.f32.mxu0 %v13608_v39 }
  0xd6   : > { %v13880_v34 = vadd.f32 %v13838_v33, %v972_v59  ;;  %v13892_v33 = vshrl.u32 %v1036_v31, 7 }
  0xd8   : > { %1140 = vmatmul.mubr.f32.gmra.mrb[8].mxu0 %v13870_v29  ;;  %12129 = vmatmul.mubr.f32.gmra.mrb[4].mxu1 %v13880_v34  ;;  %v13900_v0 = vsub.s32 0, %v13892_v33  ;;  %v13904_v37 = vsub.s32 1, %v13892_v33  ;;  %v13920_v45 = vsub.s32 2, %v13892_v33 }
  0xd9   : > { %1145 = vmatprep.mubr.f32.mxu0 %v13608_v39  ;;  %12133 = vmatprep.mubr.msk.f32.mxu1 %vm13609_vm0, %v13608_v39 }
  0xda   : > { %v1039_v38 = vrot.slane %v1034_v36, %v13900_v0  ;;  %v1043_v40 = vrot.slane %v1034_v36, %v13904_v37  ;;  %v1047_v46 = vrot.slane %v1034_v36, %v13920_v45  ;;  %v13967_v21 = vrot.slane %v13963_v52, %v13900_v0 }
  0xdc   : > { %1146 = vmatmul.mubr.f32.gmra.mrb[10].mxu0 %v13880_v34 }
  0xdd   : > { %12148 = vmatprep.mubr.msk.f32.mxu0 %vm13609_vm0, %v13608_v39 }
 0x194   : > { %v1117_v41 = vpop.f32.mrb[0].mxu0 }
 0x195   : > { %v13908_v42 = vadd.f32 %v1117_v41, %v1039_v38  ;;  %v1119_v43 = vpop.f32.mrb[1].mxu0 }
 0x196   : > { %v1120_v44 = vadd.f32 %v1119_v43, %v1043_v40 }
 0x197   : > { %1415 = vrot.lane.b32.xlu1 %v13908_v42, %s16045_s22 }
 0x198   : > { %12132 = vmatpush3.xpose.msk.msra.mxu1 %vm1247_vm1, %v1120_v44 }
 0x199   : > { %12136 = vmatprep.subr.mxu1 %v13608_v39 }
 0x19b   : > { %1591 = vrot.lane.b32.xlu1 %v1120_v44, %s16043_s23  ;;  %12134 = vmatmul.mubr.msk.f32.vlgmr.msra.gmra.mrb[6].mxu1 %vm1247_vm1, %v13908_v42 }
 0x19c   : > { %12138 = vmatprep.mubr.msk.f32.mxu1 %vm13609_vm0, %v13608_v39 }
 0x19f   : > { %v1123_v47 = vpop.f32.mrb[2].mxu0  ;;  %v12124_v48 = vpop.f32.mrb[0].mxu1 }
 0x1a0   : > { %v13923_v49 = vadd.f32 %v1123_v47, %v1039_v38  ;;  %v13925_v50 = vadd.f32 %v12124_v48, %v1047_v46  ;;  %v1125_v53 = vpop.f32.mrb[3].mxu0  ;;  %v1218_v55 = vpop.f32.mrb[1].mxu1 }
 0x1a1   : > { %v13927_v57 = vadd.f32 %v1125_v53, %v1043_v40  ;;  %v13929_v58 = vadd.f32 %v1218_v55, %v1047_v46 }
 0x1a3   : > { %v1129_v60 = vpop.f32.mrb[4].mxu0  ;;  %v12127_v61 = vpop.f32.mrb[2].mxu1  ;;  %12137 = vmatpush3.msra.mxu1 %v13929_v58 }
 0x1a4   : > { %v13932_v62 = vadd.f32 %v1129_v60, %v1039_v38  ;;  %v1131_v63 = vpop.f32.mrb[5].mxu0  ;;  %v13934_v1 = vadd.f32 %v12127_v61, %v1047_v46  ;;  %v1228_v2 = vpop.f32.mrb[3].mxu1  ;;  %12141 = vmatprep.subr.mxu1 %v13608_v39 }
 0x1a5   : > { %v13937_v3 = vadd.f32 %v1131_v63, %v1043_v40  ;;  %v13939_v4 = vadd.f32 %v1228_v2, %v1047_v46 }
 0x1a7   : > { %v1135_v5 = vpop.f32.mrb[6].mxu0 }
 0x1a8   : > { %v13941_v6 = vadd.f32 %v1135_v5, %v1039_v38  ;;  %v1137_v7 = vpop.f32.mrb[7].mxu0 }
 0x1a9   : > { %v13943_v8 = vadd.f32 %v1137_v7, %v1043_v40 }
 0x1ab   : > { %v1141_v9 = vpop.f32.mrb[8].mxu0  ;;  %v12130_v10 = vpop.f32.mrb[4].mxu1 }
 0x1ac   : > { %v13945_v11 = vadd.f32 %v1141_v9, %v1039_v38  ;;  %v1143_v12 = vpop.f32.mrb[9].mxu0  ;;  %v13947_v13 = vadd.f32 %v12130_v10, %v1047_v46  ;;  %v1238_v14 = vpop.f32.mrb[5].mxu1 }
 0x1ad   : > { %v13949_v15 = vadd.f32 %v1143_v12, %v1043_v40  ;;  %v13951_v16 = vadd.f32 %v1238_v14, %v1047_v46 }
 0x1af   : > { %v1147_v17 = vpop.f32.mrb[10].mxu0 }
 0x1b0   : > { %v13953_v18 = vadd.f32 %v1147_v17, %v1039_v38  ;;  %v1149_v19 = vpop.f32.mrb[11].mxu0 }
 0x1b1   : > { %v13955_v20 = vadd.f32 %v1149_v19, %v1043_v40 }
 0x209   : > { %v1416_v36 = vpop.permute.xlu1 %1415 }
 0x20d   : > { %v1592_v38 = vpop.permute.xlu1 %1591 }
 0x26e   : > { %v1320_v22 = vpop.f32.mrb[6].mxu1 }
 0x26f   : > { %v1324_v23 = vmul.f32 0.35355338, %v1320_v22  ;;  %v12135_v51 = vpop.f32.mrb[7].mxu1 }
 0x271   : > { %v1329_v26 = vadd.f32 %v13967_v21, %v1324_v23 }
 0x273   : > { %v1330_v54 = vsel %vm1247_vm1, %v1329_v26, -inf }
 0x274   : > { %1331 = vmax.xlane.f32.xlu0 %v1330_v54 }
 0x28a   : > { %1417 = vrot.lane.b32.xlu0 %v1120_v44, %s16045_s22 }
 0x28e   : > { %1764 = vrot.lane.b32.xlu0 %v1120_v44, %s16041_s0 }
 0x292   : > { %2104 = vrot.lane.b32.xlu0 %v13927_v57, %s16045_s22 }
 0x296   : > { %2277 = vrot.lane.b32.xlu0 %v13927_v57, %s16043_s23 }
 0x29a   : > { %2449 = vrot.lane.b32.xlu0 %v13927_v57, %s16041_s0 }
 0x29e   : > { %2788 = vrot.lane.b32.xlu0 %v13937_v3, %s16045_s22 }
 0x2a2   : > { %2961 = vrot.lane.b32.xlu0 %v13937_v3, %s16043_s23 }
 0x2a6   : > { %3133 = vrot.lane.b32.xlu0 %v13937_v3, %s16041_s0 }
 0x2aa   : > { %3472 = vrot.lane.b32.xlu0 %v13943_v8, %s16045_s22 }
 0x2ae   : > { %3645 = vrot.lane.b32.xlu0 %v13943_v8, %s16043_s23 }
 0x2b2   : > { %3817 = vrot.lane.b32.xlu0 %v13943_v8, %s16041_s0 }
 0x2b6   : > { %4156 = vrot.lane.b32.xlu0 %v13949_v15, %s16045_s22 }
 0x2ba   : > { %4329 = vrot.lane.b32.xlu0 %v13949_v15, %s16043_s23 }
 0x2be   : > { %4501 = vrot.lane.b32.xlu0 %v13949_v15, %s16041_s0 }
 0x2c2   : > { %4840 = vrot.lane.b32.xlu0 %v13955_v20, %s16045_s22 }
 0x2c6   : > { %5013 = vrot.lane.b32.xlu0 %v13955_v20, %s16043_s23 }
 0x2ca   : > { %5185 = vrot.lane.b32.xlu0 %v13955_v20, %s16041_s0 }
 0x301   : > { %v1332_v56 = vpop.xlane.xlu0 %1331 }
 0x302   : > { %v1333_v27 = vsub.f32 %v1329_v26, %v1332_v56 }
 0x304   : > { %v1334_v30 = vmul.f32 1.442695, %v1333_v27 }
 0x305   : > { %v1418_v41 = vpop.permute.xlu0 %1417 }
 0x306   : > { %13333 = vpow2.f32 %v1334_v30 }
 0x309   : > { %v1765_v44 = vpop.permute.xlu0 %1764 }
 0x30d   : > { %v2105_v48 = vpop.permute.xlu0 %2104 }
 0x310   : > { %v13334_v32 = vpop.eup %13333 }
 0x311   : > { %v1336_v59 = vsel %vm1247_vm1, %v13334_v32, 0.0  ;;  %v2278_v55 = vpop.permute.xlu0 %2277 }
 0x312   : > { %1337 = vadd.xlane.f32.xlu1 %v1336_v59 }
 0x315   : > { %v2450_v61 = vpop.permute.xlu0 %2449 }
 0x323   : > { %1589 = vrot.lane.b32.xlu1 %v13908_v42, %s16043_s23 }
 0x327   : > { %1762 = vrot.lane.b32.xlu1 %v13908_v42, %s16041_s0 }
 0x32b   : > { %2102 = vrot.lane.b32.xlu1 %v13923_v49, %s16045_s22 }
 0x32f   : > { %2275 = vrot.lane.b32.xlu1 %v13923_v49, %s16043_s23 }
 0x333   : > { %2447 = vrot.lane.b32.xlu1 %v13923_v49, %s16041_s0 }
 0x337   : > { %2786 = vrot.lane.b32.xlu1 %v13932_v62, %s16045_s22 }
 0x33b   : > { %2959 = vrot.lane.b32.xlu1 %v13932_v62, %s16043_s23 }
 0x33f   : > { %3131 = vrot.lane.b32.xlu1 %v13932_v62, %s16041_s0 }
 0x343   : > { %3470 = vrot.lane.b32.xlu1 %v13941_v6, %s16045_s22 }
 0x347   : > { %3643 = vrot.lane.b32.xlu1 %v13941_v6, %s16043_s23 }
 0x34b   : > { %3815 = vrot.lane.b32.xlu1 %v13941_v6, %s16041_s0 }
 0x34f   : > { %4154 = vrot.lane.b32.xlu1 %v13945_v11, %s16045_s22 }
 0x353   : > { %4327 = vrot.lane.b32.xlu1 %v13945_v11, %s16043_s23 }
 0x357   : > { %4499 = vrot.lane.b32.xlu1 %v13945_v11, %s16041_s0 }
 0x35b   : > { %4838 = vrot.lane.b32.xlu1 %v13953_v18, %s16045_s22 }
 0x35f   : > { %5011 = vrot.lane.b32.xlu1 %v13953_v18, %s16043_s23 }
 0x363   : > { %5183 = vrot.lane.b32.xlu1 %v13953_v18, %s16041_s0 }
 0x39f   : > { %v1338_v40 = vpop.xlane.xlu1 %1337 }
 0x3a0   : > { %13335 = vrcp.f32 %v1338_v40 }
 0x3a3   : > { %v1590_v42 = vpop.permute.xlu1 %1589 }
 0x3a7   : > { %v1763_v47 = vpop.permute.xlu1 %1762 }
 0x3aa   : > { %v13336_v43 = vpop.eup %13335 }
 0x3ab   : > { %v1340_v46 = vmul.f32 %v13336_v43, %v13334_v32  ;;  %v2103_v53 = vpop.permute.xlu1 %2102 }
 0x3ad   : > { %12139 = vmatmul.mubr.msk.f32.vlgmr.msra.gmra.mrb[8].mxu1 %vm1247_vm1, %v1340_v46 }
 0x3ae   : > { %12142 = vmatpush3.xpose.msk.msra.mxu1 %vm1247_vm1, %v1418_v41  ;;  %12143 = vmatprep.mubr.msk.f32.mxu1 %vm13609_vm0, %v13608_v39 }
 0x3af   : > { %12151 = vmatprep.subr.mxu1 %v13608_v39  ;;  %v2276_v60 = vpop.permute.xlu1 %2275 }
 0x3b1   : > { %12144 = vmatmul.mubr.msk.f32.vlgmr.msra.gmra.mrb[10].mxu1 %vm1247_vm1, %v1416_v36 }
 0x3b2   : > { %12152 = vmatpush3.xpose.msk.msra.mxu1 %vm1247_vm1, %v1592_v38  ;;  %12153 = vmatprep.mubr.msk.f32.mxu1 %vm13609_vm0, %v13608_v39 }
 0x3b3   : > { %12161 = vmatprep.subr.mxu1 %v13608_v39  ;;  %v2448_v63 = vpop.permute.xlu1 %2447 }
 0x3b5   : > { %12154 = vmatmul.mubr.msk.f32.vlgmr.msra.gmra.mrb[12].mxu1 %vm1247_vm1, %v1590_v42 }
 0x3b6   : > { %12162 = vmatpush3.xpose.msk.msra.mxu1 %vm1247_vm1, %v1765_v44  ;;  %12163 = vmatprep.mubr.msk.f32.mxu1 %vm13609_vm0, %v13608_v39 }
 0x3b7   : > { %12171 = vmatprep.subr.mxu1 %v13608_v39 }
 0x3b9   : > { %12164 = vmatmul.mubr.msk.f32.vlgmr.msra.gmra.mrb[14].mxu1 %vm1247_vm1, %v1763_v47 }
 0x3ba   : > { %12172 = vmatpush3.xpose.msk.msra.mxu1 %vm1247_vm1, %v13927_v57  ;;  %12173 = vmatprep.mubr.msk.f32.mxu1 %vm13609_vm0, %v13608_v39  ;;  %v2789_v57 = vpop.permute.xlu0 %2788 }
 0x3bb   : > { %12181 = vmatprep.subr.mxu1 %v13608_v39 }
 0x3bd   : > { %12174 = vmatmul.mubr.msk.f32.vlgmr.msra.gmra.mrb[16].mxu1 %vm1247_vm1, %v13923_v49  ;;  %v2787_v49 = vpop.permute.xlu1 %2786 }
 0x3be   : > { %12182 = vmatpush3.xpose.msk.msra.mxu1 %vm1247_vm1, %v2105_v48  ;;  %12183 = vmatprep.mubr.msk.f32.mxu1 %vm13609_vm0, %v13608_v39  ;;  %v2962_v2 = vpop.permute.xlu0 %2961  ;;  %v14176_v48 = vrot.slane %v13963_v52, %v13904_v37 }
 0x3bf   : > { %12191 = vmatprep.subr.mxu1 %v13608_v39 }
 0x3c1   : > { %12184 = vmatmul.mubr.msk.f32.vlgmr.msra.gmra.mrb[18].mxu1 %vm1247_vm1, %v2103_v53  ;;  %v2960_v5 = vpop.permute.xlu1 %2959 }
 0x3c2   : > { %12192 = vmatpush3.xpose.msk.msra.mxu1 %vm1247_vm1, %v2278_v55  ;;  %12193 = vmatprep.mubr.msk.f32.mxu1 %vm13609_vm0, %v13608_v39  ;;  %v3134_v7 = vpop.permute.xlu0 %3133 }
 0x3c3   : > { %12201 = vmatprep.subr.mxu1 %v13608_v39 }
 0x3c5   : > { %12194 = vmatmul.mubr.msk.f32.vlgmr.msra.gmra.mrb[20].mxu1 %vm1247_vm1, %v2276_v60 }
 0x3c6   : > { %12202 = vmatpush3.xpose.msk.msra.mxu1 %vm1247_vm1, %v2450_v61  ;;  %12203 = vmatprep.mubr.msk.f32.mxu1 %vm13609_vm0, %v13608_v39  ;;  %v3473_v9 = vpop.permute.xlu0 %3472 }
 0x3c7   : > { %12211 = vmatprep.subr.mxu1 %v13608_v39 }
 0x3c9   : > { %12204 = vmatmul.mubr.msk.f32.vlgmr.msra.gmra.mrb[22].mxu1 %vm1247_vm1, %v2448_v63 }
 0x3ca   : > { %12212 = vmatpush3.xpose.msk.msra.mxu1 %vm1247_vm1, %v13937_v3  ;;  %12213 = vmatprep.mubr.msk.f32.mxu1 %vm13609_vm0, %v13608_v39  ;;  %v3132_v3 = vpop.permute.xlu1 %3131  ;;  %v3646_v10 = vpop.permute.xlu0 %3645 }
 0x3cb   : > { %12221 = vmatprep.subr.mxu1 %v13608_v39 }
 0x3cd   : > { %12214 = vmatmul.mubr.msk.f32.vlgmr.msra.gmra.mrb[24].mxu1 %vm1247_vm1, %v13932_v62 }
 0x3ce   : > { %12222 = vmatpush3.xpose.msk.msra.mxu1 %vm1247_vm1, %v2789_v57  ;;  %12223 = vmatprep.mubr.msk.f32.mxu1 %vm13609_vm0, %v13608_v39  ;;  %v3471_v62 = vpop.permute.xlu1 %3470  ;;  %v3818_v14 = vpop.permute.xlu0 %3817 }
 0x3cf   : > { %12231 = vmatprep.subr.mxu1 %v13608_v39 }
 0x3d1   : > { %12224 = vmatmul.mubr.msk.f32.vlgmr.msra.gmra.mrb[26].mxu1 %vm1247_vm1, %v2787_v49 }
 0x3d2   : > { %12232 = vmatpush3.xpose.msk.msra.mxu1 %vm1247_vm1, %v2962_v2  ;;  %12233 = vmatprep.mubr.msk.f32.mxu1 %vm13609_vm0, %v13608_v39  ;;  %v3644_v12 = vpop.permute.xlu1 %3643 }
 0x3d3   : > { %12241 = vmatprep.subr.mxu1 %v13608_v39 }
 0x3d5   : > { %12234 = vmatmul.mubr.msk.f32.vlgmr.msra.gmra.mrb[28].mxu1 %vm1247_vm1, %v2960_v5 }
 0x3d6   : > { %12242 = vmatpush3.xpose.msk.msra.mxu1 %vm1247_vm1, %v3134_v7  ;;  %12243 = vmatprep.mubr.msk.f32.mxu1 %vm13609_vm0, %v13608_v39 }
 0x3d7   : > { %12251 = vmatprep.subr.mxu1 %v13608_v39 }
 0x3d9   : > { %12244 = vmatmul.mubr.msk.f32.vlgmr.msra.gmra.mrb[30].mxu1 %vm1247_vm1, %v3132_v3 }
 0x3da   : > { %12252 = vmatpush3.xpose.msk.msra.mxu1 %vm1247_vm1, %v13943_v8  ;;  %12253 = vmatprep.mubr.msk.f32.mxu1 %vm13609_vm0, %v13608_v39  ;;  %v3816_v8 = vpop.permute.xlu1 %3815 }
 0x3db   : > { %12261 = vmatprep.subr.mxu1 %v13608_v39 }
 0x3dd   : > { %12254 = vmatmul.mubr.msk.f32.vlgmr.msra.gmra.mrb[32].mxu1 %vm1247_vm1, %v13941_v6  ;;  %v4157_v6 = vpop.permute.xlu0 %4156 }
 0x3de   : > { %12262 = vmatpush3.xpose.msk.msra.mxu1 %vm1247_vm1, %v3473_v9  ;;  %12263 = vmatprep.mubr.msk.f32.mxu1 %vm13609_vm0, %v13608_v39  ;;  %v4155_v17 = vpop.permute.xlu1 %4154 }
 0x3df   : > { %12271 = vmatprep.subr.mxu1 %v13608_v39 }
 0x3e1   : > { %12264 = vmatmul.mubr.msk.f32.vlgmr.msra.gmra.mrb[34].mxu1 %vm1247_vm1, %v3471_v62  ;;  %v4330_v19 = vpop.permute.xlu0 %4329 }
 0x3e2   : > { %12272 = vmatpush3.xpose.msk.msra.mxu1 %vm1247_vm1, %v3646_v10  ;;  %12273 = vmatprep.mubr.msk.f32.mxu1 %vm13609_vm0, %v13608_v39  ;;  %v4328_v22 = vpop.permute.xlu1 %4327 }
 0x3e3   : > { %12281 = vmatprep.subr.mxu1 %v13608_v39 }
 0x3e5   : > { %12274 = vmatmul.mubr.msk.f32.vlgmr.msra.gmra.mrb[36].mxu1 %vm1247_vm1, %v3644_v12 }
 0x3e6   : > { %12282 = vmatpush3.xpose.msk.msra.mxu1 %vm1247_vm1, %v3818_v14  ;;  %12283 = vmatprep.mubr.msk.f32.mxu1 %vm13609_vm0, %v13608_v39 }
 0x3e7   : > { %12291 = vmatprep.subr.mxu1 %v13608_v39 }
 0x3e9   : > { %12284 = vmatmul.mubr.msk.f32.vlgmr.msra.gmra.mrb[38].mxu1 %vm1247_vm1, %v3816_v8 }
 0x3ea   : > { %12292 = vmatpush3.xpose.msk.msra.mxu1 %vm1247_vm1, %v13949_v15  ;;  %12293 = vmatprep.mubr.msk.f32.mxu1 %vm13609_vm0, %v13608_v39  ;;  %v4502_v15 = vpop.permute.xlu0 %4501 }
 0x3eb   : > { %12301 = vmatprep.subr.mxu1 %v13608_v39 }
 0x3ed   : > { %12294 = vmatmul.mubr.msk.f32.vlgmr.msra.gmra.mrb[40].mxu1 %vm1247_vm1, %v13945_v11  ;;  %v4500_v11 = vpop.permute.xlu1 %4499 }
 0x3ee   : > { %12302 = vmatpush3.xpose.msk.msra.mxu1 %vm1247_vm1, %v4157_v6  ;;  %12303 = vmatprep.mubr.msk.f32.mxu1 %vm13609_vm0, %v13608_v39  ;;  %v4841_v23 = vpop.permute.xlu0 %4840 }
 0x3ef   : > { %12311 = vmatprep.subr.mxu1 %v13608_v39 }
 0x3f1   : > { %12304 = vmatmul.mubr.msk.f32.vlgmr.msra.gmra.mrb[42].mxu1 %vm1247_vm1, %v4155_v17  ;;  %v4839_v51 = vpop.permute.xlu1 %4838 }
 0x3f2   : > { %12312 = vmatpush3.xpose.msk.msra.mxu1 %vm1247_vm1, %v4330_v19  ;;  %12313 = vmatprep.mubr.msk.f32.mxu1 %vm13609_vm0, %v13608_v39  ;;  %v5014_v26 = vpop.permute.xlu0 %5013 }
 0x3f3   : > { %12321 = vmatprep.subr.mxu1 %v13608_v39 }
 0x3f5   : > { %12314 = vmatmul.mubr.msk.f32.vlgmr.msra.gmra.mrb[44].mxu1 %vm1247_vm1, %v4328_v22 }
 0x3f6   : > { %12322 = vmatpush3.xpose.msk.msra.mxu1 %vm1247_vm1, %v4502_v15  ;;  %12323 = vmatprep.mubr.msk.f32.mxu1 %vm13609_vm0, %v13608_v39  ;;  %v5186_v54 = vpop.permute.xlu0 %5185 }
 0x3f7   : > { %12331 = vmatprep.subr.mxu1 %v13608_v39 }
 0x3f9   : > { %12324 = vmatmul.mubr.msk.f32.vlgmr.msra.gmra.mrb[46].mxu1 %vm1247_vm1, %v4500_v11 }
 0x3fa   : > { %12332 = vmatpush3.xpose.msk.msra.mxu1 %vm1247_vm1, %v13955_v20  ;;  %12333 = vmatprep.mubr.msk.f32.mxu1 %vm13609_vm0, %v13608_v39  ;;  %v5012_v20 = vpop.permute.xlu1 %5011 }
 0x3fb   : > { %12341 = vmatprep.subr.mxu1 %v13608_v39 }
 0x3fd   : > { %12334 = vmatmul.mubr.msk.f32.vlgmr.msra.gmra.mrb[48].mxu1 %vm1247_vm1, %v13953_v18 }
 0x3fe   : > { %12342 = vmatpush3.xpose.msk.msra.mxu1 %vm1247_vm1, %v4841_v23  ;;  %12343 = vmatprep.mubr.msk.f32.mxu1 %vm13609_vm0, %v13608_v39  ;;  %v5184_v18 = vpop.permute.xlu1 %5183 }
 0x3ff   : > { %12351 = vmatprep.subr.mxu1 %v13608_v39 }
 0x401   : > { %12344 = vmatmul.mubr.msk.f32.vlgmr.msra.gmra.mrb[50].mxu1 %vm1247_vm1, %v4839_v51 }
 0x402   : > { %12352 = vmatpush3.xpose.msk.msra.mxu1 %vm1247_vm1, %v5014_v26  ;;  %12353 = vmatprep.mubr.msk.f32.mxu1 %vm13609_vm0, %v13608_v39 }
 0x403   : > { %12361 = vmatprep.subr.mxu1 %v13608_v39 }
 0x405   : > { %12354 = vmatmul.mubr.msk.f32.vlgmr.msra.gmra.mrb[52].mxu1 %vm1247_vm1, %v5012_v20 }
 0x406   : > { %12362 = vmatpush3.xpose.msk.msra.mxu1 %vm1247_vm1, %v5186_v54  ;;  %12363 = vmatprep.mubr.msk.f32.mxu1 %vm13609_vm0, %v13608_v39 }
 0x409   : > { %12364 = vmatmul.mubr.msk.f32.vlgmr.msra.gmra.mrb[54].mxu1 %vm1247_vm1, %v5184_v18 }
 0x480   : > { %v1410_v56 = vpop.f32.mrb[8].mxu1 }
 0x481   : > { %1414 = vst.msk [vmem:[#allocation2] sm:$0xff] %vm1247_vm1, %v1410_v56  ;;  %v12140_v27 = vpop.f32.mrb[9].mxu1 }
 0x484   : > { %v1489_v30 = vpop.f32.mrb[10].mxu1 }
 0x485   : > { %v1493_v32 = vmul.f32 0.35355338, %v1489_v30  ;;  %v12145_v59 = vpop.f32.mrb[11].mxu1 }
 0x487   : > { %v14165_v36 = vadd.f32 %v1493_v32, %v13967_v21 }
 0x488   : > { %v1663_v38 = vpop.f32.mrb[12].mxu1 }
 0x489   : > { %v1667_v40 = vmul.f32 0.35355338, %v1663_v38  ;;  %v12155_v41 = vpop.f32.mrb[13].mxu1  ;;  %v1495_v42 = vsel %vm1247_vm1, %v14165_v36, -inf }
 0x48a   : > { %1496 = vmax.xlane.f32.xlu0 %v1495_v42 }
 0x48b   : > { %v14170_v39 = vadd.f32 %v1667_v40, %v13967_v21 }
 0x48c   : > { %v1836_v43 = vpop.f32.mrb[14].mxu1 }
 0x48d   : > { %v1840_v44 = vmul.f32 0.35355338, %v1836_v43  ;;  %v12165_v46 = vpop.f32.mrb[15].mxu1  ;;  %v1669_v47 = vsel %vm1247_vm1, %v14170_v39, -inf }
 0x48e   : > { %1670 = vmax.xlane.f32.xlu1 %v1669_v47 }
 0x48f   : > { %v14179_v53 = vadd.f32 %v1840_v44, %v13967_v21 }
 0x490   : > { %v2007_v55 = vpop.f32.mrb[16].mxu1 }
 0x491   : > { %v2011_v60 = vmul.f32 0.35355338, %v2007_v55  ;;  %v12175_v61 = vpop.f32.mrb[17].mxu1  ;;  %v1842_v63 = vsel %vm1247_vm1, %v14179_v53, -inf }
 0x492   : > { %1843 = vmax.xlane.f32.xlu0 %v1842_v63 }
 0x493   : > { %v14184_v57 = vadd.f32 %v14176_v48, %v2011_v60 }
 0x494   : > { %v2176_v49 = vpop.f32.mrb[18].mxu1 }
 0x495   : > { %v2180_v2 = vmul.f32 0.35355338, %v2176_v49  ;;  %v12185_v5 = vpop.f32.mrb[19].mxu1  ;;  %v2017_v7 = vsel %vm1247_vm1, %v14184_v57, -inf }
 0x496   : > { %2018 = vmax.xlane.f32.xlu0 %v2017_v7 }
 0x497   : > { %v14189_v3 = vadd.f32 %v2180_v2, %v14176_v48 }
 0x498   : > { %v2349_v9 = vpop.f32.mrb[20].mxu1 }
 0x499   : > { %v2353_v62 = vmul.f32 0.35355338, %v2349_v9  ;;  %v12195_v10 = vpop.f32.mrb[21].mxu1  ;;  %v2182_v12 = vsel %vm1247_vm1, %v14189_v3, -inf }
 0x49a   : > { %2183 = vmax.xlane.f32.xlu0 %v2182_v12 }
 0x49b   : > { %v14194_v14 = vadd.f32 %v2353_v62, %v14176_v48 }
 0x49c   : > { %v2521_v8 = vpop.f32.mrb[22].mxu1 }
 0x49d   : > { %v2525_v6 = vmul.f32 0.35355338, %v2521_v8  ;;  %v12205_v17 = vpop.f32.mrb[23].mxu1  ;;  %v2355_v19 = vsel %vm1247_vm1, %v14194_v14, -inf }
 0x49e   : > { %2356 = vmax.xlane.f32.xlu1 %v2355_v19 }
 0x49f   : > { %v14199_v22 = vadd.f32 %v2525_v6, %v14176_v48 }
 0x4a0   : > { %v14201_v15 = vpop.f32.mrb[24].mxu1 }
 0x4a1   : > { %v12215_v11 = vpop.f32.mrb[25].mxu1  ;;  %v2527_v23 = vsel %vm1247_vm1, %v14199_v22, -inf }
 0x4a2   : > { %2528 = vmax.xlane.f32.xlu0 %v2527_v23 }
 0x4a4   : > { %v14205_v51 = vpop.f32.mrb[26].mxu1 }
 0x4a5   : > { %v12225_v26 = vpop.f32.mrb[27].mxu1 }
 0x4a8   : > { %v14207_v20 = vpop.f32.mrb[28].mxu1 }
 0x4a9   : > { %v12235_v54 = vpop.f32.mrb[29].mxu1 }
 0x4ac   : > { %v14209_v18 = vpop.f32.mrb[30].mxu1 }
 0x4ad   : > { %v12245_v56 = vpop.f32.mrb[31].mxu1 }
 0x4af   : > { %1680 = vrot.lane.b32.xlu1 %v13929_v58, %s16043_s23 }
 0x4b0   : > { %v14213_v27 = vpop.f32.mrb[32].mxu1 }
 0x4b1   : > { %v12255_v30 = vpop.f32.mrb[33].mxu1 }
 0x4b3   : > { %1853 = vrot.lane.b32.xlu1 %v13929_v58, %s16041_s0 }
 0x4b4   : > { %v14217_v32 = vpop.f32.mrb[34].mxu1 }
 0x4b5   : > { %v12265_v59 = vpop.f32.mrb[35].mxu1 }
 0x4b7   : > { %2194 = vrot.lane.b32.xlu1 %v13925_v50, %s16045_s22 }
 0x4b8   : > { %v14221_v38 = vpop.f32.mrb[36].mxu1  ;;  %1507 = vrot.lane.b32.xlu0 %v13929_v58, %s16045_s22 }
 0x4b9   : > { %v12275_v40 = vpop.f32.mrb[37].mxu1 }
 0x4bc   : > { %v14225_v41 = vpop.f32.mrb[38].mxu1 }
 0x4bd   : > { %v12285_v42 = vpop.f32.mrb[39].mxu1 }
 0x4c0   : > { %v14227_v43 = vpop.f32.mrb[40].mxu1 }
 0x4c1   : > { %v12295_v44 = vpop.f32.mrb[41].mxu1 }
 0x4c4   : > { %v14229_v46 = vpop.f32.mrb[42].mxu1 }
 0x4c5   : > { %v12305_v47 = vpop.f32.mrb[43].mxu1 }
 0x4c8   : > { %v14231_v55 = vpop.f32.mrb[44].mxu1 }
 0x4c9   : > { %v12315_v60 = vpop.f32.mrb[45].mxu1 }
 0x4cc   : > { %v14233_v61 = vpop.f32.mrb[46].mxu1 }
 0x4cd   : > { %v12325_v63 = vpop.f32.mrb[47].mxu1 }
 0x4d0   : > { %v14235_v49 = vpop.f32.mrb[48].mxu1 }
 0x4d1   : > { %v12335_v2 = vpop.f32.mrb[49].mxu1 }
 0x4d4   : > { %v14237_v58 = vpop.f32.mrb[50].mxu1 }
 0x4d5   : > { %v12345_v5 = vpop.f32.mrb[51].mxu1 }
 0x4d8   : > { %v14239_v7 = vpop.f32.mrb[52].mxu1 }
 0x4d9   : > { %v12355_v9 = vpop.f32.mrb[53].mxu1 }
 0x4dc   : > { %v14241_v62 = vpop.f32.mrb[54].mxu1 }
 0x4dd   : > { %v12365_v10 = vpop.f32.mrb[55].mxu1 }
 0x517   : > { %v1497_v12 = vpop.xlane.xlu0 %1496 }
 0x518   : > { %v1498_v8 = vsub.f32 %v14165_v36, %v1497_v12 }
 0x51a   : > { %v1499_v6 = vmul.f32 1.442695, %v1498_v8  ;;  %v14265_v8 = vld [vmem:[#allocation2 + $0x8] sm:$0xff] }
 0x51b   : > { %v1671_v17 = vpop.xlane.xlu1 %1670 }
 0x51c   : > { %13337 = vpow2.f32 %v1499_v6  ;;  %v1672_v19 = vsub.f32 %v14170_v39, %v1671_v17 }
 0x51e   : > { %v1673_v11 = vmul.f32 1.442695, %v1672_v19 }
 0x51f   : > { %v1844_v23 = vpop.xlane.xlu0 %1843 }
 0x520   : > { %13339 = vpow2.f32 %v1673_v11  ;;  %v1845_v26 = vsub.f32 %v14179_v53, %v1844_v23  ;;  %v2864_v11 = vmul.f32 0.35355338, %v14205_v51  ;;  %v14283_v23 = vrot.slane %v13963_v52, %v13920_v45 }
 0x521   : > { %v3037_v51 = vmul.f32 0.35355338, %v14207_v20 }
 0x522   : > { %v1846_v54 = vmul.f32 1.442695, %v1845_v26  ;;  %v3382_v26 = vsub.s32 3, %v13892_v33 }
 0x523   : > { %v2019_v56 = vpop.xlane.xlu0 %2018  ;;  %v14309_v20 = vadd.f32 %v3037_v51, %v14283_v23 }
 0x524   : > { %13341 = vpow2.f32 %v1846_v54  ;;  %v2020_v30 = vsub.f32 %v14184_v57, %v2019_v56  ;;  %v2695_v54 = vmul.f32 0.35355338, %v14201_v15 }
 0x526   : > { %v14247_v59 = vpop.eup %13337  ;;  %v2021_v40 = vmul.f32 1.442695, %v2020_v30  ;;  %v3548_v30 = vmul.f32 0.35355338, %v14217_v32  ;;  %v4066_v32 = vsub.s32 4, %v13892_v33 }
 0x527   : > { %v2184_v42 = vpop.xlane.xlu0 %2183  ;;  %v1501_v36 = vsel %vm1247_vm1, %v14247_v59, 0.0 }
 0x528   : > { %13343 = vpow2.f32 %v2021_v40  ;;  %v2185_v39 = vsub.f32 %v14189_v3, %v2184_v42  ;;  %1502 = vadd.xlane.f32.xlu1 %v1501_v36  ;;  %v14290_v40 = vadd.f32 %v2864_v11, %v14283_v23  ;;  %v14293_v42 = vrot.slane %v13963_v52, %v3382_v26 }
 0x52a   : > { %v14252_v44 = vpop.eup %13339  ;;  %v2186_v47 = vmul.f32 1.442695, %v2185_v39  ;;  %v14297_v39 = vadd.f32 %v14283_v23, %v2695_v54  ;;  %v2866_v15 = vsel %vm1247_vm1, %v14290_v40, -inf }
 0x52b   : > { %v2357_v53 = vpop.xlane.xlu1 %2356  ;;  %v1675_v60 = vsel %vm1247_vm1, %v14252_v44, 0.0 }
 0x52c   : > { %13345 = vpow2.f32 %v2186_v47  ;;  %v2358_v57 = vsub.f32 %v14194_v14, %v2357_v53  ;;  %1676 = vadd.xlane.f32.xlu0 %v1675_v60  ;;  %v3893_v47 = vmul.f32 0.35355338, %v14225_v41  ;;  %v2701_v53 = vsel %vm1247_vm1, %v14297_v39, -inf }
 0x52d   : > { %v3209_v60 = vmul.f32 0.35355338, %v14209_v18  ;;  %v4232_v41 = vmul.f32 0.35355338, %v14229_v46 }
 0x52e   : > { %v14257_v63 = vpop.eup %13341  ;;  %v2359_v2 = vmul.f32 1.442695, %v2358_v57 }
 0x52f   : > { %v2529_v5 = vpop.xlane.xlu0 %2528  ;;  %v1848_v9 = vsel %vm1247_vm1, %v14257_v63, 0.0  ;;  %v14327_v46 = vadd.f32 %v3209_v60, %v14283_v23 }
 0x530   : > { %13347 = vpow2.f32 %v2359_v2  ;;  %1849 = vadd.xlane.f32.xlu1 %v1848_v9  ;;  %v2530_v56 = vsub.f32 %v14199_v22, %v2529_v5  ;;  %v14303_v22 = vadd.f32 %v3548_v30, %v14293_v42  ;;  %v14316_v2 = vadd.f32 %v3893_v47, %v14293_v42 }
 0x531   : > { %v14319_v5 = vrot.slane %v13963_v52, %v4066_v32  ;;  %v3039_v9 = vsel %vm1247_vm1, %v14309_v20, -inf  ;;  %v3211_v11 = vsel %vm1247_vm1, %v14327_v46, -inf  ;;  %v4063_v30 = vmul.f32 0.35355338, %v14227_v43 }
 0x532   : > { %v14261_v3 = vpop.eup %13343  ;;  %v2531_v36 = vmul.f32 1.442695, %v2530_v56  ;;  %v3550_v57 = vsel %vm1247_vm1, %v14303_v22, -inf  ;;  %v3895_v18 = vsel %vm1247_vm1, %v14316_v2, -inf  ;;  %v4750_v56 = vsub.s32 5, %v13892_v33 }
 0x533   : > { %v1508_v10 = vpop.permute.xlu0 %1507  ;;  %v2023_v12 = vsel %vm1247_vm1, %v14261_v3, 0.0  ;;  %v14362_v32 = vadd.f32 %v14319_v5, %v4063_v30 }
 0x534   : > { %12147 = vmatpush3.msra.mxu0 %v1508_v10  ;;  %2024 = vadd.xlane.f32.xlu0 %v2023_v12  ;;  %13349 = vpow2.f32 %v2531_v36  ;;  %v3379_v10 = vmul.f32 0.35355338, %v14213_v27  ;;  %v14330_v12 = vadd.f32 %v4232_v41, %v14319_v5 }
 0x535   : > { %12156 = vmatprep.subr.mxu0 %v14265_v8 }
 0x536   : > { %v14268_v14 = vpop.eup %13345  ;;  %v4234_v27 = vsel %vm1247_vm1, %v14330_v12, -inf  ;;  %v14339_v26 = vadd.f32 %v14293_v42, %v3379_v10  ;;  %v5089_v10 = vmul.f32 0.35355338, %v14239_v7 }
 0x537   : > { %v2188_v6 = vsel %vm1247_vm1, %v14268_v14, 0.0 }
 0x538   : > { %2189 = vadd.xlane.f32.xlu1 %v2188_v6  ;;  %v3721_v6 = vmul.f32 0.35355338, %v14221_v38  ;;  %v3385_v51 = vsel %vm1247_vm1, %v14339_v26, -inf }
 0x53a   : > { %v14272_v17 = vpop.eup %13347  ;;  %v14346_v38 = vadd.f32 %v3721_v6, %v14293_v42 }
 0x53b   : > { %v2361_v19 = vsel %vm1247_vm1, %v14272_v17, 0.0 }
 0x53c   : > { %2362 = vadd.xlane.f32.xlu0 %v2361_v19  ;;  %v4577_v19 = vmul.f32 0.35355338, %v14233_v61  ;;  %v4916_v61 = vmul.f32 0.35355338, %v14237_v58  ;;  %v3723_v43 = vsel %vm1247_vm1, %v14346_v38, -inf }
 0x53d   : > { %v4405_v58 = vmul.f32 0.35355338, %v14231_v55 }
 0x53e   : > { %v14341_v54 = vpop.eup %13349  ;;  %v14354_v47 = vadd.f32 %v4577_v19, %v14319_v5 }
 0x53f   : > { %v2533_v36 = vsel %vm1247_vm1, %v14341_v54, 0.0  ;;  %v14377_v55 = vadd.f32 %v4405_v58, %v14319_v5 }
 0x540   : > { %v4579_v60 = vsel %vm1247_vm1, %v14354_v47, -inf }
 0x549   : > { %2538 = vrot.lane.b32.xlu1 %v13925_v50, %s16041_s0 }
 0x552   : > { %2366 = vrot.lane.b32.xlu0 %v13925_v50, %s16043_s23 }
 0x56d   : > { %2867 = vmax.xlane.f32.xlu1 %v2866_v15  ;;  %v14357_v15 = vrot.slane %v13963_v52, %v4750_v56  ;;  %v4069_v52 = vsel %vm1247_vm1, %v14362_v32, -inf }
 0x56f   : > { %v14369_v41 = vadd.f32 %v4916_v61, %v14357_v15 }
 0x571   : > { %3551 = vmax.xlane.f32.xlu1 %v3550_v57  ;;  %2702 = vmax.xlane.f32.xlu0 %v2701_v53  ;;  %v5261_v53 = vmul.f32 0.35355338, %v14241_v62  ;;  %v4747_v57 = vmul.f32 0.35355338, %v14235_v49 }
 0x573   : > { %v14380_v62 = vadd.f32 %v5261_v53, %v14357_v15  ;;  %v14388_v49 = vadd.f32 %v14357_v15, %v4747_v57 }
 0x575   : > { %3896 = vmax.xlane.f32.xlu1 %v3895_v18  ;;  %3040 = vmax.xlane.f32.xlu0 %v3039_v9  ;;  %v4918_v9 = vsel %vm1247_vm1, %v14369_v41, -inf  ;;  %v4407_v18 = vsel %vm1247_vm1, %v14377_v55, -inf  ;;  %v5263_v6 = vsel %vm1247_vm1, %v14380_v62, -inf  ;;  %v4753_v19 = vsel %vm1247_vm1, %v14388_v49, -inf }
 0x579   : > { %3212 = vmax.xlane.f32.xlu0 %v3211_v11  ;;  %4235 = vmax.xlane.f32.xlu1 %v4234_v27  ;;  %v14393_v11 = vadd.f32 %v5089_v10, %v14357_v15  ;;  %v1681_v27 = vpop.permute.xlu1 %1680 }
 0x57b   : > { %v5091_v7 = vsel %vm1247_vm1, %v14393_v11, -inf }
 0x57d   : > { %3386 = vmax.xlane.f32.xlu0 %v3385_v51  ;;  %2534 = vadd.xlane.f32.xlu1 %v2533_v36  ;;  %v1854_v56 = vpop.permute.xlu1 %1853 }
 0x581   : > { %3724 = vmax.xlane.f32.xlu0 %v3723_v43  ;;  %4580 = vmax.xlane.f32.xlu1 %v4579_v60  ;;  %v2195_v30 = vpop.permute.xlu1 %2194 }
 0x585   : > { %4070 = vmax.xlane.f32.xlu0 %v4069_v52  ;;  %4919 = vmax.xlane.f32.xlu1 %v4918_v9 }
 0x589   : > { %4408 = vmax.xlane.f32.xlu0 %v4407_v18  ;;  %5264 = vmax.xlane.f32.xlu1 %v5263_v6 }
 0x58d   : > { %4754 = vmax.xlane.f32.xlu0 %v4753_v19 }
 0x591   : > { %5092 = vmax.xlane.f32.xlu0 %v5091_v7 }
 0x59a   : > { %3050 = vrot.lane.b32.xlu1 %v13939_v4, %s16043_s23 }
 0x59e   : > { %3562 = vrot.lane.b32.xlu1 %v13934_v1, %s16045_s22 }
 0x5a7   : > { %2878 = vrot.lane.b32.xlu0 %v13939_v4, %s16045_s22 }
 0x5ab   : > { %3222 = vrot.lane.b32.xlu0 %v13939_v4, %s16041_s0 }
 0x5af   : > { %3734 = vrot.lane.b32.xlu0 %v13934_v1, %s16043_s23 }
 0x5b5   : > { %v1503_v61 = vpop.xlane.xlu1 %1502 }
 0x5b6   : > { %13351 = vrcp.f32 %v1503_v61 }
 0x5b9   : > { %v1677_v51 = vpop.xlane.xlu0 %1676 }
 0x5ba   : > { %13353 = vrcp.f32 %v1677_v51 }
 0x5bd   : > { %v1850_v36 = vpop.xlane.xlu1 %1849 }
 0x5be   : > { %13355 = vrcp.f32 %v1850_v36 }
 0x5c0   : > { %v13352_v43 = vpop.eup %13351 }
 0x5c1   : > { %v1505_v58 = vmul.f32 %v13352_v43, %v14247_v59  ;;  %v2025_v53 = vpop.xlane.xlu0 %2024 }
 0x5c2   : > { %13357 = vrcp.f32 %v2025_v53 }
 0x5c3   : > { %12149 = vmatmul.mubr.msk.f32.vlgmr.msra.gmra.mrb[12].mxu0 %vm1247_vm1, %v1505_v58 }
 0x5c4   : > { %v13354_v60 = vpop.eup %13353  ;;  %12157 = vmatpush3.msra.mxu0 %v1681_v27  ;;  %12158 = vmatprep.mubr.msk.f32.mxu0 %vm13609_vm0, %v14265_v8 }
 0x5c5   : > { %v2190_v52 = vpop.xlane.xlu1 %2189  ;;  %12166 = vmatprep.subr.mxu0 %v14265_v8  ;;  %v1679_v57 = vmul.f32 %v13354_v60, %v14252_v44 }
 0x5c6   : > { %13359 = vrcp.f32 %v2190_v52 }
 0x5c7   : > { %12159 = vmatmul.mubr.msk.f32.vlgmr.msra.gmra.mrb[14].mxu0 %vm1247_vm1, %v1679_v57 }
 0x5c8   : > { %v13356_v9 = vpop.eup %13355  ;;  %12167 = vmatpush3.msra.mxu0 %v1854_v56  ;;  %12168 = vmatprep.mubr.msk.f32.mxu0 %vm13609_vm0, %v14265_v8 }
 0x5c9   : > { %v2363_v59 = vpop.xlane.xlu0 %2362  ;;  %12176 = vmatprep.subr.mxu0 %v14265_v8  ;;  %v1852_v10 = vmul.f32 %v13356_v9, %v14257_v63  ;;  %v2539_v7 = vpop.permute.xlu1 %2538 }
 0x5ca   : > { %13361 = vrcp.f32 %v2363_v59 }
 0x5cb   : > { %12169 = vmatmul.mubr.msk.f32.vlgmr.msra.gmra.mrb[16].mxu0 %vm1247_vm1, %v1852_v10 }
 0x5cc   : > { %v13358_v18 = vpop.eup %13357  ;;  %12177 = vmatpush3.msra.mxu0 %v13925_v50  ;;  %12178 = vmatprep.mubr.msk.f32.mxu0 %vm13609_vm0, %v14265_v8 }
 0x5cd   : > { %12186 = vmatprep.subr.mxu0 %v14265_v8  ;;  %v2027_v44 = vmul.f32 %v13358_v18, %v14261_v3  ;;  %v2367_v19 = vpop.permute.xlu0 %2366 }
 0x5cf   : > { %12179 = vmatmul.mubr.msk.f32.vlgmr.msra.gmra.mrb[18].mxu0 %vm1247_vm1, %v2027_v44 }
 0x5d0   : > { %v13360_v6 = vpop.eup %13359  ;;  %12187 = vmatpush3.msra.mxu0 %v2195_v30  ;;  %12188 = vmatprep.mubr.msk.f32.mxu0 %vm13609_vm0, %v14265_v8 }
 0x5d1   : > { %12196 = vmatprep.subr.mxu0 %v14265_v8  ;;  %v2192_v63 = vmul.f32 %v13360_v6, %v14268_v14 }
 0x5d3   : > { %12189 = vmatmul.mubr.msk.f32.vlgmr.msra.gmra.mrb[20].mxu0 %vm1247_vm1, %v2192_v63 }
 0x5d4   : > { %v13362_v50 = vpop.eup %13361  ;;  %12197 = vmatpush3.msra.mxu0 %v2367_v19  ;;  %12198 = vmatprep.mubr.msk.f32.mxu0 %vm13609_vm0, %v14265_v8 }
 0x5d5   : > { %12206 = vmatprep.subr.mxu0 %v14265_v8  ;;  %v2365_v3 = vmul.f32 %v13362_v50, %v14272_v17 }
 0x5d7   : > { %12199 = vmatmul.mubr.msk.f32.vlgmr.msra.gmra.mrb[22].mxu0 %vm1247_vm1, %v2365_v3 }
 0x5d8   : > { %12207 = vmatpush3.msra.mxu0 %v2539_v7  ;;  %12208 = vmatprep.mubr.msk.f32.mxu0 %vm13609_vm0, %v14265_v8 }
 0x5d9   : > { %12216 = vmatprep.subr.mxu0 %v14265_v8 }
 0x5fa   : > { %v2868_v14 = vpop.xlane.xlu1 %2867 }
 0x5fb   : > { %v2869_v27 = vsub.f32 %v14290_v40, %v2868_v14 }
 0x5fd   : > { %v2870_v56 = vmul.f32 1.442695, %v2869_v27 }
 0x5fe   : > { %v2703_v30 = vpop.xlane.xlu0 %2702  ;;  %v3552_v61 = vpop.xlane.xlu1 %3551 }
 0x5ff   : > { %13363 = vpow2.f32 %v2870_v56  ;;  %v2704_v51 = vsub.f32 %v14297_v39, %v2703_v30  ;;  %v3553_v19 = vsub.f32 %v14303_v22, %v3552_v61 }
 0x601   : > { %v2705_v36 = vmul.f32 1.442695, %v2704_v51  ;;  %v3554_v7 = vmul.f32 1.442695, %v3553_v19 }
 0x602   : > { %v3041_v17 = vpop.xlane.xlu0 %3040  ;;  %v3897_v43 = vpop.xlane.xlu1 %3896 }
 0x603   : > { %13365 = vpow2.f32 %v2705_v36  ;;  %v3042_v58 = vsub.f32 %v14309_v20, %v3041_v17 }
 0x605   : > { %v3043_v53 = vmul.f32 1.442695, %v3042_v58 }
 0x606   : > { %v4236_v60 = vpop.xlane.xlu1 %4235  ;;  %v3213_v44 = vpop.xlane.xlu0 %3212 }
 0x607   : > { %13367 = vpow2.f32 %v3043_v53  ;;  %v3214_v63 = vsub.f32 %v14327_v46, %v3213_v44  ;;  %v4237_v22 = vsub.f32 %v14330_v12, %v4236_v60 }
 0x609   : > { %v14441_v52 = vpop.eup %13363  ;;  %v3215_v50 = vmul.f32 1.442695, %v3214_v63 }
 0x60a   : > { %v2535_v57 = vpop.xlane.xlu1 %2534  ;;  %v2872_v40 = vsel %vm1247_vm1, %v14441_v52, 0.0  ;;  %v3387_v6 = vpop.xlane.xlu0 %3386 }
 0x60b   : > { %2873 = vadd.xlane.f32.xlu1 %v2872_v40  ;;  %13369 = vrcp.f32 %v2535_v57  ;;  %v3388_v14 = vsub.f32 %v14339_v26, %v3387_v6  ;;  %v4238_v26 = vmul.f32 1.442695, %v4237_v22 }
 0x60c   : > { %13371 = vpow2.f32 %v3215_v50 }
 0x60d   : > { %v14445_v9 = vpop.eup %13365  ;;  %13373 = vpow2.f32 %v3554_v7  ;;  %v3389_v51 = vmul.f32 1.442695, %v3388_v14 }
 0x60e   : > { %v2707_v39 = vsel %vm1247_vm1, %v14445_v9, 0.0  ;;  %v4581_v30 = vpop.xlane.xlu1 %4580 }
 0x60f   : > { %2708 = vadd.xlane.f32.xlu0 %v2707_v39 }
 0x611   : > { %v14449_v59 = vpop.eup %13367 }
 0x612   : > { %v3045_v20 = vsel %vm1247_vm1, %v14449_v59, 0.0 }
 0x613   : > { %3046 = vadd.xlane.f32.xlu0 %v3045_v20 }
 0x615   : > { %v13370_v10 = vpop.eup %13369 }
 0x616   : > { %v2537_v18 = vmul.f32 %v13370_v10, %v14341_v54  ;;  %v3725_v54 = vpop.xlane.xlu0 %3724  ;;  %v14471_v58 = vpop.eup %13371 }
 0x617   : > { %v3726_v56 = vsub.f32 %v14346_v38, %v3725_v54  ;;  %v4582_v38 = vsub.f32 %v14354_v47, %v4581_v30  ;;  %v3217_v12 = vsel %vm1247_vm1, %v14471_v58, 0.0  ;;  %v14477_v60 = vpop.eup %13373 }
 0x618   : > { %12209 = vmatmul.mubr.msk.f32.vlgmr.msra.gmra.mrb[24].mxu0 %vm1247_vm1, %v2537_v18  ;;  %v3556_v10 = vsel %vm1247_vm1, %v14477_v60, 0.0 }
 0x619   : > { %12217 = vmatpush3.msra.mxu0 %v13939_v4  ;;  %12218 = vmatprep.mubr.msk.f32.mxu0 %vm13609_vm0, %v14265_v8  ;;  %v3898_v4 = vsub.f32 %v14316_v2, %v3897_v43  ;;  %v3727_v61 = vmul.f32 1.442695, %v3726_v56  ;;  %v4920_v43 = vpop.xlane.xlu1 %4919 }
 0x61a   : > { %12226 = vmatprep.subr.mxu0 %v14265_v8  ;;  %v4071_v3 = vpop.xlane.xlu0 %4070 }
 0x61b   : > { %v3899_v27 = vmul.f32 1.442695, %v3898_v4  ;;  %v4072_v36 = vsub.f32 %v14362_v32, %v4071_v3  ;;  %v4921_v32 = vsub.f32 %v14369_v41, %v4920_v43 }
 0x61c   : > { %4246 = vrot.lane.b32.xlu1 %v13951_v16, %s16045_s22 }
 0x61d   : > { %13375 = vpow2.f32 %v3899_v27  ;;  %v4073_v2 = vmul.f32 1.442695, %v4072_v36  ;;  %v4922_v40 = vmul.f32 1.442695, %v4921_v32 }
 0x61e   : > { %v4409_v46 = vpop.xlane.xlu0 %4408  ;;  %13377 = vpow2.f32 %v3389_v51 }
 0x61f   : > { %v4410_v17 = vsub.f32 %v14377_v55, %v4409_v46  ;;  %13379 = vpow2.f32 %v3727_v61  ;;  %v4583_v55 = vmul.f32 1.442695, %v4582_v38 }
 0x620   : > { %13381 = vpow2.f32 %v4073_v2  ;;  %v5265_v2 = vpop.xlane.xlu1 %5264 }
 0x621   : > { %v4411_v57 = vmul.f32 1.442695, %v4410_v17  ;;  %13383 = vpow2.f32 %v4238_v26  ;;  %v5266_v17 = vsub.f32 %v14380_v62, %v5265_v2 }
 0x622   : > { %v4755_v53 = vpop.xlane.xlu0 %4754 }
 0x623   : > { %13385 = vpow2.f32 %v4411_v57  ;;  %v4756_v39 = vsub.f32 %v14388_v49, %v4755_v53  ;;  %v5267_v43 = vmul.f32 1.442695, %v5266_v17 }
 0x624   : > { %13387 = vpow2.f32 %v4583_v55  ;;  %v3051_v32 = vpop.permute.xlu1 %3050 }
 0x625   : > { %13389 = vpow2.f32 %v4922_v40  ;;  %v4757_v18 = vmul.f32 1.442695, %v4756_v39 }
 0x626   : > { %v5093_v47 = vpop.xlane.xlu0 %5092 }
 0x627   : > { %v14480_v20 = vpop.eup %13375  ;;  %v5094_v44 = vsub.f32 %v14393_v11, %v5093_v47  ;;  %13391 = vpow2.f32 %v4757_v18 }
 0x628   : > { %v14484_v41 = vpop.eup %13377  ;;  %v3901_v49 = vsel %vm1247_vm1, %v14480_v20, 0.0  ;;  %v14537_v40 = vpop.permute.xlu1 %3562 }
 0x629   : > { %3906 = vrot.lane.b32.xlu0 %v13934_v1, %s16041_s0  ;;  %v14487_v6 = vpop.eup %13379  ;;  %v3391_v63 = vsel %vm1247_vm1, %v14484_v41, 0.0  ;;  %v5095_v19 = vmul.f32 1.442695, %v5094_v44 }
 0x62a   : > { %v14493_v54 = vpop.eup %13381  ;;  %v3729_v4 = vsel %vm1247_vm1, %v14487_v6, 0.0  ;;  %v2879_v26 = vpop.permute.xlu0 %2878 }
 0x62b   : > { %v14495_v50 = vpop.eup %13383  ;;  %v4075_v11 = vsel %vm1247_vm1, %v14493_v54, 0.0  ;;  %13393 = vpow2.f32 %v5095_v19 }
 0x62c   : > { %v4240_v27 = vsel %vm1247_vm1, %v14495_v50, 0.0  ;;  %13395 = vpow2.f32 %v5267_v43  ;;  %v5362_v43 = vld [vmem:[%s14564_s30 + $0x8] sm:$0xff] }
 0x62d   : > { %v14501_v3 = vpop.eup %13385 }
 0x62e   : > { %v14503_v7 = vpop.eup %13387  ;;  %v4413_v14 = vsel %vm1247_vm1, %v14501_v3, 0.0  ;;  %v3223_v57 = vpop.permute.xlu0 %3222 }
 0x62f   : > { %v14509_v56 = vpop.eup %13389  ;;  %v4585_v30 = vsel %vm1247_vm1, %v14503_v7, 0.0 }
 0x630   : > { %v4924_v51 = vsel %vm1247_vm1, %v14509_v56, 0.0 }
 0x631   : > { %v14515_v36 = vpop.eup %13391 }
 0x632   : > { %v4759_v46 = vsel %vm1247_vm1, %v14515_v36, 0.0  ;;  %v14539_v39 = vpop.permute.xlu0 %3734 }
 0x635   : > { %v14519_v22 = vpop.eup %13393 }
 0x636   : > { %v5097_v61 = vsel %vm1247_vm1, %v14519_v22, 0.0  ;;  %v14532_v38 = vpop.eup %13395 }
 0x637   : > { %v5269_v53 = vsel %vm1247_vm1, %v14532_v38, 0.0 }
 0x640   : > { %3218 = vadd.xlane.f32.xlu1 %v3217_v12 }
 0x644   : > { %3557 = vadd.xlane.f32.xlu1 %v3556_v10 }
 0x648   : > { %3392 = vadd.xlane.f32.xlu0 %v3391_v63  ;;  %3902 = vadd.xlane.f32.xlu1 %v3901_v49 }
 0x64c   : > { %3730 = vadd.xlane.f32.xlu0 %v3729_v4  ;;  %4076 = vadd.xlane.f32.xlu1 %v4075_v11 }
 0x650   : > { %4414 = vadd.xlane.f32.xlu0 %v4413_v14  ;;  %4241 = vadd.xlane.f32.xlu1 %v4240_v27 }
 0x654   : > { %4586 = vadd.xlane.f32.xlu0 %v4585_v30  ;;  %4925 = vadd.xlane.f32.xlu1 %v4924_v51 }
 0x658   : > { %4760 = vadd.xlane.f32.xlu0 %v4759_v46 }
 0x65c   : > { %5098 = vadd.xlane.f32.xlu0 %v5097_v61 }
 0x665   : > { %4590 = vrot.lane.b32.xlu1 %v13951_v16, %s16041_s0 }
 0x669   : > { %4930 = vrot.lane.b32.xlu1 %v13947_v13, %s16045_s22  ;;  %s14751_s22 = scalar_lea.vmem %s16024_s9, %s14686_s26 }
 0x66d   : > { %5102 = vrot.lane.b32.xlu1 %v13947_v13, %s16043_s23 }
 0x672   : > { %4418 = vrot.lane.b32.xlu0 %v13951_v16, %s16043_s23  ;;  %s14828_s23 = scalar_lea.vmem %s16026_s11, %s14686_s26 }
 0x691   : > { %5270 = vadd.xlane.f32.xlu1 %v5269_v53 }
 0x696   : > { %v1579_v12 = vpop.f32.mrb[12].mxu0 }
 0x697   : > { %v12150_v55 = vpop.f32.mrb[13].mxu0  ;;  %1584 = vrot.lane.b32.xlu0 %v1579_v12, %s16039_s19 }
 0x698   : > { %v2874_v10 = vpop.xlane.xlu1 %2873  ;;  %v5365_v55 = vld [vmem:[%s14564_s30 + $0x20] sm:$0xff] }
 0x69a   : > { %v1752_v62 = vpop.f32.mrb[14].mxu0 }
 0x69b   : > { %v12160_v47 = vpop.f32.mrb[15].mxu0 }
 0x69c   : > { %v2709_v18 = vpop.xlane.xlu0 %2708  ;;  %v5368_v47 = vld [vmem:[%s14564_s30 + $0x38] sm:$0xff] }
 0x69d   : > { %13397 = vrcp.f32 %v2709_v18  ;;  %v5369_v18 = vld [vmem:[%s14564_s30 + $0x40] sm:$0xff] }
 0x69e   : > { %v1925_v44 = vpop.f32.mrb[16].mxu0  ;;  %13399 = vrcp.f32 %v2874_v10 }
 0x69f   : > { %v12170_v63 = vpop.f32.mrb[17].mxu0 }
 0x6a0   : > { %v3047_v49 = vpop.xlane.xlu0 %3046 }
 0x6a1   : > { %13401 = vrcp.f32 %v3047_v49  ;;  %v5371_v49 = vld [vmem:[%s14564_s30 + $0x50] sm:$0xff] }
 0x6a2   : > { %v2097_v19 = vpop.f32.mrb[18].mxu0  ;;  %5274 = vrot.lane.b32.xlu1 %v13947_v13, %s16041_s0  ;;  %s16064_s0 = smov 24  }
 0x6a3   : > { %2101 = vst.msk [vmem:[#allocation2 + $0x8] sm:$0xff] %vm1247_vm1, %v2097_v19  ;;  %v12180_v4 = vpop.f32.mrb[19].mxu0  ;;  %v5372_v19 = vld [vmem:[%s14564_s30 + $0x58] sm:$0xff] }
 0x6a4   : > { %v13032_v4 = vpack.c.bf16 %v5372_v19, %v5371_v49 }
 0x6a6   : > { %v2266_v11 = vpop.f32.mrb[20].mxu0  ;;  %1757 = vrot.lane.b32.xlu1 %v1752_v62, %s16037_s1  ;;  %v5367_v62 = vld [vmem:[%s14564_s30 + $0x30] sm:$0xff] }
 0x6a7   : > { %v13398_v14 = vpop.eup %13397  ;;  %v12190_v27 = vpop.f32.mrb[21].mxu0  ;;  %2271 = vrot.lane.b32.xlu0 %v2266_v11, %s16039_s19  ;;  %v13024_v10 = vpack.c.bf16 %v5368_v47, %v5367_v62 }
 0x6a8   : > { %v2711_v30 = vmul.f32 %v13398_v14, %v14445_v9  ;;  %v13400_v51 = vpop.eup %13399  ;;  %v5361_v9 = vld [vmem:[%s14564_s30] sm:$0xff]  ;;  %v14584_v11 = vpop.permute.xlu1 %4246 }
 0x6a9   : > { %v2876_v2 = vmul.f32 %v13400_v51, %v14441_v52  ;;  %v13012_v53 = vpack.c.bf16 %v5362_v43, %v5361_v9  ;;  %v3907_v27 = vpop.permute.xlu0 %3906  ;;  %v5373_v43 = vld [vmem:[%s14564_s30 + $0x60] sm:$0xff] }
 0x6aa   : > { %v2438_v46 = vpop.f32.mrb[22].mxu0  ;;  %12219 = vmatmul.mubr.msk.f32.vlgmr.msra.gmra.mrb[26].mxu0 %vm1247_vm1, %v2711_v30  ;;  %1930 = vrot.lane.b32.xlu1 %v1925_v44, %s16035_s20  ;;  %v5370_v44 = vld [vmem:[%s14564_s30 + $0x48] sm:$0xff] }
 0x6ab   : > { %12227 = vmatpush3.msra.mxu0 %v2879_v26  ;;  %v12200_v61 = vpop.f32.mrb[23].mxu0  ;;  %2443 = vrot.lane.b32.xlu0 %v2438_v46, %s16037_s1  ;;  %v13402_v17 = vpop.eup %13401  ;;  %v5363_v26 = vld [vmem:[%s14564_s30 + $0x10] sm:$0xff]  ;;  %v13028_v63 = vpack.c.bf16 %v5370_v44, %v5369_v18 }
 0x6ac   : > { %12228 = vmatprep.mubr.msk.f32.mxu0 %vm13609_vm0, %v14265_v8  ;;  %12236 = vmatprep.subr.mxu0 %v14265_v8  ;;  %v3049_v52 = vmul.f32 %v13402_v17, %v14449_v59  ;;  %v5366_v59 = vld [vmem:[%s14564_s30 + $0x28] sm:$0xff] }
 0x6ad   : > { %13013 = vmatprep.subr.bf16.mxu1 %v13012_v53 }
 0x6ae   : > { %12229 = vmatmul.mubr.msk.f32.vlgmr.msra.gmra.mrb[28].mxu0 %vm1247_vm1, %v2876_v2  ;;  %13015 = vmatpush3.bf16.msra.mxu1 %v13012_v53 }
 0x6af   : > { %12237 = vmatpush3.msra.mxu0 %v3051_v32  ;;  %12238 = vmatprep.mubr.msk.f32.mxu0 %vm13609_vm0, %v14265_v8  ;;  %v5364_v32 = vld [vmem:[%s14564_s30 + $0x18] sm:$0xff] }
 0x6b0   : > { %12246 = vmatprep.subr.mxu0 %v14265_v8  ;;  %v13016_v12 = vpack.c.bf16 %v5364_v32, %v5363_v26  ;;  %v5374_v26 = vld [vmem:[%s14564_s30 + $0x68] sm:$0xff] }
 0x6b1   : > { %v13036_v32 = vpack.c.bf16 %v5374_v26, %v5373_v43 }
 0x6b2   : > { %12239 = vmatmul.mubr.msk.f32.vlgmr.msra.gmra.mrb[30].mxu0 %vm1247_vm1, %v3049_v52  ;;  %13017 = vmatprep.subr.bf16.mxu1 %v13016_v12 }
 0x6b3   : > { %12247 = vmatpush3.msra.mxu0 %v3223_v57  ;;  %12248 = vmatprep.mubr.msk.f32.mxu0 %vm13609_vm0, %v14265_v8  ;;  %v13020_v57 = vpack.c.bf16 %v5366_v59, %v5365_v55  ;;  %v5376_v55 = vld [vmem:[%s14564_s30 + $0x78] sm:$0xff] }
 0x6b4   : > { %12256 = vmatprep.subr.mxu0 %v14265_v8  ;;  %13019 = vmatpush3.bf16.msra.mxu1 %v13016_v12 }
 0x6b5   : > { %13021 = vmatprep.subr.bf16.mxu1 %v13020_v57 }
 0x6b8   : > { %13023 = vmatpush3.bf16.msra.mxu1 %v13020_v57 }
 0x6b9   : > { %13025 = vmatprep.subr.bf16.mxu1 %v13024_v10 }
 0x6bc   : > { %13027 = vmatpush3.bf16.msra.mxu1 %v13024_v10 }
 0x6bd   : > { %13029 = vmatprep.subr.bf16.mxu1 %v13028_v63 }
 0x6c0   : > { %13031 = vmatpush3.bf16.msra.mxu1 %v13028_v63 }
 0x6c1   : > { %13033 = vmatprep.subr.bf16.mxu1 %v13032_v4 }
 0x6c4   : > { %13035 = vmatpush3.bf16.msra.mxu1 %v13032_v4 }
 0x6c5   : > { %13037 = vmatprep.subr.bf16.mxu1 %v13036_v32 }
 0x6c8   : > { %13039 = vmatpush3.bf16.msra.mxu1 %v13036_v32 }
 0x6cd   : > { %v3219_v14 = vpop.xlane.xlu1 %3218 }
 0x6ce   : > { %13403 = vrcp.f32 %v3219_v14 }
 0x6d1   : > { %v3558_v30 = vpop.xlane.xlu1 %3557 }
 0x6d5   : > { %v3393_v51 = vpop.xlane.xlu0 %3392  ;;  %v3903_v61 = vpop.xlane.xlu1 %3902 }
 0x6d6   : > { %13405 = vrcp.f32 %v3393_v51 }
 0x6d7   : > { %13407 = vrcp.f32 %v3558_v30 }
 0x6d8   : > { %v13404_v46 = vpop.eup %13403 }
 0x6d9   : > { %v3731_v2 = vpop.xlane.xlu0 %3730  ;;  %v3221_v17 = vmul.f32 %v13404_v46, %v14471_v58  ;;  %v4077_v52 = vpop.xlane.xlu1 %4076  ;;  %v5375_v58 = vld [vmem:[%s14564_s30 + $0x70] sm:$0xff] }
 0x6da   : > { %13409 = vrcp.f32 %v3731_v2  ;;  %v13040_v57 = vpack.c.bf16 %v5376_v55, %v5375_v58 }
 0x6db   : > { %12249 = vmatmul.mubr.msk.f32.vlgmr.msra.gmra.mrb[32].mxu0 %vm1247_vm1, %v3221_v17  ;;  %13411 = vrcp.f32 %v3903_v61 }
 0x6dc   : > { %12257 = vmatpush3.msra.mxu0 %v13934_v1  ;;  %12258 = vmatprep.mubr.msk.f32.mxu0 %vm13609_vm0, %v14265_v8  ;;  %13413 = vrcp.f32 %v4077_v52 }
 0x6dd   : > { %12266 = vmatprep.subr.mxu0 %v14265_v8  ;;  %v4415_v9 = vpop.xlane.xlu0 %4414  ;;  %v4242_v1 = vpop.xlane.xlu1 %4241  ;;  %13041 = vmatprep.subr.bf16.mxu1 %v13040_v57 }
 0x6de   : > { %13043 = vmatpush3.bf16.msra.mxu1 %v13040_v57  ;;  %13415 = vrcp.f32 %v4242_v1 }
 0x6df   : > { %13417 = vrcp.f32 %v4415_v9 }
 0x6e0   : > { %v13406_v53 = vpop.eup %13405 }
 0x6e1   : > { %v3395_v12 = vmul.f32 %v13406_v53, %v14484_v41  ;;  %v13408_v59 = vpop.eup %13407  ;;  %v4587_v62 = vpop.xlane.xlu0 %4586 }
 0x6e2   : > { %v3560_v41 = vmul.f32 %v13408_v59, %v14477_v60  ;;  %13419 = vrcp.f32 %v4587_v62 }
 0x6e3   : > { %12259 = vmatmul.mubr.msk.f32.vlgmr.msra.gmra.mrb[34].mxu0 %vm1247_vm1, %v3395_v12 }
 0x6e4   : > { %12267 = vmatpush3.msra.mxu0 %v14537_v40  ;;  %12268 = vmatprep.mubr.msk.f32.mxu0 %vm13609_vm0, %v14265_v8  ;;  %v13410_v47 = vpop.eup %13409 }
 0x6e5   : > { %12276 = vmatprep.subr.mxu0 %v14265_v8  ;;  %v3733_v40 = vmul.f32 %v13410_v47, %v14487_v6  ;;  %v13412_v10 = vpop.eup %13411  ;;  %v4761_v18 = vpop.xlane.xlu0 %4760 }
 0x6e6   : > { %v13414_v44 = vpop.eup %13413  ;;  %13421 = vrcp.f32 %v4761_v18 }
 0x6e7   : > { %12269 = vmatmul.mubr.msk.f32.vlgmr.msra.gmra.mrb[36].mxu0 %vm1247_vm1, %v3560_v41  ;;  %v4079_v49 = vmul.f32 %v13414_v44, %v14493_v54 }
 0x6e8   : > { %12277 = vmatpush3.msra.mxu0 %v14539_v39  ;;  %12278 = vmatprep.mubr.msk.f32.mxu0 %vm13609_vm0, %v14265_v8  ;;  %v3905_v39 = vmul.f32 %v13412_v10, %v14480_v20  ;;  %v13416_v19 = vpop.eup %13415  ;;  %v4926_v20 = vpop.xlane.xlu1 %4925 }
 0x6e9   : > { %12286 = vmatprep.subr.mxu0 %v14265_v8  ;;  %v5099_v6 = vpop.xlane.xlu0 %5098  ;;  %v13418_v4 = vpop.eup %13417  ;;  %13423 = vrcp.f32 %v4926_v20 }
 0x6ea   : > { %v4417_v54 = vmul.f32 %v13418_v4, %v14501_v3  ;;  %13425 = vrcp.f32 %v5099_v6 }
 0x6eb   : > { %12279 = vmatmul.mubr.msk.f32.vlgmr.msra.gmra.mrb[38].mxu0 %vm1247_vm1, %v3733_v40  ;;  %v2610_v60 = vpop.f32.mrb[24].mxu0 }
 0x6ec   : > { %12287 = vmatpush3.msra.mxu0 %v3907_v27  ;;  %12288 = vmatprep.mubr.msk.f32.mxu0 %vm13609_vm0, %v14265_v8  ;;  %v12210_v63 = vpop.f32.mrb[25].mxu0  ;;  %v4591_v27 = vpop.permute.xlu1 %4590 }
 0x6ed   : > { %12296 = vmatprep.subr.mxu0 %v14265_v8  ;;  %2615 = vrot.lane.b32.xlu1 %v2610_v60, %s16035_s20  ;;  %v4419_v14 = vpop.permute.xlu0 %4418 }
 0x6ef   : > { %12289 = vmatmul.mubr.msk.f32.vlgmr.msra.gmra.mrb[40].mxu0 %vm1247_vm1, %v3905_v39 }
 0x6f0   : > { %12297 = vmatpush3.msra.mxu0 %v13951_v16  ;;  %12298 = vmatprep.mubr.msk.f32.mxu0 %vm13609_vm0, %v14265_v8  ;;  %v4244_v16 = vmul.f32 %v13416_v19, %v14495_v50  ;;  %v4931_v3 = vpop.permute.xlu1 %4930 }
 0x6f1   : > { %12306 = vmatprep.subr.mxu0 %v14265_v8 }
 0x6f3   : > { %12299 = vmatmul.mubr.msk.f32.vlgmr.msra.gmra.mrb[42].mxu0 %vm1247_vm1, %v4079_v49 }
 0x6f4   : > { %12307 = vmatpush3.msra.mxu0 %v14584_v11  ;;  %12308 = vmatprep.mubr.msk.f32.mxu0 %vm13609_vm0, %v14265_v8  ;;  %v13420_v11 = vpop.eup %13419  ;;  %v5103_v61 = vpop.permute.xlu1 %5102 }
 0x6f5   : > { %12316 = vmatprep.subr.mxu0 %v14265_v8  ;;  %v4589_v50 = vmul.f32 %v13420_v11, %v14503_v7  ;;  %v13422_v30 = vpop.eup %13421 }
 0x6f6   : > { %v4763_v51 = vmul.f32 %v13422_v30, %v14515_v36  ;;  %v13424_v46 = vpop.eup %13423 }
 0x6f7   : > { %12309 = vmatmul.mubr.msk.f32.vlgmr.msra.gmra.mrb[44].mxu0 %vm1247_vm1, %v4244_v16  ;;  %v4928_v7 = vmul.f32 %v13424_v46, %v14509_v56 }
 0x6f8   : > { %12317 = vmatpush3.msra.mxu0 %v4419_v14  ;;  %12318 = vmatprep.mubr.msk.f32.mxu0 %vm13609_vm0, %v14265_v8 }
 0x6f9   : > { %12326 = vmatprep.subr.mxu0 %v14265_v8 }
 0x6fb   : > { %12319 = vmatmul.mubr.msk.f32.vlgmr.msra.gmra.mrb[46].mxu0 %vm1247_vm1, %v4417_v54 }
 0x6fc   : > { %12327 = vmatpush3.msra.mxu0 %v4591_v27  ;;  %12328 = vmatprep.mubr.msk.f32.mxu0 %vm13609_vm0, %v14265_v8 }
 0x6fd   : > { %12336 = vmatprep.subr.mxu0 %v14265_v8 }
 0x6ff   : > { %12329 = vmatmul.mubr.msk.f32.vlgmr.msra.gmra.mrb[48].mxu0 %vm1247_vm1, %v4589_v50 }
 0x700   : > { %12337 = vmatpush3.msra.mxu0 %v13947_v13  ;;  %12338 = vmatprep.mubr.msk.f32.mxu0 %vm13609_vm0, %v14265_v8  ;;  %v13426_v13 = vpop.eup %13425 }
 0x701   : > { %12346 = vmatprep.subr.mxu0 %v14265_v8  ;;  %v5101_v2 = vmul.f32 %v13426_v13, %v14519_v22 }
 0x703   : > { %12339 = vmatmul.mubr.msk.f32.vlgmr.msra.gmra.mrb[50].mxu0 %vm1247_vm1, %v4763_v51 }
 0x704   : > { %12347 = vmatpush3.msra.mxu0 %v4931_v3  ;;  %12348 = vmatprep.mubr.msk.f32.mxu0 %vm13609_vm0, %v14265_v8 }
 0x705   : > { %12356 = vmatprep.subr.mxu0 %v14265_v8 }
 0x707   : > { %12349 = vmatmul.mubr.msk.f32.vlgmr.msra.gmra.mrb[52].mxu0 %vm1247_vm1, %v4928_v7 }
 0x708   : > { %12357 = vmatpush3.msra.mxu0 %v5103_v61  ;;  %12358 = vmatprep.mubr.msk.f32.mxu0 %vm13609_vm0, %v14265_v8 }
 0x709   : > { %v1585_v36 = vpop.permute.xlu0 %1584  ;;  %12366 = vmatprep.subr.mxu0 %v14265_v8 }
 0x70a   : > { %1588 = vst.msk [vmem:[#allocation2] sm:$0xff] %vm1587_vm2, %v1585_v36 }
 0x70b   : > { %12359 = vmatmul.mubr.msk.f32.vlgmr.msra.gmra.mrb[54].mxu0 %vm1247_vm1, %v5101_v2 }
 0x70c   : > { %12368 = vmatprep.mubr.msk.f32.mxu0 %vm13609_vm0, %v14265_v8 }
 0x719   : > { %v2272_v56 = vpop.permute.xlu0 %2271 }
 0x71a   : > { %2274 = vst.msk [vmem:[#allocation2 + $0x8] sm:$0xff] %vm1587_vm2, %v2272_v56 }
 0x71d   : > { %v2444_v17 = vpop.permute.xlu0 %2443 }
 0x71e   : > { %2446 = vst.msk [vmem:[#allocation2 + $0x8] sm:$0xff] %vm1760_vm3, %v2444_v17  ;;  %v5271_v52 = vpop.xlane.xlu1 %5270 }
 0x71f   : > { %13427 = vrcp.f32 %v5271_v52 }
 0x722   : > { %v5275_v9 = vpop.permute.xlu1 %5274 }
 0x723   : > { %12367 = vmatpush3.msra.mxu0 %v5275_v9 }
 0x726   : > { %v1758_v22 = vpop.permute.xlu1 %1757 }
 0x727   : > { %1761 = vst.msk [vmem:[#allocation2] sm:$0xff] %vm1760_vm3, %v1758_v22 }
 0x729   : > { %v13428_v43 = vpop.eup %13427 }
 0x72a   : > { %v1931_v26 = vpop.permute.xlu1 %1930  ;;  %v5273_v53 = vmul.f32 %v13428_v43, %v14532_v38 }
 0x72b   : > { %1934 = vst.msk [vmem:[#allocation2] sm:$0xff] %vm1933_vm4, %v1931_v26 }
 0x72c   : > { %12369 = vmatmul.mubr.msk.f32.vlgmr.msra.gmra.mrb[56].mxu0 %vm1247_vm1, %v5273_v53 }
 0x732   : > { %v5355_v32 = vld [vmem:[#allocation2] sm:$0xff] }
 0x733   : > { %12403 = vmatprep.mubr.f32.mxu1 %v5355_v32 }
 0x75f   : > { %v2616_v12 = vpop.permute.xlu1 %2615 }
 0x760   : > { %2618 = vst.msk [vmem:[#allocation2 + $0x8] sm:$0xff] %vm1933_vm4, %v2616_v12 }
 0x767   : > { %v5356_v58 = vld [vmem:[#allocation2 + $0x8] sm:$0xff] }
 0x768   : > { %12404 = vmatmul.mubr.f32.vlgmr.msra.gmra.mrb[56].mxu1 %v5356_v58 }
 0x77d   : > { %v2781_v55 = vpop.f32.mrb[26].mxu0 }
 0x77e   : > { %2785 = vst.msk [vmem:[#allocation2 + $0x10] sm:$0xff] %vm1247_vm1, %v2781_v55  ;;  %v12220_v59 = vpop.f32.mrb[27].mxu0 }
 0x781   : > { %v2950_v57 = vpop.f32.mrb[28].mxu0 }
 0x782   : > { %2955 = vrot.lane.b32.xlu0 %v2950_v57, %s16039_s19  ;;  %v12230_v1 = vpop.f32.mrb[29].mxu0 }
 0x785   : > { %v3122_v38 = vpop.f32.mrb[30].mxu0 }
 0x786   : > { %3127 = vrot.lane.b32.xlu1 %v3122_v38, %s16037_s1  ;;  %v12240_v62 = vpop.f32.mrb[31].mxu0 }
 0x7ae   : > { %v3294_v41 = vpop.f32.mrb[32].mxu0 }
 0x7af   : > { %3299 = vrot.lane.b32.xlu1 %v3294_v41, %s16035_s20  ;;  %v12250_v47 = vpop.f32.mrb[33].mxu0 }
 0x7b6   : > { %v3465_v40 = vpop.f32.mrb[34].mxu0 }
 0x7b7   : > { %3469 = vst.msk [vmem:[#allocation2 + $0x18] sm:$0xff] %vm1247_vm1, %v3465_v40  ;;  %v12260_v10 = vpop.f32.mrb[35].mxu0 }
 0x7ba   : > { %v3634_v18 = vpop.f32.mrb[36].mxu0 }
 0x7bb   : > { %3639 = vrot.lane.b32.xlu0 %v3634_v18, %s16039_s19  ;;  %v12270_v60 = vpop.f32.mrb[37].mxu0 }
 0x7be   : > { %v3806_v39 = vpop.f32.mrb[38].mxu0 }
 0x7bf   : > { %3811 = vrot.lane.b32.xlu0 %v3806_v39, %s16037_s1  ;;  %v12280_v44 = vpop.f32.mrb[39].mxu0 }
 0x7c2   : > { %v3978_v63 = vpop.f32.mrb[40].mxu0 }
 0x7c3   : > { %3983 = vrot.lane.b32.xlu1 %v3978_v63, %s16035_s20  ;;  %v12290_v6 = vpop.f32.mrb[41].mxu0 }
 0x7c6   : > { %v4149_v49 = vpop.f32.mrb[42].mxu0 }
 0x7c7   : > { %4153 = vst.msk [vmem:[#allocation2 + $0x20] sm:$0xff] %vm1247_vm1, %v4149_v49  ;;  %v12300_v19 = vpop.f32.mrb[43].mxu0 }
 0x7ca   : > { %v4318_v20 = vpop.f32.mrb[44].mxu0 }
 0x7cb   : > { %4323 = vrot.lane.b32.xlu0 %v4318_v20, %s16039_s19  ;;  %v12310_v16 = vpop.f32.mrb[45].mxu0 }
 0x7ce   : > { %v4490_v4 = vpop.f32.mrb[46].mxu0 }
 0x7cf   : > { %4495 = vrot.lane.b32.xlu1 %v4490_v4, %s16037_s1  ;;  %v12320_v14 = vpop.f32.mrb[47].mxu0 }
 0x7d2   : > { %v4662_v54 = vpop.f32.mrb[48].mxu0 }
 0x7d3   : > { %4667 = vrot.lane.b32.xlu1 %v4662_v54, %s16035_s20  ;;  %v12330_v11 = vpop.f32.mrb[49].mxu0 }
 0x7d6   : > { %v4833_v27 = vpop.f32.mrb[50].mxu0 }
 0x7d7   : > { %4837 = vst.msk [vmem:[#allocation2 + $0x28] sm:$0xff] %vm1247_vm1, %v4833_v27  ;;  %v12340_v50 = vpop.f32.mrb[51].mxu0 }
 0x7da   : > { %v5002_v30 = vpop.f32.mrb[52].mxu0 }
 0x7db   : > { %5007 = vrot.lane.b32.xlu0 %v5002_v30, %s16039_s19  ;;  %v12350_v3 = vpop.f32.mrb[53].mxu0  ;;  %s14744_s19 = scalar_lea.vmem %s16023_s8, %s14686_s26 }
 0x7de   : > { %v5174_v51 = vpop.f32.mrb[54].mxu0 }
 0x7df   : > { %5179 = vrot.lane.b32.xlu0 %v5174_v51, %s16037_s1  ;;  %v12360_v46 = vpop.f32.mrb[55].mxu0  ;;  %s14719_s1 = scalar_lea.vmem %s16025_s10, %s14555_s25  ;;  %s14944_s25 = scalar_lea.vmem %s16029_s14, %s14686_s26 }
 0x7e0   : > { %v5589_v41 = vld [vmem:[%s14719_s1] sm:$0xff]  ;;  %v5590_v47 = vld [vmem:[%s14719_s1 + $0x8] sm:$0xff]  ;;  %v5591_v18 = vld [vmem:[%s14719_s1 + $0x10] sm:$0xff] }
 0x7e1   : > { %v13044_v40 = vpack.c.bf16 %v5590_v47, %v5589_v41  ;;  %v5592_v60 = vld [vmem:[%s14719_s1 + $0x18] sm:$0xff]  ;;  %v5593_v44 = vld [vmem:[%s14719_s1 + $0x20] sm:$0xff]  ;;  %v5594_v63 = vld [vmem:[%s14719_s1 + $0x28] sm:$0xff] }
 0x7e2   : > { %v13048_v39 = vpack.c.bf16 %v5592_v60, %v5591_v18  ;;  %v13052_v6 = vpack.c.bf16 %v5594_v63, %v5593_v44  ;;  %v5595_v49 = vld [vmem:[%s14719_s1 + $0x30] sm:$0xff]  ;;  %v5596_v19 = vld [vmem:[%s14719_s1 + $0x38] sm:$0xff]  ;;  %v5597_v16 = vld [vmem:[%s14719_s1 + $0x40] sm:$0xff] }
 0x7e3   : > { %13045 = vmatprep.subr.bf16.mxu0 %v13044_v40  ;;  %v13056_v20 = vpack.c.bf16 %v5596_v19, %v5595_v49  ;;  %v5598_v4 = vld [vmem:[%s14719_s1 + $0x48] sm:$0xff]  ;;  %v5599_v54 = vld [vmem:[%s14719_s1 + $0x50] sm:$0xff]  ;;  %v5600_v11 = vld [vmem:[%s14719_s1 + $0x58] sm:$0xff] }
 0x7e4   : > { %13047 = vmatpush3.bf16.msra.mxu0 %v13044_v40  ;;  %v13060_v14 = vpack.c.bf16 %v5598_v4, %v5597_v16  ;;  %v13064_v27 = vpack.c.bf16 %v5600_v11, %v5599_v54  ;;  %v5601_v50 = vld [vmem:[%s14719_s1 + $0x60] sm:$0xff]  ;;  %v5602_v30 = vld [vmem:[%s14719_s1 + $0x68] sm:$0xff]  ;;  %v5603_v51 = vld [vmem:[%s14719_s1 + $0x70] sm:$0xff] }
 0x7e5   : > { %13049 = vmatprep.subr.bf16.mxu0 %v13048_v39  ;;  %v13068_v3 = vpack.c.bf16 %v5602_v30, %v5601_v50  ;;  %v5604_v46 = vld [vmem:[%s14719_s1 + $0x78] sm:$0xff]  ;;  %v14757_v41 = vld [vmem:[%s14751_s22] ss:$0 sm:$0xff]  ;;  %v5766_v50 = vld [vmem:[%s14788_s24 + $0x28] sm:$0xff] }
 0x7e6   : > { %v5764_v54 = vld [vmem:[%s14788_s24 + $0x18] sm:$0xff] }
 0x7e8   : > { %13051 = vmatpush3.bf16.msra.mxu0 %v13048_v39 }
 0x7e9   : > { %13053 = vmatprep.subr.bf16.mxu0 %v13052_v6 }
 0x7ec   : > { %13055 = vmatpush3.bf16.msra.mxu0 %v13052_v6 }
 0x7ed   : > { %13057 = vmatprep.subr.bf16.mxu0 %v13056_v20 }
 0x7f0   : > { %13059 = vmatpush3.bf16.msra.mxu0 %v13056_v20 }
 0x7f1   : > { %13061 = vmatprep.subr.bf16.mxu0 %v13060_v14 }
 0x7f4   : > { %v2956_v7 = vpop.permute.xlu0 %2955  ;;  %13063 = vmatpush3.bf16.msra.mxu0 %v13060_v14  ;;  %v5763_v14 = vld [vmem:[%s14788_s24 + $0x10] sm:$0xff] }
 0x7f5   : > { %2958 = vst.msk [vmem:[#allocation2 + $0x10] sm:$0xff] %vm1587_vm2, %v2956_v7  ;;  %13065 = vmatprep.subr.bf16.mxu0 %v13064_v27  ;;  %v13072_v7 = vpack.c.bf16 %v5604_v46, %v5603_v51  ;;  %v13080_v11 = vpack.c.bf16 %v5764_v54, %v5763_v14  ;;  %v5768_v51 = vld [vmem:[%s14788_s24 + $0x38] sm:$0xff] }
 0x7f8   : > { %v3128_v13 = vpop.permute.xlu1 %3127  ;;  %13067 = vmatpush3.bf16.msra.mxu0 %v13064_v27  ;;  %v5765_v27 = vld [vmem:[%s14788_s24 + $0x20] sm:$0xff] }
 0x7f9   : > { %3130 = vst.msk [vmem:[#allocation2 + $0x10] sm:$0xff] %vm1760_vm3, %v3128_v13  ;;  %13069 = vmatprep.subr.bf16.mxu0 %v13068_v3  ;;  %v13084_v30 = vpack.c.bf16 %v5766_v50, %v5765_v27 }
 0x7fc   : > { %13071 = vmatpush3.bf16.msra.mxu0 %v13068_v3  ;;  %v5767_v3 = vld [vmem:[%s14788_s24 + $0x30] sm:$0xff] }
 0x7fd   : > { %13073 = vmatprep.subr.bf16.mxu0 %v13072_v7  ;;  %v13088_v46 = vpack.c.bf16 %v5768_v51, %v5767_v3 }
 0x7ff   : > { %v5346_v61 = vpop.f32.mrb[56].mxu0 }
 0x800   : > { %5351 = vrot.lane.b32.xlu1 %v5346_v61, %s16035_s20  ;;  %v12370_v36 = vpop.f32.mrb[57].mxu0  ;;  %s14693_s20 = scalar_lea.vmem %s16022_s7, %s14686_s26  ;;  %13075 = vmatpush3.bf16.msra.mxu0 %v13072_v7  ;;  %s16062_s26 = smov 8  }
 0x801   : > { %v14696_v22 = vld [vmem:[%s14693_s20] ss:$0 sm:$0xff] }
 0x821   : > { %v3300_v2 = vpop.permute.xlu1 %3299 }
 0x822   : > { %3302 = vst.msk [vmem:[#allocation2 + $0x10] sm:$0xff] %vm1933_vm4, %v3300_v2 }
 0x829   : > { %v5357_v56 = vld [vmem:[#allocation2 + $0x10] sm:$0xff] }
 0x82a   : > { %12406 = vmatprep.mubr.f32.mxu1 %v5357_v56 }
 0x82d   : > { %v3640_v17 = vpop.permute.xlu0 %3639 }
 0x82e   : > { %3642 = vst.msk [vmem:[#allocation2 + $0x18] sm:$0xff] %vm1587_vm2, %v3640_v17 }
 0x831   : > { %v3812_v52 = vpop.permute.xlu0 %3811 }
 0x832   : > { %3814 = vst.msk [vmem:[#allocation2 + $0x18] sm:$0xff] %vm1760_vm3, %v3812_v52 }
 0x835   : > { %v3984_v9 = vpop.permute.xlu1 %3983 }
 0x836   : > { %3986 = vst.msk [vmem:[#allocation2 + $0x18] sm:$0xff] %vm1933_vm4, %v3984_v9 }
 0x83b   : > { %v12405_v43 = vpop.f32.mrb[56].mxu1 }
 0x83c   : > { %v5456_v26 = vadd.f32 %v12405_v43, %v14696_v22  ;;  %v5450_v53 = vpop.f32.mrb[57].mxu1 }
 0x83d   : > { %v4324_v32 = vpop.permute.xlu0 %4323  ;;  %v5358_v12 = vld [vmem:[#allocation2 + $0x18] sm:$0xff]  ;;  %v5451_v58 = vadd.f32 %v14696_v22, %v5450_v53 }
 0x83e   : > { %4326 = vst.msk [vmem:[#allocation2 + $0x20] sm:$0xff] %vm1587_vm2, %v4324_v32  ;;  %12407 = vmatmul.mubr.f32.gmra.mrb[58].mxu1 %v5358_v12  ;;  %v14702_v55 = vadd.f32 %v5456_v26, %v13854_v24 }
 0x83f   : > { %v14705_v59 = vadd.f32 %v5451_v58, %v13842_v35 }
 0x840   : > { %5489 = vadd.xlane.f32.xlu1 %v14702_v55  ;;  %v5506_v24 = vmul.f32 %v14702_v55, %v14702_v55 }
 0x841   : > { %v4496_v57 = vpop.permute.xlu1 %4495  ;;  %5487 = vadd.xlane.f32.xlu0 %v14705_v59  ;;  %v5505_v1 = vmul.f32 %v14705_v59, %v14705_v59 }
 0x842   : > { %4498 = vst.msk [vmem:[#allocation2 + $0x20] sm:$0xff] %vm1760_vm3, %v4496_v57 }
 0x845   : > { %v4668_v38 = vpop.permute.xlu1 %4667  ;;  %5511 = vadd.xlane.f32.xlu0 %v5505_v1 }
 0x846   : > { %4670 = vst.msk [vmem:[#allocation2 + $0x20] sm:$0xff] %vm1933_vm4, %v4668_v38 }
 0x849   : > { %5513 = vadd.xlane.f32.xlu0 %v5506_v24 }
 0x84d   : > { %v5008_v35 = vpop.permute.xlu0 %5007  ;;  %v5359_v62 = vld [vmem:[#allocation2 + $0x20] sm:$0xff] }
 0x84e   : > { %5010 = vst.msk [vmem:[#allocation2 + $0x28] sm:$0xff] %vm1587_vm2, %v5008_v35  ;;  %12409 = vmatprep.mubr.f32.mxu1 %v5359_v62  ;;  %v14754_v35 = vld [vmem:[%s14744_s19] ss:$0 sm:$0xff] }
 0x851   : > { %v5180_v10 = vpop.permute.xlu0 %5179 }
 0x852   : > { %5182 = vst.msk [vmem:[#allocation2 + $0x28] sm:$0xff] %vm1760_vm3, %v5180_v10 }
 0x872   : > { %v5352_v13 = vpop.permute.xlu1 %5351 }
 0x873   : > { %5354 = vst.msk [vmem:[#allocation2 + $0x28] sm:$0xff] %vm1933_vm4, %v5352_v13  ;;  %v5769_v13 = vld [vmem:[%s14788_s24 + $0x40] sm:$0xff] }
 0x87a   : > { %v5360_v61 = vld [vmem:[#allocation2 + $0x28] sm:$0xff] }
 0x87b   : > { %12410 = vmatmul.mubr.f32.gmra.mrb[60].mxu1 %v5360_v61  ;;  %v5770_v61 = vld [vmem:[%s14788_s24 + $0x48] sm:$0xff] }
 0x8cd   : > { %v5490_v56 = vpop.xlane.xlu1 %5489 }
 0x8ce   : > { %v5488_v36 = vpop.xlane.xlu0 %5487  ;;  %v5500_v52 = vmul.f32 0.03125, %v5490_v56  ;;  %v13092_v56 = vpack.c.bf16 %v5770_v61, %v5769_v13 }
 0x8cf   : > { %v5499_v2 = vmul.f32 0.03125, %v5488_v36 }
 0x8d0   : > { %v5530_v32 = vmul.f32 %v5500_v52, %v5500_v52  ;;  %v5542_v47 = vsub.f32 %v14702_v55, %v5500_v52  ;;  %v5772_v52 = vld [vmem:[%s14788_s24 + $0x58] sm:$0xff] }
 0x8d1   : > { %v5529_v9 = vmul.f32 %v5499_v2, %v5499_v2  ;;  %v5541_v38 = vsub.f32 %v14705_v59, %v5499_v2 }
 0x8d2   : > { %v5512_v17 = vpop.xlane.xlu0 %5511 }
 0x8d3   : > { %v5523_v43 = vmul.f32 0.03125, %v5512_v17  ;;  %v5771_v17 = vld [vmem:[%s14788_s24 + $0x50] sm:$0xff] }
 0x8d5   : > { %v5535_v26 = vsub.f32 %v5523_v43, %v5529_v9  ;;  %v13096_v43 = vpack.c.bf16 %v5772_v52, %v5771_v17 }
 0x8d6   : > { %v5514_v53 = vpop.xlane.xlu0 %5513 }
 0x8d7   : > { %v5547_v12 = vadd.f32 1e-12, %v5535_v26  ;;  %v5524_v58 = vmul.f32 0.03125, %v5514_v53  ;;  %v5773_v26 = vld [vmem:[%s14788_s24 + $0x60] sm:$0xff]  ;;  %v5774_v53 = vld [vmem:[%s14788_s24 + $0x68] sm:$0xff] }
 0x8d9   : > { %13429 = vrsqrt.f32 %v5547_v12  ;;  %v5536_v57 = vsub.f32 %v5524_v58, %v5530_v32  ;;  %v13100_v58 = vpack.c.bf16 %v5774_v53, %v5773_v26 }
 0x8db   : > { %v5548_v1 = vadd.f32 1e-12, %v5536_v57  ;;  %v5775_v57 = vld [vmem:[%s14788_s24 + $0x70] sm:$0xff] }
 0x8dd   : > { %13431 = vrsqrt.f32 %v5548_v1  ;;  %v5776_v1 = vld [vmem:[%s14788_s24 + $0x78] sm:$0xff] }
 0x8e3   : > { %v13430_v24 = vpop.eup %13429 }
 0x8e4   : > { %v5559_v62 = vmul.f32 %v13430_v24, %v5541_v38 }
 0x8e6   : > { %v5571_v40 = vmul.f32 %v14754_v35, %v5559_v62 }
 0x8e7   : > { %v13432_v10 = vpop.eup %13431 }
 0x8e8   : > { %v14762_v18 = vadd.f32 %v14757_v41, %v5571_v40  ;;  %v5560_v59 = vmul.f32 %v13432_v10, %v5542_v47 }
 0x8ea   : > { %12444 = vmatprep.mubr.f32.mxu0 %v14762_v18  ;;  %v5572_v60 = vmul.f32 %v14754_v35, %v5560_v59 }
 0x8ec   : > { %v14767_v39 = vadd.f32 %v14757_v41, %v5572_v60 }
 0x8ee   : > { %12445 = vmatmul.mubr.f32.vlgmr.msra.gmra.mrb[58].mxu0 %v14767_v39 }
 0x911   : > { %v12408_v44 = vpop.f32.mrb[58].mxu1 }
 0x912   : > { %v5466_v55 = vadd.f32 %v12408_v44, %v14696_v22  ;;  %v5460_v63 = vpop.f32.mrb[59].mxu1 }
 0x913   : > { %v5461_v6 = vadd.f32 %v14696_v22, %v5460_v63 }
 0x914   : > { %v14773_v49 = vadd.f32 %v5466_v55, %v13867_v28  ;;  %v5762_v28 = vld [vmem:[%s14788_s24 + $0x8] sm:$0xff] }
 0x915   : > { %v14776_v19 = vadd.f32 %v5461_v6, %v13857_v25  ;;  %v5761_v25 = vld [vmem:[%s14788_s24] sm:$0xff] }
 0x916   : > { %5493 = vadd.xlane.f32.xlu1 %v14773_v49  ;;  %v5508_v20 = vmul.f32 %v14773_v49, %v14773_v49  ;;  %v13076_v4 = vpack.c.bf16 %v5762_v28, %v5761_v25 }
 0x917   : > { %5491 = vadd.xlane.f32.xlu0 %v14776_v19  ;;  %v5507_v16 = vmul.f32 %v14776_v19, %v14776_v19 }
 0x918   : > { %13077 = vmatprep.subr.bf16.mxu1 %v13076_v4 }
 0x919   : > { %13079 = vmatpush3.bf16.msra.mxu1 %v13076_v4 }
 0x91a   : > { %5517 = vadd.xlane.f32.xlu1 %v5508_v20  ;;  %13081 = vmatprep.subr.bf16.mxu1 %v13080_v11 }
 0x91b   : > { %5515 = vadd.xlane.f32.xlu0 %v5507_v16 }
 0x91d   : > { %13083 = vmatpush3.bf16.msra.mxu1 %v13080_v11 }
 0x91e   : > { %13085 = vmatprep.subr.bf16.mxu1 %v13084_v30 }
 0x921   : > { %13087 = vmatpush3.bf16.msra.mxu1 %v13084_v30 }
 0x922   : > { %13089 = vmatprep.subr.bf16.mxu1 %v13088_v46 }
 0x925   : > { %13091 = vmatpush3.bf16.msra.mxu1 %v13088_v46 }
 0x926   : > { %13093 = vmatprep.subr.bf16.mxu1 %v13092_v56 }
 0x929   : > { %13095 = vmatpush3.bf16.msra.mxu1 %v13092_v56 }
 0x92a   : > { %13097 = vmatprep.subr.bf16.mxu1 %v13096_v43 }
 0x92d   : > { %13099 = vmatpush3.bf16.msra.mxu1 %v13096_v43 }
 0x92e   : > { %13101 = vmatprep.subr.bf16.mxu1 %v13100_v58 }
 0x931   : > { %13103 = vmatpush3.bf16.msra.mxu1 %v13100_v58 }
 0x94e   : > { %v12411_v7 = vpop.f32.mrb[60].mxu1 }
 0x94f   : > { %v5476_v36 = vadd.f32 %v12411_v7, %v14696_v22  ;;  %v5470_v2 = vpop.f32.mrb[61].mxu1 }
 0x950   : > { %v5471_v9 = vadd.f32 %v14696_v22, %v5470_v2 }
 0x951   : > { %v14807_v32 = vadd.f32 %v5476_v36, %v13880_v34 }
 0x952   : > { %v14810_v12 = vadd.f32 %v5471_v9, %v13870_v29  ;;  %v13104_v29 = vpack.c.bf16 %v5776_v1, %v5775_v57 }
 0x953   : > { %5497 = vadd.xlane.f32.xlu1 %v14807_v32  ;;  %v5510_v22 = vmul.f32 %v14807_v32, %v14807_v32 }
 0x954   : > { %5495 = vadd.xlane.f32.xlu0 %v14810_v12  ;;  %v5509_v34 = vmul.f32 %v14810_v12, %v14810_v12  ;;  %13105 = vmatprep.subr.bf16.mxu1 %v13104_v29 }
 0x955   : > { %13107 = vmatpush3.bf16.msra.mxu1 %v13104_v29 }
 0x957   : > { %5521 = vadd.xlane.f32.xlu1 %v5510_v22 }
 0x958   : > { %5519 = vadd.xlane.f32.xlu0 %v5509_v34 }
 0x9a3   : > { %v5494_v38 = vpop.xlane.xlu1 %5493 }
 0x9a4   : > { %v5502_v24 = vmul.f32 0.03125, %v5494_v38  ;;  %v5492_v62 = vpop.xlane.xlu0 %5491 }
 0x9a5   : > { %v5501_v47 = vmul.f32 0.03125, %v5492_v62 }
 0x9a6   : > { %v5532_v10 = vmul.f32 %v5502_v24, %v5502_v24  ;;  %v5544_v25 = vsub.f32 %v14773_v49, %v5502_v24 }
 0x9a7   : > { %v5518_v40 = vpop.xlane.xlu1 %5517  ;;  %v5531_v44 = vmul.f32 %v5501_v47, %v5501_v47  ;;  %v5543_v4 = vsub.f32 %v14776_v19, %v5501_v47  ;;  %v14837_v19 = vld [vmem:[%s14828_s23] ss:$0 sm:$0xff] }
 0x9a8   : > { %v5526_v59 = vmul.f32 0.03125, %v5518_v40  ;;  %v5516_v60 = vpop.xlane.xlu0 %5515 }
 0x9a9   : > { %v5525_v55 = vmul.f32 0.03125, %v5516_v60 }
 0x9aa   : > { %v5538_v63 = vsub.f32 %v5526_v59, %v5532_v10 }
 0x9ab   : > { %v5537_v6 = vsub.f32 %v5525_v55, %v5531_v44 }
 0x9ac   : > { %v5550_v20 = vadd.f32 1e-12, %v5538_v63 }
 0x9ad   : > { %v5549_v16 = vadd.f32 1e-12, %v5537_v6 }
 0x9ae   : > { %13433 = vrsqrt.f32 %v5550_v20 }
 0x9af   : > { %13435 = vrsqrt.f32 %v5549_v16 }
 0x9b8   : > { %v13434_v28 = vpop.eup %13433 }
 0x9b9   : > { %v13436_v14 = vpop.eup %13435  ;;  %v5562_v54 = vmul.f32 %v13434_v28, %v5544_v25 }
 0x9ba   : > { %v5561_v11 = vmul.f32 %v13436_v14, %v5543_v4 }
 0x9bb   : > { %v5574_v27 = vmul.f32 %v14754_v35, %v5562_v54 }
 0x9bc   : > { %v5573_v50 = vmul.f32 %v14754_v35, %v5561_v11 }
 0x9bd   : > { %v14834_v49 = vadd.f32 %v14757_v41, %v5574_v27 }
 0x9be   : > { %v14831_v30 = vadd.f32 %v14757_v41, %v5573_v50 }
 0x9c0   : > { %12447 = vmatprep.mubr.f32.mxu0 %v14831_v30 }
 0x9c1   : > { %12448 = vmatmul.mubr.f32.gmra.mrb[60].mxu0 %v14834_v49  ;;  %v12446_v3 = vpop.f32.mrb[58].mxu0 }
 0x9c2   : > { %v5684_v51 = vadd.f32 %v12446_v3, %v14837_v19  ;;  %v5678_v46 = vpop.f32.mrb[59].mxu0 }
 0x9c3   : > { %v5679_v7 = vadd.f32 %v14837_v19, %v5678_v46  ;;  %v11510_v46 = vld [vmem:[%s13732_s2 + $0x1a0] sm:$0xff] }
 0x9c4   : > { %v5714_v13 = vmul.f32 0.044715, %v5684_v51  ;;  %v5708_v34 = vmul.f32 0.5, %v5684_v51 }
 0x9c5   : > { %v5713_v61 = vmul.f32 0.044715, %v5679_v7  ;;  %v5707_v1 = vmul.f32 0.5, %v5679_v7 }
 0x9c6   : > { %v5720_v36 = vmul.f32 %v5714_v13, %v5684_v51 }
 0x9c7   : > { %v5719_v2 = vmul.f32 %v5713_v61, %v5679_v7  ;;  %v11513_v61 = vld [vmem:[%s13732_s2 + $0x1b8] sm:$0xff] }
 0x9c8   : > { %v5726_v56 = vmul.f32 %v5720_v36, %v5684_v51  ;;  %v11516_v36 = vld [vmem:[%s13732_s2 + $0x1d0] sm:$0xff] }
 0x9c9   : > { %v5725_v17 = vmul.f32 %v5719_v2, %v5679_v7 }
 0x9ca   : > { %v5732_v52 = vadd.f32 %v5726_v56, %v5684_v51  ;;  %v13112_v56 = vpack.c.bf16 %v11516_v36, %v11513_v61  ;;  %v11521_v61 = vld [vmem:[%s13732_s2 + $0x1f8] sm:$0xff] }
 0x9cb   : > { %v5731_v9 = vadd.f32 %v5725_v17, %v5679_v7  ;;  %v11506_v7 = vld [vmem:[%s13732_s2 + $0x180] sm:$0xff]  ;;  %v11508_v17 = vld [vmem:[%s13732_s2 + $0x190] sm:$0xff] }
 0x9cc   : > { %v5738_v43 = vmul.f32 0.7978846, %v5732_v52  ;;  %v11511_v52 = vld [vmem:[%s13732_s2 + $0x1a8] sm:$0xff] }
 0x9cd   : > { %v5737_v26 = vmul.f32 0.7978846, %v5731_v9  ;;  %v13140_v9 = vpack.c.bf16 %v11511_v52, %v11508_v17  ;;  %v11528_v17 = vld [vmem:[%s13732_s2 + $0x230] sm:$0xff] }
 0x9ce   : > { %13437 = vtanh.f32 %v5738_v43  ;;  %v11515_v43 = vld [vmem:[%s13732_s2 + $0x1c8] sm:$0xff]  ;;  %v11520_v52 = vld [vmem:[%s13732_s2 + $0x1f0] sm:$0xff] }
 0x9cf   : > { %13439 = vtanh.f32 %v5737_v26  ;;  %13141 = vmatprep.subr.bf16.mxu1 %v13140_v9 }
 0x9d8   : > { %v13438_v53 = vpop.eup %13437 }
 0x9d9   : > { %v13440_v58 = vpop.eup %13439  ;;  %v5750_v57 = vadd.f32 1.0, %v13438_v53 }
 0x9da   : > { %v5749_v22 = vadd.f32 1.0, %v13440_v58 }
 0x9db   : > { %v5756_v38 = vmul.f32 %v5750_v57, %v5708_v34 }
 0x9dc   : > { %v5755_v29 = vmul.f32 %v5749_v22, %v5707_v1 }
 0x9de   : > { %12485 = vmatprep.mubr.f32.mxu1 %v5755_v29 }
 0x9df   : > { %12486 = vmatmul.mubr.f32.vlgmr.msra.gmra.mrb[62].mxu1 %v5756_v38 }
 0x9e0   : > { %v5498_v24 = vpop.xlane.xlu1 %5497  ;;  %13143 = vmatpush3.bf16.msra.mxu1 %v13140_v9  ;;  %v11523_v9 = vld [vmem:[%s13732_s2 + $0x208] sm:$0xff] }
 0x9e1   : > { %v5504_v62 = vmul.f32 0.03125, %v5498_v24  ;;  %v5496_v47 = vpop.xlane.xlu0 %5495 }
 0x9e2   : > { %v5503_v40 = vmul.f32 0.03125, %v5496_v47 }
 0x9e3   : > { %v5534_v59 = vmul.f32 %v5504_v62, %v5504_v62  ;;  %v5546_v28 = vsub.f32 %v14807_v32, %v5504_v62 }
 0x9e4   : > { %v5522_v10 = vpop.xlane.xlu1 %5521  ;;  %v5533_v55 = vmul.f32 %v5503_v40, %v5503_v40  ;;  %v5545_v14 = vsub.f32 %v14810_v12, %v5503_v40  ;;  %v11507_v12 = vld [vmem:[%s13732_s2 + $0x188] sm:$0xff] }
 0x9e5   : > { %v5528_v60 = vmul.f32 0.03125, %v5522_v10  ;;  %v5520_v44 = vpop.xlane.xlu0 %5519  ;;  %v13108_v13 = vpack.c.bf16 %v11510_v46, %v11507_v12  ;;  %v11522_v46 = vld [vmem:[%s13732_s2 + $0x200] sm:$0xff] }
 0x9e6   : > { %v5527_v63 = vmul.f32 0.03125, %v5520_v44 }
 0x9e7   : > { %v5540_v6 = vsub.f32 %v5528_v60, %v5534_v59  ;;  %13109 = vmatprep.subr.bf16.mxu0 %v13108_v13  ;;  %v11517_v13 = vld [vmem:[%s13732_s2 + $0x1d8] sm:$0xff] }
 0x9e8   : > { %v5539_v20 = vsub.f32 %v5527_v63, %v5533_v55 }
 0x9e9   : > { %v5552_v16 = vadd.f32 1e-12, %v5540_v6 }
 0x9ea   : > { %v5551_v25 = vadd.f32 1e-12, %v5539_v20 }
 0x9eb   : > { %13441 = vrsqrt.f32 %v5552_v16 }
 0x9ec   : > { %13443 = vrsqrt.f32 %v5551_v25 }
 0x9f5   : > { %v13442_v4 = vpop.eup %13441 }
 0x9f6   : > { %v13444_v54 = vpop.eup %13443  ;;  %v5564_v11 = vmul.f32 %v13442_v4, %v5546_v28  ;;  %v14875_v28 = vld [vmem:[%s14872_s29] ss:$0 sm:$0xff] }
 0x9f7   : > { %v5563_v27 = vmul.f32 %v13444_v54, %v5545_v14 }
 0x9f8   : > { %v5576_v50 = vmul.f32 %v14754_v35, %v5564_v11 }
 0x9f9   : > { %v5575_v3 = vmul.f32 %v14754_v35, %v5563_v27  ;;  %v11509_v35 = vld [vmem:[%s13732_s2 + $0x198] sm:$0xff] }
 0x9fa   : > { %v14851_v32 = vadd.f32 %v14757_v41, %v5576_v50  ;;  %v13110_v2 = vpack.c.bf16 %v11509_v35, %v11506_v7  ;;  %v11518_v35 = vld [vmem:[%s13732_s2 + $0x1e0] sm:$0xff] }
 0x9fb   : > { %v14848_v51 = vadd.f32 %v14757_v41, %v5575_v3  ;;  %v11512_v41 = vld [vmem:[%s13732_s2 + $0x1b0] sm:$0xff] }
 0x9fc   : > { %13111 = vmatpush1.bf16.msra.mxu0 %v13110_v2  ;;  %v13114_v26 = vpack.c.bf16 %v11515_v43, %v11512_v41  ;;  %v13118_v2 = vpack.c.bf16 %v11521_v61, %v11518_v35  ;;  %v11524_v43 = vld [vmem:[%s13732_s2 + $0x210] sm:$0xff]  ;;  %v11545_v35 = vld [vmem:[%s13732_s2 + $0x2b8] sm:$0xff] }
 0x9fd   : > { %12450 = vmatprep.mubr.f32.mxu0 %v14848_v51  ;;  %13113 = vmatprep.subr.bf16.mxu0 %v13112_v56  ;;  %v11525_v56 = vld [vmem:[%s13732_s2 + $0x218] sm:$0xff] }
 0x9fe   : > { %12451 = vmatmul.mubr.f32.gmra.mrb[62].mxu0 %v14851_v32  ;;  %v13120_v41 = vpack.c.bf16 %v11528_v17, %v11525_v56 }
 0x9ff   : > { %6120 = vmatprep.mubr.f32.mxu0 %v14265_v8 }
 0xa00   : > { %13115 = vmatpush1.bf16.msra.mxu0 %v13114_v26  ;;  %v11527_v26 = vld [vmem:[%s13732_s2 + $0x228] sm:$0xff] }
 0xa94   : > { %v12449_v53 = vpop.f32.mrb[60].mxu0 }
 0xa95   : > { %v5694_v58 = vadd.f32 %v12449_v53, %v14837_v19  ;;  %v5688_v57 = vpop.f32.mrb[61].mxu0  ;;  %v13148_v53 = vpack.c.bf16 %v11523_v9, %v11520_v52  ;;  %v11549_v52 = vld [vmem:[%s13732_s2 + $0x2d8] sm:$0xff]  ;;  %v11544_v9 = vld [vmem:[%s13732_s2 + $0x2b0] sm:$0xff] }
 0xa96   : > { %v5689_v1 = vadd.f32 %v14837_v19, %v5688_v57  ;;  %v11531_v57 = vld [vmem:[%s13732_s2 + $0x248] sm:$0xff] }
 0xa97   : > { %v5716_v22 = vmul.f32 0.044715, %v5694_v58  ;;  %v5710_v20 = vmul.f32 0.5, %v5694_v58 }
 0xa98   : > { %v5715_v34 = vmul.f32 0.044715, %v5689_v1  ;;  %v5709_v63 = vmul.f32 0.5, %v5689_v1 }
 0xa99   : > { %v5722_v29 = vmul.f32 %v5716_v22, %v5694_v58  ;;  %v11526_v22 = vld [vmem:[%s13732_s2 + $0x220] sm:$0xff] }
 0xa9a   : > { %v5721_v38 = vmul.f32 %v5715_v34, %v5689_v1 }
 0xa9b   : > { %v5728_v24 = vmul.f32 %v5722_v29, %v5694_v58  ;;  %v11529_v29 = vld [vmem:[%s13732_s2 + $0x238] sm:$0xff] }
 0xa9c   : > { %v5727_v62 = vmul.f32 %v5721_v38, %v5689_v1  ;;  %v11530_v38 = vld [vmem:[%s13732_s2 + $0x240] sm:$0xff] }
 0xa9d   : > { %v5734_v47 = vadd.f32 %v5728_v24, %v5694_v58  ;;  %v13122_v58 = vpack.c.bf16 %v11527_v26, %v11524_v43  ;;  %v11533_v24 = vld [vmem:[%s13732_s2 + $0x258] sm:$0xff] }
 0xa9e   : > { %v5733_v40 = vadd.f32 %v5727_v62, %v5689_v1  ;;  %v11534_v1 = vld [vmem:[%s13732_s2 + $0x260] sm:$0xff]  ;;  %v13152_v62 = vpack.c.bf16 %v11529_v29, %v11526_v22 }
 0xa9f   : > { %v5740_v10 = vmul.f32 0.7978846, %v5734_v47  ;;  %v13124_v34 = vpack.c.bf16 %v11534_v1, %v11531_v57  ;;  %v13126_v47 = vpack.c.bf16 %v11533_v24, %v11530_v38  ;;  %v11551_v57 = vld [vmem:[%s13732_s2 + $0x2e8] sm:$0xff]  ;;  %v11550_v38 = vld [vmem:[%s13732_s2 + $0x2e0] sm:$0xff]  ;;  %v11553_v24 = vld [vmem:[%s13732_s2 + $0x2f8] sm:$0xff] }
 0xaa0   : > { %v5739_v59 = vmul.f32 0.7978846, %v5733_v40 }
 0xaa1   : > { %13445 = vtanh.f32 %v5740_v10 }
 0xaa2   : > { %13447 = vtanh.f32 %v5739_v59 }
 0xaab   : > { %v13446_v60 = vpop.eup %13445 }
 0xaac   : > { %v13448_v44 = vpop.eup %13447  ;;  %v5752_v55 = vadd.f32 1.0, %v13446_v60  ;;  %v11537_v60 = vld [vmem:[%s13732_s2 + $0x278] sm:$0xff] }
 0xaad   : > { %v5751_v6 = vadd.f32 1.0, %v13448_v44  ;;  %v11540_v44 = vld [vmem:[%s13732_s2 + $0x290] sm:$0xff] }
 0xaae   : > { %v5758_v25 = vmul.f32 %v5752_v55, %v5710_v20  ;;  %v11532_v55 = vld [vmem:[%s13732_s2 + $0x250] sm:$0xff]  ;;  %v11535_v20 = vld [vmem:[%s13732_s2 + $0x268] sm:$0xff] }
 0xaaf   : > { %v5757_v16 = vmul.f32 %v5751_v6, %v5709_v63  ;;  %v13128_v6 = vpack.c.bf16 %v11540_v44, %v11537_v60 }
 0xab1   : > { %12488 = vmatprep.mubr.f32.mxu1 %v5757_v16  ;;  %v11536_v16 = vld [vmem:[%s13732_s2 + $0x270] sm:$0xff] }
 0xab2   : > { %12489 = vmatmul.mubr.f32.gmra.mrb[64].mxu1 %v5758_v25  ;;  %v12487_v4 = vpop.f32.mrb[62].mxu1  ;;  %v11539_v25 = vld [vmem:[%s13732_s2 + $0x288] sm:$0xff] }
 0xab3   : > { %v5850_v14 = vpop.f32.mrb[63].mxu1  ;;  %v5856_v54 = vadd.f32 %v12487_v4, %v14875_v28 }
 0xab4   : > { %v5851_v11 = vadd.f32 %v14875_v28, %v5850_v14  ;;  %v13156_v14 = vpack.c.bf16 %v11535_v20, %v11532_v55 }
 0xab5   : > { %v14883_v50 = vadd.f32 %v5856_v54, %v14767_v39  ;;  %v11514_v39 = vld [vmem:[%s13732_s2 + $0x1c0] sm:$0xff]  ;;  %v13130_v54 = vpack.c.bf16 %v11539_v25, %v11536_v16 }
 0xab6   : > { %v14880_v27 = vadd.f32 %v5851_v11, %v14762_v18  ;;  %v11519_v18 = vld [vmem:[%s13732_s2 + $0x1e8] sm:$0xff]  ;;  %v13144_v36 = vpack.c.bf16 %v11517_v13, %v11514_v39  ;;  %v11542_v13 = vld [vmem:[%s13732_s2 + $0x2a0] sm:$0xff] }
 0xab7   : > { %v5906_v12 = vmul.f32 %v14883_v50, %v14883_v50  ;;  %v13116_v7 = vpack.c.bf16 %v11522_v46, %v11519_v18  ;;  %v11538_v18 = vld [vmem:[%s13732_s2 + $0x280] sm:$0xff] }
 0xab8   : > { %5887 = vadd.xlane.f32.xlu0 %v14880_v27  ;;  %v5905_v3 = vmul.f32 %v14880_v27, %v14880_v27  ;;  %13145 = vmatprep.subr.bf16.mxu1 %v13144_v36 }
 0xab9   : > { %13117 = vmatprep.subr.bf16.mxu0 %v13116_v7  ;;  %13147 = vmatpush3.bf16.msra.mxu1 %v13144_v36  ;;  %v11541_v7 = vld [vmem:[%s13732_s2 + $0x298] sm:$0xff] }
 0xaba   : > { %5911 = vadd.xlane.f32.xlu1 %v5905_v3  ;;  %13119 = vmatpush1.bf16.msra.mxu0 %v13118_v2  ;;  %v13160_v36 = vpack.c.bf16 %v11541_v7, %v11538_v18  ;;  %v13134_v2 = vpack.c.bf16 %v11545_v35, %v11542_v13  ;;  %v14954_v35 = vld [vmem:[%s14944_s25] ss:$0 sm:$0xff] }
 0xabb   : > { %13121 = vmatprep.subr.bf16.mxu0 %v13120_v41  ;;  %13149 = vmatprep.subr.bf16.mxu1 %v13148_v53  ;;  %v11552_v41 = vld [vmem:[%s13732_s2 + $0x2f0] sm:$0xff] }
 0xabc   : > { %5889 = vadd.xlane.f32.xlu0 %v14883_v50  ;;  %v13136_v26 = vpack.c.bf16 %v11552_v41, %v11549_v52 }
 0xabd   : > { %13151 = vmatpush3.bf16.msra.mxu1 %v13148_v53  ;;  %v11547_v53 = vld [vmem:[%s13732_s2 + $0x2c8] sm:$0xff] }
 0xabe   : > { %5913 = vadd.xlane.f32.xlu1 %v5906_v12  ;;  %13123 = vmatpush1.bf16.msra.mxu0 %v13122_v58  ;;  %v11546_v12 = vld [vmem:[%s13732_s2 + $0x2c0] sm:$0xff]  ;;  %v11548_v58 = vld [vmem:[%s13732_s2 + $0x2d0] sm:$0xff]  ;;  %v13164_v22 = vpack.c.bf16 %v11547_v53, %v11544_v9 }
 0xabf   : > { %13125 = vmatprep.subr.bf16.mxu0 %v13124_v34  ;;  %13153 = vmatprep.subr.bf16.mxu1 %v13152_v62  ;;  %v13138_v34 = vpack.c.bf16 %v11551_v57, %v11548_v58 }
 0xac1   : > { %13155 = vmatpush3.bf16.msra.mxu1 %v13152_v62  ;;  %v13168_v62 = vpack.c.bf16 %v11553_v24, %v11550_v38 }
 0xac2   : > { %13127 = vmatpush1.bf16.msra.mxu0 %v13126_v47  ;;  %13157 = vmatprep.subr.bf16.mxu1 %v13156_v14 }
 0xac3   : > { %13129 = vmatprep.subr.bf16.mxu0 %v13128_v6 }
 0xac5   : > { %13159 = vmatpush3.bf16.msra.mxu1 %v13156_v14 }
 0xac6   : > { %13131 = vmatpush1.bf16.msra.mxu0 %v13130_v54  ;;  %13161 = vmatprep.subr.bf16.mxu1 %v13160_v36 }
 0xac9   : > { %13163 = vmatpush3.bf16.msra.mxu1 %v13160_v36  ;;  %v14957_v36 = vld [vmem:[%s14951_s5] ss:$0 sm:$0xff] }
 0xaca   : > { %13165 = vmatprep.subr.bf16.mxu1 %v13164_v22 }
 0xacd   : > { %13167 = vmatpush3.bf16.msra.mxu1 %v13164_v22 }
 0xace   : > { %13169 = vmatprep.subr.bf16.mxu1 %v13168_v62 }
 0xad1   : > { %v12452_v40 = vpop.f32.mrb[62].mxu0  ;;  %13171 = vmatpush3.bf16.msra.mxu1 %v13168_v62 }
 0xad2   : > { %v14910_v10 = vadd.f32 %v12452_v40, %v14837_v19  ;;  %v5698_v59 = vpop.f32.mrb[63].mxu0  ;;  %12560 = vmatprep.subr.mxu1 %v14265_v8 }
 0xad3   : > { %v5699_v63 = vadd.f32 %v14837_v19, %v5698_v59  ;;  %v11543_v19 = vld [vmem:[%s13732_s2 + $0x2a8] sm:$0xff]  ;;  %s16063_s2 = smov 16  }
 0xad4   : > { %v5718_v4 = vmul.f32 0.044715, %v14910_v10  ;;  %v13132_v39 = vpack.c.bf16 %v11546_v12, %v11543_v19  ;;  %v5712_v55 = vmul.f32 0.5, %v14910_v10 }
 0xad5   : > { %v5717_v11 = vmul.f32 0.044715, %v5699_v63  ;;  %v5711_v60 = vmul.f32 0.5, %v5699_v63 }
 0xad6   : > { %v5724_v3 = vmul.f32 %v5718_v4, %v14910_v10  ;;  %13133 = vmatprep.subr.bf16.mxu0 %v13132_v39 }
 0xad7   : > { %v5723_v46 = vmul.f32 %v5717_v11, %v5699_v63  ;;  %13135 = vmatpush1.bf16.msra.mxu0 %v13134_v2 }
 0xad8   : > { %v5730_v61 = vmul.f32 %v5724_v3, %v14910_v10  ;;  %13137 = vmatprep.subr.bf16.mxu0 %v13136_v26 }
 0xad9   : > { %v5729_v56 = vmul.f32 %v5723_v46, %v5699_v63 }
 0xada   : > { %v5736_v17 = vadd.f32 %v5730_v61, %v14910_v10 }
 0xadb   : > { %v5735_v43 = vadd.f32 %v5729_v56, %v5699_v63  ;;  %13139 = vmatpush1.bf16.msra.mxu0 %v13138_v34 }
 0xadc   : > { %v5742_v1 = vmul.f32 0.7978846, %v5736_v17  ;;  %12535 = vmatprep.subr.mxu0 %v14265_v8 }
 0xadd   : > { %v5741_v29 = vmul.f32 0.7978846, %v5735_v43 }
 0xade   : > { %13449 = vtanh.f32 %v5742_v1 }
 0xadf   : > { %13451 = vtanh.f32 %v5741_v29 }
 0xae8   : > { %v13450_v47 = vpop.eup %13449 }
 0xae9   : > { %v13452_v40 = vpop.eup %13451  ;;  %v5754_v59 = vadd.f32 1.0, %v13450_v47 }
 0xaea   : > { %v5753_v44 = vadd.f32 1.0, %v13452_v40 }
 0xaeb   : > { %v5760_v20 = vmul.f32 %v5754_v59, %v5712_v55 }
 0xaec   : > { %v5759_v6 = vmul.f32 %v5753_v44, %v5711_v60 }
 0xaee   : > { %12491 = vmatprep.mubr.f32.mxu1 %v5759_v6 }
 0xaef   : > { %12492 = vmatmul.mubr.f32.gmra.mrb[66].mxu1 %v5760_v20 }
 0xb45   : > { %v5888_v16 = vpop.xlane.xlu0 %5887 }
 0xb46   : > { %v5899_v25 = vmul.f32 0.03125, %v5888_v16 }
 0xb47   : > { %v5912_v4 = vpop.xlane.xlu1 %5911 }
 0xb48   : > { %v5929_v14 = vmul.f32 %v5899_v25, %v5899_v25  ;;  %v5923_v54 = vmul.f32 0.03125, %v5912_v4  ;;  %v5941_v7 = vsub.f32 %v14880_v27, %v5899_v25 }
 0xb49   : > { %v5890_v11 = vpop.xlane.xlu0 %5889 }
 0xb4a   : > { %v5935_v3 = vsub.f32 %v5923_v54, %v5929_v14  ;;  %v5900_v19 = vmul.f32 0.03125, %v5890_v11 }
 0xb4b   : > { %v5914_v12 = vpop.xlane.xlu1 %5913 }
 0xb4c   : > { %v5947_v18 = vadd.f32 1e-12, %v5935_v3  ;;  %v5930_v63 = vmul.f32 %v5900_v19, %v5900_v19  ;;  %v5924_v46 = vmul.f32 0.03125, %v5914_v12  ;;  %v5942_v2 = vsub.f32 %v14883_v50, %v5900_v19  ;;  %v11554_v12 = vld [vmem:[%s13897_s21 + $0x3] sm:$0x7]  ;;  %s16061_s21 = smov 104  }
 0xb4e   : > { %13453 = vrsqrt.f32 %v5947_v18  ;;  %v5936_v10 = vsub.f32 %v5924_v46, %v5930_v63 }
 0xb50   : > { %v5948_v39 = vadd.f32 1e-12, %v5936_v10 }
 0xb52   : > { %13455 = vrsqrt.f32 %v5948_v39  ;;  %v14998_v39 = vrot.slane %v11554_v12, %v13904_v37 }
 0xb58   : > { %v13454_v13 = vpop.eup %13453 }
 0xb59   : > { %v5959_v61 = vmul.f32 %v13454_v13, %v5941_v7 }
 0xb5b   : > { %v5971_v56 = vmul.f32 %v14954_v35, %v5959_v61 }
 0xb5c   : > { %v13456_v17 = vpop.eup %13455 }
 0xb5d   : > { %v14962_v52 = vadd.f32 %v14957_v36, %v5971_v56  ;;  %v5960_v27 = vmul.f32 %v13456_v17, %v5942_v2 }
 0xb5f   : > { %6121 = vmatmul.mubr.f32.vlgmr.msra.gmra.mrb[64].mxu0 %v14962_v52  ;;  %12526 = vmatprep.mubr.f32.mxu1 %v14962_v52  ;;  %v5972_v41 = vmul.f32 %v14954_v35, %v5960_v27 }
 0xb60   : > { %6126 = vmatprep.mubr.f32.mxu0 %v14265_v8 }
 0xb61   : > { %v14969_v9 = vadd.f32 %v14957_v36, %v5972_v41 }
 0xb63   : > { %6127 = vmatmul.mubr.f32.gmra.mrb[66].mxu0 %v14969_v9  ;;  %12527 = vmatmul.mubr.f32.vlgmr.msra.gmra.mrb[68].mxu1 %v14969_v9 }
 0xb64   : > { %6132 = vmatprep.mubr.f32.mxu0 %v14265_v8 }
 0xb85   : > { %v12490_v50 = vpop.f32.mrb[64].mxu1 }
 0xb86   : > { %v5860_v43 = vpop.f32.mrb[65].mxu1  ;;  %v5866_v26 = vadd.f32 %v12490_v50, %v14875_v28 }
 0xb87   : > { %v5861_v53 = vadd.f32 %v14875_v28, %v5860_v43 }
 0xb88   : > { %v5882_v57 = vadd.f32 %v5866_v26, %v14834_v49 }
 0xb89   : > { %v5881_v58 = vadd.f32 %v5861_v53, %v14831_v30 }
 0xb8a   : > { %v5908_v22 = vmul.f32 %v5882_v57, %v5882_v57 }
 0xb8b   : > { %5891 = vadd.xlane.f32.xlu0 %v5881_v58  ;;  %v5907_v1 = vmul.f32 %v5881_v58, %v5881_v58 }
 0xb8d   : > { %5915 = vadd.xlane.f32.xlu1 %v5907_v1 }
 0xb8f   : > { %5893 = vadd.xlane.f32.xlu0 %v5882_v57 }
 0xb91   : > { %5917 = vadd.xlane.f32.xlu1 %v5908_v22 }
 0xbc2   : > { %v12493_v34 = vpop.f32.mrb[66].mxu1 }
 0xbc3   : > { %v5870_v29 = vpop.f32.mrb[67].mxu1  ;;  %v5876_v38 = vadd.f32 %v12493_v34, %v14875_v28 }
 0xbc4   : > { %v5871_v24 = vadd.f32 %v14875_v28, %v5870_v29 }
 0xbc5   : > { %v14984_v47 = vadd.f32 %v5876_v38, %v14851_v32 }
 0xbc6   : > { %v14981_v62 = vadd.f32 %v5871_v24, %v14848_v51 }
 0xbc7   : > { %v5910_v49 = vmul.f32 %v14984_v47, %v14984_v47 }
 0xbc8   : > { %5895 = vadd.xlane.f32.xlu0 %v14981_v62  ;;  %v5909_v30 = vmul.f32 %v14981_v62, %v14981_v62 }
 0xbca   : > { %5919 = vadd.xlane.f32.xlu1 %v5909_v30 }
 0xbcc   : > { %5897 = vadd.xlane.f32.xlu0 %v14984_v47 }
 0xbce   : > { %5921 = vadd.xlane.f32.xlu1 %v5910_v49 }
 0xc18   : > { %v5892_v40 = vpop.xlane.xlu0 %5891 }
 0xc19   : > { %v5901_v28 = vmul.f32 0.03125, %v5892_v40 }
 0xc1a   : > { %v5916_v59 = vpop.xlane.xlu1 %5915 }
 0xc1b   : > { %v5931_v51 = vmul.f32 %v5901_v28, %v5901_v28  ;;  %v5925_v60 = vmul.f32 0.03125, %v5916_v59  ;;  %v5943_v54 = vsub.f32 %v5881_v58, %v5901_v28 }
 0xc1c   : > { %v5894_v32 = vpop.xlane.xlu0 %5893 }
 0xc1d   : > { %v5937_v44 = vsub.f32 %v5925_v60, %v5931_v51  ;;  %v5902_v55 = vmul.f32 0.03125, %v5894_v32 }
 0xc1e   : > { %v5918_v6 = vpop.xlane.xlu1 %5917 }
 0xc1f   : > { %v5949_v20 = vadd.f32 1e-12, %v5937_v44  ;;  %v5932_v16 = vmul.f32 %v5902_v55, %v5902_v55  ;;  %v5926_v25 = vmul.f32 0.03125, %v5918_v6  ;;  %v5944_v19 = vsub.f32 %v5882_v57, %v5902_v55 }
 0xc21   : > { %13457 = vrsqrt.f32 %v5949_v20  ;;  %v5938_v4 = vsub.f32 %v5926_v25, %v5932_v16  ;;  %v15039_v20 = vrot.slane %v11554_v12, %v13920_v45 }
 0xc23   : > { %v5950_v14 = vadd.f32 1e-12, %v5938_v4 }
 0xc25   : > { %13459 = vrsqrt.f32 %v5950_v14 }
 0xc2b   : > { %v13458_v11 = vpop.eup %13457 }
 0xc2c   : > { %v5961_v3 = vmul.f32 %v13458_v11, %v5943_v54 }
 0xc2e   : > { %v5973_v18 = vmul.f32 %v14954_v35, %v5961_v3 }
 0xc2f   : > { %v13460_v63 = vpop.eup %13459 }
 0xc30   : > { %v14995_v46 = vadd.f32 %v14957_v36, %v5973_v18  ;;  %v5962_v10 = vmul.f32 %v13460_v63, %v5944_v19 }
 0xc32   : > { %6133 = vmatmul.mubr.f32.gmra.mrb[68].mxu0 %v14995_v46  ;;  %12529 = vmatprep.mubr.f32.mxu1 %v14995_v46  ;;  %v5974_v7 = vmul.f32 %v14954_v35, %v5962_v10  ;;  %v6122_v13 = vpop.f32.mrb[64].mxu0 }
 0xc33   : > { %6138 = vmatprep.mubr.f32.mxu0 %v14265_v8  ;;  %v6124_v61 = vpop.f32.mrb[65].mxu0 }
 0xc34   : > { %v15005_v2 = vadd.f32 %v14957_v36, %v5974_v7  ;;  %v15008_v56 = vadd.f32 %v6124_v61, %v14998_v39 }
 0xc36   : > { %6139 = vmatmul.mubr.f32.gmra.mrb[70].mxu0 %v15005_v2  ;;  %12530 = vmatmul.mubr.f32.gmra.mrb[70].mxu1 %v15005_v2  ;;  %v15012_v37 = vpop.f32.mrb[66].mxu0  ;;  %v15014_v17 = vpop.f32.mrb[68].mxu1 }
 0xc37   : > { %12536 = vmatpush3.xpose.msk.msra.mxu0 %vm1247_vm1, %v15008_v56  ;;  %6144 = vmatprep.mubr.f32.mxu0 %v14265_v8  ;;  %v15019_v27 = vpop.f32.mrb[67].mxu0  ;;  %v6223_v41 = vpop.f32.mrb[69].mxu1 }
 0xc38   : > { %12540 = vmatprep.subr.mxu0 %v14265_v8 }
 0xc55   : > { %v5896_v50 = vpop.xlane.xlu0 %5895 }
 0xc56   : > { %v5903_v43 = vmul.f32 0.03125, %v5896_v50 }
 0xc57   : > { %v5920_v26 = vpop.xlane.xlu1 %5919 }
 0xc58   : > { %v5933_v53 = vmul.f32 %v5903_v43, %v5903_v43  ;;  %v5927_v58 = vmul.f32 0.03125, %v5920_v26  ;;  %v5945_v40 = vsub.f32 %v14981_v62, %v5903_v43  ;;  %v15033_v62 = vrot.slane %v11554_v12, %v13900_v0 }
 0xc59   : > { %v5898_v57 = vpop.xlane.xlu0 %5897  ;;  %v15051_v0 = vadd.f32 %v6223_v41, %v15039_v20 }
 0xc5a   : > { %v5939_v1 = vsub.f32 %v5927_v58, %v5933_v53  ;;  %v5904_v22 = vmul.f32 0.03125, %v5898_v57 }
 0xc5b   : > { %v5922_v34 = vpop.xlane.xlu1 %5921 }
 0xc5c   : > { %v5951_v29 = vadd.f32 1e-12, %v5939_v1  ;;  %v5934_v38 = vmul.f32 %v5904_v22, %v5904_v22  ;;  %v5928_v24 = vmul.f32 0.03125, %v5922_v34  ;;  %v5946_v51 = vsub.f32 %v14984_v47, %v5904_v22 }
 0xc5e   : > { %13461 = vrsqrt.f32 %v5951_v29  ;;  %v5940_v30 = vsub.f32 %v5928_v24, %v5934_v38 }
 0xc60   : > { %v5952_v49 = vadd.f32 1e-12, %v5940_v30 }
 0xc62   : > { %13463 = vrsqrt.f32 %v5952_v49 }
 0xc68   : > { %v13462_v28 = vpop.eup %13461 }
 0xc69   : > { %v5963_v59 = vmul.f32 %v13462_v28, %v5945_v40 }
 0xc6b   : > { %v5975_v60 = vmul.f32 %v14954_v35, %v5963_v59  ;;  %v15101_v59 = vadd.f32 %v15019_v27, %v14998_v39 }
 0xc6c   : > { %v13464_v32 = vpop.eup %13463 }
 0xc6d   : > { %v15026_v44 = vadd.f32 %v14957_v36, %v5975_v60  ;;  %v5964_v55 = vmul.f32 %v13464_v32, %v5946_v51  ;;  %v15149_v32 = vadd.f32 %v15014_v17, %v15039_v20 }
 0xc6f   : > { %6145 = vmatmul.mubr.f32.gmra.mrb[72].mxu0 %v15026_v44  ;;  %12532 = vmatprep.mubr.f32.mxu1 %v15026_v44  ;;  %v5976_v6 = vmul.f32 %v14954_v35, %v5964_v55  ;;  %v15048_v35 = vadd.f32 %v6122_v13, %v15033_v62 }
 0xc70   : > { %6150 = vmatprep.mubr.f32.mxu0 %v14265_v8 }
 0xc71   : > { %v15036_v47 = vadd.f32 %v14957_v36, %v5976_v6 }
 0xc73   : > { %6151 = vmatmul.mubr.f32.gmra.mrb[74].mxu0 %v15036_v47  ;;  %12533 = vmatmul.mubr.f32.gmra.mrb[72].mxu1 %v15036_v47 }
 0xc74   : > { %12537 = vmatprep.mubr.msk.f32.mxu0 %vm13609_vm0, %v14265_v8  ;;  %12562 = vmatprep.mubr.msk.f32.mxu1 %vm13609_vm0, %v14265_v8 }
 0xc77   : > { %12538 = vmatmul.mubr.msk.f32.vlgmr.msra.gmra.mrb[76].mxu0 %vm1247_vm1, %v15048_v35 }
 0xc78   : > { %12541 = vmatpush3.msra.mxu0 %v15051_v0  ;;  %12542 = vmatprep.mubr.msk.f32.mxu0 %vm13609_vm0, %v14265_v8 }
 0xc79   : > { %12545 = vmatprep.subr.mxu0 %v14265_v8 }
 0xd05   : > { %v15059_v45 = vpop.f32.mrb[68].mxu0 }
 0xd06   : > { %v6136_v36 = vpop.f32.mrb[69].mxu0 }
 0xd07   : > { %v15110_v51 = vadd.f32 %v6136_v36, %v14998_v39 }
 0xd09   : > { %v15061_v16 = vpop.f32.mrb[70].mxu0  ;;  %v15063_v25 = vpop.f32.mrb[70].mxu1 }
 0xd0a   : > { %v6142_v4 = vpop.f32.mrb[71].mxu0  ;;  %v15065_v14 = vpop.f32.mrb[71].mxu1  ;;  %v15165_v17 = vadd.f32 %v15063_v25, %v15039_v20  ;;  %v6129_v25 = vadd.f32 %v15012_v37, %v15033_v62  ;;  %v15191_v37 = vadd.f32 %v15061_v16, %v15033_v62 }
 0xd42   : > { %v15067_v54 = vpop.f32.mrb[72].mxu0 }
 0xd43   : > { %v6148_v11 = vpop.f32.mrb[73].mxu0 }
 0xd44   : > { %v15128_v27 = vadd.f32 %v6148_v11, %v14998_v39  ;;  %v15181_v11 = vadd.f32 %v15059_v45, %v15033_v62 }
 0xd46   : > { %v15069_v3 = vpop.f32.mrb[74].mxu0  ;;  %v15071_v19 = vpop.f32.mrb[72].mxu1 }
 0xd47   : > { %v6154_v12 = vpop.f32.mrb[75].mxu0  ;;  %v15073_v18 = vpop.f32.mrb[73].mxu1  ;;  %v15211_v45 = vadd.f32 %v15069_v3, %v15033_v62 }
 0xd48   : > { %v15137_v60 = vadd.f32 %v6154_v12, %v14998_v39 }
 0xd4a   : > { %v6324_v63 = vpop.f32.mrb[76].mxu0 }
 0xd4b   : > { %v6328_v10 = vmul.f32 0.35355338, %v6324_v63  ;;  %v12539_v7 = vpop.f32.mrb[77].mxu0 }
 0xd4d   : > { %v6329_v13 = vadd.f32 %v6328_v10, %v13967_v21 }
 0xd4f   : > { %v6330_v61 = vsel %vm1247_vm1, %v6329_v13, -inf }
 0xd50   : > { %6331 = vmax.xlane.f32.xlu0 %v6330_v61 }
 0xd66   : > { %6417 = vrot.lane.b32.xlu0 %v15008_v56, %s16059_s3 }
 0xddd   : > { %v6332_v41 = vpop.xlane.xlu0 %6331 }
 0xdde   : > { %v6333_v50 = vsub.f32 %v6329_v13, %v6332_v41 }
 0xde0   : > { %v6334_v43 = vmul.f32 1.442695, %v6333_v50 }
 0xde1   : > { %v6418_v22 = vpop.permute.xlu0 %6417 }
 0xde2   : > { %13465 = vpow2.f32 %v6334_v43 }
 0xdec   : > { %v13466_v26 = vpop.eup %13465 }
 0xded   : > { %v6336_v53 = vsel %vm1247_vm1, %v13466_v26, 0.0 }
 0xdee   : > { %6337 = vadd.xlane.f32.xlu1 %v6336_v53 }
 0xdff   : > { %6415 = vrot.lane.b32.xlu1 %v15048_v35, %s16059_s3 }
 0xe7b   : > { %v6338_v58 = vpop.xlane.xlu1 %6337 }
 0xe7c   : > { %13467 = vrcp.f32 %v6338_v58 }
 0xe7f   : > { %v6416_v34 = vpop.permute.xlu1 %6415 }
 0xe86   : > { %v13468_v57 = vpop.eup %13467 }
 0xe87   : > { %v6340_v1 = vmul.f32 %v13468_v57, %v13466_v26 }
 0xe89   : > { %12543 = vmatmul.mubr.msk.f32.vlgmr.msra.gmra.mrb[78].mxu0 %vm1247_vm1, %v6340_v1 }
 0xe8a   : > { %12546 = vmatpush3.xpose.msk.msra.mxu0 %vm1247_vm1, %v6418_v22  ;;  %12547 = vmatprep.mubr.msk.f32.mxu0 %vm13609_vm0, %v14265_v8 }
 0xe8b   : > { %12550 = vmatprep.subr.mxu0 %v14265_v8 }
 0xe8d   : > { %12548 = vmatmul.mubr.msk.f32.vlgmr.msra.gmra.mrb[80].mxu0 %vm1247_vm1, %v6416_v34 }
 0xe8e   : > { %12552 = vmatprep.mubr.msk.f32.mxu0 %vm13609_vm0, %v14265_v8 }
 0xf5c   : > { %v6410_v29 = vpop.f32.mrb[78].mxu0 }
 0xf5d   : > { %6414 = vst.msk [vmem:[#allocation2] sm:$0xff] %vm1247_vm1, %v6410_v29  ;;  %v12544_v38 = vpop.f32.mrb[79].mxu0 }
 0xf60   : > { %v6489_v24 = vpop.f32.mrb[80].mxu0 }
 0xf61   : > { %v6493_v30 = vmul.f32 0.35355338, %v6489_v24  ;;  %v12549_v49 = vpop.f32.mrb[81].mxu0 }
 0xf63   : > { %v6494_v40 = vadd.f32 %v6493_v30, %v13967_v21 }
 0xf65   : > { %v6495_v28 = vsel %vm1247_vm1, %v6494_v40, -inf }
 0xf66   : > { %6496 = vmax.xlane.f32.xlu1 %v6495_v28 }
 0xf77   : > { %6590 = vrot.lane.b32.xlu1 %v15008_v56, %s16060_s4 }
 0xf7b   : > { %6588 = vrot.lane.b32.xlu1 %v15048_v35, %s16060_s4 }
 0xf7f   : > { %6762 = vrot.lane.b32.xlu1 %v15008_v56, %s16061_s21  ;;  %v15119_v56 = vadd.f32 %v6142_v4, %v14998_v39  ;;  %v15157_v39 = vadd.f32 %v15065_v14, %v15039_v20 }
 0xf83   : > { %7097 = vrot.lane.b32.xlu1 %v15101_v59, %s16059_s3 }
 0xf87   : > { %7270 = vrot.lane.b32.xlu1 %v15101_v59, %s16060_s4 }
 0xf8b   : > { %7442 = vrot.lane.b32.xlu1 %v15101_v59, %s16061_s21 }
 0xf8f   : > { %7777 = vrot.lane.b32.xlu1 %v15110_v51, %s16059_s3 }
 0xf93   : > { %7950 = vrot.lane.b32.xlu1 %v15110_v51, %s16060_s4 }
 0xf97   : > { %8122 = vrot.lane.b32.xlu1 %v15110_v51, %s16061_s21 }
 0xf9b   : > { %8457 = vrot.lane.b32.xlu1 %v15119_v56, %s16059_s3 }
 0xf9f   : > { %8630 = vrot.lane.b32.xlu1 %v15119_v56, %s16060_s4 }
 0xfa3   : > { %8802 = vrot.lane.b32.xlu1 %v15119_v56, %s16061_s21 }
 0xfa7   : > { %9137 = vrot.lane.b32.xlu1 %v15128_v27, %s16059_s3 }
 0xfab   : > { %9310 = vrot.lane.b32.xlu1 %v15128_v27, %s16060_s4 }
 0xfaf   : > { %9482 = vrot.lane.b32.xlu1 %v15128_v27, %s16061_s21 }
 0xfb3   : > { %9817 = vrot.lane.b32.xlu1 %v15137_v60, %s16059_s3 }
 0xfb7   : > { %9990 = vrot.lane.b32.xlu1 %v15137_v60, %s16060_s4 }
 0xfbb   : > { %10162 = vrot.lane.b32.xlu1 %v15137_v60, %s16061_s21 }
 0xfbf   : > { %6851 = vrot.lane.b32.xlu1 %v15051_v0, %s16061_s21 }
 0xfc3   : > { %7359 = vrot.lane.b32.xlu1 %v15149_v32, %s16060_s4 }
 0xfc7   : > { %7531 = vrot.lane.b32.xlu1 %v15149_v32, %s16061_s21 }
 0xfcb   : > { %8039 = vrot.lane.b32.xlu1 %v15157_v39, %s16060_s4 }
 0xfcf   : > { %8211 = vrot.lane.b32.xlu1 %v15157_v39, %s16061_s21 }
 0xfd3   : > { %8719 = vrot.lane.b32.xlu1 %v15165_v17, %s16060_s4 }
 0xff3   : > { %v6497_v55 = vpop.xlane.xlu1 %6496 }
 0xff4   : > { %v6498_v6 = vsub.f32 %v6494_v40, %v6497_v55 }
 0xff6   : > { %v6499_v36 = vmul.f32 1.442695, %v6498_v6 }
 0xff8   : > { %13469 = vpow2.f32 %v6499_v36 }
0x1002   : > { %v13470_v4 = vpop.eup %13469 }
0x1003   : > { %v6501_v14 = vsel %vm1247_vm1, %v13470_v4, 0.0 }
0x1004   : > { %6502 = vadd.xlane.f32.xlu0 %v6501_v14 }
0x101a   : > { %6507 = vrot.lane.b32.xlu0 %v15051_v0, %s16059_s3 }
0x101e   : > { %6760 = vrot.lane.b32.xlu0 %v15048_v35, %s16061_s21  ;;  %v15201_v35 = vadd.f32 %v15067_v54, %v15033_v62  ;;  %v6591_v62 = vpop.permute.xlu1 %6590 }
0x1022   : > { %7095 = vrot.lane.b32.xlu0 %v6129_v25, %s16059_s3  ;;  %v6589_v54 = vpop.permute.xlu1 %6588 }
0x1026   : > { %7268 = vrot.lane.b32.xlu0 %v6129_v25, %s16060_s4  ;;  %v6763_v12 = vpop.permute.xlu1 %6762 }
0x102a   : > { %7440 = vrot.lane.b32.xlu0 %v6129_v25, %s16061_s21  ;;  %v7098_v13 = vpop.permute.xlu1 %7097 }
0x102e   : > { %7775 = vrot.lane.b32.xlu0 %v15181_v11, %s16059_s3  ;;  %v7271_v41 = vpop.permute.xlu1 %7270 }
0x1032   : > { %7948 = vrot.lane.b32.xlu0 %v15181_v11, %s16060_s4  ;;  %v7443_v26 = vpop.permute.xlu1 %7442 }
0x1036   : > { %8120 = vrot.lane.b32.xlu0 %v15181_v11, %s16061_s21  ;;  %v7778_v58 = vpop.permute.xlu1 %7777 }
0x103a   : > { %8455 = vrot.lane.b32.xlu0 %v15191_v37, %s16059_s3  ;;  %v7951_v22 = vpop.permute.xlu1 %7950 }
0x103e   : > { %8628 = vrot.lane.b32.xlu0 %v15191_v37, %s16060_s4  ;;  %v8123_v29 = vpop.permute.xlu1 %8122 }
0x1042   : > { %8800 = vrot.lane.b32.xlu0 %v15191_v37, %s16061_s21  ;;  %v8458_v30 = vpop.permute.xlu1 %8457 }
0x1046   : > { %9135 = vrot.lane.b32.xlu0 %v15201_v35, %s16059_s3  ;;  %v8631_v40 = vpop.permute.xlu1 %8630 }
0x104a   : > { %9308 = vrot.lane.b32.xlu0 %v15201_v35, %s16060_s4 }
0x104e   : > { %9480 = vrot.lane.b32.xlu0 %v15201_v35, %s16061_s21 }
0x1052   : > { %9815 = vrot.lane.b32.xlu0 %v15211_v45, %s16059_s3 }
0x1056   : > { %9988 = vrot.lane.b32.xlu0 %v15211_v45, %s16060_s4 }
0x105a   : > { %10160 = vrot.lane.b32.xlu0 %v15211_v45, %s16061_s21 }
0x105e   : > { %6679 = vrot.lane.b32.xlu0 %v15051_v0, %s16060_s4 }
0x1062   : > { %7187 = vrot.lane.b32.xlu0 %v15149_v32, %s16059_s3 }
0x1066   : > { %7867 = vrot.lane.b32.xlu0 %v15157_v39, %s16059_s3 }
0x106a   : > { %8547 = vrot.lane.b32.xlu0 %v15165_v17, %s16059_s3 }
0x1091   : > { %v6503_v16 = vpop.xlane.xlu0 %6502 }
0x1092   : > { %13471 = vrcp.f32 %v6503_v16 }
0x1095   : > { %v6508_v3 = vpop.permute.xlu0 %6507 }
0x1096   : > { %12551 = vmatpush3.msra.mxu0 %v6508_v3 }
0x1097   : > { %12555 = vmatprep.subr.mxu0 %v14265_v8 }
0x1099   : > { %v6761_v63 = vpop.permute.xlu0 %6760 }
0x109c   : > { %v13472_v0 = vpop.eup %13471 }
0x109d   : > { %v7096_v10 = vpop.permute.xlu0 %7095  ;;  %v6505_v7 = vmul.f32 %v13472_v0, %v13470_v4 }
0x109f   : > { %12553 = vmatmul.mubr.msk.f32.vlgmr.msra.gmra.mrb[82].mxu0 %vm1247_vm1, %v6505_v7 }
0x10a0   : > { %12556 = vmatpush3.xpose.msk.msra.mxu0 %vm1247_vm1, %v6591_v62  ;;  %12557 = vmatprep.mubr.msk.f32.mxu0 %vm13609_vm0, %v14265_v8 }
0x10a1   : > { %v7269_v61 = vpop.permute.xlu0 %7268  ;;  %12565 = vmatprep.subr.mxu0 %v14265_v8 }
0x10a3   : > { %12558 = vmatmul.mubr.msk.f32.vlgmr.msra.gmra.mrb[84].mxu0 %vm1247_vm1, %v6589_v54 }
0x10a4   : > { %12566 = vmatpush3.xpose.msk.msra.mxu0 %vm1247_vm1, %v6763_v12  ;;  %12567 = vmatprep.mubr.msk.f32.mxu0 %vm13609_vm0, %v14265_v8 }
0x10a5   : > { %v7441_v50 = vpop.permute.xlu0 %7440  ;;  %12575 = vmatprep.subr.mxu0 %v14265_v8 }
0x10a7   : > { %12568 = vmatmul.mubr.msk.f32.vlgmr.msra.gmra.mrb[86].mxu0 %vm1247_vm1, %v6761_v63 }
0x10a8   : > { %12576 = vmatpush3.xpose.msk.msra.mxu0 %vm1247_vm1, %v15101_v59  ;;  %12577 = vmatprep.mubr.msk.f32.mxu0 %vm13609_vm0, %v14265_v8 }
0x10a9   : > { %v7776_v43 = vpop.permute.xlu0 %7775  ;;  %12585 = vmatprep.subr.mxu0 %v14265_v8 }
0x10ab   : > { %12578 = vmatmul.mubr.msk.f32.vlgmr.msra.gmra.mrb[88].mxu0 %vm1247_vm1, %v6129_v25 }
0x10ac   : > { %12586 = vmatpush3.xpose.msk.msra.mxu0 %vm1247_vm1, %v7098_v13  ;;  %12587 = vmatprep.mubr.msk.f32.mxu0 %vm13609_vm0, %v14265_v8 }
0x10ad   : > { %v7949_v53 = vpop.permute.xlu0 %7948  ;;  %12595 = vmatprep.subr.mxu0 %v14265_v8 }
0x10af   : > { %12588 = vmatmul.mubr.msk.f32.vlgmr.msra.gmra.mrb[90].mxu0 %vm1247_vm1, %v7096_v10 }
0x10b0   : > { %12596 = vmatpush3.xpose.msk.msra.mxu0 %vm1247_vm1, %v7271_v41  ;;  %12597 = vmatprep.mubr.msk.f32.mxu0 %vm13609_vm0, %v14265_v8 }
0x10b1   : > { %v8121_v57 = vpop.permute.xlu0 %8120  ;;  %12605 = vmatprep.subr.mxu0 %v14265_v8 }
0x10b3   : > { %12598 = vmatmul.mubr.msk.f32.vlgmr.msra.gmra.mrb[92].mxu0 %vm1247_vm1, %v7269_v61 }
0x10b4   : > { %12606 = vmatpush3.xpose.msk.msra.mxu0 %vm1247_vm1, %v7443_v26  ;;  %12607 = vmatprep.mubr.msk.f32.mxu0 %vm13609_vm0, %v14265_v8 }
0x10b5   : > { %v8456_v1 = vpop.permute.xlu0 %8455  ;;  %12615 = vmatprep.subr.mxu0 %v14265_v8 }
0x10b7   : > { %12608 = vmatmul.mubr.msk.f32.vlgmr.msra.gmra.mrb[94].mxu0 %vm1247_vm1, %v7441_v50 }
0x10b8   : > { %12616 = vmatpush3.xpose.msk.msra.mxu0 %vm1247_vm1, %v15110_v51  ;;  %12617 = vmatprep.mubr.msk.f32.mxu0 %vm13609_vm0, %v14265_v8  ;;  %v8803_v51 = vpop.permute.xlu1 %8802 }
0x10b9   : > { %v8629_v34 = vpop.permute.xlu0 %8628  ;;  %12625 = vmatprep.subr.mxu0 %v14265_v8 }
0x10bb   : > { %12618 = vmatmul.mubr.msk.f32.vlgmr.msra.gmra.mrb[96].mxu0 %vm1247_vm1, %v15181_v11 }
0x10bc   : > { %12626 = vmatpush3.xpose.msk.msra.mxu0 %vm1247_vm1, %v7778_v58  ;;  %12627 = vmatprep.mubr.msk.f32.mxu0 %vm13609_vm0, %v14265_v8  ;;  %v9138_v55 = vpop.permute.xlu1 %9137 }
0x10bd   : > { %v8801_v38 = vpop.permute.xlu0 %8800  ;;  %12635 = vmatprep.subr.mxu0 %v14265_v8 }
0x10bf   : > { %12628 = vmatmul.mubr.msk.f32.vlgmr.msra.gmra.mrb[98].mxu0 %vm1247_vm1, %v7776_v43 }
0x10c0   : > { %12636 = vmatpush3.xpose.msk.msra.mxu0 %vm1247_vm1, %v7951_v22  ;;  %12637 = vmatprep.mubr.msk.f32.mxu0 %vm13609_vm0, %v14265_v8  ;;  %v9311_v4 = vpop.permute.xlu1 %9310 }
0x10c1   : > { %v9136_v24 = vpop.permute.xlu0 %9135  ;;  %12645 = vmatprep.subr.mxu0 %v14265_v8 }
0x10c3   : > { %12638 = vmatmul.mubr.msk.f32.vlgmr.msra.gmra.mrb[100].mxu0 %vm1247_vm1, %v7949_v53 }
0x10c4   : > { %12646 = vmatpush3.xpose.msk.msra.mxu0 %vm1247_vm1, %v8123_v29  ;;  %12647 = vmatprep.mubr.msk.f32.mxu0 %vm13609_vm0, %v14265_v8 }
0x10c5   : > { %v9309_v49 = vpop.permute.xlu0 %9308  ;;  %12655 = vmatprep.subr.mxu0 %v14265_v8 }
0x10c7   : > { %12648 = vmatmul.mubr.msk.f32.vlgmr.msra.gmra.mrb[102].mxu0 %vm1247_vm1, %v8121_v57 }
0x10c8   : > { %12656 = vmatpush3.xpose.msk.msra.mxu0 %vm1247_vm1, %v15119_v56  ;;  %12657 = vmatprep.mubr.msk.f32.mxu0 %vm13609_vm0, %v14265_v8 }
0x10c9   : > { %v9481_v28 = vpop.permute.xlu0 %9480  ;;  %12665 = vmatprep.subr.mxu0 %v14265_v8 }
0x10cb   : > { %12658 = vmatmul.mubr.msk.f32.vlgmr.msra.gmra.mrb[104].mxu0 %vm1247_vm1, %v15191_v37 }
0x10cc   : > { %12666 = vmatpush3.xpose.msk.msra.mxu0 %vm1247_vm1, %v8458_v30  ;;  %12667 = vmatprep.mubr.msk.f32.mxu0 %vm13609_vm0, %v14265_v8 }
0x10cd   : > { %v9816_v59 = vpop.permute.xlu0 %9815  ;;  %12675 = vmatprep.subr.mxu0 %v14265_v8 }
0x10cf   : > { %12668 = vmatmul.mubr.msk.f32.vlgmr.msra.gmra.mrb[106].mxu0 %vm1247_vm1, %v8456_v1 }
0x10d0   : > { %12676 = vmatpush3.xpose.msk.msra.mxu0 %vm1247_vm1, %v8631_v40  ;;  %12677 = vmatprep.mubr.msk.f32.mxu0 %vm13609_vm0, %v14265_v8 }
0x10d1   : > { %v9989_v56 = vpop.permute.xlu0 %9988  ;;  %12685 = vmatprep.subr.mxu0 %v14265_v8 }
0x10d3   : > { %12678 = vmatmul.mubr.msk.f32.vlgmr.msra.gmra.mrb[108].mxu0 %vm1247_vm1, %v8629_v34 }
0x10d4   : > { %12686 = vmatpush3.xpose.msk.msra.mxu0 %vm1247_vm1, %v8803_v51  ;;  %12687 = vmatprep.mubr.msk.f32.mxu0 %vm13609_vm0, %v14265_v8 }
0x10d5   : > { %v10161_v6 = vpop.permute.xlu0 %10160  ;;  %12695 = vmatprep.subr.mxu0 %v14265_v8 }
0x10d7   : > { %12688 = vmatmul.mubr.msk.f32.vlgmr.msra.gmra.mrb[110].mxu0 %vm1247_vm1, %v8801_v38 }
0x10d8   : > { %12696 = vmatpush3.xpose.msk.msra.mxu0 %vm1247_vm1, %v15128_v27  ;;  %12697 = vmatprep.mubr.msk.f32.mxu0 %vm13609_vm0, %v14265_v8  ;;  %v9483_v27 = vpop.permute.xlu1 %9482 }
0x10d9   : > { %v6680_v36 = vpop.permute.xlu0 %6679  ;;  %12705 = vmatprep.subr.mxu0 %v14265_v8 }
0x10da   : > { %12561 = vmatpush3.msra.mxu1 %v6680_v36 }
0x10db   : > { %12698 = vmatmul.mubr.msk.f32.vlgmr.msra.gmra.mrb[112].mxu0 %vm1247_vm1, %v15201_v35  ;;  %12570 = vmatprep.subr.mxu1 %v14265_v8 }
0x10dc   : > { %12706 = vmatpush3.xpose.msk.msra.mxu0 %vm1247_vm1, %v9138_v55  ;;  %12707 = vmatprep.mubr.msk.f32.mxu0 %vm13609_vm0, %v14265_v8  ;;  %v9818_v14 = vpop.permute.xlu1 %9817 }
0x10dd   : > { %12715 = vmatprep.subr.mxu0 %v14265_v8 }
0x10df   : > { %12708 = vmatmul.mubr.msk.f32.vlgmr.msra.gmra.mrb[114].mxu0 %vm1247_vm1, %v9136_v24 }
0x10e0   : > { %12716 = vmatpush3.xpose.msk.msra.mxu0 %vm1247_vm1, %v9311_v4  ;;  %12717 = vmatprep.mubr.msk.f32.mxu0 %vm13609_vm0, %v14265_v8  ;;  %v9991_v25 = vpop.permute.xlu1 %9990 }
0x10e1   : > { %12725 = vmatprep.subr.mxu0 %v14265_v8 }
0x10e3   : > { %12718 = vmatmul.mubr.msk.f32.vlgmr.msra.gmra.mrb[116].mxu0 %vm1247_vm1, %v9309_v49 }
0x10e4   : > { %12726 = vmatpush3.xpose.msk.msra.mxu0 %vm1247_vm1, %v9483_v27  ;;  %12727 = vmatprep.mubr.msk.f32.mxu0 %vm13609_vm0, %v14265_v8 }
0x10e5   : > { %12735 = vmatprep.subr.mxu0 %v14265_v8 }
0x10e7   : > { %12728 = vmatmul.mubr.msk.f32.vlgmr.msra.gmra.mrb[118].mxu0 %vm1247_vm1, %v9481_v28 }
0x10e8   : > { %12736 = vmatpush3.xpose.msk.msra.mxu0 %vm1247_vm1, %v15137_v60  ;;  %12737 = vmatprep.mubr.msk.f32.mxu0 %vm13609_vm0, %v14265_v8  ;;  %v10163_v60 = vpop.permute.xlu1 %10162 }
0x10e9   : > { %12745 = vmatprep.subr.mxu0 %v14265_v8 }
0x10eb   : > { %12738 = vmatmul.mubr.msk.f32.vlgmr.msra.gmra.mrb[120].mxu0 %vm1247_vm1, %v15211_v45 }
0x10ec   : > { %12746 = vmatpush3.xpose.msk.msra.mxu0 %vm1247_vm1, %v9818_v14  ;;  %12747 = vmatprep.mubr.msk.f32.mxu0 %vm13609_vm0, %v14265_v8 }
0x10ed   : > { %12755 = vmatprep.subr.mxu0 %v14265_v8 }
0x10ef   : > { %12748 = vmatmul.mubr.msk.f32.vlgmr.msra.gmra.mrb[122].mxu0 %vm1247_vm1, %v9816_v59 }
0x10f0   : > { %12756 = vmatpush3.xpose.msk.msra.mxu0 %vm1247_vm1, %v9991_v25  ;;  %12757 = vmatprep.mubr.msk.f32.mxu0 %vm13609_vm0, %v14265_v8 }
0x10f1   : > { %12765 = vmatprep.subr.mxu0 %v14265_v8 }
0x10f3   : > { %12758 = vmatmul.mubr.msk.f32.vlgmr.msra.gmra.mrb[124].mxu0 %vm1247_vm1, %v9989_v56 }
0x10f4   : > { %12766 = vmatpush3.xpose.msk.msra.mxu0 %vm1247_vm1, %v10163_v60  ;;  %12767 = vmatprep.mubr.msk.f32.mxu0 %vm13609_vm0, %v14265_v8 }
0x10f7   : > { %12768 = vmatmul.mubr.msk.f32.vlgmr.msra.gmra.mrb[126].mxu0 %vm1247_vm1, %v10161_v6 }
0x1172   : > { %v15348_v11 = vpop.f32.mrb[82].mxu0 }
0x1173   : > { %v12554_v37 = vpop.f32.mrb[83].mxu0 }
0x1176   : > { %v6662_v35 = vpop.f32.mrb[84].mxu0 }
0x1177   : > { %v6666_v45 = vmul.f32 0.35355338, %v6662_v35  ;;  %v12559_v62 = vpop.f32.mrb[85].mxu0 }
0x1179   : > { %v15351_v16 = vadd.f32 %v6666_v45, %v13967_v21 }
0x117a   : > { %v6834_v54 = vpop.f32.mrb[86].mxu0 }
0x117b   : > { %v6838_v3 = vmul.f32 0.35355338, %v6834_v54  ;;  %v12569_v12 = vpop.f32.mrb[87].mxu0  ;;  %v6668_v63 = vsel %vm1247_vm1, %v15351_v16, -inf }
0x117c   : > { %6669 = vmax.xlane.f32.xlu1 %v6668_v63 }
0x117d   : > { %v15356_v0 = vadd.f32 %v6838_v3, %v13967_v21 }
0x117e   : > { %v7004_v10 = vpop.f32.mrb[88].mxu0 }
0x117f   : > { %v7008_v7 = vmul.f32 0.35355338, %v7004_v10  ;;  %v12579_v13 = vpop.f32.mrb[89].mxu0  ;;  %v6840_v61 = vsel %vm1247_vm1, %v15356_v0, -inf }
0x1180   : > { %6841 = vmax.xlane.f32.xlu0 %v6840_v61 }
0x1181   : > { %v15361_v41 = vadd.f32 %v7008_v7, %v14176_v48 }
0x1182   : > { %v7169_v50 = vpop.f32.mrb[90].mxu0 }
0x1183   : > { %v7173_v43 = vmul.f32 0.35355338, %v7169_v50  ;;  %v12589_v26 = vpop.f32.mrb[91].mxu0  ;;  %v7010_v53 = vsel %vm1247_vm1, %v15361_v41, -inf }
0x1184   : > { %7011 = vmax.xlane.f32.xlu0 %v7010_v53 }
0x1185   : > { %v15366_v21 = vadd.f32 %v7173_v43, %v14176_v48 }
0x1186   : > { %v7342_v58 = vpop.f32.mrb[92].mxu0 }
0x1187   : > { %v7346_v57 = vmul.f32 0.35355338, %v7342_v58  ;;  %v12599_v1 = vpop.f32.mrb[93].mxu0  ;;  %v7175_v22 = vsel %vm1247_vm1, %v15366_v21, -inf }
0x1188   : > { %7176 = vmax.xlane.f32.xlu0 %v7175_v22 }
0x1189   : > { %v15371_v34 = vadd.f32 %v7346_v57, %v14176_v48 }
0x118a   : > { %v7514_v29 = vpop.f32.mrb[94].mxu0 }
0x118b   : > { %v7518_v38 = vmul.f32 0.35355338, %v7514_v29  ;;  %v12609_v24 = vpop.f32.mrb[95].mxu0  ;;  %v7348_v30 = vsel %vm1247_vm1, %v15371_v34, -inf }
0x118c   : > { %7349 = vmax.xlane.f32.xlu1 %v7348_v30 }
0x118d   : > { %v15376_v49 = vadd.f32 %v7518_v38, %v14176_v48 }
0x118e   : > { %v7684_v40 = vpop.f32.mrb[96].mxu0 }
0x118f   : > { %v7688_v28 = vmul.f32 0.35355338, %v7684_v40  ;;  %v12619_v59 = vpop.f32.mrb[97].mxu0  ;;  %v7520_v51 = vsel %vm1247_vm1, %v15376_v49, -inf }
0x1190   : > { %7521 = vmax.xlane.f32.xlu0 %v7520_v51 }
0x1191   : > { %v15381_v56 = vadd.f32 %v7688_v28, %v14283_v23 }
0x1192   : > { %v7849_v55 = vpop.f32.mrb[98].mxu0 }
0x1193   : > { %v7853_v6 = vmul.f32 0.35355338, %v7849_v55  ;;  %v12629_v36 = vpop.f32.mrb[99].mxu0  ;;  %v7690_v4 = vsel %vm1247_vm1, %v15381_v56, -inf }
0x1194   : > { %7691 = vmax.xlane.f32.xlu1 %v7690_v4 }
0x1195   : > { %v15386_v48 = vadd.f32 %v7853_v6, %v14283_v23 }
0x1196   : > { %v8022_v27 = vpop.f32.mrb[100].mxu0 }
0x1197   : > { %v8026_v14 = vmul.f32 0.35355338, %v8022_v27  ;;  %v12639_v25 = vpop.f32.mrb[101].mxu0  ;;  %v7855_v60 = vsel %vm1247_vm1, %v15386_v48, -inf }
0x1198   : > { %7856 = vmax.xlane.f32.xlu0 %v7855_v60 }
0x1199   : > { %v15391_v37 = vadd.f32 %v8026_v14, %v14283_v23 }
0x119a   : > { %v8194_v35 = vpop.f32.mrb[102].mxu0 }
0x119b   : > { %v8198_v45 = vmul.f32 0.35355338, %v8194_v35  ;;  %v12649_v62 = vpop.f32.mrb[103].mxu0  ;;  %v8028_v54 = vsel %vm1247_vm1, %v15391_v37, -inf }
0x119c   : > { %8029 = vmax.xlane.f32.xlu1 %v8028_v54 }
0x119d   : > { %v15396_v3 = vadd.f32 %v8198_v45, %v14283_v23  ;;  %v15424_v45 = vadd.f32 %v15073_v18, %v15039_v20 }
0x119e   : > { %v8364_v12 = vpop.f32.mrb[104].mxu0 }
0x119f   : > { %v8368_v63 = vmul.f32 0.35355338, %v8364_v12  ;;  %v12659_v10 = vpop.f32.mrb[105].mxu0  ;;  %v8200_v7 = vsel %vm1247_vm1, %v15396_v3, -inf }
0x11a0   : > { %8201 = vmax.xlane.f32.xlu0 %v8200_v7 }
0x11a1   : > { %v15401_v13 = vadd.f32 %v8368_v63, %v14293_v42 }
0x11a2   : > { %v8529_v61 = vpop.f32.mrb[106].mxu0 }
0x11a3   : > { %v8533_v50 = vmul.f32 0.35355338, %v8529_v61  ;;  %v12669_v43 = vpop.f32.mrb[107].mxu0  ;;  %v8370_v26 = vsel %vm1247_vm1, %v15401_v13, -inf }
0x11a4   : > { %8371 = vmax.xlane.f32.xlu1 %v8370_v26 }
0x11a5   : > { %v15406_v23 = vadd.f32 %v8533_v50, %v14293_v42 }
0x11a6   : > { %v8702_v53 = vpop.f32.mrb[108].mxu0 }
0x11a7   : > { %v8706_v58 = vmul.f32 0.35355338, %v8702_v53  ;;  %v12679_v57 = vpop.f32.mrb[109].mxu0  ;;  %v8535_v1 = vsel %vm1247_vm1, %v15406_v23, -inf }
0x11a8   : > { %8536 = vmax.xlane.f32.xlu0 %v8535_v1 }
0x11a9   : > { %v15411_v22 = vadd.f32 %v8706_v58, %v14293_v42 }
0x11aa   : > { %v8874_v29 = vpop.f32.mrb[110].mxu0 }
0x11ab   : > { %v8878_v38 = vmul.f32 0.35355338, %v8874_v29  ;;  %v12689_v24 = vpop.f32.mrb[111].mxu0  ;;  %v8708_v30 = vsel %vm1247_vm1, %v15411_v22, -inf }
0x11ac   : > { %8709 = vmax.xlane.f32.xlu1 %v8708_v30 }
0x11ad   : > { %v15416_v40 = vadd.f32 %v8878_v38, %v14293_v42 }
0x11ae   : > { %v9044_v28 = vpop.f32.mrb[112].mxu0 }
0x11af   : > { %v12699_v59 = vpop.f32.mrb[113].mxu0  ;;  %v8880_v51 = vsel %vm1247_vm1, %v15416_v40, -inf  ;;  %v9048_v10 = vmul.f32 0.35355338, %v9044_v28  ;;  %v15449_v28 = vpop.permute.xlu1 %6851 }
0x11b0   : > { %8881 = vmax.xlane.f32.xlu0 %v8880_v51 }
0x11b1   : > { %v15429_v61 = vadd.f32 %v9048_v10, %v14319_v5 }
0x11b2   : > { %v9209_v55 = vpop.f32.mrb[114].mxu0 }
0x11b3   : > { %v12709_v6 = vpop.f32.mrb[115].mxu0  ;;  %v9213_v7 = vmul.f32 0.35355338, %v9209_v55  ;;  %v9050_v58 = vsel %vm1247_vm1, %v15429_v61, -inf }
0x11b5   : > { %v15432_v43 = vadd.f32 %v9213_v7, %v14319_v5 }
0x11b6   : > { %v9382_v36 = vpop.f32.mrb[116].mxu0 }
0x11b7   : > { %v12719_v4 = vpop.f32.mrb[117].mxu0  ;;  %v9386_v50 = vmul.f32 0.35355338, %v9382_v36  ;;  %v9215_v1 = vsel %vm1247_vm1, %v15432_v43, -inf }
0x11b9   : > { %v15435_v18 = vadd.f32 %v9386_v50, %v14319_v5 }
0x11ba   : > { %v9554_v27 = vpop.f32.mrb[118].mxu0 }
0x11bb   : > { %v12729_v14 = vpop.f32.mrb[119].mxu0  ;;  %v9558_v26 = vmul.f32 0.35355338, %v9554_v27  ;;  %v9388_v30 = vsel %vm1247_vm1, %v15435_v18, -inf }
0x11bc   : > { %v15468_v14 = vpop.permute.xlu1 %7359 }
0x11bd   : > { %8891 = vrot.lane.b32.xlu1 %v15165_v17, %s16061_s21  ;;  %v15440_v57 = vadd.f32 %v9558_v26, %v14319_v5 }
0x11be   : > { %v9724_v25 = vpop.f32.mrb[120].mxu0 }
0x11bf   : > { %v12739_v60 = vpop.f32.mrb[121].mxu0  ;;  %v9728_v53 = vmul.f32 0.35355338, %v9724_v25  ;;  %v9560_v59 = vsel %vm1247_vm1, %v15440_v57, -inf }
0x11c0   : > { %v15472_v60 = vpop.permute.xlu1 %7531 }
0x11c1   : > { %v15445_v29 = vadd.f32 %v9728_v53, %v14357_v15 }
0x11c2   : > { %v9889_v35 = vpop.f32.mrb[122].mxu0 }
0x11c3   : > { %v12749_v42 = vpop.f32.mrb[123].mxu0  ;;  %v9893_v38 = vmul.f32 0.35355338, %v9889_v35  ;;  %v9730_v6 = vsel %vm1247_vm1, %v15445_v29, -inf }
0x11c4   : > { %v15474_v35 = vpop.permute.xlu1 %8039 }
0x11c5   : > { %v15454_v5 = vadd.f32 %v9893_v38, %v14357_v15 }
0x11c6   : > { %9227 = vrot.lane.b32.xlu0 %v15424_v45, %s16059_s3  ;;  %v10062_v62 = vpop.f32.mrb[124].mxu0 }
0x11c7   : > { %v12759_v54 = vpop.f32.mrb[125].mxu0  ;;  %v10066_v24 = vmul.f32 0.35355338, %v10062_v62  ;;  %v9895_v4 = vsel %vm1247_vm1, %v15454_v5, -inf }
0x11c8   : > { %v15478_v42 = vpop.permute.xlu1 %8211 }
0x11c9   : > { %v15457_v51 = vadd.f32 %v10066_v24, %v14357_v15 }
0x11ca   : > { %v10234_v12 = vpop.f32.mrb[126].mxu0 }
0x11cb   : > { %v12769_v63 = vpop.f32.mrb[127].mxu0  ;;  %v10238_v55 = vmul.f32 0.35355338, %v10234_v12  ;;  %v10068_v27 = vsel %vm1247_vm1, %v15457_v51, -inf }
0x11cc   : > { %v15482_v54 = vpop.permute.xlu1 %8719 }
0x11cd   : > { %v15462_v36 = vadd.f32 %v10238_v55, %v14357_v15  ;;  %v15476_v15 = vpop.permute.xlu0 %7187 }
0x11cf   : > { %v10240_v25 = vsel %vm1247_vm1, %v15462_v36, -inf }
0x11d1   : > { %v15480_v62 = vpop.permute.xlu0 %7867 }
0x11d5   : > { %v15484_v12 = vpop.permute.xlu0 %8547 }
0x11e1   : > { %9051 = vmax.xlane.f32.xlu1 %v9050_v58 }
0x11e5   : > { %9389 = vmax.xlane.f32.xlu1 %v9388_v30  ;;  %9216 = vmax.xlane.f32.xlu0 %v9215_v1 }
0x11e9   : > { %9561 = vmax.xlane.f32.xlu0 %v9560_v59  ;;  %9731 = vmax.xlane.f32.xlu1 %v9730_v6 }
0x11ed   : > { %9896 = vmax.xlane.f32.xlu0 %v9895_v4  ;;  %10069 = vmax.xlane.f32.xlu1 %v10068_v27 }
0x11f1   : > { %10241 = vmax.xlane.f32.xlu0 %v10240_v25 }
0x1209   : > { %v6670_v63 = vpop.xlane.xlu1 %6669 }
0x120a   : > { %v6671_v10 = vsub.f32 %v15351_v16, %v6670_v63 }
0x120c   : > { %v6672_v7 = vmul.f32 1.442695, %v6671_v10 }
0x120d   : > { %v6842_v50 = vpop.xlane.xlu0 %6841 }
0x120e   : > { %13473 = vpow2.f32 %v6672_v7  ;;  %v6843_v26 = vsub.f32 %v15356_v0, %v6842_v50 }
0x1210   : > { %v6844_v53 = vmul.f32 1.442695, %v6843_v26 }
0x1211   : > { %v7012_v58 = vpop.xlane.xlu0 %7011 }
0x1212   : > { %13475 = vpow2.f32 %v6844_v53  ;;  %v7013_v1 = vsub.f32 %v15361_v41, %v7012_v58 }
0x1214   : > { %v7014_v38 = vmul.f32 1.442695, %v7013_v1 }
0x1215   : > { %v7177_v24 = vpop.xlane.xlu0 %7176 }
0x1216   : > { %13477 = vpow2.f32 %v7014_v38  ;;  %v7178_v30 = vsub.f32 %v15366_v21, %v7177_v24 }
0x1218   : > { %v15490_v59 = vpop.eup %13473  ;;  %v7179_v55 = vmul.f32 1.442695, %v7178_v30 }
0x1219   : > { %v7350_v6 = vpop.xlane.xlu1 %7349  ;;  %v6674_v16 = vsel %vm1247_vm1, %v15490_v59, 0.0 }
0x121a   : > { %13479 = vpow2.f32 %v7179_v55  ;;  %v7351_v0 = vsub.f32 %v15371_v34, %v7350_v6  ;;  %6675 = vadd.xlane.f32.xlu1 %v6674_v16 }
0x121c   : > { %v15495_v4 = vpop.eup %13475  ;;  %v7352_v27 = vmul.f32 1.442695, %v7351_v0 }
0x121d   : > { %v7522_v41 = vpop.xlane.xlu0 %7521  ;;  %v6846_v25 = vsel %vm1247_vm1, %v15495_v4, 0.0 }
0x121e   : > { %13481 = vpow2.f32 %v7352_v27  ;;  %v7523_v21 = vsub.f32 %v15376_v49, %v7522_v41  ;;  %6847 = vadd.xlane.f32.xlu0 %v6846_v25 }
0x1220   : > { %v15500_v63 = vpop.eup %13477  ;;  %v7524_v10 = vmul.f32 1.442695, %v7523_v21 }
0x1221   : > { %v7692_v7 = vpop.xlane.xlu1 %7691  ;;  %v7016_v50 = vsel %vm1247_vm1, %v15500_v63, 0.0 }
0x1222   : > { %13483 = vpow2.f32 %v7524_v10  ;;  %v7693_v34 = vsub.f32 %v15381_v56, %v7692_v7  ;;  %7017 = vadd.xlane.f32.xlu1 %v7016_v50 }
0x1224   : > { %v15505_v26 = vpop.eup %13479  ;;  %v7694_v53 = vmul.f32 1.442695, %v7693_v34 }
0x1225   : > { %v7857_v58 = vpop.xlane.xlu0 %7856  ;;  %v7181_v1 = vsel %vm1247_vm1, %v15505_v26, 0.0 }
0x1226   : > { %13485 = vpow2.f32 %v7694_v53  ;;  %v7858_v49 = vsub.f32 %v15386_v48, %v7857_v58  ;;  %7182 = vadd.xlane.f32.xlu0 %v7181_v1 }
0x1228   : > { %v15510_v38 = vpop.eup %13481  ;;  %v7859_v24 = vmul.f32 1.442695, %v7858_v49 }
0x1229   : > { %v8030_v30 = vpop.xlane.xlu1 %8029  ;;  %v7354_v55 = vsel %vm1247_vm1, %v15510_v38, 0.0 }
0x122a   : > { %13487 = vpow2.f32 %v7859_v24  ;;  %v8031_v56 = vsub.f32 %v15391_v37, %v8030_v30  ;;  %7355 = vadd.xlane.f32.xlu1 %v7354_v55 }
0x122c   : > { %v15515_v6 = vpop.eup %13483  ;;  %v8032_v16 = vmul.f32 1.442695, %v8031_v56 }
0x122d   : > { %v8202_v0 = vpop.xlane.xlu0 %8201  ;;  %v7526_v27 = vsel %vm1247_vm1, %v15515_v6, 0.0 }
0x122e   : > { %13489 = vpow2.f32 %v8032_v16  ;;  %v8203_v48 = vsub.f32 %v15396_v3, %v8202_v0  ;;  %7527 = vadd.xlane.f32.xlu0 %v7526_v27 }
0x1230   : > { %v15520_v41 = vpop.eup %13485  ;;  %v8204_v25 = vmul.f32 1.442695, %v8203_v48 }
0x1231   : > { %v8372_v21 = vpop.xlane.xlu1 %8371  ;;  %v7696_v10 = vsel %vm1247_vm1, %v15520_v41, 0.0 }
0x1232   : > { %13491 = vpow2.f32 %v8204_v25  ;;  %v8373_v37 = vsub.f32 %v15401_v13, %v8372_v21  ;;  %7697 = vadd.xlane.f32.xlu1 %v7696_v10 }
0x1234   : > { %v15525_v7 = vpop.eup %13487  ;;  %v8374_v50 = vmul.f32 1.442695, %v8373_v37 }
0x1235   : > { %v8537_v34 = vpop.xlane.xlu0 %8536  ;;  %v7861_v53 = vsel %vm1247_vm1, %v15525_v7, 0.0 }
0x1236   : > { %13493 = vpow2.f32 %v8374_v50  ;;  %v8538_v3 = vsub.f32 %v15406_v23, %v8537_v34  ;;  %7862 = vadd.xlane.f32.xlu1 %v7861_v53 }
0x1238   : > { %v15530_v58 = vpop.eup %13489  ;;  %v8539_v1 = vmul.f32 1.442695, %v8538_v3 }
0x1239   : > { %v8710_v49 = vpop.xlane.xlu1 %8709  ;;  %v8034_v24 = vsel %vm1247_vm1, %v15530_v58, 0.0 }
0x123a   : > { %13495 = vpow2.f32 %v8539_v1  ;;  %v8711_v13 = vsub.f32 %v15411_v22, %v8710_v49  ;;  %8035 = vadd.xlane.f32.xlu1 %v8034_v24 }
0x123c   : > { %v15535_v30 = vpop.eup %13491  ;;  %v8712_v55 = vmul.f32 1.442695, %v8711_v13 }
0x123d   : > { %v8882_v56 = vpop.xlane.xlu0 %8881  ;;  %v8206_v16 = vsel %vm1247_vm1, %v15535_v30, 0.0  ;;  %v15556_v50 = vpop.permute.xlu1 %8891 }
0x123e   : > { %13497 = vpow2.f32 %v8712_v55  ;;  %v8883_v23 = vsub.f32 %v15416_v40, %v8882_v56  ;;  %8207 = vadd.xlane.f32.xlu0 %v8206_v16 }
0x1240   : > { %v15540_v0 = vpop.eup %13493  ;;  %v8884_v27 = vmul.f32 1.442695, %v8883_v23 }
0x1241   : > { %v8376_v48 = vsel %vm1247_vm1, %v15540_v0, 0.0  ;;  %v15558_v34 = vpop.permute.xlu0 %9227 }
0x1242   : > { %13499 = vpow2.f32 %v8884_v27  ;;  %8377 = vadd.xlane.f32.xlu1 %v8376_v48 }
0x1244   : > { %v15544_v22 = vpop.eup %13495 }
0x1245   : > { %v8541_v25 = vsel %vm1247_vm1, %v15544_v22, 0.0 }
0x1246   : > { %8542 = vadd.xlane.f32.xlu0 %v8541_v25 }
0x1248   : > { %v15548_v21 = vpop.eup %13497 }
0x1249   : > { %v8714_v40 = vsel %vm1247_vm1, %v15548_v21, 0.0 }
0x124a   : > { %8715 = vadd.xlane.f32.xlu1 %v8714_v40  ;;  %v15581_v40 = vadd.f32 %v15071_v19, %v15039_v20 }
0x124c   : > { %v15552_v10 = vpop.eup %13499 }
0x124d   : > { %v8886_v37 = vsel %vm1247_vm1, %v15552_v10, 0.0 }
0x124e   : > { %8887 = vadd.xlane.f32.xlu0 %v8886_v37 }
0x126e   : > { %v9052_v53 = vpop.xlane.xlu1 %9051 }
0x126f   : > { %v9053_v3 = vsub.f32 %v15429_v61, %v9052_v53 }
0x1271   : > { %v9054_v1 = vmul.f32 1.442695, %v9053_v3 }
0x1272   : > { %v9390_v49 = vpop.xlane.xlu1 %9389  ;;  %v9217_v24 = vpop.xlane.xlu0 %9216 }
0x1273   : > { %13501 = vpow2.f32 %v9054_v1  ;;  %v9391_v13 = vsub.f32 %v15435_v18, %v9390_v49  ;;  %v9218_v55 = vsub.f32 %v15432_v43, %v9217_v24 }
0x1275   : > { %v9392_v56 = vmul.f32 1.442695, %v9391_v13  ;;  %v9219_v16 = vmul.f32 1.442695, %v9218_v55 }
0x1276   : > { %v9562_v18 = vpop.xlane.xlu0 %9561  ;;  %v9732_v37 = vpop.xlane.xlu1 %9731 }
0x1277   : > { %13503 = vpow2.f32 %v9392_v56  ;;  %v9733_v3 = vsub.f32 %v15445_v29, %v9732_v37  ;;  %v9563_v13 = vsub.f32 %v15440_v57, %v9562_v18 }
0x1278   : > { %13505 = vpow2.f32 %v9219_v16 }
0x1279   : > { %v9734_v49 = vmul.f32 1.442695, %v9733_v3  ;;  %v9564_v20 = vmul.f32 1.442695, %v9563_v13 }
0x127a   : > { %v9897_v53 = vpop.xlane.xlu0 %9896  ;;  %v10070_v1 = vpop.xlane.xlu1 %10069 }
0x127b   : > { %v10071_v24 = vsub.f32 %v15457_v51, %v10070_v1  ;;  %v9898_v19 = vsub.f32 %v15454_v5, %v9897_v53 }
0x127d   : > { %v15563_v23 = vpop.eup %13501  ;;  %v10072_v16 = vmul.f32 1.442695, %v10071_v24 }
0x127e   : > { %v9056_v27 = vsel %vm1247_vm1, %v15563_v23, 0.0  ;;  %v10242_v55 = vpop.xlane.xlu0 %10241 }
0x127f   : > { %9057 = vadd.xlane.f32.xlu1 %v9056_v27  ;;  %v10243_v29 = vsub.f32 %v15462_v36, %v10242_v55 }
0x1281   : > { %v15567_v48 = vpop.eup %13503  ;;  %v10244_v57 = vmul.f32 1.442695, %v10243_v29 }
0x1282   : > { %v15569_v61 = vpop.eup %13505  ;;  %v9394_v25 = vsel %vm1247_vm1, %v15567_v48, 0.0 }
0x1283   : > { %9395 = vadd.xlane.f32.xlu1 %v9394_v25  ;;  %v9221_v43 = vsel %vm1247_vm1, %v15569_v61, 0.0  ;;  %v9899_v25 = vmul.f32 1.442695, %v9898_v19 }
0x1284   : > { %9222 = vadd.xlane.f32.xlu0 %v9221_v43 }
0x1294   : > { %9399 = vrot.lane.b32.xlu1 %v15424_v45, %s16060_s4 }
0x129a   : > { %9571 = vrot.lane.b32.xlu0 %v15424_v45, %s16061_s21 }
0x129e   : > { %9907 = vrot.lane.b32.xlu0 %v15581_v40, %s16059_s3 }
0x12a7   : > { %v6676_v56 = vpop.xlane.xlu1 %6675 }
0x12a8   : > { %13507 = vrcp.f32 %v6676_v56 }
0x12a9   : > { %13509 = vpow2.f32 %v9734_v49 }
0x12ab   : > { %v6848_v27 = vpop.xlane.xlu0 %6847 }
0x12ac   : > { %13511 = vrcp.f32 %v6848_v27 }
0x12ad   : > { %13513 = vpow2.f32 %v10072_v16 }
0x12ae   : > { %13515 = vpow2.f32 %v9564_v20 }
0x12af   : > { %v7018_v43 = vpop.xlane.xlu1 %7017 }
0x12b0   : > { %13517 = vrcp.f32 %v7018_v43 }
0x12b1   : > { %13519 = vpow2.f32 %v9899_v25 }
0x12b2   : > { %v13508_v51 = vpop.eup %13507 }
0x12b3   : > { %v6678_v18 = vmul.f32 %v13508_v51, %v15490_v59  ;;  %v7183_v37 = vpop.xlane.xlu0 %7182  ;;  %v15591_v3 = vpop.eup %13509 }
0x12b4   : > { %13521 = vrcp.f32 %v7183_v37  ;;  %v9736_v1 = vsel %vm1247_vm1, %v15591_v3, 0.0 }
0x12b5   : > { %12563 = vmatmul.mubr.msk.f32.vlgmr.msra.gmra.mrb[74].mxu1 %vm1247_vm1, %v6678_v18  ;;  %13523 = vpow2.f32 %v10244_v57 }
0x12b6   : > { %v13512_v5 = vpop.eup %13511  ;;  %12571 = vmatpush3.msra.mxu1 %v15449_v28  ;;  %12572 = vmatprep.mubr.msk.f32.mxu1 %vm13609_vm0, %v14265_v8 }
0x12b7   : > { %v6850_v36 = vmul.f32 %v13512_v5, %v15495_v4  ;;  %v7356_v53 = vpop.xlane.xlu1 %7355  ;;  %12580 = vmatprep.subr.mxu1 %v14265_v8  ;;  %v15601_v59 = vpop.eup %13513 }
0x12b8   : > { %13525 = vrcp.f32 %v7356_v53  ;;  %9737 = vadd.xlane.f32.xlu1 %v9736_v1  ;;  %v15603_v49 = vpop.eup %13515  ;;  %v10074_v13 = vsel %vm1247_vm1, %v15601_v59, 0.0 }
0x12b9   : > { %12573 = vmatmul.mubr.msk.f32.vlgmr.msra.gmra.mrb[76].mxu1 %vm1247_vm1, %v6850_v36  ;;  %v9566_v55 = vsel %vm1247_vm1, %v15603_v49, 0.0 }
0x12ba   : > { %v13518_v28 = vpop.eup %13517  ;;  %12581 = vmatpush3.msra.mxu1 %v15149_v32  ;;  %12582 = vmatprep.mubr.msk.f32.mxu1 %vm13609_vm0, %v14265_v8 }
0x12bb   : > { %v7020_v4 = vmul.f32 %v13518_v28, %v15500_v63  ;;  %v7528_v24 = vpop.xlane.xlu0 %7527  ;;  %12590 = vmatprep.subr.mxu1 %v14265_v8  ;;  %v15615_v56 = vpop.eup %13519 }
0x12bc   : > { %13527 = vrcp.f32 %v7528_v24  ;;  %10075 = vadd.xlane.f32.xlu1 %v10074_v13  ;;  %v9901_v20 = vsel %vm1247_vm1, %v15615_v56, 0.0 }
0x12bd   : > { %9567 = vadd.xlane.f32.xlu0 %v9566_v55  ;;  %12583 = vmatmul.mubr.msk.f32.vlgmr.msra.gmra.mrb[78].mxu1 %vm1247_vm1, %v7020_v4 }
0x12be   : > { %v13522_v32 = vpop.eup %13521  ;;  %12591 = vmatpush3.msra.mxu1 %v15476_v15  ;;  %12592 = vmatprep.mubr.msk.f32.mxu1 %vm13609_vm0, %v14265_v8 }
0x12bf   : > { %v7185_v63 = vmul.f32 %v13522_v32, %v15505_v26  ;;  %v7698_v16 = vpop.xlane.xlu1 %7697  ;;  %12600 = vmatprep.subr.mxu1 %v14265_v8  ;;  %v15625_v19 = vpop.eup %13523 }
0x12c0   : > { %13529 = vrcp.f32 %v7698_v16  ;;  %v10246_v25 = vsel %vm1247_vm1, %v15625_v19, 0.0 }
0x12c1   : > { %9902 = vadd.xlane.f32.xlu0 %v9901_v20  ;;  %12593 = vmatmul.mubr.msk.f32.vlgmr.msra.gmra.mrb[80].mxu1 %vm1247_vm1, %v7185_v63 }
0x12c2   : > { %v13526_v27 = vpop.eup %13525  ;;  %12601 = vmatpush3.msra.mxu1 %v15468_v14  ;;  %12602 = vmatprep.mubr.msk.f32.mxu1 %vm13609_vm0, %v14265_v8 }
0x12c3   : > { %v7358_v15 = vmul.f32 %v13526_v27, %v15510_v38  ;;  %v7863_v26 = vpop.xlane.xlu1 %7862  ;;  %12610 = vmatprep.subr.mxu1 %v14265_v8 }
0x12c4   : > { %13531 = vrcp.f32 %v7863_v26 }
0x12c5   : > { %10247 = vadd.xlane.f32.xlu0 %v10246_v25  ;;  %12603 = vmatmul.mubr.msk.f32.vlgmr.msra.gmra.mrb[82].mxu1 %vm1247_vm1, %v7358_v15 }
0x12c6   : > { %v13528_v29 = vpop.eup %13527  ;;  %12611 = vmatpush3.msra.mxu1 %v15472_v60  ;;  %12612 = vmatprep.mubr.msk.f32.mxu1 %vm13609_vm0, %v14265_v8 }
0x12c7   : > { %v7530_v14 = vmul.f32 %v13528_v29, %v15515_v6  ;;  %v8036_v43 = vpop.xlane.xlu1 %8035  ;;  %12620 = vmatprep.subr.mxu1 %v14265_v8 }
0x12c8   : > { %13533 = vrcp.f32 %v8036_v43 }
0x12c9   : > { %12613 = vmatmul.mubr.msk.f32.vlgmr.msra.gmra.mrb[84].mxu1 %vm1247_vm1, %v7530_v14  ;;  %v11627_v14 = vld [vmem:[%s14564_s30 + $0x80] sm:$0xff] }
0x12ca   : > { %v13530_v38 = vpop.eup %13529  ;;  %12621 = vmatpush3.msra.mxu1 %v15157_v39  ;;  %12622 = vmatprep.mubr.msk.f32.mxu1 %vm13609_vm0, %v14265_v8 }
0x12cb   : > { %v7700_v51 = vmul.f32 %v13530_v38, %v15520_v41  ;;  %v8208_v60 = vpop.xlane.xlu0 %8207  ;;  %12630 = vmatprep.subr.mxu1 %v14265_v8  ;;  %v11629_v38 = vld [vmem:[%s14564_s30 + $0x90] sm:$0xff] }
0x12cc   : > { %13535 = vrcp.f32 %v8208_v60 }
0x12cd   : > { %10251 = vrot.lane.b32.xlu1 %v15581_v40, %s16061_s21  ;;  %12623 = vmatmul.mubr.msk.f32.vlgmr.msra.gmra.mrb[86].mxu1 %vm1247_vm1, %v7700_v51  ;;  %v11630_v51 = vld [vmem:[%s14564_s30 + $0x98] sm:$0xff] }
0x12ce   : > { %v13532_v6 = vpop.eup %13531  ;;  %12631 = vmatpush3.msra.mxu1 %v15480_v62  ;;  %12632 = vmatprep.mubr.msk.f32.mxu1 %vm13609_vm0, %v14265_v8  ;;  %v13176_v60 = vpack.c.bf16 %v11630_v51, %v11629_v38 }
0x12cf   : > { %v7865_v39 = vmul.f32 %v13532_v6, %v15525_v7  ;;  %v8378_v57 = vpop.xlane.xlu1 %8377  ;;  %12640 = vmatprep.subr.mxu1 %v14265_v8  ;;  %v11631_v6 = vld [vmem:[%s14564_s30 + $0xa0] sm:$0xff] }
0x12d0   : > { %13537 = vrcp.f32 %v8378_v57  ;;  %v11633_v57 = vld [vmem:[%s14564_s30 + $0xb0] sm:$0xff] }
0x12d1   : > { %12633 = vmatmul.mubr.msk.f32.vlgmr.msra.gmra.mrb[88].mxu1 %vm1247_vm1, %v7865_v39  ;;  %v11632_v39 = vld [vmem:[%s14564_s30 + $0xa8] sm:$0xff] }
0x12d2   : > { %v13534_v41 = vpop.eup %13533  ;;  %12641 = vmatpush3.msra.mxu1 %v15474_v35  ;;  %12642 = vmatprep.mubr.msk.f32.mxu1 %vm13609_vm0, %v14265_v8 }
0x12d3   : > { %v8038_v18 = vmul.f32 %v13534_v41, %v15530_v58  ;;  %v8543_v62 = vpop.xlane.xlu0 %8542  ;;  %12650 = vmatprep.subr.mxu1 %v14265_v8  ;;  %v13180_v41 = vpack.c.bf16 %v11632_v39, %v11631_v6 }
0x12d4   : > { %13539 = vrcp.f32 %v8543_v62 }
0x12d5   : > { %12643 = vmatmul.mubr.msk.f32.vlgmr.msra.gmra.mrb[90].mxu1 %vm1247_vm1, %v8038_v18 }
0x12d6   : > { %v13536_v7 = vpop.eup %13535  ;;  %12651 = vmatpush3.msra.mxu1 %v15478_v42  ;;  %12652 = vmatprep.mubr.msk.f32.mxu1 %vm13609_vm0, %v14265_v8 }
0x12d7   : > { %v8210_v37 = vmul.f32 %v13536_v7, %v15535_v30  ;;  %v8716_v35 = vpop.xlane.xlu1 %8715  ;;  %12660 = vmatprep.subr.mxu1 %v14265_v8  ;;  %v11635_v7 = vld [vmem:[%s14564_s30 + $0xc0] sm:$0xff] }
0x12d8   : > { %13541 = vrcp.f32 %v8716_v35 }
0x12d9   : > { %12653 = vmatmul.mubr.msk.f32.vlgmr.msra.gmra.mrb[92].mxu1 %vm1247_vm1, %v8210_v37  ;;  %v11636_v37 = vld [vmem:[%s14564_s30 + $0xc8] sm:$0xff] }
0x12da   : > { %v13538_v58 = vpop.eup %13537  ;;  %12661 = vmatpush3.msra.mxu1 %v15165_v17  ;;  %12662 = vmatprep.mubr.msk.f32.mxu1 %vm13609_vm0, %v14265_v8 }
0x12db   : > { %v8380_v5 = vmul.f32 %v13538_v58, %v15540_v0  ;;  %10079 = vrot.lane.b32.xlu0 %v15581_v40, %s16060_s4  ;;  %v8888_v42 = vpop.xlane.xlu0 %8887  ;;  %12670 = vmatprep.subr.mxu1 %v14265_v8  ;;  %v13188_v58 = vpack.c.bf16 %v11636_v37, %v11635_v7 }
0x12dc   : > { %13543 = vrcp.f32 %v8888_v42  ;;  %v11637_v42 = vld [vmem:[%s14564_s30 + $0xd0] sm:$0xff] }
0x12dd   : > { %12663 = vmatmul.mubr.msk.f32.vlgmr.msra.gmra.mrb[94].mxu1 %vm1247_vm1, %v8380_v5 }
0x12de   : > { %v13540_v30 = vpop.eup %13539  ;;  %12671 = vmatpush3.msra.mxu1 %v15484_v12  ;;  %12672 = vmatprep.mubr.msk.f32.mxu1 %vm13609_vm0, %v14265_v8 }
0x12df   : > { %v8545_v17 = vmul.f32 %v13540_v30, %v15544_v22  ;;  %6584 = vrot.lane.b32.xlu0 %v15348_v11, %s16062_s26  ;;  %12680 = vmatprep.subr.mxu1 %v14265_v8  ;;  %v11638_v30 = vld [vmem:[%s14564_s30 + $0xd8] sm:$0xff] }
0x12e1   : > { %12673 = vmatmul.mubr.msk.f32.vlgmr.msra.gmra.mrb[96].mxu1 %vm1247_vm1, %v8545_v17 }
0x12e2   : > { %v13542_v0 = vpop.eup %13541  ;;  %12681 = vmatpush3.msra.mxu1 %v15482_v54  ;;  %12682 = vmatprep.mubr.msk.f32.mxu1 %vm13609_vm0, %v14265_v8 }
0x12e3   : > { %v8718_v12 = vmul.f32 %v13542_v0, %v15548_v21  ;;  %12690 = vmatprep.subr.mxu1 %v14265_v8  ;;  %v13192_v0 = vpack.c.bf16 %v11638_v30, %v11637_v42 }
0x12e5   : > { %12683 = vmatmul.mubr.msk.f32.vlgmr.msra.gmra.mrb[98].mxu1 %vm1247_vm1, %v8718_v12 }
0x12e6   : > { %v13544_v22 = vpop.eup %13543  ;;  %12691 = vmatpush3.msra.mxu1 %v15556_v50  ;;  %12692 = vmatprep.mubr.msk.f32.mxu1 %vm13609_vm0, %v14265_v8 }
0x12e7   : > { %v8890_v11 = vmul.f32 %v13544_v22, %v15552_v10  ;;  %12700 = vmatprep.subr.mxu1 %v14265_v8  ;;  %v11639_v22 = vld [vmem:[%s14564_s30 + $0xe0] sm:$0xff] }
0x12e9   : > { %12693 = vmatmul.mubr.msk.f32.vlgmr.msra.gmra.mrb[100].mxu1 %vm1247_vm1, %v8890_v11  ;;  %v11640_v11 = vld [vmem:[%s14564_s30 + $0xe8] sm:$0xff] }
0x12ea   : > { %12701 = vmatpush3.msra.mxu1 %v15424_v45  ;;  %12702 = vmatprep.mubr.msk.f32.mxu1 %vm13609_vm0, %v14265_v8 }
0x12eb   : > { %12710 = vmatprep.subr.mxu1 %v14265_v8 }
0x130c   : > { %v9058_v54 = vpop.xlane.xlu1 %9057 }
0x130d   : > { %13545 = vrcp.f32 %v9058_v54  ;;  %v11641_v54 = vld [vmem:[%s14564_s30 + $0xf0] sm:$0xff] }
0x1310   : > { %v9396_v21 = vpop.xlane.xlu1 %9395 }
0x1311   : > { %v9223_v50 = vpop.xlane.xlu0 %9222 }
0x1312   : > { %13547 = vrcp.f32 %v9223_v50  ;;  %v13196_v50 = vpack.c.bf16 %v11640_v11, %v11639_v22 }
0x1313   : > { %13549 = vrcp.f32 %v9396_v21 }
0x1314   : > { %v9400_v28 = vpop.permute.xlu1 %9399 }
0x1317   : > { %v13546_v36 = vpop.eup %13545 }
0x1318   : > { %v9060_v10 = vmul.f32 %v13546_v36, %v15563_v23  ;;  %v11642_v36 = vld [vmem:[%s14564_s30 + $0xf8] sm:$0xff] }
0x131a   : > { %12703 = vmatmul.mubr.msk.f32.vlgmr.msra.gmra.mrb[102].mxu1 %vm1247_vm1, %v9060_v10  ;;  %v13200_v10 = vpack.c.bf16 %v11642_v36, %v11641_v54 }
0x131b   : > { %12711 = vmatpush3.msra.mxu1 %v15558_v34  ;;  %12712 = vmatprep.mubr.msk.f32.mxu1 %vm13609_vm0, %v14265_v8  ;;  %v9572_v34 = vpop.permute.xlu0 %9571 }
0x131c   : > { %v13548_v45 = vpop.eup %13547  ;;  %12720 = vmatprep.subr.mxu1 %v14265_v8 }
0x131d   : > { %v9225_v53 = vmul.f32 %v13548_v45, %v15569_v61  ;;  %v13550_v1 = vpop.eup %13549 }
0x131e   : > { %v9398_v23 = vmul.f32 %v13550_v1, %v15567_v48 }
0x131f   : > { %12713 = vmatmul.mubr.msk.f32.vlgmr.msra.gmra.mrb[104].mxu1 %vm1247_vm1, %v9225_v53  ;;  %v9908_v61 = vpop.permute.xlu0 %9907 }
0x1320   : > { %12721 = vmatpush3.msra.mxu1 %v9400_v28  ;;  %12722 = vmatprep.mubr.msk.f32.mxu1 %vm13609_vm0, %v14265_v8 }
0x1321   : > { %12730 = vmatprep.subr.mxu1 %v14265_v8 }
0x1323   : > { %12723 = vmatmul.mubr.msk.f32.vlgmr.msra.gmra.mrb[106].mxu1 %vm1247_vm1, %v9398_v23 }
0x1324   : > { %12731 = vmatpush3.msra.mxu1 %v9572_v34  ;;  %12732 = vmatprep.mubr.msk.f32.mxu1 %vm13609_vm0, %v14265_v8 }
0x1325   : > { %12740 = vmatprep.subr.mxu1 %v14265_v8 }
0x1345   : > { %v9738_v4 = vpop.xlane.xlu1 %9737 }
0x1349   : > { %v10076_v55 = vpop.xlane.xlu1 %10075 }
0x134a   : > { %v9568_v24 = vpop.xlane.xlu0 %9567 }
0x134b   : > { %13551 = vrcp.f32 %v9568_v24 }
0x134c   : > { %13553 = vrcp.f32 %v9738_v4 }
0x134d   : > { %v10252_v29 = vpop.permute.xlu1 %10251 }
0x134e   : > { %v9903_v13 = vpop.xlane.xlu0 %9902 }
0x134f   : > { %13555 = vrcp.f32 %v9903_v13 }
0x1350   : > { %13557 = vrcp.f32 %v10076_v55 }
0x1352   : > { %v10248_v48 = vpop.xlane.xlu0 %10247 }
0x1353   : > { %13559 = vrcp.f32 %v10248_v48 }
0x1355   : > { %v13552_v32 = vpop.eup %13551 }
0x1356   : > { %v9570_v63 = vmul.f32 %v13552_v32, %v15603_v49  ;;  %v10080_v16 = vpop.permute.xlu0 %10079  ;;  %v13554_v20 = vpop.eup %13553 }
0x1357   : > { %v9740_v27 = vmul.f32 %v13554_v20, %v15591_v3 }
0x1358   : > { %12733 = vmatmul.mubr.msk.f32.vlgmr.msra.gmra.mrb[108].mxu1 %vm1247_vm1, %v9570_v63 }
0x1359   : > { %12741 = vmatpush3.msra.mxu1 %v15581_v40  ;;  %12742 = vmatprep.mubr.msk.f32.mxu1 %vm13609_vm0, %v14265_v8  ;;  %v13556_v26 = vpop.eup %13555 }
0x135a   : > { %v6585_v15 = vpop.permute.xlu0 %6584  ;;  %12750 = vmatprep.subr.mxu1 %v14265_v8  ;;  %v9905_v40 = vmul.f32 %v13556_v26, %v15615_v56  ;;  %v13558_v49 = vpop.eup %13557 }
0x135b   : > { %6587 = vst.msk [vmem:[#allocation2] sm:$0xff] %vm1587_vm2, %v6585_v15  ;;  %v10078_v3 = vmul.f32 %v13558_v49, %v15601_v59  ;;  %v11628_v59 = vld [vmem:[%s14564_s30 + $0x88] sm:$0xff] }
0x135c   : > { %12743 = vmatmul.mubr.msk.f32.vlgmr.msra.gmra.mrb[110].mxu1 %vm1247_vm1, %v9740_v27  ;;  %v13172_v43 = vpack.c.bf16 %v11628_v59, %v11627_v14 }
0x135d   : > { %12751 = vmatpush3.msra.mxu1 %v9908_v61  ;;  %12752 = vmatprep.mubr.msk.f32.mxu1 %vm13609_vm0, %v14265_v8  ;;  %v13560_v25 = vpop.eup %13559 }
0x135e   : > { %12760 = vmatprep.subr.mxu1 %v14265_v8  ;;  %v10250_v56 = vmul.f32 %v13560_v25, %v15625_v19  ;;  %13173 = vmatprep.subr.bf16.mxu0 %v13172_v43  ;;  %v11634_v19 = vld [vmem:[%s14564_s30 + $0xb8] sm:$0xff] }
0x135f   : > { %13175 = vmatpush3.bf16.msra.mxu0 %v13172_v43  ;;  %v13184_v18 = vpack.c.bf16 %v11634_v19, %v11633_v57 }
0x1360   : > { %12753 = vmatmul.mubr.msk.f32.vlgmr.msra.gmra.mrb[112].mxu1 %vm1247_vm1, %v9905_v40  ;;  %13177 = vmatprep.subr.bf16.mxu0 %v13176_v60 }
0x1361   : > { %12761 = vmatpush3.msra.mxu1 %v10080_v16  ;;  %12762 = vmatprep.mubr.msk.f32.mxu1 %vm13609_vm0, %v14265_v8 }
0x1362   : > { %12770 = vmatprep.subr.mxu1 %v14265_v8 }
0x1363   : > { %13179 = vmatpush3.bf16.msra.mxu0 %v13176_v60 }
0x1364   : > { %12763 = vmatmul.mubr.msk.f32.vlgmr.msra.gmra.mrb[114].mxu1 %vm1247_vm1, %v10078_v3  ;;  %13181 = vmatprep.subr.bf16.mxu0 %v13180_v41 }
0x1365   : > { %12771 = vmatpush3.msra.mxu1 %v10252_v29  ;;  %12772 = vmatprep.mubr.msk.f32.mxu1 %vm13609_vm0, %v14265_v8 }
0x1367   : > { %13183 = vmatpush3.bf16.msra.mxu0 %v13180_v41 }
0x1368   : > { %12773 = vmatmul.mubr.msk.f32.vlgmr.msra.gmra.mrb[116].mxu1 %vm1247_vm1, %v10250_v56  ;;  %13185 = vmatprep.subr.bf16.mxu0 %v13184_v18 }
0x136b   : > { %13187 = vmatpush3.bf16.msra.mxu0 %v13184_v18 }
0x136c   : > { %13189 = vmatprep.subr.bf16.mxu0 %v13188_v58 }
0x136f   : > { %13191 = vmatpush3.bf16.msra.mxu0 %v13188_v58 }
0x1370   : > { %13193 = vmatprep.subr.bf16.mxu0 %v13192_v0 }
0x1373   : > { %13195 = vmatpush3.bf16.msra.mxu0 %v13192_v0 }
0x1374   : > { %13197 = vmatprep.subr.bf16.mxu0 %v13196_v50 }
0x1377   : > { %13199 = vmatpush3.bf16.msra.mxu0 %v13196_v50 }
0x1378   : > { %13201 = vmatprep.subr.bf16.mxu0 %v13200_v10 }
0x137b   : > { %13203 = vmatpush3.bf16.msra.mxu0 %v13200_v10 }
0x1388   : > { %v6751_v62 = vpop.f32.mrb[74].mxu1 }
0x1389   : > { %6756 = vrot.lane.b32.xlu1 %v6751_v62, %s16063_s2  ;;  %v12564_v35 = vpop.f32.mrb[75].mxu1 }
0x138c   : > { %v6923_v5 = vpop.f32.mrb[76].mxu1 }
0x138d   : > { %6928 = vrot.lane.b32.xlu1 %v6923_v5, %s16064_s0  ;;  %v12574_v17 = vpop.f32.mrb[77].mxu1 }
0x1390   : > { %v7090_v12 = vpop.f32.mrb[78].mxu1 }
0x1391   : > { %7094 = vst.msk [vmem:[#allocation2 + $0x8] sm:$0xff] %vm1247_vm1, %v7090_v12  ;;  %v12584_v21 = vpop.f32.mrb[79].mxu1 }
0x1394   : > { %v7259_v45 = vpop.f32.mrb[80].mxu1 }
0x1395   : > { %7264 = vrot.lane.b32.xlu0 %v7259_v45, %s16062_s26  ;;  %v12594_v53 = vpop.f32.mrb[81].mxu1 }
0x1398   : > { %v7431_v1 = vpop.f32.mrb[82].mxu1 }
0x1399   : > { %7436 = vrot.lane.b32.xlu0 %v7431_v1, %s16063_s2  ;;  %v12604_v28 = vpop.f32.mrb[83].mxu1 }
0x139c   : > { %v7603_v23 = vpop.f32.mrb[84].mxu1 }
0x139d   : > { %7608 = vrot.lane.b32.xlu1 %v7603_v23, %s16064_s0  ;;  %v12614_v34 = vpop.f32.mrb[85].mxu1 }
0x13a0   : > { %v7770_v61 = vpop.f32.mrb[86].mxu1 }
0x13a1   : > { %7774 = vst.msk [vmem:[#allocation2 + $0x10] sm:$0xff] %vm1247_vm1, %v7770_v61  ;;  %v12624_v4 = vpop.f32.mrb[87].mxu1  ;;  %v15795_v61 = vld [vmem:[%s14693_s20 + $0x1] ss:$0 sm:$0xff] }
0x13a4   : > { %v7939_v24 = vpop.f32.mrb[88].mxu1 }
0x13a5   : > { %7944 = vrot.lane.b32.xlu0 %v7939_v24, %s16062_s26  ;;  %v12634_v13 = vpop.f32.mrb[89].mxu1 }
0x13a8   : > { %v8111_v55 = vpop.f32.mrb[90].mxu1 }
0x13a9   : > { %8116 = vrot.lane.b32.xlu1 %v8111_v55, %s16063_s2  ;;  %v12644_v48 = vpop.f32.mrb[91].mxu1 }
0x13ac   : > { %v8283_v32 = vpop.f32.mrb[92].mxu1 }
0x13ad   : > { %8288 = vrot.lane.b32.xlu1 %v8283_v32, %s16064_s0  ;;  %v12654_v63 = vpop.f32.mrb[93].mxu1 }
0x13b0   : > { %v8450_v16 = vpop.f32.mrb[94].mxu1 }
0x13b1   : > { %8454 = vst.msk [vmem:[#allocation2 + $0x18] sm:$0xff] %vm1247_vm1, %v8450_v16  ;;  %v12664_v20 = vpop.f32.mrb[95].mxu1 }
0x13b2   : > { %v11649_v20 = vld [vmem:[%s14719_s1 + $0x80] sm:$0xff] }
0x13b4   : > { %v8619_v27 = vpop.f32.mrb[96].mxu1 }
0x13b5   : > { %8624 = vrot.lane.b32.xlu0 %v8619_v27, %s16062_s26  ;;  %v12674_v15 = vpop.f32.mrb[97].mxu1  ;;  %v11651_v27 = vld [vmem:[%s14719_s1 + $0x90] sm:$0xff] }
0x13b6   : > { %v11652_v15 = vld [vmem:[%s14719_s1 + $0x98] sm:$0xff] }
0x13b8   : > { %v8791_v26 = vpop.f32.mrb[98].mxu1 }
0x13b9   : > { %8796 = vrot.lane.b32.xlu0 %v8791_v26, %s16063_s2  ;;  %v12684_v40 = vpop.f32.mrb[99].mxu1  ;;  %v13208_v26 = vpack.c.bf16 %v11652_v15, %v11651_v27  ;;  %v15862_v27 = vld [vmem:[%s14751_s22 + $0x1] ss:$0 sm:$0xff] }
0x13ba   : > { %v11653_v40 = vld [vmem:[%s14719_s1 + $0xa0] sm:$0xff] }
0x13bc   : > { %v8963_v49 = vpop.f32.mrb[100].mxu1 }
0x13bd   : > { %8968 = vrot.lane.b32.xlu1 %v8963_v49, %s16064_s0  ;;  %v12694_v3 = vpop.f32.mrb[101].mxu1  ;;  %v11654_v49 = vld [vmem:[%s14719_s1 + $0xa8] sm:$0xff] }
0x13be   : > { %v13212_v3 = vpack.c.bf16 %v11654_v49, %v11653_v40 }
0x13ed   : > { %v9130_v25 = vpop.f32.mrb[102].mxu1 }
0x13ee   : > { %9134 = vst.msk [vmem:[#allocation2 + $0x20] sm:$0xff] %vm1247_vm1, %v9130_v25  ;;  %v12704_v29 = vpop.f32.mrb[103].mxu1 }
0x13ef   : > { %v11655_v29 = vld [vmem:[%s14719_s1 + $0xb0] sm:$0xff] }
0x13f2   : > { %v9299_v56 = vpop.f32.mrb[104].mxu1 }
0x13f3   : > { %9304 = vrot.lane.b32.xlu0 %v9299_v56, %s16062_s26  ;;  %v12714_v14 = vpop.f32.mrb[105].mxu1  ;;  %v11656_v56 = vld [vmem:[%s14719_s1 + $0xb8] sm:$0xff] }
0x13f6   : > { %v9471_v59 = vpop.f32.mrb[106].mxu1 }
0x13f7   : > { %9476 = vrot.lane.b32.xlu1 %v9471_v59, %s16063_s2  ;;  %v12724_v43 = vpop.f32.mrb[107].mxu1 }
0x13f8   : > { %v13216_v43 = vpack.c.bf16 %v11656_v56, %v11655_v29 }
0x13fb   : > { %v6757_v38 = vpop.permute.xlu1 %6756 }
0x13fc   : > { %6759 = vst.msk [vmem:[#allocation2] sm:$0xff] %vm1760_vm3, %v6757_v38 }
0x13ff   : > { %v6929_v51 = vpop.permute.xlu1 %6928 }
0x1400   : > { %6931 = vst.msk [vmem:[#allocation2] sm:$0xff] %vm1933_vm4, %v6929_v51 }
0x1407   : > { %v7265_v60 = vpop.permute.xlu0 %7264  ;;  %v10332_v6 = vld [vmem:[#allocation2] sm:$0xff] }
0x1408   : > { %7267 = vst.msk [vmem:[#allocation2 + $0x8] sm:$0xff] %vm1587_vm2, %v7265_v60  ;;  %12807 = vmatprep.mubr.f32.mxu0 %v10332_v6  ;;  %v11657_v6 = vld [vmem:[%s14719_s1 + $0xc0] sm:$0xff] }
0x140b   : > { %v7437_v39 = vpop.permute.xlu0 %7436 }
0x140c   : > { %7439 = vst.msk [vmem:[#allocation2 + $0x8] sm:$0xff] %vm1760_vm3, %v7437_v39  ;;  %v11658_v39 = vld [vmem:[%s14719_s1 + $0xc8] sm:$0xff] }
0x140f   : > { %v7609_v57 = vpop.permute.xlu1 %7608 }
0x1410   : > { %7611 = vst.msk [vmem:[#allocation2 + $0x8] sm:$0xff] %vm1933_vm4, %v7609_v57  ;;  %v13220_v57 = vpack.c.bf16 %v11658_v39, %v11657_v6 }
0x1417   : > { %v7945_v41 = vpop.permute.xlu0 %7944  ;;  %v10333_v19 = vld [vmem:[#allocation2 + $0x8] sm:$0xff] }
0x1418   : > { %7947 = vst.msk [vmem:[#allocation2 + $0x10] sm:$0xff] %vm1587_vm2, %v7945_v41  ;;  %12808 = vmatmul.mubr.f32.vlgmr.msra.gmra.mrb[128].mxu0 %v10333_v19  ;;  %v11660_v19 = vld [vmem:[%s14719_s1 + $0xd8] sm:$0xff] }
0x141b   : > { %v8117_v18 = vpop.permute.xlu1 %8116 }
0x141c   : > { %8119 = vst.msk [vmem:[#allocation2 + $0x10] sm:$0xff] %vm1760_vm3, %v8117_v18 }
0x141f   : > { %v8289_v62 = vpop.permute.xlu1 %8288 }
0x1420   : > { %8291 = vst.msk [vmem:[#allocation2 + $0x10] sm:$0xff] %vm1933_vm4, %v8289_v62  ;;  %v11661_v62 = vld [vmem:[%s14719_s1 + $0xe0] sm:$0xff] }
0x1427   : > { %v8625_v7 = vpop.permute.xlu0 %8624  ;;  %v10334_v37 = vld [vmem:[#allocation2 + $0x10] sm:$0xff] }
0x1428   : > { %8627 = vst.msk [vmem:[#allocation2 + $0x18] sm:$0xff] %vm1587_vm2, %v8625_v7  ;;  %12810 = vmatprep.mubr.f32.mxu0 %v10334_v37  ;;  %v11662_v7 = vld [vmem:[%s14719_s1 + $0xe8] sm:$0xff] }
0x1429   : > { %v13228_v37 = vpack.c.bf16 %v11662_v7, %v11661_v62 }
0x142b   : > { %v9643_v35 = vpop.f32.mrb[108].mxu1  ;;  %v8797_v58 = vpop.permute.xlu0 %8796 }
0x142c   : > { %9648 = vrot.lane.b32.xlu1 %v9643_v35, %s16064_s0  ;;  %v12734_v5 = vpop.f32.mrb[109].mxu1  ;;  %8799 = vst.msk [vmem:[#allocation2 + $0x18] sm:$0xff] %vm1760_vm3, %v8797_v58  ;;  %v11663_v35 = vld [vmem:[%s14719_s1 + $0xf0] sm:$0xff]  ;;  %v11664_v58 = vld [vmem:[%s14719_s1 + $0xf8] sm:$0xff] }
0x142d   : > { %v13232_v5 = vpack.c.bf16 %v11664_v58, %v11663_v35 }
0x142f   : > { %v9810_v42 = vpop.f32.mrb[110].mxu1  ;;  %v8969_v30 = vpop.permute.xlu1 %8968 }
0x1430   : > { %9814 = vst.msk [vmem:[#allocation2 + $0x28] sm:$0xff] %vm1247_vm1, %v9810_v42  ;;  %v12744_v17 = vpop.f32.mrb[111].mxu1 }
0x1431   : > { %8971 = vst.msk [vmem:[#allocation2 + $0x18] sm:$0xff] %vm1933_vm4, %v8969_v30 }
0x1433   : > { %v9979_v0 = vpop.f32.mrb[112].mxu1 }
0x1434   : > { %9984 = vrot.lane.b32.xlu0 %v9979_v0, %s16062_s26  ;;  %v12754_v12 = vpop.f32.mrb[113].mxu1 }
0x1437   : > { %v10151_v22 = vpop.f32.mrb[114].mxu1 }
0x1438   : > { %v10335_v11 = vld [vmem:[#allocation2 + $0x18] sm:$0xff]  ;;  %10156 = vrot.lane.b32.xlu0 %v10151_v22, %s16063_s2  ;;  %v12764_v54 = vpop.f32.mrb[115].mxu1 }
0x1439   : > { %12811 = vmatmul.mubr.f32.gmra.mrb[130].mxu0 %v10335_v11 }
0x143b   : > { %v10323_v21 = vpop.f32.mrb[116].mxu1 }
0x143c   : > { %10328 = vrot.lane.b32.xlu1 %v10323_v21, %s16064_s0  ;;  %v12774_v50 = vpop.f32.mrb[117].mxu1 }
0x1465   : > { %v9305_v36 = vpop.permute.xlu0 %9304 }
0x1466   : > { %9307 = vst.msk [vmem:[#allocation2 + $0x20] sm:$0xff] %vm1587_vm2, %v9305_v36 }
0x1469   : > { %v9477_v10 = vpop.permute.xlu1 %9476 }
0x146a   : > { %9479 = vst.msk [vmem:[#allocation2 + $0x20] sm:$0xff] %vm1760_vm3, %v9477_v10 }
0x149e   : > { %v9649_v45 = vpop.permute.xlu1 %9648 }
0x149f   : > { %9651 = vst.msk [vmem:[#allocation2 + $0x20] sm:$0xff] %vm1933_vm4, %v9649_v45 }
0x14a6   : > { %v9985_v53 = vpop.permute.xlu0 %9984  ;;  %v10336_v1 = vld [vmem:[#allocation2 + $0x20] sm:$0xff] }
0x14a7   : > { %9987 = vst.msk [vmem:[#allocation2 + $0x28] sm:$0xff] %vm1587_vm2, %v9985_v53  ;;  %12813 = vmatprep.mubr.f32.mxu0 %v10336_v1 }
0x14aa   : > { %v10157_v28 = vpop.permute.xlu0 %10156 }
0x14ab   : > { %10159 = vst.msk [vmem:[#allocation2 + $0x28] sm:$0xff] %vm1760_vm3, %v10157_v28 }
0x14ae   : > { %v10329_v23 = vpop.permute.xlu1 %10328 }
0x14af   : > { %10331 = vst.msk [vmem:[#allocation2 + $0x28] sm:$0xff] %vm1933_vm4, %v10329_v23 }
0x14b6   : > { %v10337_v34 = vld [vmem:[#allocation2 + $0x28] sm:$0xff] }
0x14b7   : > { %12814 = vmatmul.mubr.f32.gmra.mrb[132].mxu0 %v10337_v34 }
0x14eb   : > { %v12809_v4 = vpop.f32.mrb[128].mxu0 }
0x14ec   : > { %v10435_v24 = vadd.f32 %v12809_v4, %v15795_v61  ;;  %v10429_v13 = vpop.f32.mrb[129].mxu0 }
0x14ed   : > { %v10430_v55 = vadd.f32 %v15795_v61, %v10429_v13 }
0x14ee   : > { %v15800_v48 = vadd.f32 %v10435_v24, %v14969_v9  ;;  %v11650_v9 = vld [vmem:[%s14719_s1 + $0x88] sm:$0xff] }
0x14ef   : > { %v15803_v32 = vadd.f32 %v10430_v55, %v14962_v52  ;;  %v13204_v52 = vpack.c.bf16 %v11650_v9, %v11649_v20 }
0x14f0   : > { %10470 = vadd.xlane.f32.xlu1 %v15800_v48  ;;  %v10487_v63 = vmul.f32 %v15800_v48, %v15800_v48 }
0x14f1   : > { %10468 = vadd.xlane.f32.xlu0 %v15803_v32  ;;  %v10486_v16 = vmul.f32 %v15803_v32, %v15803_v32  ;;  %13205 = vmatprep.subr.bf16.mxu1 %v13204_v52 }
0x14f2   : > { %13207 = vmatpush3.bf16.msra.mxu1 %v13204_v52 }
0x14f3   : > { %13209 = vmatprep.subr.bf16.mxu1 %v13208_v26 }
0x14f5   : > { %10494 = vadd.xlane.f32.xlu0 %v10487_v63 }
0x14f6   : > { %13211 = vmatpush3.bf16.msra.mxu1 %v13208_v26 }
0x14f7   : > { %13213 = vmatprep.subr.bf16.mxu1 %v13212_v3 }
0x14f9   : > { %10492 = vadd.xlane.f32.xlu0 %v10486_v16 }
0x14fa   : > { %13215 = vmatpush3.bf16.msra.mxu1 %v13212_v3 }
0x14fb   : > { %13217 = vmatprep.subr.bf16.mxu1 %v13216_v43 }
0x14fe   : > { %13219 = vmatpush3.bf16.msra.mxu1 %v13216_v43 }
0x14ff   : > { %13221 = vmatprep.subr.bf16.mxu1 %v13220_v57 }
0x1502   : > { %13223 = vmatpush3.bf16.msra.mxu1 %v13220_v57 }
0x150c   : > { %v12812_v25 = vpop.f32.mrb[130].mxu0 }
0x150d   : > { %v10445_v14 = vadd.f32 %v12812_v25, %v15795_v61  ;;  %v10439_v59 = vpop.f32.mrb[131].mxu0 }
0x150e   : > { %v10440_v38 = vadd.f32 %v15795_v61, %v10439_v59 }
0x150f   : > { %v15822_v51 = vadd.f32 %v10445_v14, %v15005_v2 }
0x1510   : > { %v15825_v60 = vadd.f32 %v10440_v38, %v14995_v46  ;;  %v11659_v46 = vld [vmem:[%s14719_s1 + $0xd0] sm:$0xff] }
0x1511   : > { %10474 = vadd.xlane.f32.xlu1 %v15822_v51  ;;  %v10489_v2 = vmul.f32 %v15822_v51, %v15822_v51  ;;  %v13224_v18 = vpack.c.bf16 %v11660_v19, %v11659_v46 }
0x1512   : > { %10472 = vadd.xlane.f32.xlu0 %v15825_v60  ;;  %v10488_v41 = vmul.f32 %v15825_v60, %v15825_v60 }
0x1513   : > { %13225 = vmatprep.subr.bf16.mxu1 %v13224_v18 }
0x1514   : > { %13227 = vmatpush3.bf16.msra.mxu1 %v13224_v18 }
0x1515   : > { %10498 = vadd.xlane.f32.xlu1 %v10489_v2  ;;  %13229 = vmatprep.subr.bf16.mxu1 %v13228_v37 }
0x1516   : > { %10496 = vadd.xlane.f32.xlu0 %v10488_v41 }
0x1518   : > { %13231 = vmatpush3.bf16.msra.mxu1 %v13228_v37 }
0x1519   : > { %13233 = vmatprep.subr.bf16.mxu1 %v13232_v5 }
0x151c   : > { %13235 = vmatpush3.bf16.msra.mxu1 %v13232_v5 }
0x157d   : > { %v10471_v42 = vpop.xlane.xlu1 %10470 }
0x157e   : > { %v10469_v30 = vpop.xlane.xlu0 %10468  ;;  %v10481_v17 = vmul.f32 0.03125, %v10471_v42  ;;  %v11669_v42 = vld [vmem:[%s14788_s24 + $0x90] sm:$0xff] }
0x157f   : > { %v10480_v22 = vmul.f32 0.03125, %v10469_v30  ;;  %v11670_v30 = vld [vmem:[%s14788_s24 + $0x98] sm:$0xff] }
0x1580   : > { %v10511_v12 = vmul.f32 %v10481_v17, %v10481_v17 }
0x1581   : > { %v10510_v50 = vmul.f32 %v10480_v22, %v10480_v22  ;;  %v10522_v16 = vsub.f32 %v15803_v32, %v10480_v22 }
0x1582   : > { %v10495_v0 = vpop.xlane.xlu0 %10494 }
0x1583   : > { %v10505_v11 = vmul.f32 0.03125, %v10495_v0  ;;  %v11671_v0 = vld [vmem:[%s14788_s24 + $0xa0] sm:$0xff] }
0x1585   : > { %v10517_v54 = vsub.f32 %v10505_v11, %v10511_v12  ;;  %v11672_v12 = vld [vmem:[%s14788_s24 + $0xa8] sm:$0xff]  ;;  %v11673_v11 = vld [vmem:[%s14788_s24 + $0xb0] sm:$0xff] }
0x1586   : > { %v10493_v21 = vpop.xlane.xlu0 %10492  ;;  %v13244_v22 = vpack.c.bf16 %v11672_v12, %v11671_v0 }
0x1587   : > { %v10529_v36 = vadd.f32 1e-12, %v10517_v54  ;;  %v10504_v10 = vmul.f32 0.03125, %v10493_v21  ;;  %v11674_v54 = vld [vmem:[%s14788_s24 + $0xb8] sm:$0xff] }
0x1588   : > { %v13248_v21 = vpack.c.bf16 %v11674_v54, %v11673_v11 }
0x1589   : > { %13561 = vrsqrt.f32 %v10529_v36  ;;  %v10516_v45 = vsub.f32 %v10504_v10, %v10510_v50  ;;  %v11675_v50 = vld [vmem:[%s14788_s24 + $0xc0] sm:$0xff]  ;;  %v11676_v36 = vld [vmem:[%s14788_s24 + $0xc8] sm:$0xff]  ;;  %v11677_v10 = vld [vmem:[%s14788_s24 + $0xd0] sm:$0xff] }
0x158a   : > { %v12815_v53 = vpop.f32.mrb[132].mxu0 }
0x158b   : > { %v10528_v1 = vadd.f32 1e-12, %v10516_v45  ;;  %v10455_v28 = vadd.f32 %v12815_v53, %v15795_v61  ;;  %v10449_v23 = vpop.f32.mrb[133].mxu0  ;;  %v13252_v45 = vpack.c.bf16 %v11676_v36, %v11675_v50  ;;  %v11678_v53 = vld [vmem:[%s14788_s24 + $0xd8] sm:$0xff] }
0x158c   : > { %v10450_v34 = vadd.f32 %v15795_v61, %v10449_v23  ;;  %v10523_v61 = vsub.f32 %v15800_v48, %v10481_v17  ;;  %v13240_v17 = vpack.c.bf16 %v11670_v30, %v11669_v42  ;;  %v11680_v23 = vld [vmem:[%s14788_s24 + $0xe8] sm:$0xff] }
0x158d   : > { %13563 = vrsqrt.f32 %v10528_v1  ;;  %v15844_v4 = vadd.f32 %v10455_v28, %v15036_v47  ;;  %v13256_v1 = vpack.c.bf16 %v11678_v53, %v11677_v10  ;;  %v11679_v28 = vld [vmem:[%s14788_s24 + $0xe0] sm:$0xff] }
0x158e   : > { %v15847_v24 = vadd.f32 %v10450_v34, %v15026_v44  ;;  %v15858_v44 = vld [vmem:[%s14744_s19 + $0x1] ss:$0 sm:$0xff]  ;;  %v13260_v34 = vpack.c.bf16 %v11680_v23, %v11679_v28 }
0x158f   : > { %10478 = vadd.xlane.f32.xlu1 %v15844_v4  ;;  %v10491_v13 = vmul.f32 %v15844_v4, %v15844_v4 }
0x1590   : > { %10476 = vadd.xlane.f32.xlu0 %v15847_v24  ;;  %v10490_v55 = vmul.f32 %v15847_v24, %v15847_v24 }
0x1593   : > { %v13562_v63 = vpop.eup %13561  ;;  %10502 = vadd.xlane.f32.xlu1 %v10491_v13  ;;  %v11681_v13 = vld [vmem:[%s14788_s24 + $0xf0] sm:$0xff] }
0x1594   : > { %10500 = vadd.xlane.f32.xlu0 %v10490_v55  ;;  %v10541_v47 = vmul.f32 %v13562_v63, %v10523_v61  ;;  %v11682_v55 = vld [vmem:[%s14788_s24 + $0xf8] sm:$0xff] }
0x1595   : > { %v13264_v63 = vpack.c.bf16 %v11682_v55, %v11681_v13 }
0x1596   : > { %v10553_v52 = vmul.f32 %v15858_v44, %v10541_v47 }
0x1597   : > { %v13564_v20 = vpop.eup %13563 }
0x1598   : > { %v10540_v9 = vmul.f32 %v13564_v20, %v10522_v16  ;;  %v15869_v48 = vadd.f32 %v15862_v27, %v10553_v52 }
0x159a   : > { %v10552_v15 = vmul.f32 %v15858_v44, %v10540_v9 }
0x159c   : > { %v15866_v26 = vadd.f32 %v15862_v27, %v10552_v15 }
0x159e   : > { %v10475_v40 = vpop.xlane.xlu1 %10474  ;;  %12848 = vmatprep.mubr.f32.mxu1 %v15866_v26 }
0x159f   : > { %v10483_v49 = vmul.f32 0.03125, %v10475_v40  ;;  %v10473_v32 = vpop.xlane.xlu0 %10472  ;;  %12849 = vmatmul.mubr.f32.vlgmr.msra.gmra.mrb[118].mxu1 %v15869_v48 }
0x15a0   : > { %v10482_v3 = vmul.f32 0.03125, %v10473_v32 }
0x15a1   : > { %v10513_v29 = vmul.f32 %v10483_v49, %v10483_v49  ;;  %v10525_v2 = vsub.f32 %v15822_v51, %v10483_v49  ;;  %v11667_v51 = vld [vmem:[%s14788_s24 + $0x80] sm:$0xff] }
0x15a2   : > { %v10499_v25 = vpop.xlane.xlu1 %10498  ;;  %v10512_v59 = vmul.f32 %v10482_v3, %v10482_v3  ;;  %v10524_v46 = vsub.f32 %v15825_v60, %v10482_v3  ;;  %v11668_v60 = vld [vmem:[%s14788_s24 + $0x88] sm:$0xff]  ;;  %s864_s24 = scalar_lea.vmem %s16032_s17, %s16067_s28 }
0x15a3   : > { %v10507_v56 = vmul.f32 0.03125, %v10499_v25  ;;  %v10497_v14 = vpop.xlane.xlu0 %10496  ;;  %v13236_v5 = vpack.c.bf16 %v11668_v60, %v11667_v51 }
0x15a4   : > { %v10506_v43 = vmul.f32 0.03125, %v10497_v14 }
0x15a5   : > { %v10519_v38 = vsub.f32 %v10507_v56, %v10513_v29  ;;  %13237 = vmatprep.subr.bf16.mxu0 %v13236_v5 }
0x15a6   : > { %v10518_v6 = vsub.f32 %v10506_v43, %v10512_v59  ;;  %13239 = vmatpush3.bf16.msra.mxu0 %v13236_v5 }
0x15a7   : > { %v10531_v39 = vadd.f32 1e-12, %v10519_v38  ;;  %13241 = vmatprep.subr.bf16.mxu0 %v13240_v17 }
0x15a8   : > { %v10530_v57 = vadd.f32 1e-12, %v10518_v6 }
0x15a9   : > { %13565 = vrsqrt.f32 %v10531_v39 }
0x15aa   : > { %13567 = vrsqrt.f32 %v10530_v57  ;;  %13243 = vmatpush3.bf16.msra.mxu0 %v13240_v17 }
0x15ab   : > { %13245 = vmatprep.subr.bf16.mxu0 %v13244_v22 }
0x15ae   : > { %13247 = vmatpush3.bf16.msra.mxu0 %v13244_v22 }
0x15af   : > { %13249 = vmatprep.subr.bf16.mxu0 %v13248_v21 }
0x15b2   : > { %13251 = vmatpush3.bf16.msra.mxu0 %v13248_v21 }
0x15b3   : > { %v13566_v41 = vpop.eup %13565  ;;  %13253 = vmatprep.subr.bf16.mxu0 %v13252_v45 }
0x15b4   : > { %v13568_v19 = vpop.eup %13567  ;;  %v10543_v18 = vmul.f32 %v13566_v41, %v10525_v2 }
0x15b5   : > { %v10542_v62 = vmul.f32 %v13568_v19, %v10524_v46 }
0x15b6   : > { %v10555_v7 = vmul.f32 %v15858_v44, %v10543_v18  ;;  %13255 = vmatpush3.bf16.msra.mxu0 %v13252_v45 }
0x15b7   : > { %v10554_v37 = vmul.f32 %v15858_v44, %v10542_v62  ;;  %13257 = vmatprep.subr.bf16.mxu0 %v13256_v1 }
0x15b8   : > { %v15881_v58 = vadd.f32 %v15862_v27, %v10555_v7 }
0x15b9   : > { %v15878_v35 = vadd.f32 %v15862_v27, %v10554_v37 }
0x15ba   : > { %13259 = vmatpush3.bf16.msra.mxu0 %v13256_v1 }
0x15bb   : > { %12851 = vmatprep.mubr.f32.mxu1 %v15878_v35  ;;  %13261 = vmatprep.subr.bf16.mxu0 %v13260_v34 }
0x15bc   : > { %12852 = vmatmul.mubr.f32.gmra.mrb[120].mxu1 %v15881_v58 }
0x15be   : > { %13263 = vmatpush3.bf16.msra.mxu0 %v13260_v34 }
0x15bf   : > { %13265 = vmatprep.subr.bf16.mxu0 %v13264_v63 }
0x15c2   : > { %13267 = vmatpush3.bf16.msra.mxu0 %v13264_v63 }
0x161c   : > { %v10479_v61 = vpop.xlane.xlu1 %10478 }
0x161d   : > { %v10485_v47 = vmul.f32 0.03125, %v10479_v61  ;;  %v10477_v16 = vpop.xlane.xlu0 %10476 }
0x161e   : > { %v10484_v20 = vmul.f32 0.03125, %v10477_v16 }
0x161f   : > { %v10515_v52 = vmul.f32 %v10485_v47, %v10485_v47  ;;  %v10527_v14 = vsub.f32 %v15844_v4, %v10485_v47  ;;  %v11666_v4 = vld [vmem:[%s14828_s23 + $0x1] ss:$0 sm:$0xff]  ;;  %s16065_s23 = sshll.u32 %s16067_s28, 3 }
0x1620   : > { %v10503_v9 = vpop.xlane.xlu1 %10502  ;;  %v10514_v49 = vmul.f32 %v10484_v20, %v10484_v20  ;;  %v10526_v43 = vsub.f32 %v15847_v24, %v10484_v20  ;;  %s868_s3 = scalar_lea.vmem %s16033_s18, %s16065_s23 }
0x1621   : > { %v10509_v15 = vmul.f32 0.03125, %v10503_v9  ;;  %v10501_v40 = vpop.xlane.xlu0 %10500 }
0x1622   : > { %v10508_v32 = vmul.f32 0.03125, %v10501_v40 }
0x1623   : > { %v10521_v3 = vsub.f32 %v10509_v15, %v10515_v52 }
0x1624   : > { %v10520_v25 = vsub.f32 %v10508_v32, %v10514_v49 }
0x1625   : > { %v10533_v29 = vadd.f32 1e-12, %v10521_v3 }
0x1626   : > { %v10532_v56 = vadd.f32 1e-12, %v10520_v25 }
0x1627   : > { %13569 = vrsqrt.f32 %v10533_v29 }
0x1628   : > { %13571 = vrsqrt.f32 %v10532_v56 }
0x1631   : > { %v13570_v59 = vpop.eup %13569 }
0x1632   : > { %v13572_v38 = vpop.eup %13571  ;;  %v10545_v6 = vmul.f32 %v13570_v59, %v10527_v14 }
0x1633   : > { %v10544_v39 = vmul.f32 %v13572_v38, %v10526_v43 }
0x1634   : > { %v10557_v57 = vmul.f32 %v15858_v44, %v10545_v6 }
0x1635   : > { %v10556_v2 = vmul.f32 %v15858_v44, %v10544_v39 }
0x1636   : > { %v15909_v46 = vadd.f32 %v15862_v27, %v10557_v57 }
0x1637   : > { %v15906_v41 = vadd.f32 %v15862_v27, %v10556_v2 }
0x1639   : > { %12854 = vmatprep.mubr.f32.mxu1 %v15906_v41 }
0x163a   : > { %12855 = vmatmul.mubr.f32.gmra.mrb[122].mxu1 %v15909_v46 }
0x163b   : > { %12910 = vmatprep.mubr.msk.f32.mxu1 %vm13609_vm0, %v14265_v8 }
0x1672   : > { %v12850_v24 = vpop.f32.mrb[118].mxu1 }
0x1673   : > { %v10667_v19 = vadd.f32 %v12850_v24, %v11666_v4  ;;  %v10661_v18 = vpop.f32.mrb[119].mxu1 }
0x1674   : > { %v10662_v62 = vadd.f32 %v11666_v4, %v10661_v18 }
0x1675   : > { %v10697_v7 = vmul.f32 0.044715, %v10667_v19  ;;  %v10691_v21 = vmul.f32 0.5, %v10667_v19 }
0x1676   : > { %v10696_v44 = vmul.f32 0.044715, %v10662_v62  ;;  %v10690_v11 = vmul.f32 0.5, %v10662_v62 }
0x1677   : > { %v10703_v37 = vmul.f32 %v10697_v7, %v10667_v19 }
0x1678   : > { %v10702_v51 = vmul.f32 %v10696_v44, %v10662_v62 }
0x1679   : > { %v10709_v60 = vmul.f32 %v10703_v37, %v10667_v19 }
0x167a   : > { %v10708_v5 = vmul.f32 %v10702_v51, %v10662_v62 }
0x167b   : > { %v10715_v27 = vadd.f32 %v10709_v60, %v10667_v19 }
0x167c   : > { %v10714_v42 = vadd.f32 %v10708_v5, %v10662_v62 }
0x167d   : > { %v10721_v30 = vmul.f32 0.7978846, %v10715_v27 }
0x167e   : > { %v10720_v17 = vmul.f32 0.7978846, %v10714_v42  ;;  %v11684_v42 = vld [vmem:[%s14872_s29 + $0x1] ss:$0 sm:$0xff] }
0x167f   : > { %13573 = vtanh.f32 %v10721_v30 }
0x1680   : > { %13575 = vtanh.f32 %v10720_v17 }
0x1689   : > { %v13574_v0 = vpop.eup %13573 }
0x168a   : > { %v13576_v12 = vpop.eup %13575  ;;  %v10733_v22 = vadd.f32 1.0, %v13574_v0 }
0x168b   : > { %v10732_v54 = vadd.f32 1.0, %v13576_v12 }
0x168c   : > { %v10739_v10 = vmul.f32 %v10733_v22, %v10691_v21 }
0x168d   : > { %v10738_v50 = vmul.f32 %v10732_v54, %v10690_v11 }
0x168f   : > { %v12853_v36 = vpop.f32.mrb[120].mxu1  ;;  %12889 = vmatprep.mubr.f32.mxu0 %v10738_v50 }
0x1690   : > { %v10677_v45 = vadd.f32 %v12853_v36, %v11666_v4  ;;  %v10671_v53 = vpop.f32.mrb[121].mxu1  ;;  %12890 = vmatmul.mubr.f32.vlgmr.msra.gmra.mrb[134].mxu0 %v10739_v10 }
0x1691   : > { %v10672_v1 = vadd.f32 %v11666_v4, %v10671_v53 }
0x1692   : > { %v10699_v28 = vmul.f32 0.044715, %v10677_v45  ;;  %v10693_v32 = vmul.f32 0.5, %v10677_v45 }
0x1693   : > { %v10698_v23 = vmul.f32 0.044715, %v10672_v1  ;;  %v10692_v40 = vmul.f32 0.5, %v10672_v1 }
0x1694   : > { %v10705_v34 = vmul.f32 %v10699_v28, %v10677_v45  ;;  %v13616_v28 = vmov 0.0|0.0  }
0x1695   : > { %v10704_v13 = vmul.f32 %v10698_v23, %v10672_v1  ;;  %13268 = vmatprep.subr.bf16.mxu1 %v13616_v28 }
0x1696   : > { %v10711_v55 = vmul.f32 %v10705_v34, %v10677_v45 }
0x1697   : > { %v10710_v63 = vmul.f32 %v10704_v13, %v10672_v1 }
0x1698   : > { %v10717_v61 = vadd.f32 %v10711_v55, %v10677_v45 }
0x1699   : > { %v10716_v47 = vadd.f32 %v10710_v63, %v10672_v1 }
0x169a   : > { %v10723_v16 = vmul.f32 0.7978846, %v10717_v61 }
0x169b   : > { %v10722_v20 = vmul.f32 0.7978846, %v10716_v47 }
0x169c   : > { %13577 = vtanh.f32 %v10723_v16 }
0x169d   : > { %13579 = vtanh.f32 %v10722_v20 }
0x16a6   : > { %v13578_v9 = vpop.eup %13577 }
0x16a7   : > { %v13580_v52 = vpop.eup %13579  ;;  %v10735_v15 = vadd.f32 1.0, %v13578_v9 }
0x16a8   : > { %v10734_v49 = vadd.f32 1.0, %v13580_v52 }
0x16a9   : > { %v10741_v25 = vmul.f32 %v10735_v15, %v10693_v32 }
0x16aa   : > { %v10740_v3 = vmul.f32 %v10734_v49, %v10692_v40 }
0x16ac   : > { %12892 = vmatprep.mubr.f32.mxu0 %v10740_v3 }
0x16ad   : > { %12893 = vmatmul.mubr.f32.gmra.mrb[136].mxu0 %v10741_v25 }
0x170d   : > { %v12856_v29 = vpop.f32.mrb[122].mxu1 }
0x170e   : > { %v10687_v56 = vadd.f32 %v12856_v29, %v11666_v4  ;;  %v10681_v14 = vpop.f32.mrb[123].mxu1 }
0x170f   : > { %v10682_v59 = vadd.f32 %v11666_v4, %v10681_v14 }
0x1710   : > { %v10701_v43 = vmul.f32 0.044715, %v10687_v56  ;;  %v10695_v5 = vmul.f32 0.5, %v10687_v56 }
0x1711   : > { %v10700_v38 = vmul.f32 0.044715, %v10682_v59  ;;  %v10694_v51 = vmul.f32 0.5, %v10682_v59 }
0x1712   : > { %v10707_v6 = vmul.f32 %v10701_v43, %v10687_v56 }
0x1713   : > { %v10706_v39 = vmul.f32 %v10700_v38, %v10682_v59 }
0x1714   : > { %v10713_v57 = vmul.f32 %v10707_v6, %v10687_v56 }
0x1715   : > { %v10712_v2 = vmul.f32 %v10706_v39, %v10682_v59  ;;  %v15948_v39 = vld [vmem:[%s14951_s5 + $0x1] ss:$0 sm:$0xff]  ;;  %s11697_s5 = sshll.u32 %s16067_s28, 7 }
0x1716   : > { %v10719_v24 = vadd.f32 %v10713_v57, %v10687_v56  ;;  %s15972_s1 = scalar_lea.vmem %s16031_s16, %s11697_s5 }
0x1717   : > { %v10718_v19 = vadd.f32 %v10712_v2, %v10682_v59 }
0x1718   : > { %v10725_v18 = vmul.f32 0.7978846, %v10719_v24 }
0x1719   : > { %v10724_v62 = vmul.f32 0.7978846, %v10718_v19 }
0x171a   : > { %13581 = vtanh.f32 %v10725_v18 }
0x171b   : > { %13583 = vtanh.f32 %v10724_v62 }
0x1724   : > { %v13582_v7 = vpop.eup %13581 }
0x1725   : > { %v13584_v44 = vpop.eup %13583  ;;  %v10737_v37 = vadd.f32 1.0, %v13582_v7 }
0x1726   : > { %v10736_v60 = vadd.f32 1.0, %v13584_v44 }
0x1727   : > { %v10743_v27 = vmul.f32 %v10737_v37, %v10695_v5 }
0x1728   : > { %v10742_v4 = vmul.f32 %v10736_v60, %v10694_v51 }
0x172a   : > { %12895 = vmatprep.mubr.f32.mxu0 %v10742_v4 }
0x172b   : > { %12896 = vmatmul.mubr.f32.gmra.mrb[138].mxu0 %v10743_v27 }
0x1763   : > { %v12891_v30 = vpop.f32.mrb[134].mxu0 }
0x1764   : > { %v10841_v17 = vadd.f32 %v12891_v30, %v11684_v42  ;;  %v10835_v0 = vpop.f32.mrb[135].mxu0 }
0x1765   : > { %v10836_v12 = vadd.f32 %v11684_v42, %v10835_v0 }
0x1766   : > { %v10865_v22 = vadd.f32 %v10841_v17, %v15869_v48 }
0x1767   : > { %v10864_v11 = vadd.f32 %v10836_v12, %v15866_v26 }
0x1768   : > { %10876 = vadd.xlane.f32.xlu1 %v10865_v22  ;;  %v10893_v54 = vmul.f32 %v10865_v22, %v10865_v22 }
0x1769   : > { %10874 = vadd.xlane.f32.xlu0 %v10864_v11  ;;  %v10892_v21 = vmul.f32 %v10864_v11, %v10864_v11 }
0x176c   : > { %10900 = vadd.xlane.f32.xlu1 %v10893_v54 }
0x176d   : > { %10898 = vadd.xlane.f32.xlu0 %v10892_v21 }
0x1780   : > { %v12894_v50 = vpop.f32.mrb[136].mxu0 }
0x1781   : > { %v10851_v36 = vadd.f32 %v12894_v50, %v11684_v42  ;;  %v10845_v10 = vpop.f32.mrb[137].mxu0 }
0x1782   : > { %v10846_v45 = vadd.f32 %v11684_v42, %v10845_v10 }
0x1783   : > { %v15920_v53 = vadd.f32 %v10851_v36, %v15881_v58 }
0x1784   : > { %v15923_v1 = vadd.f32 %v10846_v45, %v15878_v35 }
0x1785   : > { %10880 = vadd.xlane.f32.xlu1 %v15920_v53  ;;  %v10895_v26 = vmul.f32 %v15920_v53, %v15920_v53 }
0x1786   : > { %10878 = vadd.xlane.f32.xlu0 %v15923_v1  ;;  %v10894_v48 = vmul.f32 %v15923_v1, %v15923_v1 }
0x1789   : > { %10904 = vadd.xlane.f32.xlu1 %v10895_v26 }
0x178a   : > { %10902 = vadd.xlane.f32.xlu0 %v10894_v48 }
0x17f5   : > { %v10877_v58 = vpop.xlane.xlu1 %10876 }
0x17f6   : > { %v10887_v23 = vmul.f32 0.03125, %v10877_v58  ;;  %v10875_v34 = vpop.xlane.xlu0 %10874 }
0x17f7   : > { %v10886_v35 = vmul.f32 0.03125, %v10875_v34 }
0x17f8   : > { %v10917_v55 = vmul.f32 %v10887_v23, %v10887_v23  ;;  %v10929_v59 = vsub.f32 %v10865_v22, %v10887_v23 }
0x17f9   : > { %v10901_v13 = vpop.xlane.xlu1 %10900  ;;  %v10916_v47 = vmul.f32 %v10886_v35, %v10886_v35  ;;  %v10928_v38 = vsub.f32 %v10864_v11, %v10886_v35 }
0x17fa   : > { %v10911_v63 = vmul.f32 0.03125, %v10901_v13  ;;  %v10899_v61 = vpop.xlane.xlu0 %10898 }
0x17fb   : > { %v10910_v16 = vmul.f32 0.03125, %v10899_v61 }
0x17fc   : > { %v10923_v20 = vsub.f32 %v10911_v63, %v10917_v55 }
0x17fd   : > { %v10922_v9 = vsub.f32 %v10910_v16, %v10916_v47 }
0x17fe   : > { %v10935_v52 = vadd.f32 1e-12, %v10923_v20  ;;  %v12897_v15 = vpop.f32.mrb[138].mxu0 }
0x17ff   : > { %v10934_v40 = vadd.f32 1e-12, %v10922_v9  ;;  %v10861_v49 = vadd.f32 %v12897_v15, %v11684_v42  ;;  %v10855_v32 = vpop.f32.mrb[139].mxu0 }
0x1800   : > { %13585 = vrsqrt.f32 %v10935_v52  ;;  %v10856_v3 = vadd.f32 %v11684_v42, %v10855_v32 }
0x1801   : > { %13587 = vrsqrt.f32 %v10934_v40  ;;  %v15933_v25 = vadd.f32 %v10861_v49, %v15909_v46  ;;  %v15945_v46 = vld [vmem:[%s14944_s25 + $0x1] ss:$0 sm:$0xff] }
0x1802   : > { %v15936_v29 = vadd.f32 %v10856_v3, %v15906_v41 }
0x1803   : > { %10884 = vadd.xlane.f32.xlu1 %v15933_v25  ;;  %v10897_v56 = vmul.f32 %v15933_v25, %v15933_v25 }
0x1804   : > { %10882 = vadd.xlane.f32.xlu0 %v15936_v29  ;;  %v10896_v14 = vmul.f32 %v15936_v29, %v15936_v29 }
0x1807   : > { %10908 = vadd.xlane.f32.xlu1 %v10897_v56 }
0x1808   : > { %10906 = vadd.xlane.f32.xlu0 %v10896_v14 }
0x180a   : > { %v13586_v43 = vpop.eup %13585 }
0x180b   : > { %v13588_v6 = vpop.eup %13587  ;;  %v10947_v41 = vmul.f32 %v13586_v43, %v10929_v59  ;;  %v10977_v43 = vand.u32 127, %v1036_v31  ;;  %v11058_v31 = vld [vmem:[%s15972_s1] sm:$0xff] }
0x180c   : > { %v10946_v57 = vmul.f32 %v13588_v6, %v10928_v38  ;;  %v10980_v38 = vmul.u32 8, %v13892_v33  ;;  %v11059_v33 = vld [vmem:[%s15972_s1 + $0x8] sm:$0xff] }
0x180d   : > { %v10959_v2 = vmul.f32 %v15945_v46, %v10947_v41 }
0x180e   : > { %v10958_v24 = vmul.f32 %v15945_v46, %v10946_v57  ;;  %vm10981_vm5 = vcmp.eq.s32.totalorder %v10977_v43, %v10980_v38  ;;  %v13278_v57 = vpack.c.bf16 %v11059_v33, %v11058_v31 }
0x180f   : > { %v10971_v19 = vadd.f32 %v15948_v39, %v10959_v2  ;;  %v11060_v2 = vld [vmem:[%s15972_s1 + $0x10] sm:$0xff] }
0x1810   : > { %v10970_v18 = vadd.f32 %v15948_v39, %v10958_v24  ;;  %v11061_v24 = vld [vmem:[%s15972_s1 + $0x18] sm:$0xff] }
0x1812   : > { %v10881_v62 = vpop.xlane.xlu1 %10880  ;;  %v13269_v37 = vpack.c.bf16 %v10971_v19, %v10970_v18  ;;  %v11062_v19 = vld [vmem:[%s15972_s1 + $0x20] sm:$0xff]  ;;  %v11063_v18 = vld [vmem:[%s15972_s1 + $0x28] sm:$0xff] }
0x1813   : > { %v10889_v7 = vmul.f32 0.03125, %v10881_v62  ;;  %v10879_v44 = vpop.xlane.xlu0 %10878  ;;  %v13284_v62 = vpack.c.bf16 %v11063_v18, %v11062_v19 }
0x1814   : > { %v10888_v51 = vmul.f32 0.03125, %v10879_v44  ;;  %13270 = vmatpush3.bf16.msra.mxu1 %v13269_v37  ;;  %v11065_v44 = vld [vmem:[%s15972_s1 + $0x38] sm:$0xff] }
0x1815   : > { %13271 = vmatprep.subr.bf16.mxu1 %v13616_v28  ;;  %v10919_v5 = vmul.f32 %v10889_v7, %v10889_v7  ;;  %v10931_v11 = vsub.f32 %v15920_v53, %v10889_v7  ;;  %v11064_v7 = vld [vmem:[%s15972_s1 + $0x30] sm:$0xff] }
0x1816   : > { %v10905_v60 = vpop.xlane.xlu1 %10904  ;;  %v10918_v42 = vmul.f32 %v10888_v51, %v10888_v51  ;;  %v10930_v21 = vsub.f32 %v15923_v1, %v10888_v51  ;;  %v13287_v37 = vpack.c.bf16 %v11065_v44, %v11064_v7  ;;  %v11067_v51 = vld [vmem:[%s15972_s1 + $0x48] sm:$0xff] }
0x1817   : > { %v10913_v4 = vmul.f32 0.03125, %v10905_v60  ;;  %v10903_v27 = vpop.xlane.xlu0 %10902 }
0x1818   : > { %v10912_v30 = vmul.f32 0.03125, %v10903_v27 }
0x1819   : > { %v10925_v17 = vsub.f32 %v10913_v4, %v10919_v5  ;;  %v11068_v5 = vld [vmem:[%s15972_s1 + $0x50] sm:$0xff]  ;;  %v11069_v4 = vld [vmem:[%s15972_s1 + $0x58] sm:$0xff] }
0x181a   : > { %v10924_v0 = vsub.f32 %v10912_v30, %v10918_v42  ;;  %v13293_v27 = vpack.c.bf16 %v11069_v4, %v11068_v5  ;;  %v11070_v42 = vld [vmem:[%s15972_s1 + $0x60] sm:$0xff]  ;;  %v11071_v30 = vld [vmem:[%s15972_s1 + $0x68] sm:$0xff] }
0x181b   : > { %v10937_v12 = vadd.f32 1e-12, %v10925_v17  ;;  %v13296_v17 = vpack.c.bf16 %v11071_v30, %v11070_v42 }
0x181c   : > { %v10936_v22 = vadd.f32 1e-12, %v10924_v0  ;;  %v11072_v0 = vld [vmem:[%s15972_s1 + $0x70] sm:$0xff] }
0x181d   : > { %13589 = vrsqrt.f32 %v10937_v12  ;;  %v11073_v12 = vld [vmem:[%s15972_s1 + $0x78] sm:$0xff] }
0x181e   : > { %13591 = vrsqrt.f32 %v10936_v22  ;;  %v13299_v22 = vpack.c.bf16 %v11073_v12, %v11072_v0 }
0x1827   : > { %v13590_v54 = vpop.eup %13589 }
0x1828   : > { %v13592_v50 = vpop.eup %13591  ;;  %v10949_v36 = vmul.f32 %v13590_v54, %v10931_v11 }
0x1829   : > { %v10948_v10 = vmul.f32 %v13592_v50, %v10930_v21  ;;  %v11691_v21 = vld [vmem:[%s864_s24] ss:$0 sm:$0xff] }
0x182a   : > { %v10961_v45 = vmul.f32 %v15945_v46, %v10949_v36 }
0x182b   : > { %v10960_v26 = vmul.f32 %v15945_v46, %v10948_v10 }
0x182c   : > { %v10973_v48 = vadd.f32 %v15948_v39, %v10961_v45 }
0x182d   : > { %v10972_v58 = vadd.f32 %v15948_v39, %v10960_v26 }
0x182f   : > { %v13272_v23 = vpack.c.bf16 %v10973_v48, %v10972_v58 }
0x1831   : > { %13273 = vmatpush3.bf16.msra.mxu1 %v13272_v23 }
0x1832   : > { %13274 = vmatprep.subr.bf16.mxu1 %v13616_v28 }
0x1890   : > { %v10885_v34 = vpop.xlane.xlu1 %10884 }
0x1891   : > { %v10891_v53 = vmul.f32 0.03125, %v10885_v34  ;;  %v10883_v35 = vpop.xlane.xlu0 %10882 }
0x1892   : > { %v10890_v13 = vmul.f32 0.03125, %v10883_v35 }
0x1893   : > { %v10921_v55 = vmul.f32 %v10891_v53, %v10891_v53  ;;  %v10933_v40 = vsub.f32 %v15933_v25, %v10891_v53 }
0x1894   : > { %v10909_v1 = vpop.xlane.xlu1 %10908  ;;  %v10920_v47 = vmul.f32 %v10890_v13, %v10890_v13  ;;  %v10932_v32 = vsub.f32 %v15936_v29, %v10890_v13 }
0x1895   : > { %v10915_v63 = vmul.f32 0.03125, %v10909_v1  ;;  %v10907_v61 = vpop.xlane.xlu0 %10906 }
0x1896   : > { %v10914_v16 = vmul.f32 0.03125, %v10907_v61 }
0x1897   : > { %v10927_v20 = vsub.f32 %v10915_v63, %v10921_v55 }
0x1898   : > { %v10926_v9 = vsub.f32 %v10914_v16, %v10920_v47 }
0x1899   : > { %v10939_v52 = vadd.f32 1e-12, %v10927_v20 }
0x189a   : > { %v10938_v15 = vadd.f32 1e-12, %v10926_v9 }
0x189b   : > { %13593 = vrsqrt.f32 %v10939_v52 }
0x189c   : > { %13595 = vrsqrt.f32 %v10938_v15 }
0x18a5   : > { %v13594_v49 = vpop.eup %13593 }
0x18a6   : > { %v13596_v3 = vpop.eup %13595  ;;  %v10951_v56 = vmul.f32 %v13594_v49, %v10933_v40 }
0x18a7   : > { %v10950_v14 = vmul.f32 %v13596_v3, %v10932_v32 }
0x18a8   : > { %v10963_v59 = vmul.f32 %v15945_v46, %v10951_v56 }
0x18a9   : > { %v10962_v6 = vmul.f32 %v15945_v46, %v10950_v14  ;;  %v11689_v46 = vsel %vm10981_vm5, 1.0, %v14265_v8 }
0x18aa   : > { %v10975_v25 = vadd.f32 %v15948_v39, %v10963_v59 }
0x18ab   : > { %v10974_v29 = vadd.f32 %v15948_v39, %v10962_v6  ;;  %v13281_v39 = vpack.c.bf16 %v11061_v24, %v11060_v2 }
0x18ad   : > { %v13275_v41 = vpack.c.bf16 %v10975_v25, %v10974_v29 }
0x18af   : > { %13276 = vmatpush3.bf16.msra.mxu1 %v13275_v41 }
0x18b0   : > { %13277 = vmatprep.subr.bf16.mxu1 %v13616_v28 }
0x18b2   : > { %12911 = vmatmul.mubr.msk.f32.vlgmr.msra.gmra.mrb[124].mxu1 %vm10984_vm6, %v11689_v46 }
0x18b3   : > { %13279 = vmatpush3.bf16.msra.mxu1 %v13278_v57  ;;  %12945 = vmatprep.mubr.msk.f32.mxu1 %vm13609_vm0, %v14265_v8  ;;  %v11066_v8 = vld [vmem:[%s15972_s1 + $0x40] sm:$0xff] }
0x18b4   : > { %13280 = vmatprep.subr.bf16.mxu1 %v13616_v28  ;;  %v13290_v60 = vpack.c.bf16 %v11067_v51, %v11066_v8 }
0x18b7   : > { %13282 = vmatpush3.bf16.msra.mxu1 %v13281_v39 }
0x18b8   : > { %13283 = vmatprep.subr.bf16.mxu1 %v13616_v28 }
0x18bb   : > { %13285 = vmatpush3.bf16.msra.mxu1 %v13284_v62 }
0x18bc   : > { %13286 = vmatprep.subr.bf16.mxu1 %v13616_v28 }
0x18bf   : > { %13288 = vmatpush3.bf16.msra.mxu1 %v13287_v37 }
0x18c0   : > { %13289 = vmatprep.subr.bf16.mxu1 %v13616_v28 }
0x18c3   : > { %13291 = vmatpush3.bf16.msra.mxu1 %v13290_v60 }
0x18c4   : > { %13292 = vmatprep.subr.bf16.mxu1 %v13616_v28 }
0x18c7   : > { %13294 = vmatpush3.bf16.msra.mxu1 %v13293_v27 }
0x18c8   : > { %13295 = vmatprep.subr.bf16.mxu1 %v13616_v28 }
0x18cb   : > { %13297 = vmatpush3.bf16.msra.mxu1 %v13296_v17 }
0x18cc   : > { %13298 = vmatprep.subr.bf16.mxu1 %v13616_v28 }
0x18cf   : > { %13300 = vmatpush3.bf16.msra.mxu1 %v13299_v22 }
0x1985   : > { %v11054_v11 = vpop.f32.mrb[124].mxu1 }
0x1986   : > { %v12912_v54 = vpop.f32.mrb[125].mxu1  ;;  %12946 = vmatmul.mubr.f32.vlgmr.msra.gmra.mrb[126].mxu1 %v11054_v11 }
0x1a59   : > { %v11147_v50 = vpop.f32.mrb[126].mxu1 }
0x1a5a   : > { %v11148_v36 = vadd.f32 %v11691_v21, %v11147_v50  ;;  %v12947_v10 = vpop.f32.mrb[127].mxu1 }
0x1a5c   : > { %13597 = vtanh.f32 %v11148_v36 }
0x1a66   : > { %v13598_v45 = vpop.eup %13597 }
0x1a67   : > { %11152 = vst [vmem:[%s868_s3] sm:$0xff] %v13598_v45 }
0x1a68 PF: > { %s28_s27 = sadd.s32 1, %s13606_s27  }
0x1a69   : > { %p25_p4 = scmp.ge.s32.totalorder %s28_s27, 4  }
0x1a6b   :  { %27 = sbr.rel (!%p25_p4) target bundleno = 7 (0x7), region = 185 }

</bundles_post_ra>
